<compile_context>
chip_gen: v7x
topology: tpu7x:2x2x1
jax: 0.10.0
libtpu: 0.0.40
codegen_flags: <defaults>
</compile_context>

<pallas_src>
import functools
import math

import jax
import jax.numpy as jnp
from jax.experimental import pallas as pl
from jax.experimental.pallas import tpu as pltpu


_VMEM_LIMIT = 64 * 1024 * 1024


# -----------------------------------------------------------------------------
# Kernel 1: conv1 (im2col matmul) + bias + ReLU + concat(Fl) + FiLM, fused.
# Grid is over M tiles (one batch worth of voxels per step -> FiLM params are
# per-tile); output is a lane-dense 128-channel tensor.
# -----------------------------------------------------------------------------
def _conv1_concat_film_kernel(p_ref, fl_ref, w_ref, b_ref, g_ref, bt_ref, o_ref):
    # p_ref : (tm, Kp)  bf16   im2col patches (K zero-padded to 128)
    # fl_ref: (tm, Cf)  f32    Fl rows (channels-last) for this batch
    # w_ref : (Kp, Cc)  bf16   conv1 weight (rows zero-padded)
    # b_ref : (1, Cc)   f32
    # g_ref : (1, Cc+Cf) f32   FiLM gamma for this batch
    # bt_ref: (1, Cc+Cf) f32   FiLM beta  for this batch
    # o_ref : (tm, Cc+Cf) bf16
    c = w_ref.shape[1]
    y = jnp.dot(p_ref[...], w_ref[...], preferred_element_type=jnp.float32)
    y = jnp.maximum(y + b_ref[...], 0.0)                       # conv1 + ReLU
    fl = fl_ref[...].astype(jnp.float32)
    g = g_ref[...]
    bt = bt_ref[...]
    o_ref[:, :c] = (y * (1.0 + g[:, :c]) + bt[:, :c]).astype(o_ref.dtype)
    o_ref[:, c:] = (fl * (1.0 + g[:, c:]) + bt[:, c:]).astype(o_ref.dtype)


def conv1_concat_film(patches, fl_cl, w, b, gamma, beta, *, rows_per_batch):
    """patches: (B*N, Kp) bf16; fl_cl: (B*N, Cf) f32; w: (Kp, Cc) bf16;
    gamma/beta: (B, 1, Cc+Cf) f32.  Returns (B*N, Cc+Cf) bf16."""
    M, Kp = patches.shape
    Cf = fl_cl.shape[1]
    Cc = w.shape[1]
    Ccat = Cc + Cf
    assert M % rows_per_batch == 0
    B = M // rows_per_batch
    return pl.pallas_call(
        _conv1_concat_film_kernel,
        out_shape=jax.ShapeDtypeStruct((M, Ccat), jnp.bfloat16),
        grid=(B,),
        in_specs=[
            pl.BlockSpec((rows_per_batch, Kp), lambda i: (i, 0)),
            pl.BlockSpec((rows_per_batch, Cf), lambda i: (i, 0)),
            pl.BlockSpec((Kp, Cc), lambda i: (0, 0)),
            pl.BlockSpec((1, Cc), lambda i: (0, 0)),
            pl.BlockSpec((None, 1, Ccat), lambda i: (i, 0, 0)),
            pl.BlockSpec((None, 1, Ccat), lambda i: (i, 0, 0)),
        ],
        out_specs=pl.BlockSpec((rows_per_batch, Ccat), lambda i: (i, 0)),
        compiler_params=pltpu.CompilerParams(
            dimension_semantics=("parallel",),
            vmem_limit_bytes=_VMEM_LIMIT),
    )(patches, fl_cl, w, b.reshape(1, Cc), gamma, beta)


# -----------------------------------------------------------------------------
# Kernel 2: generic Y = act(X @ W + b); M tiled, full K resident (no K grid).
# -----------------------------------------------------------------------------
def _mm_bias_act_kernel(x_ref, w_ref, b_ref, o_ref, *, relu):
    y = jnp.dot(x_ref[...], w_ref[...], preferred_element_type=jnp.float32)
    y = y + b_ref[...]
    if relu:
        y = jnp.maximum(y, 0.0)
    o_ref[...] = y.astype(o_ref.dtype)


def matmul_bias_act(x, w, b, *, relu, tm, out_dtype):
    M, K = x.shape
    Kw, N = w.shape
    assert K == Kw and M % tm == 0
    return pl.pallas_call(
        functools.partial(_mm_bias_act_kernel, relu=relu),
        out_shape=jax.ShapeDtypeStruct((M, N), out_dtype),
        grid=(M // tm,),
        in_specs=[
            pl.BlockSpec((tm, K), lambda i: (i, 0)),
            pl.BlockSpec((K, N), lambda i: (0, 0)),
            pl.BlockSpec((1, N), lambda i: (0, 0)),
        ],
        out_specs=pl.BlockSpec((tm, N), lambda i: (i, 0)),
        compiler_params=pltpu.CompilerParams(
            dimension_semantics=("parallel",),
            vmem_limit_bytes=_VMEM_LIMIT),
    )(x, w, b.reshape(1, N))


# -----------------------------------------------------------------------------
# Kernel 3: conv3 (1x1x1 matmul) + bias + ReLU fused with global average pool.
# The per-batch spatial mean is done in-kernel with a block-diagonal pooling
# matmul so the (B*No, 1024) tensor never has to be re-read from HBM.
# -----------------------------------------------------------------------------
def _conv3_gap_kernel(x_ref, w_ref, b_ref, pool_ref, y_ref, f_ref):
    y = jnp.dot(x_ref[...], w_ref[...], preferred_element_type=jnp.float32)
    y = jnp.maximum(y + b_ref[...], 0.0)
    y_ref[...] = y.astype(y_ref.dtype)
    f_ref[...] = jnp.dot(pool_ref[...], y,
                         preferred_element_type=jnp.float32).astype(f_ref.dtype)


def conv3_and_gap(x, w, b, pool):
    M, K = x.shape
    N = w.shape[1]
    B = pool.shape[0]
    return pl.pallas_call(
        _conv3_gap_kernel,
        out_shape=(jax.ShapeDtypeStruct((M, N), jnp.float32),
                   jax.ShapeDtypeStruct((B, N), jnp.float32)),
        grid=(1,),
        in_specs=[
            pl.BlockSpec((M, K), lambda i: (0, 0)),
            pl.BlockSpec((K, N), lambda i: (0, 0)),
            pl.BlockSpec((1, N), lambda i: (0, 0)),
            pl.BlockSpec((B, M), lambda i: (0, 0)),
        ],
        out_specs=(pl.BlockSpec((M, N), lambda i: (0, 0)),
                   pl.BlockSpec((B, N), lambda i: (0, 0))),
        compiler_params=pltpu.CompilerParams(
            dimension_semantics=("arbitrary",),
            vmem_limit_bytes=_VMEM_LIMIT),
    )(x, w, b.reshape(1, N), pool)


# -----------------------------------------------------------------------------
# Kernel 4: ArcFace (MarginLoss) logits for all three classifiers in ONE call.
# Weights are stacked column-wise; per-group blocks are sliced out afterwards.
# -----------------------------------------------------------------------------
def _arcface_kernel(f_ref, w_ref, t_ref, o_ref, *, s, m):
    f = f_ref[...].astype(jnp.float32)
    w = w_ref[...].astype(jnp.float32)
    f_n = f * jax.lax.rsqrt(jnp.sum(f * f, axis=-1, keepdims=True) + 1e-12)
    w_n = w * jax.lax.rsqrt(jnp.sum(w * w, axis=0, keepdims=True) + 1e-12)
    cosine = jnp.clip(jnp.dot(f_n, w_n, preferred_element_type=jnp.float32),
                      -1.0, 1.0)
    sine = jnp.sqrt(jnp.maximum(1.0 - cosine * cosine, 0.0))
    cos_m, sin_m = math.cos(m), math.sin(m)
    th, mm = math.cos(math.pi - m), math.sin(math.pi - m) * m
    phi = cosine * cos_m - sine * sin_m
    phi = jnp.where(cosine > th, phi, cosine - mm)          # easy_margin=False
    one_hot = (jax.lax.broadcasted_iota(jnp.int32, cosine.shape, 1)
               == t_ref[...]).astype(jnp.float32)
    o_ref[...] = ((one_hot * phi + (1.0 - one_hot) * cosine) * s).astype(o_ref.dtype)


def arcface_logits_all(features, w_all, targets, *, s=64.0, m=0.5):
    """features: (M, dim); w_all: (dim, n_total); targets: (M,) column index."""
    M, dim = features.shape
    n_total = w_all.shape[1]
    return pl.pallas_call(
        functools.partial(_arcface_kernel, s=s, m=m),
        out_shape=jax.ShapeDtypeStruct((M, n_total), jnp.float32),
        grid=(1,),
        in_specs=[
            pl.BlockSpec((M, dim), lambda i: (0, 0)),
            pl.BlockSpec((dim, n_total), lambda i: (0, 0)),
            pl.BlockSpec((M, 1), lambda i: (0, 0)),
        ],
        out_specs=pl.BlockSpec((M, n_total), lambda i: (0, 0)),
    )(features, w_all, targets.reshape(M, 1).astype(jnp.int32))


# -----------------------------------------------------------------------------
# Glue: channels-last im2col (no NCDHW round-trips between convs)
# -----------------------------------------------------------------------------
def im2col_3d_cl(x_cl, ksize=3, stride=1, pad=1):
    """x_cl: (B, D, H, W, C) -> (B, Do*Ho*Wo, k^3*C) patches (kd,kh,kw major,
    channel minor) plus output spatial dims."""
    B, D, H, W, C = x_cl.shape
    xp = jnp.pad(x_cl, ((0, 0), (pad, pad), (pad, pad), (pad, pad), (0, 0)))
    Do = (D + 2 * pad - ksize) // stride + 1
    Ho = (H + 2 * pad - ksize) // stride + 1
    Wo = (W + 2 * pad - ksize) // stride + 1
    cols = []
    for kd in range(ksize):
        for kh in range(ksize):
            for kw in range(ksize):
                cols.append(xp[:, kd:kd + stride * Do:stride,
                               kh:kh + stride * Ho:stride,
                               kw:kw + stride * Wo:stride, :])
    cols = jnp.stack(cols, axis=4)                 # (B, Do, Ho, Wo, k^3, C)
    return cols.reshape(B, Do * Ho * Wo, ksize ** 3 * C), (Do, Ho, Wo)


# -----------------------------------------------------------------------------
# UFE forward
# -----------------------------------------------------------------------------
def ufe_forward(params, x, label_list, condition, Fl):
    """x: (B, 3, D, H, W); Fl: (B, 64, D, H, W); condition: (B, 3)."""
    B, _, D, H, W = x.shape
    N = D * H * W
    Cf = Fl.shape[1]
    nc = params["cls_w"][0].shape[0]

    # --- weight prep: layout (kd,kh,kw,cin -> rows) + bf16 casts -------------
    W1 = params["W1"]
    C1out = W1.shape[0]
    W1m = W1.transpose(2, 3, 4, 1, 0).reshape(-1, C1out)
    K1 = W1m.shape[0]
    K1p = ((K1 + 127) // 128) * 128                           # pad K 81 -> 128
    W1m = jnp.pad(W1m, ((0, K1p - K1), (0, 0))).astype(jnp.bfloat16)

    W2 = params["W2"]
    C2out = W2.shape[0]
    W2m = W2.transpose(2, 3, 4, 1, 0).reshape(-1, C2out).astype(jnp.bfloat16)

    W3m = params["W3"].T.astype(jnp.bfloat16)                 # (256, 1024)

    # --- conv1 + concat(Fl) + FiLM (single fused Pallas kernel) --------------
    x_cl = jnp.transpose(x, (0, 2, 3, 4, 1))                  # (B, D, H, W, 3)
    p1, _ = im2col_3d_cl(x_cl, 3, 1, 1)                       # (B, N, 81)
    p1 = jnp.pad(p1.reshape(B * N, K1),
                 ((0, 0), (0, K1p - K1))).astype(jnp.bfloat16)
    fl_cl = jnp.transpose(Fl.reshape(B, Cf, N), (0, 2, 1)).reshape(B * N, Cf)

    # condition projection is tiny -> plain XLA (no kernel launch overhead)
    gb = jnp.dot(condition, params["Wc"]) + params["bc"]      # (B, 256)
    Ccat = C1out + Cf                                         # 128
    gamma = gb[:, :Ccat].reshape(B, 1, Ccat)
    beta = gb[:, Ccat:2 * Ccat].reshape(B, 1, Ccat)

    x2 = conv1_concat_film(p1, fl_cl, W1m, params["b1"], gamma, beta,
                           rows_per_batch=N)                  # (B*N, 128) bf16

    # --- conv2 (stride 2), full-K-resident M-tiled matmul --------------------
    p2, (Do, Ho, Wo) = im2col_3d_cl(x2.reshape(B, D, H, W, Ccat), 3, 2, 1)
    No = Do * Ho * Wo
    M2 = B * No
    p2 = p2.reshape(M2, -1)                                   # (384, 3456) bf16
    tm2 = M2 // 2 if (M2 // 2) % 8 == 0 else M2               # 2 parallel M tiles
    y2 = matmul_bias_act(p2, W2m, params["b2"], relu=True, tm=tm2,
                         out_dtype=jnp.bfloat16)              # (384, 256)

    # --- conv3 (1x1x1) + global average pool, fused --------------------------
    pool = jnp.repeat(jnp.eye(B, dtype=jnp.float32), No, axis=1) / float(No)
    y3, feats = conv3_and_gap(y2, W3m, params["b3"], pool)    # (384,1024),(B,1024)

    Fuhc_prime = jnp.transpose(y3.reshape(B, Do, Ho, Wo, -1), (0, 4, 1, 2, 3))

    # --- class_glioma: three ArcFace classifiers in one Pallas call ----------
    size_img = label_list[0].shape[0]
    w_all = jnp.concatenate([w.T for w in params["cls_w"]], axis=1)  # (1024, 3*nc)
    targets = jnp.concatenate([label_list[i].astype(jnp.int32) + i * nc
                               for i in range(3)])
    logits_all = arcface_logits_all(feats, w_all, targets, s=64.0, m=0.5)
    out_cls_list = [logits_all[size_img * i: size_img * (i + 1),
                               nc * i: nc * (i + 1)] for i in range(3)]
    out_cls_labels = [label_list[i] for i in range(3)]

    return Fuhc_prime, out_cls_list, out_cls_labels


# -----------------------------------------------------------------------------
# Deterministic parameter / input construction
# -----------------------------------------------------------------------------
def make_params(key, num_classes=3, multi=3):
    ks = jax.random.split(key, 8)

    def init(k, shape, fan_in):
        return jax.random.normal(k, shape, jnp.float32) / math.sqrt(fan_in)

    params = {
        "W1": init(ks[0], (64, 3, 3, 3, 3), 3 * 27),
        "b1": jnp.zeros((64,), jnp.float32),
        "Wc": init(ks[1], (3, 256), 3),
        "bc": jnp.zeros((256,), jnp.float32),
        "W2": init(ks[2], (256, 128, 3, 3, 3), 128 * 27),
        "b2": jnp.zeros((256,), jnp.float32),
        "W3": init(ks[3], (1024, 256), 256),
        "b3": jnp.zeros((1024,), jnp.float32),
        "cls_w": [init(ks[4 + i], (num_classes, 1024), 1024)
                  for i in range(multi)],
    }
    return params


if __name__ == "__main__":
    key = jax.random.PRNGKey(0)
    k_par, k_in, k_fl, k_l0, k_l1, k_l2 = jax.random.split(key, 6)

    size_img, multi, num_classes = 2, 3, 3
    B = size_img * multi
    D = H = W = 8

    params = make_params(k_par, num_classes=num_classes, multi=multi)

    x = jax.random.normal(k_in, (B, 3, D, H, W), jnp.float32)
    Fl = jax.random.normal(k_fl, (B, 64, D, H, W), jnp.float32)
    condition = jax.nn.one_hot(jnp.array([0, 0, 1, 1, 2, 2]), 3, dtype=jnp.float32)
    label_list = [
        jax.random.randint(k_l0, (size_img,), 0, num_classes, jnp.int32),
        jax.random.randint(k_l1, (size_img,), 0, num_classes, jnp.int32),
        jax.random.randint(k_l2, (size_img,), 0, num_classes, jnp.int32),
    ]

    fwd = jax.jit(ufe_forward)
    Fuhc_prime, out_cls_list, out_cls_labels = fwd(
        params, x, label_list, condition, Fl)

    jax.block_until_ready(Fuhc_prime)
    for o in out_cls_list:
        jax.block_until_ready(o)

    assert Fuhc_prime.shape == (B, 1024, 4, 4, 4)
    assert all(o.shape == (size_img, num_classes) for o in out_cls_list)
    print("KERNEL_OK")
</pallas_src>

<mosaic_0001>
module attributes {stable_mosaic.version = 11 : i64} {
  func.func @_conv1_concat_film_kernel(%arg0: i32, %arg1: memref<512x128xbf16, #tpu.memory_space<vmem>>, %arg2: memref<512x64xf32, #tpu.memory_space<vmem>>, %arg3: memref<128x64xbf16, #tpu.memory_space<vmem>>, %arg4: memref<1x64xf32, #tpu.memory_space<vmem>>, %arg5: memref<1x1x128xf32, #tpu.memory_space<vmem>>, %arg6: memref<1x1x128xf32, #tpu.memory_space<vmem>>, %arg7: memref<512x128xbf16, #tpu.memory_space<vmem>>) attributes {dimension_semantics = [#tpu.dimension_semantics<parallel>], iteration_bounds = array<i64: 6>, scalar_prefetch = 0 : i64, scratch_operands = 0 : i64, tpu.core_type = #tpu.core_type<tc>, window_params = [{transform_indices = @transform_0, window_bounds = array<i64: 512, 128>}, {transform_indices = @transform_1, window_bounds = array<i64: 512, 64>}, {pipeline_mode = #tpu.pipeline_mode<synchronous>, transform_indices = @transform_2, window_bounds = array<i64: 128, 64>}, {pipeline_mode = #tpu.pipeline_mode<synchronous>, transform_indices = @transform_3, window_bounds = array<i64: 1, 64>}, {transform_indices = @transform_4, window_bounds = array<i64: 1, 1, 128>}, {transform_indices = @transform_5, window_bounds = array<i64: 1, 1, 128>}, {transform_indices = @transform_6, window_bounds = array<i64: 512, 128>}]} {
    %c0 = arith.constant 0 : index
    %c0_0 = arith.constant 0 : index
    %0 = vector.load %arg1[%c0, %c0_0] : memref<512x128xbf16, #tpu.memory_space<vmem>>, vector<512x128xbf16>
    %c0_1 = arith.constant 0 : index
    %c0_2 = arith.constant 0 : index
    %1 = vector.load %arg3[%c0_1, %c0_2] : memref<128x64xbf16, #tpu.memory_space<vmem>>, vector<128x64xbf16>
    %cst = arith.constant dense<0.000000e+00> : vector<512x64xf32>
    %2 = tpu.matmul %0, %1, %cst {dimension_numbers = #tpu.dot_dimension_numbers<[1], [0], [0], [1], [0, 0, 1, 1], [], []>} : vector<512x128xbf16>, vector<128x64xbf16>, vector<512x64xf32> -> vector<512x64xf32>
    %c0_3 = arith.constant 0 : index
    %c0_4 = arith.constant 0 : index
    %3 = vector.load %arg4[%c0_3, %c0_4] : memref<1x64xf32, #tpu.memory_space<vmem>>, vector<1x64xf32>
    %4 = vector.broadcast %3 : vector<1x64xf32> to vector<512x64xf32>
    %5 = arith.addf %2, %4 : vector<512x64xf32>
    %cst_5 = arith.constant 0.000000e+00 : f32
    %6 = vector.broadcast %cst_5 : f32 to vector<512x64xf32>
    %7 = arith.maximumf %5, %6 : vector<512x64xf32>
    %c0_6 = arith.constant 0 : index
    %c0_7 = arith.constant 0 : index
    %8 = vector.load %arg2[%c0_6, %c0_7] : memref<512x64xf32, #tpu.memory_space<vmem>>, vector<512x64xf32>
    %c0_8 = arith.constant 0 : index
    %c0_9 = arith.constant 0 : index
    %c0_10 = arith.constant 0 : index
    %9 = vector.load %arg5[%c0_8, %c0_9, %c0_10] : memref<1x1x128xf32, #tpu.memory_space<vmem>>, vector<1x1x128xf32>
    %10 = vector.shape_cast %9 : vector<1x1x128xf32> to vector<1x128xf32>
    %c0_11 = arith.constant 0 : index
    %c0_12 = arith.constant 0 : index
    %c0_13 = arith.constant 0 : index
    %11 = vector.load %arg6[%c0_11, %c0_12, %c0_13] : memref<1x1x128xf32, #tpu.memory_space<vmem>>, vector<1x1x128xf32>
    %12 = vector.shape_cast %11 : vector<1x1x128xf32> to vector<1x128xf32>
    %13 = vector.extract_strided_slice %10 {offsets = [0, 0], sizes = [1, 64], strides = [1, 1]} : vector<1x128xf32> to vector<1x64xf32>
    %cst_14 = arith.constant 1.000000e+00 : f32
    %14 = vector.broadcast %cst_14 : f32 to vector<1x64xf32>
    %15 = arith.addf %14, %13 : vector<1x64xf32>
    %16 = vector.broadcast %15 : vector<1x64xf32> to vector<512x64xf32>
    %17 = arith.mulf %7, %16 : vector<512x64xf32>
    %18 = vector.extract_strided_slice %12 {offsets = [0, 0], sizes = [1, 64], strides = [1, 1]} : vector<1x128xf32> to vector<1x64xf32>
    %19 = vector.broadcast %18 : vector<1x64xf32> to vector<512x64xf32>
    %20 = arith.addf %17, %19 : vector<512x64xf32>
    %21 = arith.truncf %20 : vector<512x64xf32> to vector<512x64xbf16>
    %c0_15 = arith.constant 0 : index
    %c0_16 = arith.constant 0 : index
    %22 = vector.load %arg7[%c0_15, %c0_16] : memref<512x128xbf16, #tpu.memory_space<vmem>>, vector<512x64xbf16>
    tpu.vector_store %arg7[%c0_15, %c0_16], %21 {strides = array<i32>} : memref<512x128xbf16, #tpu.memory_space<vmem>>, vector<512x64xbf16>,
    %23 = vector.extract_strided_slice %10 {offsets = [0, 64], sizes = [1, 64], strides = [1, 1]} : vector<1x128xf32> to vector<1x64xf32>
    %cst_17 = arith.constant 1.000000e+00 : f32
    %24 = vector.broadcast %cst_17 : f32 to vector<1x64xf32>
    %25 = arith.addf %24, %23 : vector<1x64xf32>
    %26 = vector.broadcast %25 : vector<1x64xf32> to vector<512x64xf32>
    %27 = arith.mulf %8, %26 : vector<512x64xf32>
    %28 = vector.extract_strided_slice %12 {offsets = [0, 64], sizes = [1, 64], strides = [1, 1]} : vector<1x128xf32> to vector<1x64xf32>
    %29 = vector.broadcast %28 : vector<1x64xf32> to vector<512x64xf32>
    %30 = arith.addf %27, %29 : vector<512x64xf32>
    %31 = arith.truncf %30 : vector<512x64xf32> to vector<512x64xbf16>
    %c0_18 = arith.constant 0 : index
    %c64 = arith.constant 64 : index
    %32 = vector.load %arg7[%c0_18, %c64] : memref<512x128xbf16, #tpu.memory_space<vmem>>, vector<512x64xbf16>
    tpu.vector_store %arg7[%c0_18, %c64], %31 {strides = array<i32>} : memref<512x128xbf16, #tpu.memory_space<vmem>>, vector<512x64xbf16>,
    return
  }
  func.func @transform_0(%arg0: i32) -> (i32, i32) {
    %c0_i32 = arith.constant 0 : i32
    %c0_i32_0 = arith.constant 0 : i32
    return %arg0, %c0_i32 : i32, i32
  }
  func.func @transform_1(%arg0: i32) -> (i32, i32) {
    %c0_i32 = arith.constant 0 : i32
    %c0_i32_0 = arith.constant 0 : i32
    return %arg0, %c0_i32 : i32, i32
  }
  func.func @transform_2(%arg0: i32) -> (i32, i32) {
    %c0_i32 = arith.constant 0 : i32
    %c0_i32_0 = arith.constant 0 : i32
    %c0_i32_1 = arith.constant 0 : i32
    return %c0_i32, %c0_i32_0 : i32, i32
  }
  func.func @transform_3(%arg0: i32) -> (i32, i32) {
    %c0_i32 = arith.constant 0 : i32
    %c0_i32_0 = arith.constant 0 : i32
    %c0_i32_1 = arith.constant 0 : i32
    return %c0_i32, %c0_i32_0 : i32, i32
  }
  func.func @transform_4(%arg0: i32) -> (i32, i32, i32) {
    %c0_i32 = arith.constant 0 : i32
    %c0_i32_0 = arith.constant 0 : i32
    %c0_i32_1 = arith.constant 0 : i32
    return %arg0, %c0_i32, %c0_i32_0 : i32, i32, i32
  }
  func.func @transform_5(%arg0: i32) -> (i32, i32, i32) {
    %c0_i32 = arith.constant 0 : i32
    %c0_i32_0 = arith.constant 0 : i32
    %c0_i32_1 = arith.constant 0 : i32
    return %arg0, %c0_i32, %c0_i32_0 : i32, i32, i32
  }
  func.func @transform_6(%arg0: i32) -> (i32, i32) {
    %c0_i32 = arith.constant 0 : i32
    %c0_i32_0 = arith.constant 0 : i32
    return %arg0, %c0_i32 : i32, i32
  }
}

module attributes {stable_mosaic.version = 11 : i64} {
  func.func @_mm_bias_act_kernel(%arg0: i32, %arg1: memref<192x3456xbf16, #tpu.memory_space<vmem>>, %arg2: memref<3456x256xbf16, #tpu.memory_space<vmem>>, %arg3: memref<1x256xf32, #tpu.memory_space<vmem>>, %arg4: memref<192x256xbf16, #tpu.memory_space<vmem>>) attributes {dimension_semantics = [#tpu.dimension_semantics<parallel>], iteration_bounds = array<i64: 2>, scalar_prefetch = 0 : i64, scratch_operands = 0 : i64, tpu.core_type = #tpu.core_type<tc>, window_params = [{transform_indices = @transform_0, window_bounds = array<i64: 192, 3456>}, {pipeline_mode = #tpu.pipeline_mode<synchronous>, transform_indices = @transform_1, window_bounds = array<i64: 3456, 256>}, {pipeline_mode = #tpu.pipeline_mode<synchronous>, transform_indices = @transform_2, window_bounds = array<i64: 1, 256>}, {transform_indices = @transform_3, window_bounds = array<i64: 192, 256>}]} {
    %c0 = arith.constant 0 : index
    %c0_0 = arith.constant 0 : index
    %0 = vector.load %arg1[%c0, %c0_0] : memref<192x3456xbf16, #tpu.memory_space<vmem>>, vector<192x3456xbf16>
    %c0_1 = arith.constant 0 : index
    %c0_2 = arith.constant 0 : index
    %1 = vector.load %arg2[%c0_1, %c0_2] : memref<3456x256xbf16, #tpu.memory_space<vmem>>, vector<3456x256xbf16>
    %cst = arith.constant dense<0.000000e+00> : vector<192x256xf32>
    %2 = tpu.matmul %0, %1, %cst {dimension_numbers = #tpu.dot_dimension_numbers<[1], [0], [0], [1], [0, 0, 1, 1], [], []>} : vector<192x3456xbf16>, vector<3456x256xbf16>, vector<192x256xf32> -> vector<192x256xf32>
    %c0_3 = arith.constant 0 : index
    %c0_4 = arith.constant 0 : index
    %3 = vector.load %arg3[%c0_3, %c0_4] : memref<1x256xf32, #tpu.memory_space<vmem>>, vector<1x256xf32>
    %4 = vector.broadcast %3 : vector<1x256xf32> to vector<192x256xf32>
    %5 = arith.addf %2, %4 : vector<192x256xf32>
    %cst_5 = arith.constant 0.000000e+00 : f32
    %6 = vector.broadcast %cst_5 : f32 to vector<192x256xf32>
    %7 = arith.maximumf %5, %6 : vector<192x256xf32>
    %8 = arith.truncf %7 : vector<192x256xf32> to vector<192x256xbf16>
    %c0_6 = arith.constant 0 : index
    %c0_7 = arith.constant 0 : index
    %9 = vector.load %arg4[%c0_6, %c0_7] : memref<192x256xbf16, #tpu.memory_space<vmem>>, vector<192x256xbf16>
    tpu.vector_store %arg4[%c0_6, %c0_7], %8 {strides = array<i32>} : memref<192x256xbf16, #tpu.memory_space<vmem>>, vector<192x256xbf16>,
    return
  }
  func.func @transform_0(%arg0: i32) -> (i32, i32) {
    %c0_i32 = arith.constant 0 : i32
    %c0_i32_0 = arith.constant 0 : i32
    return %arg0, %c0_i32 : i32, i32
  }
  func.func @transform_1(%arg0: i32) -> (i32, i32) {
    %c0_i32 = arith.constant 0 : i32
    %c0_i32_0 = arith.constant 0 : i32
    %c0_i32_1 = arith.constant 0 : i32
    return %c0_i32, %c0_i32_0 : i32, i32
  }
  func.func @transform_2(%arg0: i32) -> (i32, i32) {
    %c0_i32 = arith.constant 0 : i32
    %c0_i32_0 = arith.constant 0 : i32
    %c0_i32_1 = arith.constant 0 : i32
    return %c0_i32, %c0_i32_0 : i32, i32
  }
  func.func @transform_3(%arg0: i32) -> (i32, i32) {
    %c0_i32 = arith.constant 0 : i32
    %c0_i32_0 = arith.constant 0 : i32
    return %arg0, %c0_i32 : i32, i32
  }
}

module attributes {stable_mosaic.version = 11 : i64} {
  func.func @_conv3_gap_kernel(%arg0: i32, %arg1: memref<384x256xbf16, #tpu.memory_space<vmem>>, %arg2: memref<256x1024xbf16, #tpu.memory_space<vmem>>, %arg3: memref<1x1024xf32, #tpu.memory_space<vmem>>, %arg4: memref<6x384xf32, #tpu.memory_space<vmem>>, %arg5: memref<384x1024xf32, #tpu.memory_space<vmem>>, %arg6: memref<6x1024xf32, #tpu.memory_space<vmem>>) attributes {dimension_semantics = [#tpu.dimension_semantics<arbitrary>], iteration_bounds = array<i64: 1>, scalar_prefetch = 0 : i64, scratch_operands = 0 : i64, tpu.core_type = #tpu.core_type<tc>, window_params = [{pipeline_mode = #tpu.pipeline_mode<synchronous>, transform_indices = @transform_0, window_bounds = array<i64: 384, 256>}, {pipeline_mode = #tpu.pipeline_mode<synchronous>, transform_indices = @transform_1, window_bounds = array<i64: 256, 1024>}, {pipeline_mode = #tpu.pipeline_mode<synchronous>, transform_indices = @transform_2, window_bounds = array<i64: 1, 1024>}, {pipeline_mode = #tpu.pipeline_mode<synchronous>, transform_indices = @transform_3, window_bounds = array<i64: 6, 384>}, {pipeline_mode = #tpu.pipeline_mode<synchronous>, transform_indices = @transform_4, window_bounds = array<i64: 384, 1024>}, {pipeline_mode = #tpu.pipeline_mode<synchronous>, transform_indices = @transform_5, window_bounds = array<i64: 6, 1024>}]} {
    %c0 = arith.constant 0 : index
    %c0_0 = arith.constant 0 : index
    %0 = vector.load %arg1[%c0, %c0_0] : memref<384x256xbf16, #tpu.memory_space<vmem>>, vector<384x256xbf16>
    %c0_1 = arith.constant 0 : index
    %c0_2 = arith.constant 0 : index
    %1 = vector.load %arg2[%c0_1, %c0_2] : memref<256x1024xbf16, #tpu.memory_space<vmem>>, vector<256x1024xbf16>
    %cst = arith.constant dense<0.000000e+00> : vector<384x1024xf32>
    %2 = tpu.matmul %0, %1, %cst {dimension_numbers = #tpu.dot_dimension_numbers<[1], [0], [0], [1], [0, 0, 1, 1], [], []>} : vector<384x256xbf16>, vector<256x1024xbf16>, vector<384x1024xf32> -> vector<384x1024xf32>
    %c0_3 = arith.constant 0 : index
    %c0_4 = arith.constant 0 : index
    %3 = vector.load %arg3[%c0_3, %c0_4] : memref<1x1024xf32, #tpu.memory_space<vmem>>, vector<1x1024xf32>
    %4 = vector.broadcast %3 : vector<1x1024xf32> to vector<384x1024xf32>
    %5 = arith.addf %2, %4 : vector<384x1024xf32>
    %cst_5 = arith.constant 0.000000e+00 : f32
    %6 = vector.broadcast %cst_5 : f32 to vector<384x1024xf32>
    %7 = arith.maximumf %5, %6 : vector<384x1024xf32>
    %c0_6 = arith.constant 0 : index
    %c0_7 = arith.constant 0 : index
    %8 = vector.load %arg5[%c0_6, %c0_7] : memref<384x1024xf32, #tpu.memory_space<vmem>>, vector<384x1024xf32>
    tpu.vector_store %arg5[%c0_6, %c0_7], %7 {strides = array<i32>} : memref<384x1024xf32, #tpu.memory_space<vmem>>, vector<384x1024xf32>,
    %c0_8 = arith.constant 0 : index
    %c0_9 = arith.constant 0 : index
    %9 = vector.load %arg4[%c0_8, %c0_9] : memref<6x384xf32, #tpu.memory_space<vmem>>, vector<6x384xf32>
    %cst_10 = arith.constant dense<0.000000e+00> : vector<6x1024xf32>
    %10 = tpu.matmul %9, %7, %cst_10 {dimension_numbers = #tpu.dot_dimension_numbers<[1], [0], [0], [1], [0, 0, 1, 1], [], []>} : vector<6x384xf32>, vector<384x1024xf32>, vector<6x1024xf32> -> vector<6x1024xf32>
    %c0_11 = arith.constant 0 : index
    %c0_12 = arith.constant 0 : index
    %11 = vector.load %arg6[%c0_11, %c0_12] : memref<6x1024xf32, #tpu.memory_space<vmem>>, vector<6x1024xf32>
    tpu.vector_store %arg6[%c0_11, %c0_12], %10 {strides = array<i32>} : memref<6x1024xf32, #tpu.memory_space<vmem>>, vector<6x1024xf32>,
    return
  }
  func.func @transform_0(%arg0: i32) -> (i32, i32) {
    %c0_i32 = arith.constant 0 : i32
    %c0_i32_0 = arith.constant 0 : i32
    %c0_i32_1 = arith.constant 0 : i32
    return %c0_i32, %c0_i32_0 : i32, i32
  }
  func.func @transform_1(%arg0: i32) -> (i32, i32) {
    %c0_i32 = arith.constant 0 : i32
    %c0_i32_0 = arith.constant 0 : i32
    %c0_i32_1 = arith.constant 0 : i32
    return %c0_i32, %c0_i32_0 : i32, i32
  }
  func.func @transform_2(%arg0: i32) -> (i32, i32) {
    %c0_i32 = arith.constant 0 : i32
    %c0_i32_0 = arith.constant 0 : i32
    %c0_i32_1 = arith.constant 0 : i32
    return %c0_i32, %c0_i32_0 : i32, i32
  }
  func.func @transform_3(%arg0: i32) -> (i32, i32) {
    %c0_i32 = arith.constant 0 : i32
    %c0_i32_0 = arith.constant 0 : i32
    %c0_i32_1 = arith.constant 0 : i32
    return %c0_i32, %c0_i32_0 : i32, i32
  }
  func.func @transform_4(%arg0: i32) -> (i32, i32) {
    %c0_i32 = arith.constant 0 : i32
    %c0_i32_0 = arith.constant 0 : i32
    %c0_i32_1 = arith.constant 0 : i32
    return %c0_i32, %c0_i32_0 : i32, i32
  }
  func.func @transform_5(%arg0: i32) -> (i32, i32) {
    %c0_i32 = arith.constant 0 : i32
    %c0_i32_0 = arith.constant 0 : i32
    %c0_i32_1 = arith.constant 0 : i32
    return %c0_i32, %c0_i32_0 : i32, i32
  }
}

module attributes {stable_mosaic.version = 11 : i64} {
  func.func @_arcface_kernel(%arg0: i32, %arg1: memref<6x1024xf32, #tpu.memory_space<vmem>>, %arg2: memref<1024x9xf32, #tpu.memory_space<vmem>>, %arg3: memref<6x1xi32, #tpu.memory_space<vmem>>, %arg4: memref<6x9xf32, #tpu.memory_space<vmem>>) attributes {dimension_semantics = [#tpu.dimension_semantics<arbitrary>], iteration_bounds = array<i64: 1>, scalar_prefetch = 0 : i64, scratch_operands = 0 : i64, tpu.core_type = #tpu.core_type<tc>, window_params = [{pipeline_mode = #tpu.pipeline_mode<synchronous>, transform_indices = @transform_0, window_bounds = array<i64: 6, 1024>}, {pipeline_mode = #tpu.pipeline_mode<synchronous>, transform_indices = @transform_1, window_bounds = array<i64: 1024, 9>}, {pipeline_mode = #tpu.pipeline_mode<synchronous>, transform_indices = @transform_2, window_bounds = array<i64: 6, 1>}, {pipeline_mode = #tpu.pipeline_mode<synchronous>, transform_indices = @transform_3, window_bounds = array<i64: 6, 9>}]} {
    %c0 = arith.constant 0 : index
    %c0_0 = arith.constant 0 : index
    %0 = vector.load %arg1[%c0, %c0_0] : memref<6x1024xf32, #tpu.memory_space<vmem>>, vector<6x1024xf32>
    %c0_1 = arith.constant 0 : index
    %c0_2 = arith.constant 0 : index
    %1 = vector.load %arg2[%c0_1, %c0_2] : memref<1024x9xf32, #tpu.memory_space<vmem>>, vector<1024x9xf32>
    %2 = arith.mulf %0, %0 : vector<6x1024xf32>
    %cst = arith.constant dense<0.000000e+00> : vector<6xf32>
    %3 = vector.multi_reduction <add>, %2, %cst [1] : vector<6x1024xf32> to vector<6xf32>
    %4 = vector.shape_cast %3 : vector<6xf32> to vector<6x1xf32>
    %cst_3 = arith.constant 9.99999996E-13 : f32
    %5 = vector.broadcast %cst_3 : f32 to vector<6x1xf32>
    %6 = arith.addf %4, %5 : vector<6x1xf32>
    %7 = math.rsqrt %6 : vector<6x1xf32>
    %8 = vector.broadcast %7 : vector<6x1xf32> to vector<6x1024xf32>
    %9 = arith.mulf %0, %8 : vector<6x1024xf32>
    %10 = arith.mulf %1, %1 : vector<1024x9xf32>
    %cst_4 = arith.constant dense<0.000000e+00> : vector<9xf32>
    %11 = vector.multi_reduction <add>, %10, %cst_4 [0] : vector<1024x9xf32> to vector<9xf32>
    %12 = vector.shape_cast %11 : vector<9xf32> to vector<1x9xf32>
    %cst_5 = arith.constant 9.99999996E-13 : f32
    %13 = vector.broadcast %cst_5 : f32 to vector<1x9xf32>
    %14 = arith.addf %12, %13 : vector<1x9xf32>
    %15 = math.rsqrt %14 : vector<1x9xf32>
    %16 = vector.broadcast %15 : vector<1x9xf32> to vector<1024x9xf32>
    %17 = arith.mulf %1, %16 : vector<1024x9xf32>
    %cst_6 = arith.constant dense<0.000000e+00> : vector<6x9xf32>
    %18 = tpu.matmul %9, %17, %cst_6 {dimension_numbers = #tpu.dot_dimension_numbers<[1], [0], [0], [1], [0, 0, 1, 1], [], []>} : vector<6x1024xf32>, vector<1024x9xf32>, vector<6x9xf32> -> vector<6x9xf32>
    %cst_7 = arith.constant -1.000000e+00 : f32
    %cst_8 = arith.constant 1.000000e+00 : f32
    %19 = vector.broadcast %cst_7 : f32 to vector<6x9xf32>
    %20 = arith.maximumf %19, %18 : vector<6x9xf32>
    %21 = vector.broadcast %cst_8 : f32 to vector<6x9xf32>
    %22 = arith.minimumf %21, %20 : vector<6x9xf32>
    %23 = arith.mulf %22, %22 : vector<6x9xf32>
    %cst_9 = arith.constant 1.000000e+00 : f32
    %24 = vector.broadcast %cst_9 : f32 to vector<6x9xf32>
    %25 = arith.subf %24, %23 : vector<6x9xf32>
    %cst_10 = arith.constant 0.000000e+00 : f32
    %26 = vector.broadcast %cst_10 : f32 to vector<6x9xf32>
    %27 = arith.maximumf %25, %26 : vector<6x9xf32>
    %28 = math.sqrt %27 : vector<6x9xf32>
    %cst_11 = arith.constant 0.87758255 : f32
    %29 = vector.broadcast %cst_11 : f32 to vector<6x9xf32>
    %30 = arith.mulf %22, %29 : vector<6x9xf32>
    %cst_12 = arith.constant 0.47942555 : f32
    %31 = vector.broadcast %cst_12 : f32 to vector<6x9xf32>
    %32 = arith.mulf %28, %31 : vector<6x9xf32>
    %33 = arith.subf %30, %32 : vector<6x9xf32>
    %cst_13 = arith.constant -0.87758255 : f32
    %34 = vector.broadcast %cst_13 : f32 to vector<6x9xf32>
    %35 = arith.cmpf ogt, %22, %34 : vector<6x9xf32>
    %cst_14 = arith.constant 0.239712775 : f32
    %36 = vector.broadcast %cst_14 : f32 to vector<6x9xf32>
    %37 = arith.subf %22, %36 : vector<6x9xf32>
    %38 = arith.select %35, %33, %37 : vector<6x9xi1>, vector<6x9xf32>
    %39 = tpu.iota {dimensions = array<i32: 1>} : vector<6x9xi32>
    %c0_15 = arith.constant 0 : index
    %c0_16 = arith.constant 0 : index
    %40 = vector.load %arg3[%c0_15, %c0_16] : memref<6x1xi32, #tpu.memory_space<vmem>>, vector<6x1xi32>
    %41 = vector.broadcast %40 : vector<6x1xi32> to vector<6x9xi32>
    %42 = arith.cmpi eq, %39, %41 : vector<6x9xi32>
    %43 = arith.extui %42 : vector<6x9xi1> to vector<6x9xi32>
    %44 = arith.sitofp %43 : vector<6x9xi32> to vector<6x9xf32>
    %45 = arith.mulf %44, %38 : vector<6x9xf32>
    %cst_17 = arith.constant 1.000000e+00 : f32
    %46 = vector.broadcast %cst_17 : f32 to vector<6x9xf32>
    %47 = arith.subf %46, %44 : vector<6x9xf32>
    %48 = arith.mulf %47, %22 : vector<6x9xf32>
    %49 = arith.addf %45, %48 : vector<6x9xf32>
    %cst_18 = arith.constant 6.400000e+01 : f32
    %50 = vector.broadcast %cst_18 : f32 to vector<6x9xf32>
    %51 = arith.mulf %49, %50 : vector<6x9xf32>
    %c0_19 = arith.constant 0 : index
    %c0_20 = arith.constant 0 : index
    %52 = vector.load %arg4[%c0_19, %c0_20] : memref<6x9xf32, #tpu.memory_space<vmem>>, vector<6x9xf32>
    tpu.vector_store %arg4[%c0_19, %c0_20], %51 {strides = array<i32>} : memref<6x9xf32, #tpu.memory_space<vmem>>, vector<6x9xf32>,
    return
  }
  func.func @transform_0(%arg0: i32) -> (i32, i32) {
    %c0_i32 = arith.constant 0 : i32
    %c0_i32_0 = arith.constant 0 : i32
    %c0_i32_1 = arith.constant 0 : i32
    return %c0_i32, %c0_i32_0 : i32, i32
  }
  func.func @transform_1(%arg0: i32) -> (i32, i32) {
    %c0_i32 = arith.constant 0 : i32
    %c0_i32_0 = arith.constant 0 : i32
    %c0_i32_1 = arith.constant 0 : i32
    return %c0_i32, %c0_i32_0 : i32, i32
  }
  func.func @transform_2(%arg0: i32) -> (i32, i32) {
    %c0_i32 = arith.constant 0 : i32
    %c0_i32_0 = arith.constant 0 : i32
    %c0_i32_1 = arith.constant 0 : i32
    return %c0_i32, %c0_i32_0 : i32, i32
  }
  func.func @transform_3(%arg0: i32) -> (i32, i32) {
    %c0_i32 = arith.constant 0 : i32
    %c0_i32_0 = arith.constant 0 : i32
    %c0_i32_1 = arith.constant 0 : i32
    return %c0_i32, %c0_i32_0 : i32, i32
  }
}

</mosaic_0001>

<bundles_post_ra>
// kernel: ufe_forward.4
= control target key start
LH: loop header
LB: loop body
LE: loop exit
PB: predicated region body
PF: predicated region fallthrough
CT: control target
= control target key end

     0   :  { %s4533_s0 = inlined_call_operand.hbm [shape: bf16[3072,128], index: 0, kind: input, shape index: {}]   ;;  %s4534_s1 = inlined_call_operand.hbm [shape: f32[3072,64], index: 1, kind: input, shape index: {}]   ;;  %s4535_s2 = inlined_call_operand.hbm [shape: bf16[128,64], index: 2, kind: input, shape index: {}]   ;;  %s4536_s3 = inlined_call_operand.hbm [shape: f32[1,64], index: 3, kind: input, shape index: {}]   ;;  %s4537_s4 = inlined_call_operand.hbm [shape: f32[6,1,128], index: 4, kind: input, shape index: {}]   ;;  %s4538_s5 = inlined_call_operand.hbm [shape: f32[6,1,128], index: 5, kind: input, shape index: {}]   ;;  %s4539_s6 = inlined_call_operand.hbm [shape: bf16[3072,128], index: 6, kind: output, shape index: {}]  }
   0x1   :  { %4558 = sst [smem:[#allocation25_spill]] %s4533_s0 }
   0x2   :  { %4559 = sst [smem:[#allocation26_spill]] %s4534_s1 }
   0x3   :  { %4560 = sst [smem:[#allocation27_spill]] %s4535_s2 }
   0x4   :  { %11 = vsyncpa [#allocation3], 0 }
   0x5   :  { %13 = vsyncpa [#allocation3 + $0x1], 0 }
   0x6   :  { %14 = vsyncpa [#allocation6], 0 }
   0x7   :  { %16 = vsyncpa [#allocation6 + $0x1], 0 }
   0x8   :  { %17 = vsyncpa [#allocation9], 0 }
   0x9   :  { %18 = vsyncpa [#allocation4], 0 }
   0xa   :  { %20 = vsyncpa [#allocation4 + $0x1], 0  ;;  %s3260_s21 = smov 0   ;;  %s3262_s22 = smov 0  }
   0xb   :  { %s3264_s23 = smov 0   ;;  %s3266_s24 = smov 0  }
   0xc LB: > { %4561 = sst [smem:[#allocation20_spill]] %s3198_s21  ;;  %s3281_s25 = sadd.s32 4294967295, %s3210_s24   ;;  %s3210_s24 = sphi %s3266_s24, %s4599_s24   ;;  %s3206_s23 = sphi %s3264_s23, %s4601_s23   ;;  %s3202_s22 = sphi %s3262_s22, %s4603_s22   ;;  %s3198_s21 = sphi %s3260_s21, %s4602_s21  }
   0xd   : > { %4562 = sst [smem:[#allocation21_spill]] %s3206_s23  ;;  %s2357_s26 = sadd.s32 4294967294, %s3210_s24  }
   0xe   : > { %s3285_s27 = sadd.s32 1, %s3210_s24   ;;  %s33_s28 = sadd.s32 1, %s3206_s23 }
   0xf   : > { %4563 = sst [smem:[#allocation22_spill]] %s3285_s27  ;;  %s30_s29 = ssub.s32 %s3210_s24, %s3285_s27 }
  0x10   : > { %p40_p0 = scmp.ne.s32.totalorder %s3206_s23, %s3202_s22  ;;  %p31_p1 = scmp.eq.s32.totalorder %s30_s29, 0 }
  0x11   : > { %p41_p2 = scmp.eq.s32.totalorder %s3210_s24, 0  ;;  %p46_p3 = scmp.ne.s32.totalorder %s3202_s22, %s3198_s21 }
  0x12   : > { %p4540_p4 = scmp.eq.s32.totalorder %s3281_s25, 0  ;;  %p190_p7 = scmp.eq.s32.totalorder %s3281_s25, 5 }
  0x13   : > { %s3297_s30 = scalar_select %p31_p1, %s3206_s23, %s33_s28  }
  0x14   : > { %p3299_p5 = por %p41_p2, %p40_p0  ;;  %p3305_p6 = por %p4540_p4, %p46_p3 }
  0x15   : > { %4564 = sst [smem:[#allocation23_spill]] %s3297_s30  ;;  %p196_p8 = scmp.eq.s32.totalorder %s2357_s26, 5 }
  0x16   : > { %s4565_s7 = scalar_select %p3299_p5, 1, 0 }
  0x17   : > { %s4566_s8 = scalar_select %p3305_p6, 1, 0 }
  0x18   : > { %p2358_p9 = scmp.ge.s32.totalorder %s3210_s24, 1  ;;  %p203_p10 = scmp.lt.s32.totalorder %s3210_s24, 7 }
  0x19   : > { %p3312_p11 = por %p190_p7, %p40_p0  ;;  %p3316_p12 = por %p196_p8, %p46_p3 }
  0x1a   : > { %p3320_p13 = pnand %p2358_p9, %p203_p10  ;;  %s3212_s12 = smov [#allocation7]  }
  0x1b   : > { %s4567_s9 = scalar_select %p3312_p11, 1, 0 }
  0x1c   : > { %s4568_s10 = scalar_select %p3316_p12, 1, 0 }
  0x1d   : > { %s4570_s11 = scalar_select %p3320_p13, 1, 0 }
  0x1e   : > { %4569 = sst [smem:[#allocation24_spill]] %s4568_s10  ;;  %p2836_p1 = pneg %p3320_p13 }
  0x1f   : > { %s215_s13 = sshll.u32 %s3212_s12, 4  ;;  %s4572_s2 = sld [smem:[#allocation27_spill]]  ;;  %s216_s13 = int_to_ptr.vmem [resolvable:$true] %s215_s13 }
  0x20   : > { %p3328_p2 = pnand %p2836_p1, %p4540_p4 }
  0x22   : > { %s4571_s14 = scalar_select %p3328_p2, 1, 0 }
  0x23   : > { %p4546_p7 = pneg %p3328_p2 }
  0x25   : > { %s2948_s18 = scalar_lea.hbm %s4572_s2, 1024 }
  0x26   : > { %p2949_p3 = scmp.ne.s32.totalorder %s4572_s2, %s2948_s18  ;;  %p2955_p10 = scmp.lt.u32.totalorder %s2948_s18, %s4572_s2 }
  0x28   : > { %p2951_p8 = pnand %p4546_p7, %p2949_p3 }
  0x2a   : > { %p2952_p9 = pneg %p2951_p8 }
  0x2c   : > { %p2957_p1 = pnand %p2955_p10, %p2952_p9 }
  0x2e   : > { %2960 = shalt.err (!%p2957_p1)
}
  0x2f   : > { %s2961_s29 = scalar_lea.vmem %s216_s13, 1024  ;;  %p2969_p11 = scmp.lt.s32.totalorder %s216_s13, %s216_s13 }
  0x30   : > { %p2962_p4 = scmp.ne.s32.totalorder %s216_s13, %s2961_s29  ;;  %p2970_p6 = scmp.lt.s32.totalorder %s2961_s29, %s2961_s29 }
  0x32   : > { %p2964_p0 = pnand %p2962_p4, %p4546_p7  ;;  %p2971_p13 = por %p2970_p6, %p2969_p11 }
  0x34   : > { %p2965_p12 = pneg %p2964_p0 }
  0x36   : > { %p2972_p5 = pnand %p2971_p13, %p2965_p12 }
  0x38   : > { %2975 = shalt.err (!%p2972_p5)
}
  0x39   : > { %s4544_s12 = smov 64   ;;  %s4545_s16 = smov 4  }
  0x3a   : > { %2839 = dma.hbm_to_vmem [thread:$0]  (!%p3328_p2), %s4572_s2, 1024, %s216_s13, [#allocation6], %s4544_s12, %s4544_s12, %s4545_s16  }
  0x3b   : > { %s3360_s19 = sand.u32 1, %s3206_s23   ;;  %s2551_s20 = sshll.u32 %s3210_s24, 12 }
  0x3c   : > { %s2362_s26 = sshll.u32 %s3360_s19, 8  ;;  %s4573_s0 = sld [smem:[#allocation25_spill]] }
  0x3d   : > { %p4574_p4 = scmp.ne.s32.totalorder %s4565_s7, 0  ;;  %p4575_p5 = scmp.lt.s32.totalorder %s3210_s24, 6 }
  0x3e   : > { %s244_s13 = scalar_lea.vmem [#allocation2], %s2362_s26  ;;  %s4577_s18 = sand.u32 1, %s3210_s24  }
  0x3f   : > { %p3373_p6 = pnand %p4575_p5, %p4574_p4  ;;  %s251_s17 = sshll.u32 %s244_s13, 4  ;;  %s3377_s17 = int_to_ptr.vmem [resolvable:$true] %s251_s17 }
  0x40   : > { %s3381_s12 = scalar_lea.sflag [#allocation3], %s4577_s18 }
  0x41   : > { %s4576_s30 = scalar_select %p3373_p6, 1, 0 }
  0x42   : > { %s3367_s15 = scalar_lea.hbm %s4573_s0, %s2551_s20  ;;  %p3387_p12 = pneg %p3373_p6 }
  0x43   : > { %s2976_s20 = scalar_lea.hbm %s3367_s15, 4096  ;;  %s2981_s26 = scalar_lea.hbm %s4573_s0, 24576 }
  0x44   : > { %p2977_p11 = scmp.ne.s32.totalorder %s3367_s15, %s2976_s20  ;;  %p2982_p3 = scmp.lt.u32.totalorder %s3367_s15, %s4573_s0 }
  0x45   : > { %s4578_s7 = scalar_select %p3387_p12, 1, 0 }
  0x46   : > { %p2979_p13 = pnand %p3387_p12, %p2977_p11  ;;  %p2983_p8 = scmp.lt.u32.totalorder %s2981_s26, %s2976_s20 }
  0x47   : > { %p2985_p10 = scmp.lt.u32.totalorder %s2976_s20, %s3367_s15 }
  0x48   : > { %p2980_p0 = pneg %p2979_p13  ;;  %p2984_p9 = por %p2983_p8, %p2982_p3 }
  0x4a   : > { %p2986_p1 = por %p2985_p10, %p2984_p9 }
  0x4c   : > { %p2987_p4 = pnand %p2986_p1, %p2980_p0 }
  0x4e   : > { %2990 = shalt.err (!%p2987_p4)
}
  0x4f   : > { %s2991_s18 = scalar_lea.vmem %s3377_s17, 4096  ;;  %s3215_s28 = smov [#allocation2]  }
  0x50   : > { %p2992_p5 = scmp.ne.s32.totalorder %s3377_s17, %s2991_s18  ;;  %s2996_s29 = sshll.u32 %s3215_s28, 4  ;;  %s2997_s29 = int_to_ptr.vmem [resolvable:$false] %s2996_s29 }
  0x51   : > { %s2998_s16 = scalar_lea.vmem %s2997_s29, 8192  ;;  %p2999_p7 = scmp.lt.s32.totalorder %s3377_s17, %s2997_s29 }
  0x52   : > { %p2994_p11 = pnand %p2992_p5, %p3387_p12  ;;  %p3000_p2 = scmp.lt.s32.totalorder %s2998_s16, %s2991_s18 }
  0x54   : > { %p2995_p13 = pneg %p2994_p11  ;;  %p3001_p3 = por %p3000_p2, %p2999_p7 }
  0x56   : > { %p3002_p8 = pnand %p3001_p3, %p2995_p13 }
  0x58   : > { %3005 = shalt.err (!%p3002_p8)
}
  0x59   : > { %s4579_s20 = smov 4   ;;  %s4580_s26 = smov 64  }
  0x5a   : > { %2846 = dma.hbm_to_vmem [thread:$0]  (!%p3373_p6), %s3367_s15, 4096, %s3377_s17, %s3381_s12, %s4580_s26, %s4580_s26, %s4579_s20  }
  0x5b   : > { %s2365_s13 = sshll.u32 %s3360_s19, 9  ;;  %s2552_s28 = sshll.u32 %s3210_s24, 13 }
  0x5c   : > { %s4581_s1 = sld [smem:[#allocation26_spill]]  ;;  %s265_s0 = scalar_lea.vmem [#allocation5], %s2365_s13 }
  0x5d   : > { %s272_s2 = sshll.u32 %s265_s0, 4  ;;  %s4582_s23 = sand.u32 1, %s3210_s24   ;;  %s3421_s2 = int_to_ptr.vmem [resolvable:$true] %s272_s2 }
  0x5e   : > { %s3425_s27 = scalar_lea.sflag [#allocation6], %s4582_s23 }
  0x62   : > { %s3419_s16 = scalar_lea.hbm %s4581_s1, %s2552_s28  ;;  %s3011_s20 = scalar_lea.hbm %s4581_s1, 49152 }
  0x63   : > { %s3006_s10 = scalar_lea.hbm %s3419_s16, 8192  ;;  %p3012_p9 = scmp.lt.u32.totalorder %s3419_s16, %s4581_s1 }
  0x64   : > { %p3007_p2 = scmp.ne.s32.totalorder %s3419_s16, %s3006_s10  ;;  %p3013_p10 = scmp.lt.u32.totalorder %s3011_s20, %s3006_s10 }
  0x65   : > { %p3015_p4 = scmp.lt.u32.totalorder %s3006_s10, %s3419_s16 }
  0x66   : > { %p3009_p7 = pnand %p3007_p2, %p3387_p12  ;;  %p3014_p1 = por %p3013_p10, %p3012_p9 }
  0x68   : > { %p3010_p0 = pneg %p3009_p7  ;;  %p3016_p5 = por %p3015_p4, %p3014_p1 }
  0x6a   : > { %p3017_p11 = pnand %p3016_p5, %p3010_p0 }
  0x6c   : > { %3020 = shalt.err (!%p3017_p11)
}
  0x6d   : > { %s3021_s0 = scalar_lea.vmem %s3421_s2, 8192  ;;  %s3216_s23 = smov [#allocation5]  }
  0x6e   : > { %p3022_p13 = scmp.ne.s32.totalorder %s3421_s2, %s3021_s0  ;;  %s3026_s13 = sshll.u32 %s3216_s23, 4  ;;  %s3027_s13 = int_to_ptr.vmem [resolvable:$false] %s3026_s13 }
  0x6f   : > { %s3028_s29 = scalar_lea.vmem %s3027_s13, 16384  ;;  %p3029_p2 = scmp.lt.s32.totalorder %s3421_s2, %s3027_s13 }
  0x70   : > { %p3024_p3 = pnand %p3022_p13, %p3387_p12  ;;  %p3030_p7 = scmp.lt.s32.totalorder %s3028_s29, %s3021_s0 }
  0x72   : > { %p3025_p8 = pneg %p3024_p3  ;;  %p3031_p9 = por %p3030_p7, %p3029_p2 }
  0x74   : > { %p3032_p10 = pnand %p3031_p9, %p3025_p8 }
  0x76   : > { %3035 = shalt.err (!%p3032_p10)
}
  0x77   : > { %s3217_s10 = smov 128   ;;  %s3218_s18 = smov 8  }
  0x78   : > { %2849 = dma.hbm_to_vmem [thread:$0]  (!%p3373_p6), %s3419_s16, 8192, %s3421_s2, %s3425_s27, %s3217_s10, %s3217_s10, %s3218_s18  }
  0x79   : > { %s3219_s15 = smov [#allocation8]   ;;  %s2368_s20 = sshll.u32 %s3210_s24, 4 }
  0x7a   : > { %s229_s17 = sshll.u32 %s3219_s15, 4  ;;  %s3453_s0 = scalar_lea.hbm %s4537_s4, %s2368_s20  ;;  %s230_s17 = int_to_ptr.vmem [resolvable:$true] %s229_s17 }
  0x7b   : > { %s3036_s29 = scalar_lea.hbm %s4536_s3, 16  ;;  %p4583_p1 = scmp.ne.s32.totalorder %s4571_s14, 0 }
  0x7c   : > { %p3037_p0 = scmp.ne.s32.totalorder %s4536_s3, %s3036_s29  ;;  %p3043_p13 = scmp.lt.u32.totalorder %s3036_s29, %s4536_s3 }
  0x7d   : > { %p4584_p4 = pneg %p4583_p1 }
  0x7f   : > { %p3039_p5 = pnand %p3037_p0, %p4584_p4 }
  0x81   : > { %p3040_p11 = pneg %p3039_p5 }
  0x83   : > { %p3045_p3 = pnand %p3043_p13, %p3040_p11 }
  0x85   : > { %3048 = shalt.err (!%p3045_p3)
}
  0x86   : > { %s3049_s10 = scalar_lea.vmem %s230_s17, 16  ;;  %p4585_p2 = pmov %p4584_p4 }
  0x87   : > { %p3050_p8 = scmp.ne.s32.totalorder %s230_s17, %s3049_s10  ;;  %s3056_s18 = scalar_lea.vmem %s230_s17, 32 }
  0x88   : > { %p3057_p10 = scmp.lt.s32.totalorder %s230_s17, %s230_s17  ;;  %p3058_p6 = scmp.lt.s32.totalorder %s3056_s18, %s3049_s10 }
  0x89   : > { %p3052_p7 = pnand %p3050_p8, %p4585_p2 }
  0x8a   : > { %p3059_p12 = por %p3058_p6, %p3057_p10 }
  0x8b   : > { %p3053_p9 = pneg %p3052_p7 }
  0x8d   : > { %p3060_p0 = pnand %p3059_p12, %p3053_p9 }
  0x8f   : > { %3063 = shalt.err (!%p3060_p0)
}
  0x90   : > { %2842 = dma.hbm_to_vmem [thread:$0]  (!%p4583_p1), %s4536_s3, 16, %s230_s17, [#allocation9]  }
  0x91   : > { %s285_s15 = scalar_lea.vmem [#allocation10], %s3360_s19  ;;  %s3479_s13 = scalar_lea.hbm %s4538_s5, %s2368_s20 }
  0x92   : > { %s292_s26 = sshll.u32 %s285_s15, 4  ;;  %s3064_s29 = scalar_lea.hbm %s3453_s0, 16  ;;  %s293_s26 = int_to_ptr.vmem [resolvable:$true] %s292_s26 }
  0x93   : > { %p3065_p6 = scmp.ne.s32.totalorder %s3453_s0, %s3064_s29  ;;  %p4586_p12 = scmp.ne.s32.totalorder %s4578_s7, 0 }
  0x94   : > { %s3069_s16 = scalar_lea.hbm %s4537_s4, 96  ;;  %p3070_p1 = scmp.lt.u32.totalorder %s3453_s0, %s4537_s4 }
  0x95   : > { %p3067_p4 = pnand %p3065_p6, %p4586_p12  ;;  %p3071_p11 = scmp.lt.u32.totalorder %s3069_s16, %s3064_s29 }
  0x96   : > { %p3073_p3 = scmp.lt.u32.totalorder %s3064_s29, %s3453_s0 }
  0x97   : > { %p3068_p5 = pneg %p3067_p4  ;;  %p3072_p13 = por %p3071_p11, %p3070_p1 }
  0x99   : > { %p3074_p8 = por %p3073_p3, %p3072_p13 }
  0x9b   : > { %p3075_p2 = pnand %p3074_p8, %p3068_p5 }
  0x9d   : > { %3078 = shalt.err (!%p3075_p2)
}
  0x9e   : > { %s3079_s17 = scalar_lea.vmem %s293_s26, 16  ;;  %s3220_s20 = smov [#allocation10]  }
  0x9f   : > { %p3080_p7 = scmp.ne.s32.totalorder %s293_s26, %s3079_s17  ;;  %s3084_s1 = sshll.u32 %s3220_s20, 4  ;;  %s3085_s1 = int_to_ptr.vmem [resolvable:$false] %s3084_s1 }
  0xa0   : > { %s3086_s21 = scalar_lea.vmem %s3085_s1, 32  ;;  %p3087_p0 = scmp.lt.s32.totalorder %s293_s26, %s3085_s1 }
  0xa1   : > { %p3082_p9 = pnand %p3080_p7, %p4586_p12  ;;  %p3088_p6 = scmp.lt.s32.totalorder %s3086_s21, %s3079_s17 }
  0xa3   : > { %p3083_p10 = pneg %p3082_p9  ;;  %p3089_p4 = por %p3088_p6, %p3087_p0 }
  0xa5   : > { %p3090_p1 = pnand %p3089_p4, %p3083_p10 }
  0xa7   : > { %3093 = shalt.err (!%p3090_p1)
}
  0xa8   : > { %p4587_p11 = scmp.ne.s32.totalorder %s4576_s30, 0  ;;  %s302_s15 = scalar_lea.vmem [#allocation11], %s3360_s19 }
  0xa9   : > { %s309_s28 = sshll.u32 %s302_s15, 4  ;;  %s3094_s23 = scalar_lea.hbm %s3479_s13, 16  ;;  %s310_s28 = int_to_ptr.vmem [resolvable:$true] %s309_s28 }
  0xaa   : > { %2852 = dma.hbm_to_vmem [thread:$0]  (!%p4587_p11), %s3453_s0, 16, %s293_s26, %s3381_s12  }
  0xab   : > { %p3095_p5 = scmp.ne.s32.totalorder %s3479_s13, %s3094_s23  ;;  %s3099_s2 = scalar_lea.hbm %s4538_s5, 96 }
  0xac   : > { %p3100_p8 = scmp.lt.u32.totalorder %s3479_s13, %s4538_s5  ;;  %p3101_p2 = scmp.lt.u32.totalorder %s3099_s2, %s3094_s23 }
  0xad   : > { %p3097_p13 = pnand %p3095_p5, %p4586_p12  ;;  %p3103_p9 = scmp.lt.u32.totalorder %s3094_s23, %s3479_s13 }
  0xae   : > { %p3102_p7 = por %p3101_p2, %p3100_p8 }
  0xaf   : > { %p3098_p3 = pneg %p3097_p13 }
  0xb0   : > { %p3104_p10 = por %p3103_p9, %p3102_p7 }
  0xb2   : > { %p3105_p0 = pnand %p3104_p10, %p3098_p3 }
  0xb4   : > { %3108 = shalt.err (!%p3105_p0)
}
  0xb5   : > { %s3109_s12 = scalar_lea.vmem %s310_s28, 16  ;;  %s3221_s19 = smov [#allocation11]  }
  0xb6   : > { %p3110_p6 = scmp.ne.s32.totalorder %s310_s28, %s3109_s12  ;;  %s3114_s0 = sshll.u32 %s3221_s19, 4  ;;  %s3115_s0 = int_to_ptr.vmem [resolvable:$false] %s3114_s0 }
  0xb7   : > { %s3116_s26 = scalar_lea.vmem %s3115_s0, 32  ;;  %p3117_p5 = scmp.lt.s32.totalorder %s310_s28, %s3115_s0 }
  0xb8   : > { %p3112_p4 = pnand %p3110_p6, %p4586_p12  ;;  %p3118_p13 = scmp.lt.s32.totalorder %s3116_s26, %s3109_s12 }
  0xba   : > { %p3113_p1 = pneg %p3112_p4  ;;  %p3119_p11 = por %p3118_p13, %p3117_p5 }
  0xbc   : > { %p3120_p2 = pnand %p3119_p11, %p3113_p1 }
  0xbe   : > { %3123 = shalt.err (!%p3120_p2)
}
  0xbf   : > { %p4588_p8 = scmp.ne.s32.totalorder %s4576_s30, 0  ;;  %p4589_p3 = scmp.ne.s32.totalorder %s4570_s11, 0 }
  0xc0   : > { %s320_s7 = sand.u32 (!%p4589_p3), 1, %s3281_s25   ;;  %s3522_s18 = sand.u32 (!%p4589_p3), 1, %s3202_s22  }
  0xc1   : > { %2855 = dma.hbm_to_vmem [thread:$0]  (!%p4588_p8), %s3479_s13, 16, %s310_s28, %s3425_s27  }
  0xc2   : > { %318 = sbr.rel (%p4589_p3) target bundleno = 603 (0x25b), region = 44  ;;  %s2371_s17 = sshll.u32 (!%p4589_p3), %s3522_s18, 8 }
  0xc3   : > { %s321_s20 = scalar_lea.sflag (!%p4589_p3), [#allocation3], %s320_s7  ;;  %s3527_s1 = scalar_lea.vmem (!%p4589_p3), [#allocation2], %s2371_s17 }
  0xc4   : > { %p4590_p12 = scmp.ne.s32.totalorder (!%p4589_p3), %s4566_s8, 0 }
  0xc9   : > { %3169 = dma.done.wait (%p4590_p12), %s321_s20, 4096  }
  0xca   : > { %3171 = vsyncadd (%p4590_p12), %s321_s20, 4294963200  ;;  %s2372_s27 = sshll.u32 %s3522_s18, 9  ;;  %s330_s30 = scalar_lea.sflag [#allocation6], %s320_s7 }
  0xcb   : > { %s3534_s11 = scalar_lea.vmem [#allocation5], %s2372_s27 }
  0xcc   : > { %3173 = dma.done.wait (%p4590_p12), %s330_s30, 8192  }
  0xcd   : > { %3175 = vsyncadd (%p4590_p12), %s330_s30, 4294959104  ;;  %p4591_p11 = scmp.eq.s32.totalorder %s3281_s25, 0 }
  0xcf   : > { %3177 = dma.done.wait (%p4591_p11), [#allocation6], 1024   ;;  %p4592_p7 = pmov %p4591_p11 }
  0xd1   : > { %3179 = vsyncadd (%p4592_p7), [#allocation6], 4294966272  ;;  %p4593_p9 = pmov %p4592_p7 }
  0xd2   : > { %p4594_p10 = pmov %p4592_p7 }
  0xd3   : > { %3181 = dma.done.wait (%p4593_p9), [#allocation9], 16  }
  0xd4   : > { %3183 = vsyncadd (%p4594_p10), [#allocation9], 4294967280  ;;  %s349_s13 = scalar_lea.vmem [#allocation10], %s3522_s18 }
  0xd5   : > { %3185 = dma.done.wait (%p4590_p12), %s321_s20, 16  }
  0xd6   : > { %3187 = vsyncadd (%p4590_p12), %s321_s20, 4294967280  ;;  %s357_s21 = scalar_lea.vmem [#allocation11], %s3522_s18 }
  0xd7   : > { %3189 = dma.done.wait (%p4590_p12), %s330_s30, 16  }
  0xd8   : > { %3191 = vsyncadd (%p4590_p12), %s330_s30, 4294967280  ;;  %v1151_v0 = vlaneseq  ;;  %v2417_v3 = vld [vmem:[%s357_s21] ss:$0 sm:$0xff]  ;;  %s3222_s15 = smov 64   ;;  %v2907_v7 = vld [vmem:[#allocation7 + $0x8] sm:$0xff]   ;;  %vm1546_vm0 = vcmask 519168  }
  0xd9   : > { %1678 = vrot.lane.b32.xlu0 %v2417_v3, %s3222_s15  ;;  %v2906_v4 = vld [vmem:[#allocation7] sm:$0xff]   ;;  %v2908_v9 = vld [vmem:[#allocation7 + $0x10] sm:$0xff]   ;;  %v2909_v10 = vld [vmem:[#allocation7 + $0x18] sm:$0xff]   ;;  %vm2129_vm1 = vcmask 1043968   ;;  %s3903_s8 = scalar_lea.vmem [#allocation12], %s2371_s17  ;;  %s2681_s28 = sshll.u32 %s3281_s25, 12 }
  0xda   : > { %v1152_v1 = vshrl.u32 %v1151_v0, 7  ;;  %v1147_v5 = vld [vmem:[%s349_s13] sm:$0x1]  ;;  %2722 = vmatprep.subr.bf16.mxu0 %v2906_v4  ;;  %2802 = vmatprep.subr.bf16.mxu1 %v2906_v4  ;;  %v2911_v13 = vld [vmem:[#allocation7 + $0x28] sm:$0xff]   ;;  %v2912_v14 = vld [vmem:[#allocation7 + $0x30] sm:$0xff]   ;;  %s2208_s23 = sshll.u32 %s3903_s8, 4  ;;  %s4484_s2 = scalar_lea.hbm %s4539_s6, %s2681_s28  ;;  %s4486_s23 = int_to_ptr.vmem [resolvable:$true] %s2208_s23 }
  0xdb   : > { %v1149_v6 = vadd.f32 1.0, %v1147_v5  ;;  %2723 = vmatpush3.bf16.msra.mxu0 %v2906_v4  ;;  %2810 = vmatpush3.bf16.msra.mxu1 %v2906_v4  ;;  %v2914_v11 = vld [vmem:[%s3527_s1] sm:$0xff]   ;;  %v2913_v16 = vld [vmem:[#allocation7 + $0x38] sm:$0xff]   ;;  %v2915_v17 = vld [vmem:[%s3527_s1 + $0x8] sm:$0xff]   ;;  %s2195_s16 = scalar_lea.sflag [#allocation4], %s3522_s18  ;;  %s3124_s10 = scalar_lea.vmem %s4486_s23, 4096 }
  0xdc   : > { %v1153_v2 = vsub.s32 0, %v1152_v1  ;;  %2724 = vmatprep.subr.bf16.mxu0 %v2907_v7  ;;  %2803 = vmatprep.subr.bf16.mxu1 %v2907_v7  ;;  %v2910_v12 = vld [vmem:[#allocation7 + $0x20] sm:$0xff]   ;;  %v2916_v18 = vld [vmem:[%s3527_s1 + $0x10] sm:$0xff]   ;;  %v2927_v19 = vld [vmem:[%s3527_s1 + $0x88] sm:$0xff]   ;;  %p3125_p0 = scmp.ne.s32.totalorder %s4486_s23, %s3124_s10  ;;  %p4595_p6 = scmp.ne.s32.totalorder %s4567_s9, 0 }
  0xdd   : > { %2738 = vmatprep.mubr.bf16.mxu0 %v2914_v11  ;;  %v2926_v15 = vld [vmem:[%s3527_s1 + $0x80] sm:$0xff]   ;;  %v2930_v20 = vld [vmem:[%s3527_s1 + $0x90] sm:$0xff]   ;;  %v2917_v21 = vld [vmem:[%s3527_s1 + $0x18] sm:$0xff]   ;;  %s3223_s25 = smov [#allocation12]  }
  0xde   : > { %v3561_v8 = vrot.slane %v1149_v6, %v1153_v2  ;;  %2770 = vmatprep.mubr.bf16.mxu1 %v2926_v15  ;;  %v2918_v22 = vld [vmem:[%s3527_s1 + $0x20] sm:$0xff]   ;;  %v2931_v23 = vld [vmem:[%s3527_s1 + $0x98] sm:$0xff]   ;;  %v2919_v25 = vld [vmem:[%s3527_s1 + $0x28] sm:$0xff]   ;;  %p3126_p4 = pnand %p3125_p0, %p4595_p6  ;;  %s3128_s12 = sshll.u32 %s3223_s25, 4  ;;  %s3129_s12 = int_to_ptr.vmem [resolvable:$false] %s3128_s12 }
  0xdf   : > { %2725 = vmatpush3.bf16.msra.mxu0 %v2907_v7  ;;  %2811 = vmatpush3.bf16.msra.mxu1 %v2907_v7  ;;  %v2934_v24 = vld [vmem:[%s3527_s1 + $0xa0] sm:$0xff]   ;;  %v2935_v26 = vld [vmem:[%s3527_s1 + $0xa8] sm:$0xff]   ;;  %v2920_v27 = vld [vmem:[%s3527_s1 + $0x30] sm:$0xff]   ;;  %s3130_s19 = scalar_lea.vmem %s3129_s12, 8192  ;;  %p3131_p5 = scmp.lt.s32.totalorder %s4486_s23, %s3129_s12 }
  0xe0   : > { %1611 = vrot.lane.b32.xlu0 %v3561_v8, %s3222_s15  ;;  %2726 = vmatprep.subr.bf16.mxu0 %v2908_v9  ;;  %v2936_v28 = vld [vmem:[%s3527_s1 + $0xb0] sm:$0xff]   ;;  %v2921_v29 = vld [vmem:[%s3527_s1 + $0x38] sm:$0xff]   ;;  %v2922_v31 = vld [vmem:[%s3527_s1 + $0x40] sm:$0xff]   ;;  %p3127_p1 = pneg %p3126_p4  ;;  %p3132_p13 = scmp.lt.s32.totalorder %s3130_s19, %s3124_s10 }
  0xe1   : > { %2804 = vmatprep.subr.bf16.mxu1 %v2908_v9  ;;  %v2937_v30 = vld [vmem:[%s3527_s1 + $0xb8] sm:$0xff]   ;;  %v2938_v32 = vld [vmem:[%s3527_s1 + $0xc0] sm:$0xff]   ;;  %v2923_v33 = vld [vmem:[%s3527_s1 + $0x48] sm:$0xff]  }
  0xe2   : > { %v2939_v34 = vld [vmem:[%s3527_s1 + $0xc8] sm:$0xff]   ;;  %v2924_v35 = vld [vmem:[%s3527_s1 + $0x50] sm:$0xff]   ;;  %v2925_v37 = vld [vmem:[%s3527_s1 + $0x58] sm:$0xff]   ;;  %p3133_p2 = por %p3132_p13, %p3131_p5 }
  0xe3   : > { %2727 = vmatpush3.bf16.msra.mxu0 %v2908_v9  ;;  %2812 = vmatpush3.bf16.msra.mxu1 %v2908_v9  ;;  %v2940_v36 = vld [vmem:[%s3527_s1 + $0xd0] sm:$0xff]   ;;  %v2941_v38 = vld [vmem:[%s3527_s1 + $0xd8] sm:$0xff]   ;;  %v2928_v39 = vld [vmem:[%s3527_s1 + $0x60] sm:$0xff]  }
  0xe4   : > { %2728 = vmatprep.subr.bf16.mxu0 %v2909_v10  ;;  %2805 = vmatprep.subr.bf16.mxu1 %v2909_v10  ;;  %v2942_v40 = vld [vmem:[%s3527_s1 + $0xe0] sm:$0xff]   ;;  %v2929_v41 = vld [vmem:[%s3527_s1 + $0x68] sm:$0xff]   ;;  %v2932_v43 = vld [vmem:[%s3527_s1 + $0x70] sm:$0xff]   ;;  %p3134_p8 = pnand %p3133_p2, %p3127_p1 }
  0xe5   : > { %v2943_v42 = vld [vmem:[%s3527_s1 + $0xe8] sm:$0xff]   ;;  %v2944_v44 = vld [vmem:[%s3527_s1 + $0xf0] sm:$0xff]   ;;  %v2933_v45 = vld [vmem:[%s3527_s1 + $0x78] sm:$0xff]  }
  0xe6   : > { %v2945_v46 = vld [vmem:[%s3527_s1 + $0xf8] sm:$0xff]   ;;  %v1085_v48 = vld [vmem:[%s3534_s11 + $0x10] sm:$0xff]  ;;  %v1083_v49 = vld [vmem:[%s3534_s11] sm:$0xff] }
  0xe7   : > { %2729 = vmatpush3.bf16.msra.mxu0 %v2909_v10  ;;  %2813 = vmatpush3.bf16.msra.mxu1 %v2909_v10  ;;  %v1087_v50 = vld [vmem:[%s3534_s11 + $0x20] sm:$0xff]  ;;  %v1084_v51 = vld [vmem:[%s3534_s11 + $0x8] sm:$0xff]  ;;  %v1089_v57 = vld [vmem:[%s3534_s11 + $0x30] sm:$0xff] }
  0xe8   : > { %2730 = vmatprep.subr.bf16.mxu0 %v2910_v12  ;;  %2806 = vmatprep.subr.bf16.mxu1 %v2910_v12  ;;  %v1086_v58 = vld [vmem:[%s3534_s11 + $0x18] sm:$0xff]  ;;  %v1091_v3 = vld [vmem:[%s3534_s11 + $0x40] sm:$0xff]  ;;  %v1088_v4 = vld [vmem:[%s3534_s11 + $0x28] sm:$0xff] }
  0xeb   : > { %2731 = vmatpush3.bf16.msra.mxu0 %v2910_v12  ;;  %2814 = vmatpush3.bf16.msra.mxu1 %v2910_v12  ;;  %v1093_v12 = vld [vmem:[%s3534_s11 + $0x50] sm:$0xff] }
  0xec   : > { %2732 = vmatprep.subr.bf16.mxu0 %v2911_v13  ;;  %2807 = vmatprep.subr.bf16.mxu1 %v2911_v13 }
  0xef   : > { %2733 = vmatpush3.bf16.msra.mxu0 %v2911_v13  ;;  %2815 = vmatpush3.bf16.msra.mxu1 %v2911_v13  ;;  %v1090_v13 = vld [vmem:[%s3534_s11 + $0x38] sm:$0xff] }
  0xf0   : > { %2734 = vmatprep.subr.bf16.mxu0 %v2912_v14  ;;  %2808 = vmatprep.subr.bf16.mxu1 %v2912_v14 }
  0xf3   : > { %2735 = vmatpush3.bf16.msra.mxu0 %v2912_v14  ;;  %2816 = vmatpush3.bf16.msra.mxu1 %v2912_v14 }
  0xf4   : > { %2736 = vmatprep.subr.bf16.mxu0 %v2913_v16  ;;  %2809 = vmatprep.subr.bf16.mxu1 %v2913_v16 }
  0xf7   : > { %2737 = vmatpush3.bf16.msra.mxu0 %v2913_v16  ;;  %2817 = vmatpush3.bf16.msra.mxu1 %v2913_v16 }
  0xfa   : > { %2739 = vmatmul.mubr.bf16.vlgmr.msra.gmra.mrb[0].mxu0 %v2915_v17  ;;  %2771 = vmatmul.mubr.bf16.vlgmr.msra.gmra.mrb[0].mxu1 %v2927_v19 }
  0xfb   : > { %2742 = vmatprep.mubr.bf16.mxu0 %v2916_v18  ;;  %2774 = vmatprep.mubr.bf16.mxu1 %v2930_v20  ;;  %v1095_v20 = vld [vmem:[%s3534_s11 + $0x60] sm:$0xff] }
 0x102   : > { %2743 = vmatmul.mubr.bf16.gmra.mrb[4].mxu0 %v2917_v21  ;;  %2775 = vmatmul.mubr.bf16.gmra.mrb[4].mxu1 %v2931_v23  ;;  %v1092_v21 = vld [vmem:[%s3534_s11 + $0x48] sm:$0xff] }
 0x103   : > { %2746 = vmatprep.mubr.bf16.mxu0 %v2918_v22  ;;  %2778 = vmatprep.mubr.bf16.mxu1 %v2934_v24 }
 0x10a   : > { %2747 = vmatmul.mubr.bf16.gmra.mrb[8].mxu0 %v2919_v25  ;;  %2779 = vmatmul.mubr.bf16.gmra.mrb[8].mxu1 %v2935_v26 }
 0x10b   : > { %2750 = vmatprep.mubr.bf16.mxu0 %v2920_v27  ;;  %2782 = vmatprep.mubr.bf16.mxu1 %v2936_v28  ;;  %v1097_v28 = vld [vmem:[%s3534_s11 + $0x70] sm:$0xff] }
 0x112   : > { %2751 = vmatmul.mubr.bf16.gmra.mrb[12].mxu0 %v2921_v29  ;;  %2783 = vmatmul.mubr.bf16.gmra.mrb[12].mxu1 %v2937_v30  ;;  %v1094_v29 = vld [vmem:[%s3534_s11 + $0x58] sm:$0xff] }
 0x113   : > { %2754 = vmatprep.mubr.bf16.mxu0 %v2922_v31  ;;  %2786 = vmatprep.mubr.bf16.mxu1 %v2938_v32 }
 0x11a   : > { %2755 = vmatmul.mubr.bf16.gmra.mrb[16].mxu0 %v2923_v33  ;;  %2787 = vmatmul.mubr.bf16.gmra.mrb[16].mxu1 %v2939_v34 }
 0x11b   : > { %2758 = vmatprep.mubr.bf16.mxu0 %v2924_v35  ;;  %2790 = vmatprep.mubr.bf16.mxu1 %v2940_v36  ;;  %v1099_v36 = vld [vmem:[%s3534_s11 + $0x80] sm:$0xff] }
 0x122   : > { %2759 = vmatmul.mubr.bf16.gmra.mrb[20].mxu0 %v2925_v37  ;;  %2791 = vmatmul.mubr.bf16.gmra.mrb[20].mxu1 %v2941_v38  ;;  %v1096_v37 = vld [vmem:[%s3534_s11 + $0x68] sm:$0xff] }
 0x123   : > { %2762 = vmatprep.mubr.bf16.mxu0 %v2928_v39  ;;  %2794 = vmatprep.mubr.bf16.mxu1 %v2942_v40 }
 0x12a   : > { %2763 = vmatmul.mubr.bf16.gmra.mrb[24].mxu0 %v2929_v41  ;;  %2795 = vmatmul.mubr.bf16.gmra.mrb[24].mxu1 %v2943_v42 }
 0x12b   : > { %2766 = vmatprep.mubr.bf16.mxu0 %v2932_v43  ;;  %2798 = vmatprep.mubr.bf16.mxu1 %v2944_v44  ;;  %v1101_v44 = vld [vmem:[%s3534_s11 + $0x90] sm:$0xff] }
 0x132   : > { %2767 = vmatmul.mubr.bf16.gmra.mrb[28].mxu0 %v2933_v45  ;;  %2799 = vmatmul.mubr.bf16.gmra.mrb[28].mxu1 %v2945_v46  ;;  %v1098_v45 = vld [vmem:[%s3534_s11 + $0x78] sm:$0xff] }
 0x14b   : > { %v3597_v47 = vpop.permute.xlu0 %1678 }
 0x152   : > { %v3603_v52 = vpop.permute.xlu0 %1611 }
 0x153   : > { %v1616_v53 = vmul.f32 %v3603_v52, %v1085_v48  ;;  %v1614_v54 = vmul.f32 %v3603_v52, %v1083_v49  ;;  %v1618_v55 = vmul.f32 %v3603_v52, %v1087_v50  ;;  %v1615_v56 = vmul.f32 %v3603_v52, %v1084_v51 }
 0x154   : > { %v1620_v61 = vmul.f32 %v3603_v52, %v1089_v57  ;;  %v1617_v62 = vmul.f32 %v3603_v52, %v1086_v58  ;;  %v1622_v5 = vmul.f32 %v3603_v52, %v1091_v3  ;;  %v1619_v6 = vmul.f32 %v3603_v52, %v1088_v4 }
 0x155   : > { %v1683_v59 = vadd.f32 %v3597_v47, %v1616_v53  ;;  %v1681_v60 = vadd.f32 %v3597_v47, %v1614_v54  ;;  %v1685_v1 = vadd.f32 %v3597_v47, %v1618_v55  ;;  %v1682_v2 = vadd.f32 %v3597_v47, %v1615_v56  ;;  %v1103_v54 = vld [vmem:[%s3534_s11 + $0xa0] sm:$0xff]  ;;  %v1100_v55 = vld [vmem:[%s3534_s11 + $0x88] sm:$0xff] }
 0x156   : > { %v1687_v10 = vadd.f32 %v3597_v47, %v1620_v61  ;;  %v1684_v11 = vadd.f32 %v3597_v47, %v1617_v62  ;;  %v1689_v14 = vadd.f32 %v3597_v47, %v1622_v5  ;;  %v1686_v15 = vadd.f32 %v3597_v47, %v1619_v6  ;;  %v1105_v62 = vld [vmem:[%s3534_s11 + $0xb0] sm:$0xff]  ;;  %v1107_v6 = vld [vmem:[%s3534_s11 + $0xc0] sm:$0xff] }
 0x157   : > { %v2619_v63 = vpack.c.bf16 %v1683_v59, %v1683_v59  ;;  %v2617_v0 = vpack.c.bf16 %v1681_v60, %v1681_v60  ;;  %v2621_v7 = vpack.c.bf16 %v1685_v1, %v1685_v1  ;;  %v2618_v9 = vpack.c.bf16 %v1682_v2, %v1682_v2 }
 0x158   : > { %v2623_v16 = vpack.c.bf16 %v1687_v10, %v1687_v10  ;;  %v2620_v17 = vpack.c.bf16 %v1684_v11, %v1684_v11  ;;  %v1624_v18 = vmul.f32 %v3603_v52, %v1093_v12  ;;  %v1621_v19 = vmul.f32 %v3603_v52, %v1090_v13 }
 0x159   : > { %1941 = vrot.lane.b32.xlu0 %v2619_v63, %s3222_s15  ;;  %1937 = vrot.lane.b32.xlu1 %v2617_v0, %s3222_s15  ;;  %v2625_v22 = vpack.c.bf16 %v1689_v14, %v1689_v14  ;;  %v2622_v23 = vpack.c.bf16 %v1686_v15, %v1686_v15  ;;  %v1626_v26 = vmul.f32 %v3603_v52, %v1095_v20  ;;  %v1102_v63 = vld [vmem:[%s3534_s11 + $0x98] sm:$0xff]  ;;  %v1109_v15 = vld [vmem:[%s3534_s11 + $0xd0] sm:$0xff] }
 0x15a   : > { %v1691_v24 = vadd.f32 %v3597_v47, %v1624_v18  ;;  %v1688_v25 = vadd.f32 %v3597_v47, %v1621_v19  ;;  %v1623_v27 = vmul.f32 %v3603_v52, %v1092_v21  ;;  %v1628_v30 = vmul.f32 %v3603_v52, %v1097_v28 }
 0x15b   : > { %v1625_v31 = vmul.f32 %v3603_v52, %v1094_v29  ;;  %v1693_v34 = vadd.f32 %v3597_v47, %v1626_v26  ;;  %v1630_v39 = vmul.f32 %v3603_v52, %v1099_v36  ;;  %v1627_v43 = vmul.f32 %v3603_v52, %v1096_v37 }
 0x15c   : > { %v2627_v32 = vpack.c.bf16 %v1691_v24, %v1691_v24  ;;  %v2624_v33 = vpack.c.bf16 %v1688_v25, %v1688_v25  ;;  %v1690_v35 = vadd.f32 %v3597_v47, %v1623_v27  ;;  %v1695_v38 = vadd.f32 %v3597_v47, %v1628_v30  ;;  %v1108_v24 = vld [vmem:[%s3534_s11 + $0xc8] sm:$0xff] }
 0x15d   : > { %1945 = vrot.lane.b32.xlu0 %v2621_v7, %s3222_s15  ;;  %1939 = vrot.lane.b32.xlu1 %v2618_v9, %s3222_s15  ;;  %v2629_v40 = vpack.c.bf16 %v1693_v34, %v1693_v34  ;;  %v1692_v42 = vadd.f32 %v3597_v47, %v1625_v31  ;;  %v1697_v48 = vadd.f32 %v3597_v47, %v1630_v39  ;;  %v1104_v7 = vld [vmem:[%s3534_s11 + $0xa8] sm:$0xff]  ;;  %v1113_v31 = vld [vmem:[%s3534_s11 + $0xf0] sm:$0xff] }
 0x15e   : > { %v2626_v41 = vpack.c.bf16 %v1690_v35, %v1690_v35  ;;  %v2631_v46 = vpack.c.bf16 %v1695_v38, %v1695_v38  ;;  %v1694_v50 = vadd.f32 %v3597_v47, %v1627_v43  ;;  %v1632_v51 = vmul.f32 %v3603_v52, %v1101_v44  ;;  %v1115_v39 = vld [vmem:[%s3534_s11 + $0x100] sm:$0xff] }
 0x15f   : > { %v2628_v49 = vpack.c.bf16 %v1692_v42, %v1692_v42  ;;  %v1629_v53 = vmul.f32 %v3603_v52, %v1098_v45  ;;  %v2633_v56 = vpack.c.bf16 %v1697_v48, %v1697_v48  ;;  %v1634_v57 = vmul.f32 %v3603_v52, %v1103_v54  ;;  %v1117_v48 = vld [vmem:[%s3534_s11 + $0x110] sm:$0xff] }
 0x160   : > { %v2630_v58 = vpack.c.bf16 %v1694_v50, %v1694_v50  ;;  %v1699_v59 = vadd.f32 %v3597_v47, %v1632_v51  ;;  %v1631_v61 = vmul.f32 %v3603_v52, %v1100_v55  ;;  %v1636_v0 = vmul.f32 %v3603_v52, %v1105_v62 }
 0x161   : > { %1949 = vrot.lane.b32.xlu0 %v2623_v16, %s3222_s15  ;;  %1943 = vrot.lane.b32.xlu1 %v2620_v17, %s3222_s15  ;;  %v1696_v60 = vadd.f32 %v3597_v47, %v1629_v53  ;;  %v1633_v1 = vmul.f32 %v3603_v52, %v1102_v63  ;;  %v1701_v4 = vadd.f32 %v3597_v47, %v1634_v57  ;;  %v1106_v16 = vld [vmem:[%s3534_s11 + $0xb8] sm:$0xff]  ;;  %v1119_v57 = vld [vmem:[%s3534_s11 + $0x120] sm:$0xff] }
 0x162   : > { %v2635_v2 = vpack.c.bf16 %v1699_v59, %v1699_v59  ;;  %v1698_v5 = vadd.f32 %v3597_v47, %v1631_v61  ;;  %v1703_v9 = vadd.f32 %v3597_v47, %v1636_v0  ;;  %v1638_v10 = vmul.f32 %v3603_v52, %v1107_v6 }
 0x163   : > { %v2632_v3 = vpack.c.bf16 %v1696_v60, %v1696_v60  ;;  %v2637_v11 = vpack.c.bf16 %v1701_v4, %v1701_v4  ;;  %v1700_v13 = vadd.f32 %v3597_v47, %v1633_v1  ;;  %v1635_v14 = vmul.f32 %v3603_v52, %v1104_v7  ;;  %v1121_v1 = vld [vmem:[%s3534_s11 + $0x130] sm:$0xff] }
 0x164   : > { %v2634_v12 = vpack.c.bf16 %v1698_v5, %v1698_v5  ;;  %v2639_v17 = vpack.c.bf16 %v1703_v9, %v1703_v9  ;;  %v1705_v18 = vadd.f32 %v3597_v47, %v1638_v10  ;;  %v1640_v21 = vmul.f32 %v3603_v52, %v1109_v15  ;;  %v1123_v10 = vld [vmem:[%s3534_s11 + $0x140] sm:$0xff] }
 0x165   : > { %1953 = vrot.lane.b32.xlu0 %v2625_v22, %s3222_s15  ;;  %1947 = vrot.lane.b32.xlu1 %v2622_v23, %s3222_s15  ;;  %v2636_v19 = vpack.c.bf16 %v1700_v13, %v1700_v13  ;;  %v1702_v20 = vadd.f32 %v3597_v47, %v1635_v14  ;;  %v1637_v22 = vmul.f32 %v3603_v52, %v1106_v16  ;;  %v1111_v23 = vld [vmem:[%s3534_s11 + $0xe0] sm:$0xff] }
 0x166   : > { %v2641_v25 = vpack.c.bf16 %v1705_v18, %v1705_v18  ;;  %v1642_v26 = vmul.f32 %v3603_v52, %v1111_v23  ;;  %v1707_v28 = vadd.f32 %v3597_v47, %v1640_v21  ;;  %v1639_v30 = vmul.f32 %v3603_v52, %v1108_v24  ;;  %v1125_v18 = vld [vmem:[%s3534_s11 + $0x150] sm:$0xff] }
 0x167   : > { %v2638_v27 = vpack.c.bf16 %v1702_v20, %v1702_v20  ;;  %v1704_v29 = vadd.f32 %v3597_v47, %v1637_v22  ;;  %v1646_v42 = vmul.f32 %v3603_v52, %v1115_v39  ;;  %v1648_v55 = vmul.f32 %v3603_v52, %v1117_v48 }
 0x168   : > { %v2643_v35 = vpack.c.bf16 %v1707_v28, %v1707_v28  ;;  %v1709_v37 = vadd.f32 %v3597_v47, %v1642_v26  ;;  %v1706_v38 = vadd.f32 %v3597_v47, %v1639_v30  ;;  %v1650_v60 = vmul.f32 %v3603_v52, %v1119_v57  ;;  %v1127_v26 = vld [vmem:[%s3534_s11 + $0x160] sm:$0xff] }
 0x169   : > { %1957 = vrot.lane.b32.xlu0 %v2627_v32, %s3222_s15  ;;  %1951 = vrot.lane.b32.xlu1 %v2624_v33, %s3222_s15  ;;  %v1110_v32 = vld [vmem:[%s3534_s11 + $0xd8] sm:$0xff]  ;;  %v1644_v33 = vmul.f32 %v3603_v52, %v1113_v31  ;;  %v2640_v36 = vpack.c.bf16 %v1704_v29, %v1704_v29  ;;  %v1713_v51 = vadd.f32 %v3597_v47, %v1646_v42  ;;  %v1131_v42 = vld [vmem:[%s3534_s11 + $0x180] sm:$0xff] }
 0x16a   : > { %v1641_v34 = vmul.f32 %v3603_v52, %v1110_v32  ;;  %v2645_v43 = vpack.c.bf16 %v1709_v37, %v1709_v37  ;;  %v2642_v44 = vpack.c.bf16 %v1706_v38, %v1706_v38  ;;  %v1715_v62 = vadd.f32 %v3597_v47, %v1648_v55 }
 0x16b   : > { %v2649_v59 = vpack.c.bf16 %v1713_v51, %v1713_v51  ;;  %v1717_v7 = vadd.f32 %v3597_v47, %v1650_v60  ;;  %v1654_v16 = vmul.f32 %v3603_v52, %v1123_v10  ;;  %v1656_v24 = vmul.f32 %v3603_v52, %v1125_v18  ;;  %v1133_v51 = vld [vmem:[%s3534_s11 + $0x190] sm:$0xff]  ;;  %v1135_v60 = vld [vmem:[%s3534_s11 + $0x1a0] sm:$0xff] }
 0x16c   : > { %v1708_v45 = vadd.f32 %v3597_v47, %v1641_v34  ;;  %v2651_v5 = vpack.c.bf16 %v1715_v62, %v1715_v62  ;;  %v1658_v28 = vmul.f32 %v3603_v52, %v1127_v26  ;;  %v1129_v34 = vld [vmem:[%s3534_s11 + $0x170] sm:$0xff]  ;;  %v1666_v62 = vmul.f32 %v3603_v52, %v1135_v60 }
 0x16d   : > { %1961 = vrot.lane.b32.xlu0 %v2629_v40, %s3222_s15  ;;  %1955 = vrot.lane.b32.xlu1 %v2626_v41, %s3222_s15  ;;  %v1112_v40 = vld [vmem:[%s3534_s11 + $0xe8] sm:$0xff]  ;;  %v1711_v41 = vadd.f32 %v3597_v47, %v1644_v33  ;;  %v2653_v14 = vpack.c.bf16 %v1717_v7, %v1717_v7  ;;  %v1721_v22 = vadd.f32 %v3597_v47, %v1654_v16 }
 0x16e   : > { %v2644_v53 = vpack.c.bf16 %v1708_v45, %v1708_v45  ;;  %v1723_v32 = vadd.f32 %v3597_v47, %v1656_v24 }
 0x16f   : > { %v2647_v50 = vpack.c.bf16 %v1711_v41, %v1711_v41  ;;  %v2657_v30 = vpack.c.bf16 %v1721_v22, %v1721_v22  ;;  %v1138_v22 = vld [vmem:[%s3534_s11 + $0x1b8] sm:$0xff] }
 0x170   : > { %v2659_v38 = vpack.c.bf16 %v1723_v32, %v1723_v32 }
 0x171   : > { %1965 = vrot.lane.b32.xlu0 %v2631_v46, %s3222_s15  ;;  %1959 = vrot.lane.b32.xlu1 %v2628_v49, %s3222_s15  ;;  %v1643_v46 = vmul.f32 %v3603_v52, %v1112_v40  ;;  %v1114_v49 = vld [vmem:[%s3534_s11 + $0xf8] sm:$0xff]  ;;  %v1725_v40 = vadd.f32 %v3597_v47, %v1658_v28  ;;  %v1669_v28 = vmul.f32 %v3603_v52, %v1138_v22 }
 0x173   : > { %v1710_v54 = vadd.f32 %v3597_v47, %v1643_v46  ;;  %v2661_v46 = vpack.c.bf16 %v1725_v40, %v1725_v40 }
 0x175   : > { %1969 = vrot.lane.b32.xlu0 %v2633_v56, %s3222_s15  ;;  %1963 = vrot.lane.b32.xlu1 %v2630_v58, %s3222_s15  ;;  %v1645_v56 = vmul.f32 %v3603_v52, %v1114_v49  ;;  %v1116_v58 = vld [vmem:[%s3534_s11 + $0x108] sm:$0xff]  ;;  %v2646_v61 = vpack.c.bf16 %v1710_v54, %v1710_v54  ;;  %v1662_v49 = vmul.f32 %v3603_v52, %v1131_v42 }
 0x176   : > { %v1647_v0 = vmul.f32 %v3603_v52, %v1116_v58  ;;  %v1664_v58 = vmul.f32 %v3603_v52, %v1133_v51 }
 0x177   : > { %v1712_v63 = vadd.f32 %v3597_v47, %v1645_v56  ;;  %v1729_v56 = vadd.f32 %v3597_v47, %v1662_v49 }
 0x178   : > { %v1714_v9 = vadd.f32 %v3597_v47, %v1647_v0 }
 0x179   : > { %1973 = vrot.lane.b32.xlu0 %v2635_v2, %s3222_s15  ;;  %1967 = vrot.lane.b32.xlu1 %v2632_v3, %s3222_s15  ;;  %v1118_v2 = vld [vmem:[%s3534_s11 + $0x118] sm:$0xff]  ;;  %v1652_v3 = vmul.f32 %v3603_v52, %v1121_v1  ;;  %v2648_v6 = vpack.c.bf16 %v1712_v63, %v1712_v63  ;;  %v2665_v0 = vpack.c.bf16 %v1729_v56, %v1729_v56 }
 0x17a   : > { %v1649_v4 = vmul.f32 %v3603_v52, %v1118_v2  ;;  %v2650_v15 = vpack.c.bf16 %v1714_v9, %v1714_v9  ;;  %v1731_v2 = vadd.f32 %v3597_v47, %v1664_v58 }
 0x17c   : > { %v1716_v13 = vadd.f32 %v3597_v47, %v1649_v4  ;;  %v1137_v4 = vld [vmem:[%s3534_s11 + $0x1b0] sm:$0xff]  ;;  %v2667_v9 = vpack.c.bf16 %v1731_v2, %v1731_v2 }
 0x17d   : > { %1977 = vrot.lane.b32.xlu0 %v2637_v11, %s3222_s15  ;;  %1971 = vrot.lane.b32.xlu1 %v2634_v12, %s3222_s15  ;;  %v1120_v11 = vld [vmem:[%s3534_s11 + $0x128] sm:$0xff]  ;;  %v1719_v12 = vadd.f32 %v3597_v47, %v1652_v3  ;;  %v1668_v7 = vmul.f32 %v3603_v52, %v1137_v4 }
 0x17e   : > { %v2652_v21 = vpack.c.bf16 %v1716_v13, %v1716_v13  ;;  %v1139_v13 = vld [vmem:[%s3534_s11 + $0x1c0] sm:$0xff] }
 0x17f   : > { %v2655_v20 = vpack.c.bf16 %v1719_v12, %v1719_v12  ;;  %v1735_v16 = vadd.f32 %v3597_v47, %v1668_v7 }
 0x181   : > { %1981 = vrot.lane.b32.xlu0 %v2639_v17, %s3222_s15  ;;  %1975 = vrot.lane.b32.xlu1 %v2636_v19, %s3222_s15  ;;  %v1651_v17 = vmul.f32 %v3603_v52, %v1120_v11  ;;  %v1122_v19 = vld [vmem:[%s3534_s11 + $0x138] sm:$0xff] }
 0x183   : > { %v1718_v23 = vadd.f32 %v3597_v47, %v1651_v17 }
 0x185   : > { %1985 = vrot.lane.b32.xlu0 %v2641_v25, %s3222_s15  ;;  %1979 = vrot.lane.b32.xlu1 %v2638_v27, %s3222_s15  ;;  %v1653_v25 = vmul.f32 %v3603_v52, %v1122_v19  ;;  %v1124_v27 = vld [vmem:[%s3534_s11 + $0x148] sm:$0xff]  ;;  %v2654_v31 = vpack.c.bf16 %v1718_v23, %v1718_v23  ;;  %v1670_v19 = vmul.f32 %v3603_v52, %v1139_v13 }
 0x186   : > { %v1655_v29 = vmul.f32 %v3603_v52, %v1124_v27  ;;  %v2671_v23 = vpack.c.bf16 %v1735_v16, %v1735_v16 }
 0x187   : > { %v1720_v33 = vadd.f32 %v3597_v47, %v1653_v25  ;;  %v1737_v26 = vadd.f32 %v3597_v47, %v1670_v19 }
 0x188   : > { %v1722_v41 = vadd.f32 %v3597_v47, %v1655_v29  ;;  %v1143_v29 = vld [vmem:[%s3534_s11 + $0x1e0] sm:$0xff] }
 0x189   : > { %1989 = vrot.lane.b32.xlu0 %v2643_v35, %s3222_s15  ;;  %1983 = vrot.lane.b32.xlu1 %v2640_v36, %s3222_s15  ;;  %v1126_v35 = vld [vmem:[%s3534_s11 + $0x158] sm:$0xff]  ;;  %v1660_v36 = vmul.f32 %v3603_v52, %v1129_v34  ;;  %v2656_v39 = vpack.c.bf16 %v1720_v33, %v1720_v33  ;;  %v2673_v33 = vpack.c.bf16 %v1737_v26, %v1737_v26 }
 0x18a   : > { %v1657_v37 = vmul.f32 %v3603_v52, %v1126_v35  ;;  %v2658_v48 = vpack.c.bf16 %v1722_v41, %v1722_v41 }
 0x18c   : > { %v1724_v45 = vadd.f32 %v3597_v47, %v1657_v37  ;;  %v1145_v37 = vld [vmem:[%s3534_s11 + $0x1f0] sm:$0xff] }
 0x18d   : > { %1993 = vrot.lane.b32.xlu0 %v2645_v43, %s3222_s15  ;;  %1987 = vrot.lane.b32.xlu1 %v2642_v44, %s3222_s15  ;;  %v1128_v43 = vld [vmem:[%s3534_s11 + $0x168] sm:$0xff]  ;;  %v1727_v44 = vadd.f32 %v3597_v47, %v1660_v36  ;;  %v1736_v36 = vadd.f32 %v3597_v47, %v1669_v28  ;;  %v1676_v40 = vmul.f32 %v3603_v52, %v1145_v37 }
 0x18e   : > { %v2660_v55 = vpack.c.bf16 %v1724_v45, %v1724_v45  ;;  %v1144_v45 = vld [vmem:[%s3534_s11 + $0x1e8] sm:$0xff] }
 0x18f   : > { %v2663_v54 = vpack.c.bf16 %v1727_v44, %v1727_v44  ;;  %v2672_v42 = vpack.c.bf16 %v1736_v36, %v1736_v36 }
 0x191   : > { %1997 = vrot.lane.b32.xlu0 %v2647_v50, %s3222_s15  ;;  %1991 = vrot.lane.b32.xlu1 %v2644_v53, %s3222_s15  ;;  %v1659_v50 = vmul.f32 %v3603_v52, %v1128_v43  ;;  %v1130_v53 = vld [vmem:[%s3534_s11 + $0x178] sm:$0xff] }
 0x193   : > { %v1726_v57 = vadd.f32 %v3597_v47, %v1659_v50 }
 0x195   : > { %2001 = vrot.lane.b32.xlu0 %v2649_v59, %s3222_s15  ;;  %1995 = vrot.lane.b32.xlu1 %v2646_v61, %s3222_s15  ;;  %v1661_v59 = vmul.f32 %v3603_v52, %v1130_v53  ;;  %v1132_v61 = vld [vmem:[%s3534_s11 + $0x188] sm:$0xff]  ;;  %v2662_v1 = vpack.c.bf16 %v1726_v57, %v1726_v57  ;;  %v3855_v57 = vld [vmem:[#allocation8] ss:$0 sm:$0xff] }
 0x196   : > { %v1663_v63 = vmul.f32 %v3603_v52, %v1132_v61 }
 0x197   : > { %v1728_v3 = vadd.f32 %v3597_v47, %v1661_v59 }
 0x198   : > { %v1730_v11 = vadd.f32 %v3597_v47, %v1663_v63 }
 0x199   : > { %2005 = vrot.lane.b32.xlu0 %v2651_v5, %s3222_s15  ;;  %1999 = vrot.lane.b32.xlu1 %v2648_v6, %s3222_s15  ;;  %v1134_v5 = vld [vmem:[%s3534_s11 + $0x198] sm:$0xff]  ;;  %v1733_v6 = vadd.f32 %v3597_v47, %v1666_v62  ;;  %v2664_v10 = vpack.c.bf16 %v1728_v3, %v1728_v3 }
 0x19a   : > { %v1665_v12 = vmul.f32 %v3603_v52, %v1134_v5  ;;  %v2666_v17 = vpack.c.bf16 %v1730_v11, %v1730_v11 }
 0x19c   : > { %v1732_v18 = vadd.f32 %v3597_v47, %v1665_v12 }
 0x19d   : > { %2009 = vrot.lane.b32.xlu0 %v2653_v14, %s3222_s15  ;;  %2003 = vrot.lane.b32.xlu1 %v2650_v15, %s3222_s15  ;;  %v1136_v14 = vld [vmem:[%s3534_s11 + $0x1a8] sm:$0xff]  ;;  %v2669_v15 = vpack.c.bf16 %v1733_v6, %v1733_v6 }
 0x19e   : > { %v2668_v25 = vpack.c.bf16 %v1732_v18, %v1732_v18 }
 0x1a1   : > { %2013 = vrot.lane.b32.xlu0 %v2655_v20, %s3222_s15  ;;  %2007 = vrot.lane.b32.xlu1 %v2652_v21, %s3222_s15  ;;  %v1667_v20 = vmul.f32 %v3603_v52, %v1136_v14  ;;  %v1141_v21 = vld [vmem:[%s3534_s11 + $0x1d0] sm:$0xff] }
 0x1a2   : > { %v1672_v24 = vmul.f32 %v3603_v52, %v1141_v21 }
 0x1a3   : > { %v1734_v27 = vadd.f32 %v3597_v47, %v1667_v20 }
 0x1a4   : > { %v1739_v35 = vadd.f32 %v3597_v47, %v1672_v24 }
 0x1a5   : > { %2017 = vrot.lane.b32.xlu0 %v2657_v30, %s3222_s15  ;;  %2011 = vrot.lane.b32.xlu1 %v2654_v31, %s3222_s15  ;;  %v1140_v30 = vld [vmem:[%s3534_s11 + $0x1c8] sm:$0xff]  ;;  %v1674_v31 = vmul.f32 %v3603_v52, %v1143_v29  ;;  %v2670_v34 = vpack.c.bf16 %v1734_v27, %v1734_v27  ;;  %v3884_v29 = vld [vmem:[%s357_s21] ss:$0 sm:$0xff] }
 0x1a6   : > { %v1671_v32 = vmul.f32 %v3603_v52, %v1140_v30  ;;  %v2675_v41 = vpack.c.bf16 %v1739_v35, %v1739_v35 }
 0x1a8   : > { %v1738_v43 = vadd.f32 %v3597_v47, %v1671_v32 }
 0x1a9   : > { %2021 = vrot.lane.b32.xlu0 %v2659_v38, %s3222_s15  ;;  %2015 = vrot.lane.b32.xlu1 %v2656_v39, %s3222_s15  ;;  %v1142_v38 = vld [vmem:[%s3534_s11 + $0x1d8] sm:$0xff]  ;;  %v1741_v39 = vadd.f32 %v3597_v47, %v1674_v31 }
 0x1aa   : > { %v1673_v44 = vmul.f32 %v3603_v52, %v1142_v38  ;;  %v2674_v53 = vpack.c.bf16 %v1738_v43, %v1738_v43 }
 0x1ab   : > { %v2677_v51 = vpack.c.bf16 %v1741_v39, %v1741_v39 }
 0x1ad   : > { %2025 = vrot.lane.b32.xlu0 %v2661_v46, %s3222_s15  ;;  %2019 = vrot.lane.b32.xlu1 %v2658_v48, %s3222_s15  ;;  %v1146_v46 = vld [vmem:[%s3534_s11 + $0x1f8] sm:$0xff]  ;;  %v1675_v48 = vmul.f32 %v3603_v52, %v1144_v45 }
 0x1ae   : > { %v1677_v56 = vmul.f32 %v3603_v52, %v1146_v46 }
 0x1af   : > { %v1742_v58 = vadd.f32 %v3597_v47, %v1675_v48 }
 0x1b1   : > { %2029 = vrot.lane.b32.xlu0 %v2663_v54, %s3222_s15  ;;  %2023 = vrot.lane.b32.xlu1 %v2660_v55, %s3222_s15  ;;  %v1743_v54 = vadd.f32 %v3597_v47, %v1676_v40  ;;  %v1740_v55 = vadd.f32 %v3597_v47, %v1673_v44  ;;  %v2678_v7 = vpack.c.bf16 %v1742_v58, %v1742_v58 }
 0x1b3   : > { %v2679_v61 = vpack.c.bf16 %v1743_v54, %v1743_v54  ;;  %v2676_v62 = vpack.c.bf16 %v1740_v55, %v1740_v55 }
 0x1b5   : > { %2033 = vrot.lane.b32.xlu0 %v2665_v0, %s3222_s15  ;;  %2027 = vrot.lane.b32.xlu1 %v2662_v1, %s3222_s15  ;;  %v1744_v0 = vadd.f32 %v3597_v47, %v1677_v56 }
 0x1b7   : > { %v2680_v18 = vpack.c.bf16 %v1744_v0, %v1744_v0 }
 0x1b9   : > { %2037 = vrot.lane.b32.xlu0 %v2667_v9, %s3222_s15  ;;  %2031 = vrot.lane.b32.xlu1 %v2664_v10, %s3222_s15 }
 0x1bd   : > { %2041 = vrot.lane.b32.xlu0 %v2669_v15, %s3222_s15  ;;  %2035 = vrot.lane.b32.xlu1 %v2666_v17, %s3222_s15 }
 0x1c1   : > { %2045 = vrot.lane.b32.xlu0 %v2671_v23, %s3222_s15  ;;  %2039 = vrot.lane.b32.xlu1 %v2668_v25, %s3222_s15 }
 0x1c5   : > { %2049 = vrot.lane.b32.xlu0 %v2673_v33, %s3222_s15  ;;  %2043 = vrot.lane.b32.xlu1 %v2670_v34, %s3222_s15 }
 0x1c9   : > { %2053 = vrot.lane.b32.xlu0 %v2675_v41, %s3222_s15  ;;  %2047 = vrot.lane.b32.xlu1 %v2672_v42, %s3222_s15 }
 0x1cb   : > { %v3846_v49 = vpop.permute.xlu0 %1941  ;;  %v3848_v50 = vpop.permute.xlu1 %1937 }
 0x1cd   : > { %2057 = vrot.lane.b32.xlu0 %v2677_v51, %s3222_s15  ;;  %2051 = vrot.lane.b32.xlu1 %v2674_v53, %s3222_s15  ;;  %v2740_v63 = vpop.f32.mrb[0].mxu0  ;;  %v2772_v1 = vpop.f32.mrb[0].mxu1 }
 0x1ce   : > { %v773_v52 = vadd.f32 %v2740_v63, %v3855_v57  ;;  %v764_v2 = vpop.f32.mrb[1].mxu0  ;;  %v901_v3 = vadd.f32 %v2772_v1, %v3855_v57  ;;  %v892_v4 = vpop.f32.mrb[1].mxu1 }
 0x1cf   : > { %v3858_v59 = vpop.permute.xlu0 %1945  ;;  %v3860_v60 = vpop.permute.xlu1 %1939  ;;  %v765_v5 = vadd.f32 %v3855_v57, %v764_v2  ;;  %v893_v9 = vadd.f32 %v3855_v57, %v892_v4 }
 0x1d0   : > { %v2741_v6 = vpop.f32.mrb[2].mxu0  ;;  %v2773_v10 = vpop.f32.mrb[2].mxu1  ;;  %v1021_v47 = vmax.f32 %v773_v52, 0.0  ;;  %v1053_v14 = vmax.f32 %v901_v3, 0.0 }
 0x1d1   : > { %2061 = vrot.lane.b32.xlu0 %v2679_v61, %s3222_s15  ;;  %2055 = vrot.lane.b32.xlu1 %v2676_v62, %s3222_s15  ;;  %v776_v13 = vadd.f32 %v2741_v6, %v3855_v57  ;;  %v904_v15 = vadd.f32 %v2773_v10, %v3855_v57  ;;  %v1019_v16 = vmax.f32 %v765_v5, 0.0  ;;  %v767_v17 = vpop.f32.mrb[3].mxu0  ;;  %v1051_v19 = vmax.f32 %v893_v9, 0.0  ;;  %v895_v20 = vpop.f32.mrb[3].mxu1 }
 0x1d2   : > { %v1158_v21 = vmul.f32 %v3561_v8, %v1021_v47  ;;  %v768_v23 = vadd.f32 %v3855_v57, %v767_v17  ;;  %v1190_v24 = vmul.f32 %v3561_v8, %v1053_v14  ;;  %v896_v28 = vadd.f32 %v3855_v57, %v895_v20 }
 0x1d3   : > { %v3869_v11 = vpop.permute.xlu0 %1949  ;;  %v3871_v12 = vpop.permute.xlu1 %1943  ;;  %v1022_v22 = vmax.f32 %v776_v13, 0.0  ;;  %v1156_v25 = vmul.f32 %v3561_v8, %v1019_v16  ;;  %v1188_v26 = vmul.f32 %v3561_v8, %v1051_v19  ;;  %v1054_v27 = vmax.f32 %v904_v15, 0.0 }
 0x1d4   : > { %v1228_v30 = vadd.f32 %v3884_v29, %v1158_v21  ;;  %v1020_v32 = vmax.f32 %v768_v23, 0.0  ;;  %v1260_v35 = vadd.f32 %v3884_v29, %v1190_v24  ;;  %v1052_v40 = vmax.f32 %v896_v28, 0.0 }
 0x1d5   : > { %2059 = vrot.lane.b32.xlu1 %v2678_v7, %s3222_s15  ;;  %v1159_v31 = vmul.f32 %v3561_v8, %v1022_v22  ;;  %v1226_v36 = vadd.f32 %v3884_v29, %v1156_v25  ;;  %v2744_v37 = vpop.f32.mrb[4].mxu0  ;;  %v1258_v38 = vadd.f32 %v3884_v29, %v1188_v26  ;;  %v1191_v39 = vmul.f32 %v3561_v8, %v1054_v27  ;;  %v2776_v41 = vpop.f32.mrb[4].mxu1 }
 0x1d6   : > { %v2555_v42 = vpack.c.bf16 %v1228_v30, %v1228_v30  ;;  %v1157_v44 = vmul.f32 %v3561_v8, %v1020_v32  ;;  %v789_v45 = vadd.f32 %v2744_v37, %v3855_v57  ;;  %v780_v46 = vpop.f32.mrb[5].mxu0  ;;  %v908_v48 = vpop.f32.mrb[5].mxu1  ;;  %v2587_v55 = vpack.c.bf16 %v1260_v35, %v1260_v35 }
 0x1d7   : > { %v3888_v33 = vpop.permute.xlu0 %1953  ;;  %v3890_v34 = vpop.permute.xlu1 %1947  ;;  %v1229_v43 = vadd.f32 %v3884_v29, %v1159_v31  ;;  %v2553_v51 = vpack.c.bf16 %v1226_v36, %v1226_v36  ;;  %v781_v53 = vadd.f32 %v3855_v57, %v780_v46  ;;  %v2585_v56 = vpack.c.bf16 %v1258_v38, %v1258_v38 }
 0x1d8   : > { %v2745_v54 = vpop.f32.mrb[6].mxu0  ;;  %v2777_v58 = vpop.f32.mrb[6].mxu1  ;;  %1549 = vst.msk [vmem:[%s3903_s8 + $0x8] sm:$0xf] %vm1546_vm0, %v2555_v42  ;;  %v1227_v62 = vadd.f32 %v3884_v29, %v1157_v44  ;;  %v1025_v63 = vmax.f32 %v789_v45, 0.0  ;;  %v1261_v4 = vadd.f32 %v3884_v29, %v1191_v39  ;;  %v1189_v5 = vmul.f32 %v3561_v8, %v1052_v40 }
 0x1d9   : > { %2063 = vrot.lane.b32.xlu1 %v2680_v18, %s3222_s15  ;;  %v2556_v61 = vpack.c.bf16 %v1229_v43, %v1229_v43  ;;  %v792_v52 = vadd.f32 %v2745_v54, %v3855_v57  ;;  %2132 = vst.msk [vmem:[%s3903_s8 + $0x8] sm:$0xf] %vm2129_vm1, %v3846_v49  ;;  %v1023_v2 = vmax.f32 %v781_v53, 0.0  ;;  %v783_v3 = vpop.f32.mrb[7].mxu0  ;;  %v917_v6 = vadd.f32 %v2776_v41, %v3855_v57  ;;  %v3925_v7 = vpop.f32.mrb[7].mxu1 }
 0x1da   : > { %1547 = vst.msk [vmem:[%s3903_s8] sm:$0xf] %vm1546_vm0, %v2553_v51  ;;  %1581 = vst.msk [vmem:[%s3903_s8 + $0x88] sm:$0xf] %vm1546_vm0, %v2587_v55  ;;  %v2554_v49 = vpack.c.bf16 %v1227_v62, %v1227_v62  ;;  %v1162_v9 = vmul.f32 %v3561_v8, %v1025_v63  ;;  %v784_v47 = vadd.f32 %v3855_v57, %v783_v3 }
 0x1db   : > { %v3908_v0 = vpop.permute.xlu0 %1957  ;;  %v3910_v1 = vpop.permute.xlu1 %1951  ;;  %1579 = vst.msk [vmem:[%s3903_s8 + $0x80] sm:$0xf] %vm1546_vm0, %v2585_v56  ;;  %1550 = vst.msk [vmem:[%s3903_s8 + $0xc] sm:$0xf] %vm1546_vm0, %v2556_v61  ;;  %v1026_v10 = vmax.f32 %v792_v52, 0.0  ;;  %v1160_v13 = vmul.f32 %v3561_v8, %v1023_v2  ;;  %v2588_v14 = vpack.c.bf16 %v1261_v4, %v1261_v4  ;;  %v1259_v15 = vadd.f32 %v3884_v29, %v1189_v5 }
 0x1dc   : > { %2130 = vst.msk [vmem:[%s3903_s8] sm:$0xf] %vm2129_vm1, %v3848_v50  ;;  %2133 = vst.msk [vmem:[%s3903_s8 + $0xc] sm:$0xf] %vm2129_vm1, %v3871_v12  ;;  %v1057_v16 = vmax.f32 %v917_v6, 0.0  ;;  %v1232_v50 = vadd.f32 %v3884_v29, %v1162_v9  ;;  %v1024_v18 = vmax.f32 %v784_v47, 0.0  ;;  %v909_v21 = vadd.f32 %v3855_v57, %v908_v48 }
 0x1dd   : > { %1548 = vst.msk [vmem:[%s3903_s8 + $0x4] sm:$0xf] %vm1546_vm0, %v2554_v49  ;;  %v1163_v17 = vmul.f32 %v3561_v8, %v1026_v10  ;;  %v1230_v12 = vadd.f32 %v3884_v29, %v1160_v13  ;;  %v2748_v22 = vpop.f32.mrb[8].mxu0  ;;  %1582 = vst.msk [vmem:[%s3903_s8 + $0x8c] sm:$0xf] %vm1546_vm0, %v2588_v14  ;;  %v2586_v23 = vpack.c.bf16 %v1259_v15, %v1259_v15  ;;  %v2780_v26 = vpop.f32.mrb[8].mxu1 }
 0x1de   : > { %2131 = vst.msk [vmem:[%s3903_s8 + $0x4] sm:$0xf] %vm2129_vm1, %v3860_v60  ;;  %v1194_v24 = vmul.f32 %v3561_v8, %v1057_v16  ;;  %v920_v25 = vadd.f32 %v2777_v58, %v3855_v57  ;;  %v2559_v27 = vpack.c.bf16 %v1232_v50, %v1232_v50  ;;  %v1161_v30 = vmul.f32 %v3561_v8, %v1024_v18  ;;  %v796_v31 = vpop.f32.mrb[9].mxu0  ;;  %v3959_v32 = vpop.f32.mrb[9].mxu1 }
 0x1df   : > { %v3943_v19 = vpop.permute.xlu0 %1961  ;;  %v3945_v20 = vpop.permute.xlu1 %1955  ;;  %v1233_v28 = vadd.f32 %v3884_v29, %v1163_v17  ;;  %v805_v60 = vadd.f32 %v2748_v22, %v3855_v57  ;;  %v2557_v35 = vpack.c.bf16 %v1230_v12, %v1230_v12  ;;  %v797_v36 = vadd.f32 %v3855_v57, %v796_v31  ;;  %1580 = vst.msk [vmem:[%s3903_s8 + $0x84] sm:$0xf] %vm1546_vm0, %v2586_v23 }
 0x1e0   : > { %v2749_v37 = vpop.f32.mrb[10].mxu0  ;;  %v1264_v38 = vadd.f32 %v3884_v29, %v1194_v24  ;;  %v1055_v39 = vmax.f32 %v909_v21, 0.0  ;;  %v3965_v40 = vpop.f32.mrb[10].mxu1  ;;  %1553 = vst.msk [vmem:[%s3903_s8 + $0x18] sm:$0xf] %vm1546_vm0, %v2559_v27  ;;  %v1231_v42 = vadd.f32 %v3884_v29, %v1161_v30  ;;  %v1058_v55 = vmax.f32 %v920_v25, 0.0 }
 0x1e1   : > { %v2560_v41 = vpack.c.bf16 %v1233_v28, %v1233_v28  ;;  %v1029_v43 = vmax.f32 %v805_v60, 0.0  ;;  %v808_v46 = vadd.f32 %v2749_v37, %v3855_v57  ;;  %2136 = vst.msk [vmem:[%s3903_s8 + $0x18] sm:$0xf] %vm2129_vm1, %v3869_v11  ;;  %v1027_v48 = vmax.f32 %v797_v36, 0.0  ;;  %v799_v51 = vpop.f32.mrb[11].mxu0  ;;  %v3981_v56 = vpop.f32.mrb[11].mxu1 }
 0x1e2   : > { %1551 = vst.msk [vmem:[%s3903_s8 + $0x10] sm:$0xf] %vm1546_vm0, %v2557_v35  ;;  %v2591_v53 = vpack.c.bf16 %v1264_v38, %v1264_v38  ;;  %v1192_v54 = vmul.f32 %v3561_v8, %v1055_v39  ;;  %v2558_v58 = vpack.c.bf16 %v1231_v42, %v1231_v42  ;;  %v800_v62 = vadd.f32 %v3855_v57, %v799_v51 }
 0x1e3   : > { %v3970_v44 = vpop.permute.xlu0 %1965  ;;  %v3972_v45 = vpop.permute.xlu1 %1959  ;;  %2134 = vst.msk [vmem:[%s3903_s8 + $0x10] sm:$0xf] %vm2129_vm1, %v3858_v59  ;;  %v1166_v11 = vmul.f32 %v3561_v8, %v1029_v43  ;;  %v1030_v61 = vmax.f32 %v808_v46, 0.0  ;;  %v1164_v63 = vmul.f32 %v3561_v8, %v1027_v48  ;;  %v1195_v59 = vmul.f32 %v3561_v8, %v1058_v55 }
 0x1e4   : > { %1554 = vst.msk [vmem:[%s3903_s8 + $0x1c] sm:$0xf] %vm1546_vm0, %v2560_v41  ;;  %1585 = vst.msk [vmem:[%s3903_s8 + $0x98] sm:$0xf] %vm1546_vm0, %v2591_v53  ;;  %v1262_v52 = vadd.f32 %v3884_v29, %v1192_v54  ;;  %v912_v2 = vadd.f32 %v3855_v57, %v3925_v7  ;;  %v1028_v5 = vmax.f32 %v800_v62, 0.0  ;;  %v933_v49 = vadd.f32 %v2780_v26, %v3855_v57 }
 0x1e5   : > { %2137 = vst.msk [vmem:[%s3903_s8 + $0x1c] sm:$0xf] %vm2129_vm1, %v3910_v1  ;;  %v1236_v3 = vadd.f32 %v3884_v29, %v1166_v11  ;;  %v1167_v4 = vmul.f32 %v3561_v8, %v1030_v61  ;;  %v1234_v9 = vadd.f32 %v3884_v29, %v1164_v63  ;;  %v2752_v7 = vpop.f32.mrb[12].mxu0  ;;  %v1265_v47 = vadd.f32 %v3884_v29, %v1195_v59  ;;  %v4014_v14 = vpop.f32.mrb[12].mxu1 }
 0x1e6   : > { %1552 = vst.msk [vmem:[%s3903_s8 + $0x14] sm:$0xf] %vm1546_vm0, %v2558_v58  ;;  %v2589_v10 = vpack.c.bf16 %v1262_v52, %v1262_v52  ;;  %v1056_v13 = vmax.f32 %v912_v2, 0.0  ;;  %v1165_v50 = vmul.f32 %v3561_v8, %v1028_v5  ;;  %v821_v17 = vadd.f32 %v2752_v7, %v3855_v57  ;;  %v812_v18 = vpop.f32.mrb[13].mxu0 }
 0x1e7   : > { %v4004_v6 = vpop.permute.xlu0 %1969  ;;  %v4006_v1 = vpop.permute.xlu1 %1963  ;;  %2135 = vst.msk [vmem:[%s3903_s8 + $0x14] sm:$0xf] %vm2129_vm1, %v3890_v34  ;;  %v2563_v15 = vpack.c.bf16 %v1236_v3, %v1236_v3  ;;  %v1237_v16 = vadd.f32 %v3884_v29, %v1167_v4  ;;  %v2561_v21 = vpack.c.bf16 %v1234_v9, %v1234_v9  ;;  %v813_v12 = vadd.f32 %v3855_v57, %v812_v18 }
 0x1e8   : > { %v4019_v34 = vpop.f32.mrb[13].mxu1  ;;  %v2753_v22 = vpop.f32.mrb[14].mxu0  ;;  %1583 = vst.msk [vmem:[%s3903_s8 + $0x90] sm:$0xf] %vm1546_vm0, %v2589_v10  ;;  %v2592_v23 = vpack.c.bf16 %v1265_v47, %v1265_v47  ;;  %v1193_v24 = vmul.f32 %v3561_v8, %v1056_v13  ;;  %v1235_v27 = vadd.f32 %v3884_v29, %v1165_v50  ;;  %v1033_v28 = vmax.f32 %v821_v17, 0.0 }
 0x1e9   : > { %v4025_v25 = vpop.f32.mrb[14].mxu1  ;;  %1557 = vst.msk [vmem:[%s3903_s8 + $0x28] sm:$0xf] %vm1546_vm0, %v2563_v15  ;;  %v2564_v26 = vpack.c.bf16 %v1237_v16, %v1237_v16  ;;  %v824_v31 = vadd.f32 %v2753_v22, %v3855_v57  ;;  %1555 = vst.msk [vmem:[%s3903_s8 + $0x20] sm:$0xf] %vm1546_vm0, %v2561_v21  ;;  %v1031_v35 = vmax.f32 %v813_v12, 0.0  ;;  %v925_v39 = vadd.f32 %v3855_v57, %v3959_v32 }
 0x1ea   : > { %2140 = vst.msk [vmem:[%s3903_s8 + $0x28] sm:$0xf] %vm2129_vm1, %v3908_v0  ;;  %v815_v36 = vpop.f32.mrb[15].mxu0  ;;  %v1263_v37 = vadd.f32 %v3884_v29, %v1193_v24  ;;  %v1061_v38 = vmax.f32 %v933_v49, 0.0  ;;  %v4045_v41 = vpop.f32.mrb[15].mxu1  ;;  %v2562_v0 = vpack.c.bf16 %v1235_v27, %v1235_v27  ;;  %v1170_v42 = vmul.f32 %v3561_v8, %v1033_v28 }
 0x1eb   : > { %v4030_v30 = vpop.permute.xlu0 %1973  ;;  %v4032_v60 = vpop.permute.xlu1 %1967  ;;  %1586 = vst.msk [vmem:[%s3903_s8 + $0x9c] sm:$0xf] %vm1546_vm0, %v2592_v23  ;;  %1558 = vst.msk [vmem:[%s3903_s8 + $0x2c] sm:$0xf] %vm1546_vm0, %v2564_v26  ;;  %v1034_v43 = vmax.f32 %v824_v31, 0.0  ;;  %v816_v46 = vadd.f32 %v3855_v57, %v815_v36  ;;  %v1168_v32 = vmul.f32 %v3561_v8, %v1031_v35  ;;  %v1059_v53 = vmax.f32 %v925_v39, 0.0 }
 0x1ec   : > { %2138 = vst.msk [vmem:[%s3903_s8 + $0x20] sm:$0xf] %vm2129_vm1, %v3888_v33  ;;  %2141 = vst.msk [vmem:[%s3903_s8 + $0x2c] sm:$0xf] %vm2129_vm1, %v3972_v45  ;;  %v2590_v48 = vpack.c.bf16 %v1263_v37, %v1263_v37  ;;  %v1198_v51 = vmul.f32 %v3561_v8, %v1061_v38  ;;  %v1240_v33 = vadd.f32 %v3884_v29, %v1170_v42 }
 0x1ed   : > { %1556 = vst.msk [vmem:[%s3903_s8 + $0x24] sm:$0xf] %vm1546_vm0, %v2562_v0  ;;  %v1171_v54 = vmul.f32 %v3561_v8, %v1034_v43  ;;  %v1032_v55 = vmax.f32 %v816_v46, 0.0  ;;  %v936_v45 = vadd.f32 %v3965_v40, %v3855_v57  ;;  %v1238_v61 = vadd.f32 %v3884_v29, %v1168_v32  ;;  %v2756_v62 = vpop.f32.mrb[16].mxu0  ;;  %v4079_v2 = vpop.f32.mrb[16].mxu1 }
 0x1ee   : > { %2139 = vst.msk [vmem:[%s3903_s8 + $0x24] sm:$0xf] %vm2129_vm1, %v3945_v20  ;;  %v1268_v63 = vadd.f32 %v3884_v29, %v1198_v51  ;;  %v1196_v52 = vmul.f32 %v3561_v8, %v1059_v53  ;;  %v928_v59 = vadd.f32 %v3855_v57, %v3981_v56  ;;  %v2567_v3 = vpack.c.bf16 %v1240_v33, %v1240_v33  ;;  %v828_v5 = vpop.f32.mrb[17].mxu0  ;;  %v4084_v49 = vpop.f32.mrb[17].mxu1 }
 0x1ef   : > { %v4063_v58 = vpop.permute.xlu0 %1977  ;;  %v4065_v11 = vpop.permute.xlu1 %1971  ;;  %1584 = vst.msk [vmem:[%s3903_s8 + $0x94] sm:$0xf] %vm1546_vm0, %v2590_v48  ;;  %v1241_v40 = vadd.f32 %v3884_v29, %v1171_v54  ;;  %v1169_v20 = vmul.f32 %v3561_v8, %v1032_v55  ;;  %v837_v4 = vadd.f32 %v2756_v62, %v3855_v57  ;;  %v2565_v9 = vpack.c.bf16 %v1238_v61, %v1238_v61 }
 0x1f0   : > { %v829_v7 = vadd.f32 %v3855_v57, %v828_v5  ;;  %v2757_v10 = vpop.f32.mrb[18].mxu0  ;;  %v2595_v56 = vpack.c.bf16 %v1268_v63, %v1268_v63  ;;  %v1266_v47 = vadd.f32 %v3884_v29, %v1196_v52  ;;  %v4088_v13 = vpop.f32.mrb[18].mxu1  ;;  %1561 = vst.msk [vmem:[%s3903_s8 + $0x38] sm:$0xf] %vm1546_vm0, %v2567_v3  ;;  %v1062_v24 = vmax.f32 %v936_v45, 0.0 }
 0x1f1   : > { %v2568_v15 = vpack.c.bf16 %v1241_v40, %v1241_v40  ;;  %v1239_v16 = vadd.f32 %v3884_v29, %v1169_v20  ;;  %v1037_v50 = vmax.f32 %v837_v4, 0.0  ;;  %v840_v21 = vadd.f32 %v2757_v10, %v3855_v57  ;;  %2144 = vst.msk [vmem:[%s3903_s8 + $0x38] sm:$0xf] %vm2129_vm1, %v3970_v44  ;;  %v831_v22 = vpop.f32.mrb[19].mxu0  ;;  %v4105_v27 = vpop.f32.mrb[19].mxu1 }
 0x1f2   : > { %1559 = vst.msk [vmem:[%s3903_s8 + $0x30] sm:$0xf] %vm1546_vm0, %v2565_v9  ;;  %v1035_v12 = vmax.f32 %v829_v7, 0.0  ;;  %1589 = vst.msk [vmem:[%s3903_s8 + $0xa8] sm:$0xf] %vm1546_vm0, %v2595_v56  ;;  %v2593_v23 = vpack.c.bf16 %v1266_v47, %v1266_v47  ;;  %v1060_v26 = vmax.f32 %v928_v59, 0.0  ;;  %v832_v35 = vadd.f32 %v3855_v57, %v831_v22 }
 0x1f3   : > { %v4093_v17 = vpop.permute.xlu0 %1981  ;;  %v4095_v18 = vpop.permute.xlu1 %1975  ;;  %2142 = vst.msk [vmem:[%s3903_s8 + $0x30] sm:$0xf] %vm2129_vm1, %v3943_v19  ;;  %v2566_v28 = vpack.c.bf16 %v1239_v16, %v1239_v16  ;;  %v1174_v44 = vmul.f32 %v3561_v8, %v1037_v50  ;;  %v1038_v31 = vmax.f32 %v840_v21, 0.0  ;;  %v1199_v37 = vmul.f32 %v3561_v8, %v1062_v24 }
 0x1f4   : > { %1562 = vst.msk [vmem:[%s3903_s8 + $0x3c] sm:$0xf] %vm1546_vm0, %v2568_v15  ;;  %v1172_v36 = vmul.f32 %v3561_v8, %v1035_v12  ;;  %1587 = vst.msk [vmem:[%s3903_s8 + $0xa0] sm:$0xf] %vm1546_vm0, %v2593_v23  ;;  %v1197_v19 = vmul.f32 %v3561_v8, %v1060_v26  ;;  %v949_v38 = vadd.f32 %v4014_v14, %v3855_v57  ;;  %v1036_v42 = vmax.f32 %v832_v35, 0.0 }
 0x1f5   : > { %2145 = vst.msk [vmem:[%s3903_s8 + $0x3c] sm:$0xf] %vm2129_vm1, %v4032_v60  ;;  %v1244_v39 = vadd.f32 %v3884_v29, %v1174_v44  ;;  %v1175_v0 = vmul.f32 %v3561_v8, %v1038_v31  ;;  %v941_v46 = vadd.f32 %v3855_v57, %v4019_v34  ;;  %v2760_v14 = vpop.f32.mrb[20].mxu0  ;;  %v1269_v48 = vadd.f32 %v3884_v29, %v1199_v37  ;;  %v4140_v33 = vpop.f32.mrb[20].mxu1 }
 0x1f6   : > { %1560 = vst.msk [vmem:[%s3903_s8 + $0x34] sm:$0xf] %vm1546_vm0, %v2566_v28  ;;  %v1242_v32 = vadd.f32 %v3884_v29, %v1172_v36  ;;  %v1267_v51 = vadd.f32 %v3884_v29, %v1197_v19  ;;  %v1065_v53 = vmax.f32 %v949_v38, 0.0  ;;  %v1173_v45 = vmul.f32 %v3561_v8, %v1036_v42  ;;  %v4145_v61 = vpop.f32.mrb[21].mxu1 }
 0x1f7   : > { %v4128_v43 = vpop.permute.xlu0 %1985  ;;  %v4130_v60 = vpop.permute.xlu1 %1979  ;;  %2143 = vst.msk [vmem:[%s3903_s8 + $0x34] sm:$0xf] %vm2129_vm1, %v4006_v1  ;;  %v2571_v54 = vpack.c.bf16 %v1244_v39, %v1244_v39  ;;  %v1245_v55 = vadd.f32 %v3884_v29, %v1175_v0  ;;  %v853_v34 = vadd.f32 %v2760_v14, %v3855_v57  ;;  %v2596_v59 = vpack.c.bf16 %v1269_v48, %v1269_v48 }
 0x1f8   : > { %v844_v1 = vpop.f32.mrb[21].mxu0  ;;  %v2569_v62 = vpack.c.bf16 %v1242_v32, %v1242_v32  ;;  %v2594_v3 = vpack.c.bf16 %v1267_v51, %v1267_v51  ;;  %v4148_v40 = vpop.f32.mrb[22].mxu1  ;;  %v1243_v4 = vadd.f32 %v3884_v29, %v1173_v45  ;;  %v1202_v15 = vmul.f32 %v3561_v8, %v1065_v53 }
 0x1f9   : > { %v845_v63 = vadd.f32 %v3855_v57, %v844_v1  ;;  %v2761_v52 = vpop.f32.mrb[22].mxu0  ;;  %1565 = vst.msk [vmem:[%s3903_s8 + $0x48] sm:$0xf] %vm1546_vm0, %v2571_v54  ;;  %v2572_v20 = vpack.c.bf16 %v1245_v55, %v1245_v55  ;;  %v1041_v5 = vmax.f32 %v853_v34, 0.0  ;;  %1590 = vst.msk [vmem:[%s3903_s8 + $0xac] sm:$0xf] %vm1546_vm0, %v2596_v59  ;;  %v952_v50 = vadd.f32 %v4025_v25, %v3855_v57 }
 0x1fa   : > { %v856_v10 = vadd.f32 %v2761_v52, %v3855_v57  ;;  %2148 = vst.msk [vmem:[%s3903_s8 + $0x48] sm:$0xf] %vm2129_vm1, %v4030_v30  ;;  %v847_v47 = vpop.f32.mrb[23].mxu0  ;;  %v1063_v16 = vmax.f32 %v941_v46, 0.0  ;;  %v4170_v21 = vpop.f32.mrb[23].mxu1  ;;  %v2570_v30 = vpack.c.bf16 %v1243_v4, %v1243_v4  ;;  %v1272_v25 = vadd.f32 %v3884_v29, %v1202_v15 }
 0x1fb   : > { %v4153_v9 = vpop.permute.xlu0 %1989  ;;  %v4155_v7 = vpop.permute.xlu1 %1983  ;;  %1563 = vst.msk [vmem:[%s3903_s8 + $0x40] sm:$0xf] %vm1546_vm0, %v2569_v62  ;;  %v1039_v56 = vmax.f32 %v845_v63, 0.0  ;;  %1588 = vst.msk [vmem:[%s3903_s8 + $0xa4] sm:$0xf] %vm1546_vm0, %v2594_v3  ;;  %v1178_v12 = vmul.f32 %v3561_v8, %v1041_v5  ;;  %v848_v23 = vadd.f32 %v3855_v57, %v847_v47  ;;  %v1066_v28 = vmax.f32 %v952_v50, 0.0 }
 0x1fc   : > { %2146 = vst.msk [vmem:[%s3903_s8 + $0x40] sm:$0xf] %vm2129_vm1, %v4004_v6  ;;  %v1042_v22 = vmax.f32 %v856_v10, 0.0  ;;  %v1200_v26 = vmul.f32 %v3561_v8, %v1063_v16  ;;  %v2599_v38 = vpack.c.bf16 %v1272_v25, %v1272_v25 }
 0x1fd   : > { %1566 = vst.msk [vmem:[%s3903_s8 + $0x4c] sm:$0xf] %vm1546_vm0, %v2572_v20  ;;  %v1176_v24 = vmul.f32 %v3561_v8, %v1039_v56  ;;  %1564 = vst.msk [vmem:[%s3903_s8 + $0x44] sm:$0xf] %vm1546_vm0, %v2570_v30  ;;  %v1248_v6 = vadd.f32 %v3884_v29, %v1178_v12  ;;  %v1040_v31 = vmax.f32 %v848_v23, 0.0  ;;  %v2764_v19 = vpop.f32.mrb[24].mxu0  ;;  %v1203_v0 = vmul.f32 %v3561_v8, %v1066_v28 }
 0x1fe   : > { %2149 = vst.msk [vmem:[%s3903_s8 + $0x4c] sm:$0xf] %vm2129_vm1, %v4095_v18  ;;  %v1179_v44 = vmul.f32 %v3561_v8, %v1042_v22  ;;  %v944_v18 = vadd.f32 %v3855_v57, %v4045_v41  ;;  %2147 = vst.msk [vmem:[%s3903_s8 + $0x44] sm:$0xf] %vm2129_vm1, %v4065_v11  ;;  %v1270_v39 = vadd.f32 %v3884_v29, %v1200_v26  ;;  %v4201_v42 = vpop.f32.mrb[24].mxu1  ;;  %v860_v11 = vpop.f32.mrb[25].mxu0 }
 0x1ff   : > { %v4189_v35 = vpop.permute.xlu0 %1993  ;;  %v4191_v36 = vpop.permute.xlu1 %1987  ;;  %v1246_v37 = vadd.f32 %v3884_v29, %v1176_v24  ;;  %v2575_v46 = vpack.c.bf16 %v1248_v6, %v1248_v6  ;;  %v1177_v41 = vmul.f32 %v3561_v8, %v1040_v31  ;;  %v869_v14 = vadd.f32 %v2764_v19, %v3855_v57  ;;  %1593 = vst.msk [vmem:[%s3903_s8 + $0xb8] sm:$0xf] %vm1546_vm0, %v2599_v38 }
 0x200   : > { %v1249_v32 = vadd.f32 %v3884_v29, %v1179_v44  ;;  %v4206_v48 = vpop.f32.mrb[25].mxu1  ;;  %v861_v53 = vadd.f32 %v3855_v57, %v860_v11  ;;  %v2765_v54 = vpop.f32.mrb[26].mxu0  ;;  %v2597_v55 = vpack.c.bf16 %v1270_v39, %v1270_v39  ;;  %v1273_v45 = vadd.f32 %v3884_v29, %v1203_v0 }
 0x201   : > { %v2573_v51 = vpack.c.bf16 %v1246_v37, %v1246_v37  ;;  %v4212_v34 = vpop.f32.mrb[26].mxu1  ;;  %1569 = vst.msk [vmem:[%s3903_s8 + $0x58] sm:$0xf] %vm1546_vm0, %v2575_v46  ;;  %v1247_v62 = vadd.f32 %v3884_v29, %v1177_v41  ;;  %v1045_v63 = vmax.f32 %v869_v14, 0.0  ;;  %v872_v3 = vadd.f32 %v2765_v54, %v3855_v57  ;;  %v863_v4 = vpop.f32.mrb[27].mxu0 }
 0x202   : > { %v2576_v1 = vpack.c.bf16 %v1249_v32, %v1249_v32  ;;  %2152 = vst.msk [vmem:[%s3903_s8 + $0x58] sm:$0xf] %vm2129_vm1, %v4093_v17  ;;  %v1043_v20 = vmax.f32 %v861_v53, 0.0  ;;  %v2600_v5 = vpack.c.bf16 %v1273_v45, %v1273_v45  ;;  %v1064_v10 = vmax.f32 %v944_v18, 0.0  ;;  %v4231_v47 = vpop.f32.mrb[27].mxu1 }
 0x203   : > { %v4217_v52 = vpop.permute.xlu0 %1997  ;;  %v4219_v59 = vpop.permute.xlu1 %1991  ;;  %1567 = vst.msk [vmem:[%s3903_s8 + $0x50] sm:$0xf] %vm1546_vm0, %v2573_v51  ;;  %1591 = vst.msk [vmem:[%s3903_s8 + $0xb0] sm:$0xf] %vm1546_vm0, %v2597_v55  ;;  %v965_v56 = vadd.f32 %v4079_v2, %v3855_v57  ;;  %v2574_v17 = vpack.c.bf16 %v1247_v62, %v1247_v62  ;;  %v1182_v15 = vmul.f32 %v3561_v8, %v1045_v63  ;;  %v1046_v16 = vmax.f32 %v872_v3, 0.0 }
 0x204   : > { %2150 = vst.msk [vmem:[%s3903_s8 + $0x50] sm:$0xf] %vm2129_vm1, %v4063_v58  ;;  %v864_v50 = vadd.f32 %v3855_v57, %v863_v4  ;;  %v1180_v2 = vmul.f32 %v3561_v8, %v1043_v20  ;;  %v1201_v30 = vmul.f32 %v3561_v8, %v1064_v10  ;;  %v957_v12 = vadd.f32 %v3855_v57, %v4084_v49 }
 0x205   : > { %1570 = vst.msk [vmem:[%s3903_s8 + $0x5c] sm:$0xf] %vm1546_vm0, %v2576_v1  ;;  %1594 = vst.msk [vmem:[%s3903_s8 + $0xbc] sm:$0xf] %vm1546_vm0, %v2600_v5  ;;  %v1069_v58 = vmax.f32 %v965_v56, 0.0  ;;  %v1252_v22 = vadd.f32 %v3884_v29, %v1182_v15  ;;  %v1183_v23 = vmul.f32 %v3561_v8, %v1046_v16  ;;  %v2768_v49 = vpop.f32.mrb[28].mxu0 }
 0x206   : > { %2153 = vst.msk [vmem:[%s3903_s8 + $0x5c] sm:$0xf] %vm2129_vm1, %v4155_v7  ;;  %v1044_v24 = vmax.f32 %v864_v50, 0.0  ;;  %v968_v7 = vadd.f32 %v4088_v13, %v3855_v57  ;;  %v1250_v28 = vadd.f32 %v3884_v29, %v1180_v2  ;;  %v1271_v6 = vadd.f32 %v3884_v29, %v1201_v30  ;;  %v4265_v18 = vpop.f32.mrb[28].mxu1  ;;  %v876_v38 = vpop.f32.mrb[29].mxu0 }
 0x207   : > { %1568 = vst.msk [vmem:[%s3903_s8 + $0x54] sm:$0xf] %vm1546_vm0, %v2574_v17  ;;  %v2002_v25 = vpop.permute.xlu0 %2001  ;;  %v4253_v26 = vpop.permute.xlu1 %1995  ;;  %v1206_v44 = vmul.f32 %v3561_v8, %v1069_v58  ;;  %v1067_v31 = vmax.f32 %v957_v12, 0.0  ;;  %v2579_v37 = vpack.c.bf16 %v1252_v22, %v1252_v22  ;;  %v1253_v19 = vadd.f32 %v3884_v29, %v1183_v23 }
 0x208   : > { %2151 = vst.msk [vmem:[%s3903_s8 + $0x54] sm:$0xf] %vm2129_vm1, %v4130_v60  ;;  %2162 = vst.msk [vmem:[%s3903_s8 + $0x80] sm:$0xf] %vm2129_vm1, %v2002_v25  ;;  %v1181_v13 = vmul.f32 %v3561_v8, %v1044_v24  ;;  %v885_v60 = vadd.f32 %v2768_v49, %v3855_v57  ;;  %v4270_v39 = vpop.f32.mrb[29].mxu1  ;;  %v2577_v0 = vpack.c.bf16 %v1250_v28, %v1250_v28  ;;  %v2769_v32 = vpop.f32.mrb[30].mxu0 }
 0x209   : > { %v877_v46 = vadd.f32 %v3855_v57, %v876_v38  ;;  %v2598_v41 = vpack.c.bf16 %v1271_v6, %v1271_v6  ;;  %v1276_v14 = vadd.f32 %v3884_v29, %v1206_v44  ;;  %v4274_v11 = vpop.f32.mrb[30].mxu1  ;;  %1573 = vst.msk [vmem:[%s3903_s8 + $0x68] sm:$0xf] %vm1546_vm0, %v2579_v37  ;;  %v2580_v51 = vpack.c.bf16 %v1253_v19, %v1253_v19  ;;  %v879_v63 = vpop.f32.mrb[31].mxu0 }
 0x20a   : > { %v1251_v53 = vadd.f32 %v3884_v29, %v1181_v13  ;;  %v1049_v54 = vmax.f32 %v885_v60, 0.0  ;;  %v888_v1 = vadd.f32 %v2769_v32, %v3855_v57  ;;  %2156 = vst.msk [vmem:[%s3903_s8 + $0x68] sm:$0xf] %vm2129_vm1, %v4153_v9  ;;  %v1204_v20 = vmul.f32 %v3561_v8, %v1067_v31  ;;  %v4292_v5 = vpop.f32.mrb[31].mxu1 }
 0x20b   : > { %v2006_v55 = vpop.permute.xlu0 %2005  ;;  %v4279_v45 = vpop.permute.xlu1 %1999  ;;  %1571 = vst.msk [vmem:[%s3903_s8 + $0x60] sm:$0xf] %vm1546_vm0, %v2577_v0  ;;  %v1047_v62 = vmax.f32 %v877_v46, 0.0  ;;  %1592 = vst.msk [vmem:[%s3903_s8 + $0xb4] sm:$0xf] %vm1546_vm0, %v2598_v41  ;;  %v2603_v3 = vpack.c.bf16 %v1276_v14, %v1276_v14  ;;  %v1070_v4 = vmax.f32 %v968_v7, 0.0  ;;  %v880_v17 = vadd.f32 %v3855_v57, %v879_v63 }
 0x20c   : > { %2164 = vst.msk [vmem:[%s3903_s8 + $0x88] sm:$0xf] %vm2129_vm1, %v2006_v55  ;;  %2154 = vst.msk [vmem:[%s3903_s8 + $0x60] sm:$0xf] %vm2129_vm1, %v4128_v43  ;;  %v2578_v9 = vpack.c.bf16 %v1251_v53, %v1251_v53  ;;  %v1186_v10 = vmul.f32 %v3561_v8, %v1049_v54  ;;  %v1050_v56 = vmax.f32 %v888_v1, 0.0  ;;  %v1274_v43 = vadd.f32 %v3884_v29, %v1204_v20 }
 0x20d   : > { %1574 = vst.msk [vmem:[%s3903_s8 + $0x6c] sm:$0xf] %vm1546_vm0, %v2580_v51  ;;  %v1184_v15 = vmul.f32 %v3561_v8, %v1047_v62  ;;  %1597 = vst.msk [vmem:[%s3903_s8 + $0xc8] sm:$0xf] %vm1546_vm0, %v2603_v3  ;;  %v1207_v16 = vmul.f32 %v3561_v8, %v1070_v4  ;;  %v960_v50 = vadd.f32 %v3855_v57, %v4105_v27  ;;  %v1048_v58 = vmax.f32 %v880_v17, 0.0 }
 0x20e   : > { %2157 = vst.msk [vmem:[%s3903_s8 + $0x6c] sm:$0xf] %vm2129_vm1, %v4219_v59  ;;  %v1256_v2 = vadd.f32 %v3884_v29, %v1186_v10  ;;  %v1187_v30 = vmul.f32 %v3561_v8, %v1050_v56  ;;  %v981_v22 = vadd.f32 %v4140_v33, %v3855_v57  ;;  %v2601_v27 = vpack.c.bf16 %v1274_v43, %v1274_v43 }
 0x20f   : > { %1572 = vst.msk [vmem:[%s3903_s8 + $0x64] sm:$0xf] %vm1546_vm0, %v2578_v9  ;;  %v2010_v59 = vpop.permute.xlu0 %2009  ;;  %v2004_v12 = vpop.permute.xlu1 %2003  ;;  %v1254_v23 = vadd.f32 %v3884_v29, %v1184_v15  ;;  %v1277_v24 = vadd.f32 %v3884_v29, %v1207_v16  ;;  %v1068_v25 = vmax.f32 %v960_v50, 0.0  ;;  %v1185_v33 = vmul.f32 %v3561_v8, %v1048_v58 }
 0x210   : > { %2155 = vst.msk [vmem:[%s3903_s8 + $0x64] sm:$0xf] %vm2129_vm1, %v4191_v36  ;;  %2166 = vst.msk [vmem:[%s3903_s8 + $0x90] sm:$0xf] %vm2129_vm1, %v2010_v59  ;;  %v2583_v7 = vpack.c.bf16 %v1256_v2, %v1256_v2  ;;  %v1257_v28 = vadd.f32 %v3884_v29, %v1187_v30  ;;  %v1073_v36 = vmax.f32 %v981_v22, 0.0  ;;  %v973_v31 = vadd.f32 %v3855_v57, %v4145_v61 }
 0x211   : > { %2163 = vst.msk [vmem:[%s3903_s8 + $0x84] sm:$0xf] %vm2129_vm1, %v2004_v12  ;;  %v2581_v49 = vpack.c.bf16 %v1254_v23, %v1254_v23  ;;  %v2604_v6 = vpack.c.bf16 %v1277_v24, %v1277_v24  ;;  %v1205_v44 = vmul.f32 %v3561_v8, %v1068_v25  ;;  %v1255_v19 = vadd.f32 %v3884_v29, %v1185_v33  ;;  %v2947_v25 = vld [vmem:[#allocation8] ss:$0 sm:$0xff] }
 0x212   : > { %1595 = vst.msk [vmem:[%s3903_s8 + $0xc0] sm:$0xf] %vm1546_vm0, %v2601_v27  ;;  %1577 = vst.msk [vmem:[%s3903_s8 + $0x78] sm:$0xf] %vm1546_vm0, %v2583_v7  ;;  %v2584_v37 = vpack.c.bf16 %v1257_v28, %v1257_v28  ;;  %v1210_v38 = vmul.f32 %v3561_v8, %v1073_v36  ;;  %v984_v0 = vadd.f32 %v4148_v40, %v3855_v57  ;;  %v1071_v46 = vmax.f32 %v973_v31, 0.0 }
 0x213   : > { %v2014_v13 = vpop.permute.xlu0 %2013  ;;  %v2008_v60 = vpop.permute.xlu1 %2007  ;;  %2160 = vst.msk [vmem:[%s3903_s8 + $0x78] sm:$0xf] %vm2129_vm1, %v4217_v52  ;;  %v1275_v61 = vadd.f32 %v3884_v29, %v1205_v44  ;;  %v976_v32 = vadd.f32 %v3855_v57, %v4170_v21  ;;  %v997_v40 = vadd.f32 %v4201_v42, %v3855_v57  ;;  %v2582_v52 = vpack.c.bf16 %v1255_v19, %v1255_v19 }
 0x214   : > { %1575 = vst.msk [vmem:[%s3903_s8 + $0x70] sm:$0xf] %vm1546_vm0, %v2581_v49  ;;  %1598 = vst.msk [vmem:[%s3903_s8 + $0xcc] sm:$0xf] %vm1546_vm0, %v2604_v6  ;;  %v1280_v41 = vadd.f32 %v3884_v29, %v1210_v38  ;;  %v1074_v14 = vmax.f32 %v984_v0, 0.0  ;;  %v989_v51 = vadd.f32 %v3855_v57, %v4206_v48  ;;  %v1208_v42 = vmul.f32 %v3561_v8, %v1071_v46 }
 0x215   : > { %2168 = vst.msk [vmem:[%s3903_s8 + $0x98] sm:$0xf] %vm2129_vm1, %v2014_v13  ;;  %2165 = vst.msk [vmem:[%s3903_s8 + $0x8c] sm:$0xf] %vm2129_vm1, %v2008_v60  ;;  %v2602_v21 = vpack.c.bf16 %v1275_v61, %v1275_v61  ;;  %v1077_v53 = vmax.f32 %v997_v40, 0.0  ;;  %v1000_v48 = vadd.f32 %v4212_v34, %v3855_v57  ;;  %v992_v4 = vadd.f32 %v3855_v57, %v4231_v47 }
 0x216   : > { %2158 = vst.msk [vmem:[%s3903_s8 + $0x70] sm:$0xf] %vm2129_vm1, %v4189_v35  ;;  %v1072_v35 = vmax.f32 %v976_v32, 0.0  ;;  %v2607_v1 = vpack.c.bf16 %v1280_v41, %v1280_v41  ;;  %v1211_v62 = vmul.f32 %v3561_v8, %v1074_v14  ;;  %v1075_v63 = vmax.f32 %v989_v51, 0.0 }
 0x217   : > { %1578 = vst.msk [vmem:[%s3903_s8 + $0x7c] sm:$0xf] %vm1546_vm0, %v2584_v37  ;;  %1576 = vst.msk [vmem:[%s3903_s8 + $0x74] sm:$0xf] %vm1546_vm0, %v2582_v52  ;;  %v2018_v54 = vpop.permute.xlu0 %2017  ;;  %v2012_v55 = vpop.permute.xlu1 %2011  ;;  %v1214_v20 = vmul.f32 %v3561_v8, %v1077_v53  ;;  %v1078_v9 = vmax.f32 %v1000_v48, 0.0  ;;  %v1013_v10 = vadd.f32 %v4265_v18, %v3855_v57  ;;  %v1076_v47 = vmax.f32 %v992_v4, 0.0 }
 0x218   : > { %2161 = vst.msk [vmem:[%s3903_s8 + $0x7c] sm:$0xf] %vm2129_vm1, %v4279_v45  ;;  %2159 = vst.msk [vmem:[%s3903_s8 + $0x74] sm:$0xf] %vm2129_vm1, %v4253_v26  ;;  %v1278_v45 = vadd.f32 %v3884_v29, %v1208_v42  ;;  %v1209_v3 = vmul.f32 %v3561_v8, %v1072_v35  ;;  %v1281_v34 = vadd.f32 %v3884_v29, %v1211_v62 }
 0x219   : > { %2170 = vst.msk [vmem:[%s3903_s8 + $0xa0] sm:$0xf] %vm2129_vm1, %v2018_v54  ;;  %2167 = vst.msk [vmem:[%s3903_s8 + $0x94] sm:$0xf] %vm2129_vm1, %v2012_v55  ;;  %v1212_v26 = vmul.f32 %v3561_v8, %v1075_v63  ;;  %v1284_v15 = vadd.f32 %v3884_v29, %v1214_v20  ;;  %v1215_v30 = vmul.f32 %v3561_v8, %v1078_v9  ;;  %v1081_v58 = vmax.f32 %v1013_v10, 0.0 }
 0x21a   : > { %1596 = vst.msk [vmem:[%s3903_s8 + $0xc4] sm:$0xf] %vm1546_vm0, %v2602_v21  ;;  %1601 = vst.msk [vmem:[%s3903_s8 + $0xd8] sm:$0xf] %vm1546_vm0, %v2607_v1  ;;  %v2605_v56 = vpack.c.bf16 %v1278_v45, %v1278_v45  ;;  %v1279_v17 = vadd.f32 %v3884_v29, %v1209_v3  ;;  %v2608_v50 = vpack.c.bf16 %v1281_v34, %v1281_v34 }
 0x21b   : > { %v2022_v43 = vpop.permute.xlu0 %2021  ;;  %v2016_v16 = vpop.permute.xlu1 %2015  ;;  %v1282_v2 = vadd.f32 %v3884_v29, %v1212_v26  ;;  %v2611_v59 = vpack.c.bf16 %v1284_v15, %v1284_v15  ;;  %v1213_v12 = vmul.f32 %v3561_v8, %v1076_v47  ;;  %v1005_v22 = vadd.f32 %v3855_v57, %v4270_v39 }
 0x21c   : > { %2172 = vst.msk [vmem:[%s3903_s8 + $0xa8] sm:$0xf] %vm2129_vm1, %v2022_v43  ;;  %2169 = vst.msk [vmem:[%s3903_s8 + $0x9c] sm:$0xf] %vm2129_vm1, %v2016_v16  ;;  %v2606_v18 = vpack.c.bf16 %v1279_v17, %v1279_v17  ;;  %v1285_v27 = vadd.f32 %v3884_v29, %v1215_v30  ;;  %v1218_v24 = vmul.f32 %v3561_v8, %v1081_v58 }
 0x21d   : > { %1599 = vst.msk [vmem:[%s3903_s8 + $0xd0] sm:$0xf] %vm1546_vm0, %v2605_v56  ;;  %1602 = vst.msk [vmem:[%s3903_s8 + $0xdc] sm:$0xf] %vm1546_vm0, %v2608_v50  ;;  %v2609_v23 = vpack.c.bf16 %v1282_v2, %v1282_v2  ;;  %v1016_v7 = vadd.f32 %v2947_v25, %v4274_v11  ;;  %v1283_v28 = vadd.f32 %v3884_v29, %v1213_v12  ;;  %v1079_v57 = vmax.f32 %v1005_v22, 0.0 }
 0x21e   : > { %1600 = vst.msk [vmem:[%s3903_s8 + $0xd4] sm:$0xf] %vm1546_vm0, %v2606_v18  ;;  %1605 = vst.msk [vmem:[%s3903_s8 + $0xe8] sm:$0xf] %vm1546_vm0, %v2611_v59  ;;  %v1008_v39 = vadd.f32 %v2947_v25, %v4292_v5  ;;  %v2612_v49 = vpack.c.bf16 %v1285_v27, %v1285_v27  ;;  %v1288_v6 = vadd.f32 %v3884_v29, %v1218_v24 }
 0x21f   : > { %v2026_v33 = vpop.permute.xlu0 %2025  ;;  %v2020_v36 = vpop.permute.xlu1 %2019  ;;  %1603 = vst.msk [vmem:[%s3903_s8 + $0xe0] sm:$0xf] %vm1546_vm0, %v2609_v23  ;;  %v1082_v11 = vmax.f32 %v1016_v7, 0.0  ;;  %v2610_v44 = vpack.c.bf16 %v1283_v28, %v1283_v28  ;;  %v1216_v31 = vmul.f32 %v3561_v8, %v1079_v57 }
 0x220   : > { %2174 = vst.msk [vmem:[%s3903_s8 + $0xb0] sm:$0xf] %vm2129_vm1, %v2026_v33  ;;  %2171 = vst.msk [vmem:[%s3903_s8 + $0xa4] sm:$0xf] %vm2129_vm1, %v2020_v36  ;;  %v1080_v37 = vmax.f32 %v1008_v39, 0.0  ;;  %v2615_v5 = vpack.c.bf16 %v1288_v6, %v1288_v6 }
 0x221   : > { %1606 = vst.msk [vmem:[%s3903_s8 + $0xec] sm:$0xf] %vm1546_vm0, %v2612_v49  ;;  %v1219_v19 = vmul.f32 %v3561_v8, %v1082_v11  ;;  %1604 = vst.msk [vmem:[%s3903_s8 + $0xe4] sm:$0xf] %vm1546_vm0, %v2610_v44  ;;  %v1286_v13 = vadd.f32 %v3884_v29, %v1216_v31 }
 0x222   : > { %v1217_v60 = vmul.f32 %v3561_v8, %v1080_v37  ;;  %1609 = vst.msk [vmem:[%s3903_s8 + $0xf8] sm:$0xf] %vm1546_vm0, %v2615_v5 }
 0x223   : > { %v2030_v38 = vpop.permute.xlu0 %2029  ;;  %v2024_v0 = vpop.permute.xlu1 %2023  ;;  %v1289_v61 = vadd.f32 %v3884_v29, %v1219_v19  ;;  %v2613_v46 = vpack.c.bf16 %v1286_v13, %v1286_v13 }
 0x224   : > { %2176 = vst.msk [vmem:[%s3903_s8 + $0xb8] sm:$0xf] %vm2129_vm1, %v2030_v38  ;;  %2173 = vst.msk [vmem:[%s3903_s8 + $0xac] sm:$0xf] %vm2129_vm1, %v2024_v0  ;;  %v1287_v32 = vadd.f32 %v3884_v29, %v1217_v60 }
 0x225   : > { %v2616_v40 = vpack.c.bf16 %v1289_v61, %v1289_v61  ;;  %1607 = vst.msk [vmem:[%s3903_s8 + $0xf0] sm:$0xf] %vm1546_vm0, %v2613_v46 }
 0x226   : > { %v2614_v8 = vpack.c.bf16 %v1287_v32, %v1287_v32 }
 0x227   : > { %v2034_v52 = vpop.permute.xlu0 %2033  ;;  %v2028_v41 = vpop.permute.xlu1 %2027  ;;  %1610 = vst.msk [vmem:[%s3903_s8 + $0xfc] sm:$0xf] %vm1546_vm0, %v2616_v40 }
 0x228   : > { %2178 = vst.msk [vmem:[%s3903_s8 + $0xc0] sm:$0xf] %vm2129_vm1, %v2034_v52  ;;  %2175 = vst.msk [vmem:[%s3903_s8 + $0xb4] sm:$0xf] %vm2129_vm1, %v2028_v41 }
 0x229   : > { %1608 = vst.msk [vmem:[%s3903_s8 + $0xf4] sm:$0xf] %vm1546_vm0, %v2614_v8 }
 0x22b   : > { %v2038_v29 = vpop.permute.xlu0 %2037  ;;  %v2032_v14 = vpop.permute.xlu1 %2031 }
 0x22c   : > { %2180 = vst.msk [vmem:[%s3903_s8 + $0xc8] sm:$0xf] %vm2129_vm1, %v2038_v29  ;;  %2177 = vst.msk [vmem:[%s3903_s8 + $0xbc] sm:$0xf] %vm2129_vm1, %v2032_v14 }
 0x22f   : > { %v2042_v51 = vpop.permute.xlu0 %2041  ;;  %v2036_v21 = vpop.permute.xlu1 %2035 }
 0x230   : > { %2182 = vst.msk [vmem:[%s3903_s8 + $0xd0] sm:$0xf] %vm2129_vm1, %v2042_v51  ;;  %2179 = vst.msk [vmem:[%s3903_s8 + $0xc4] sm:$0xf] %vm2129_vm1, %v2036_v21 }
 0x233   : > { %v2046_v42 = vpop.permute.xlu0 %2045  ;;  %v2040_v35 = vpop.permute.xlu1 %2039 }
 0x234   : > { %2184 = vst.msk [vmem:[%s3903_s8 + $0xd8] sm:$0xf] %vm2129_vm1, %v2046_v42  ;;  %2181 = vst.msk [vmem:[%s3903_s8 + $0xcc] sm:$0xf] %vm2129_vm1, %v2040_v35 }
 0x237   : > { %v2050_v53 = vpop.permute.xlu0 %2049  ;;  %v2044_v54 = vpop.permute.xlu1 %2043 }
 0x238   : > { %2186 = vst.msk [vmem:[%s3903_s8 + $0xe0] sm:$0xf] %vm2129_vm1, %v2050_v53  ;;  %2183 = vst.msk [vmem:[%s3903_s8 + $0xd4] sm:$0xf] %vm2129_vm1, %v2044_v54 }
 0x23b   : > { %v2054_v55 = vpop.permute.xlu0 %2053  ;;  %v2048_v1 = vpop.permute.xlu1 %2047 }
 0x23c   : > { %2188 = vst.msk [vmem:[%s3903_s8 + $0xe8] sm:$0xf] %vm2129_vm1, %v2054_v55  ;;  %2185 = vst.msk [vmem:[%s3903_s8 + $0xdc] sm:$0xf] %vm2129_vm1, %v2048_v1 }
 0x23f   : > { %v2058_v62 = vpop.permute.xlu0 %2057  ;;  %v2052_v63 = vpop.permute.xlu1 %2051 }
 0x240   : > { %2190 = vst.msk [vmem:[%s3903_s8 + $0xf0] sm:$0xf] %vm2129_vm1, %v2058_v62  ;;  %2187 = vst.msk [vmem:[%s3903_s8 + $0xe4] sm:$0xf] %vm2129_vm1, %v2052_v63 }
 0x243   : > { %v2062_v48 = vpop.permute.xlu0 %2061  ;;  %v2056_v45 = vpop.permute.xlu1 %2055 }
 0x244   : > { %2192 = vst.msk [vmem:[%s3903_s8 + $0xf8] sm:$0xf] %vm2129_vm1, %v2062_v48  ;;  %2189 = vst.msk [vmem:[%s3903_s8 + $0xec] sm:$0xf] %vm2129_vm1, %v2056_v45 }
 0x247   : > { %v2060_v3 = vpop.permute.xlu1 %2059 }
 0x248   : > { %2191 = vst.msk [vmem:[%s3903_s8 + $0xf4] sm:$0xf] %vm2129_vm1, %v2060_v3 }
 0x24b   : > { %v2064_v20 = vpop.permute.xlu1 %2063 }
 0x24c   : > { %2193 = vst.msk [vmem:[%s3903_s8 + $0xfc] sm:$0xf] %vm2129_vm1, %v2064_v20 }
 0x24d   : > { %3137 = shalt.err (!%p3134_p8)
}
 0x24e   : > { %s3138_s0 = scalar_lea.hbm %s4484_s2, 4096  ;;  %s3142_s17 = scalar_lea.hbm %s4539_s6, 24576 }
 0x24f   : > { %p3139_p3 = scmp.ne.s32.totalorder %s4484_s2, %s3138_s0  ;;  %p3143_p7 = scmp.lt.u32.totalorder %s4484_s2, %s4539_s6 }
 0x250   : > { %p3144_p9 = scmp.lt.u32.totalorder %s3142_s17, %s3138_s0  ;;  %p3146_p0 = scmp.lt.u32.totalorder %s3138_s0, %s4484_s2 }
 0x251   : > { %p3140_p12 = pnand %p3139_p3, %p4595_p6 }
 0x252   : > { %p3145_p10 = por %p3144_p9, %p3143_p7 }
 0x253   : > { %p3141_p11 = pneg %p3140_p12 }
 0x254   : > { %p3147_p4 = por %p3146_p0, %p3145_p10 }
 0x256   : > { %p3148_p1 = pnand %p3147_p4, %p3141_p11 }
 0x258   : > { %3151 = shalt.err (!%p3148_p1)
}
 0x259   : > { %s3224_s27 = smov 4  }
 0x25a   : > { %2834 = dma.vmem_to_hbm [thread:$0]  (%p4595_p6), %s4486_s23, 4096, %s4484_s2, %s2195_s16, %s3222_s15, %s3222_s15, %s3224_s27  }
 0x25b PF: > { %s4596_s30 = sld [smem:[#allocation20_spill]]  ;;  %s4597_s11 = sld [smem:[#allocation24_spill]] }
 0x25c   : > { %p2865_p5 = scmp.ge.s32.totalorder %s3210_s24, 2 }
 0x261   : > { %s2223_s13 = sand.u32 1, %s4596_s30   ;;  %p4598_p13 = scmp.ne.s32.totalorder %s4597_s11, 0 }
 0x262   : > { %s2224_s21 = scalar_lea.sflag [#allocation4], %s2223_s13 }
 0x263   : > { %p2857_p2 = pnand %p2865_p5, %p4598_p13 }
 0x265   : > { %3193 = dma.done.wait (!%p2857_p2), %s2224_s21, 4096  }
 0x266   : > { %3195 = vsyncadd (!%p2857_p2), %s2224_s21, 4294963200  ;;  %s4599_s24 = sld [smem:[#allocation22_spill]]  ;;  %s4600_s9 = sld [smem:[#allocation21_spill]] }
 0x267   : > { %s4601_s23 = sld [smem:[#allocation23_spill]]  ;;  %s4602_s21 = smov %s3202_s22 }
 0x26c   : > { %p23_p8 = scmp.ge.s32.totalorder %s4599_s24, 8   ;;  %s4603_s22 = smov %s4600_s9 }
 0x26e   :  { %25 = sbr.rel (!%p23_p8) target bundleno = 12 (0xc), region = 132 }
 0x275   :  { %2229 = vsyncpa [#allocation3], 1 }
 0x276   :  { %2231 = vsyncpa [#allocation3 + $0x1], 1 }
 0x277   :  { %2232 = vsyncpa [#allocation6], 1 }
 0x278   :  { %2234 = vsyncpa [#allocation6 + $0x1], 1 }
 0x279   :  { %2235 = vsyncpa [#allocation9], 1 }
 0x27a   :  { %2236 = vsyncpa [#allocation4], 1 }
 0x27b   :  { %2238 = vsyncpa [#allocation4 + $0x1], 1 }

// kernel: ufe_forward.5
= control target key start
LH: loop header
LB: loop body
LE: loop exit
PB: predicated region body
PF: predicated region fallthrough
CT: control target
= control target key end

     0   :  { %8 = vsyncpa [#allocation3], 0  ;;  %s10797_s0 = inlined_call_operand.hbm [shape: bf16[384,3456], index: 0, kind: input, shape index: {}]   ;;  %s10798_s1 = inlined_call_operand.hbm [shape: bf16[3456,256], index: 1, kind: input, shape index: {}]   ;;  %s10799_s2 = inlined_call_operand.hbm [shape: f32[1,256], index: 2, kind: input, shape index: {}]   ;;  %s10800_s3 = inlined_call_operand.hbm [shape: bf16[384,256], index: 3, kind: output, shape index: {}]  }
   0x1   :  { %10 = vsyncpa [#allocation3 + $0x1], 0 }
   0x2   :  { %11 = vsyncpa [#allocation6], 0 }
   0x3   :  { %12 = vsyncpa [#allocation4], 0 }
   0x4   :  { %14 = vsyncpa [#allocation4 + $0x1], 0  ;;  %s10145_s12 = smov 0   ;;  %s10147_s13 = smov 0  }
   0x5   :  { %s10149_s14 = smov 0   ;;  %s10151_s15 = smov 0  }
   0x6 LB: > { %s10166_s16 = sadd.s32 4294967295, %s10112_s15   ;;  %s7257_s17 = sadd.s32 4294967294, %s10112_s15   ;;  %s10112_s15 = sphi %s10151_s15, %s10820_s15   ;;  %s10108_s14 = sphi %s10149_s14, %s10819_s14   ;;  %s10104_s13 = sphi %s10147_s13, %s10818_s13   ;;  %s10100_s12 = sphi %s10145_s12, %s10817_s12  }
   0x7   : > { %p40_p0 = scmp.ne.s32.totalorder %s10104_s13, %s10100_s12  ;;  %p10801_p1 = scmp.eq.s32.totalorder %s10166_s16, 0 }
   0x8   : > { %p112_p3 = scmp.eq.s32.totalorder %s7257_s17, 1  ;;  %p7258_p5 = scmp.ge.s32.totalorder %s10112_s15, 1 }
   0x9   : > { %p10175_p4 = por %p10801_p1, %p40_p0  ;;  %p119_p7 = scmp.lt.s32.totalorder %s10112_s15, 3 }
   0xa   : > { %p10180_p6 = por %p112_p3, %p40_p0  ;;  %s10114_s21 = smov [#allocation5]  }
   0xb   : > { %s10804_s18 = scalar_select %p10175_p4, 1, 0 }
   0xc   : > { %s10805_s19 = scalar_select %p10180_p6, 1, 0 }
   0xd   : > { %p10185_p8 = pnand %p7258_p5, %p119_p7  ;;  %s131_s22 = sshll.u32 %s10114_s21, 4  ;;  %s10189_s22 = int_to_ptr.vmem [resolvable:$true] %s131_s22 }
   0xe   : > { %s10115_s24 = smov [#allocation7]   ;;  %s9956_s28 = scalar_lea.hbm %s10798_s1, 55296 }
   0xf   : > { %p8765_p9 = pneg %p10185_p8  ;;  %s145_s25 = sshll.u32 %s10115_s24, 4  ;;  %s10200_s25 = int_to_ptr.vmem [resolvable:$true] %s145_s25 }
  0x10   : > { %p9957_p12 = scmp.ne.s32.totalorder %s10798_s1, %s9956_s28  ;;  %p9963_p5 = scmp.lt.u32.totalorder %s9956_s28, %s10798_s1 }
  0x11   : > { %p10196_p11 = pnand %p8765_p9, %p10801_p1 }
  0x13   : > { %p9958_p13 = pneg %p10196_p11 }
  0x15   : > { %p9959_p0 = pnand %p9958_p13, %p9957_p12 }
  0x17   : > { %p9960_p3 = pneg %p9959_p0 }
  0x19   : > { %p9965_p7 = pnand %p9963_p5, %p9960_p3 }
  0x1b   : > { %9968 = shalt.err (!%p9965_p7)
}
  0x1c   : > { %s9969_s6 = scalar_lea.vmem %s10189_s22, 55296  ;;  %p9977_p2 = scmp.lt.s32.totalorder %s10189_s22, %s10189_s22 }
  0x1d   : > { %p9970_p9 = scmp.ne.s32.totalorder %s10189_s22, %s9969_s6  ;;  %p9978_p12 = scmp.lt.s32.totalorder %s9969_s6, %s9969_s6 }
  0x1f   : > { %p9972_p10 = pnand %p9970_p9, %p9958_p13  ;;  %p9979_p0 = por %p9978_p12, %p9977_p2 }
  0x21   : > { %p9973_p1 = pneg %p9972_p10 }
  0x23   : > { %p9980_p6 = pnand %p9979_p0, %p9973_p1 }
  0x25   : > { %9983 = shalt.err (!%p9980_p6)
}
  0x26   : > { %s10116_s7 = smov 128   ;;  %s10117_s8 = smov 8  }
  0x27   : > { %8768 = dma.hbm_to_vmem [thread:$0]  (!%p10196_p11), %s10798_s1, 55296, %s10189_s22, [#allocation6], %s10116_s7, %s10116_s7, %s10117_s8  }
  0x28   : > { %s9984_s21 = scalar_lea.hbm %s10799_s2, 32 }
  0x29   : > { %p9985_p2 = scmp.ne.s32.totalorder %s10799_s2, %s9984_s21  ;;  %p9991_p10 = scmp.lt.u32.totalorder %s9984_s21, %s10799_s2 }
  0x2b   : > { %p9987_p1 = pnand %p9985_p2, %p9958_p13 }
  0x2d   : > { %p9988_p6 = pneg %p9987_p1 }
  0x2f   : > { %p9993_p3 = pnand %p9991_p10, %p9988_p6 }
  0x31   : > { %9996 = shalt.err (!%p9993_p3)
}
  0x32   : > { %s9997_s22 = scalar_lea.vmem %s10200_s25, 32  ;;  %p10005_p12 = scmp.lt.s32.totalorder %s10200_s25, %s10200_s25 }
  0x33   : > { %p9998_p5 = scmp.ne.s32.totalorder %s10200_s25, %s9997_s22  ;;  %p10006_p0 = scmp.lt.s32.totalorder %s9997_s22, %s9997_s22 }
  0x35   : > { %p10000_p7 = pnand %p9998_p5, %p9958_p13  ;;  %p10007_p2 = por %p10006_p0, %p10005_p12 }
  0x37   : > { %p10001_p9 = pneg %p10000_p7 }
  0x39   : > { %p10008_p1 = pnand %p10007_p2, %p10001_p9 }
  0x3b   : > { %10011 = shalt.err (!%p10008_p1)
}
  0x3c   : > { %8771 = dma.hbm_to_vmem [thread:$0]  (!%p10196_p11), %s10799_s2, 32, %s10200_s25, [#allocation6]  }
  0x3d   : > { %s10255_s4 = sadd.s32 1, %s10112_s15   ;;  %s27_s5 = sadd.s32 1, %s10108_s14 }
  0x3e   : > { %s24_s23 = ssub.s32 %s10112_s15, %s10255_s4  ;;  %p34_p6 = scmp.ne.s32.totalorder %s10108_s14, %s10104_s13 }
  0x3f   : > { %p25_p13 = scmp.eq.s32.totalorder %s24_s23, 0  ;;  %p35_p10 = scmp.eq.s32.totalorder %s10112_s15, 0 }
  0x40   : > { %p8782_p3 = scmp.lt.s32.totalorder %s10112_s15, 2  ;;  %p10808_p7 = scmp.eq.s32.totalorder %s10166_s16, 1 }
  0x41   : > { %s10265_s6 = scalar_select %p25_p13, %s10108_s14, %s27_s5  }
  0x42   : > { %p36_p5 = por %p35_p10, %p34_p6  ;;  %p10269_p9 = por %p10808_p7, %p34_p6 }
  0x43   : > { %s156_s8 = sand.u32 1, %s10108_s14   ;;  %s8783_s9 = smul.u32 41472, %s10112_s15 }
  0x44   : > { %s10809_s7 = scalar_select %p10269_p9, 1, 0 }
  0x45   : > { %s8749_s25 = smul.u32 2592, %s156_s8  ;;  %s10278_s17 = scalar_lea.hbm %s10797_s0, %s8783_s9 }
  0x46   : > { %p10280_p11 = pnand %p8782_p3, %p36_p5  ;;  %s10286_s27 = scalar_lea.sflag [#allocation3], %s156_s8 }
  0x47   : > { %s160_s24 = scalar_lea.vmem [#allocation2], %s8749_s25  ;;  %s10012_s28 = scalar_lea.hbm %s10278_s17, 41472 }
  0x48   : > { %s168_s26 = sshll.u32 %s160_s24, 4  ;;  %p10013_p12 = scmp.ne.s32.totalorder %s10278_s17, %s10012_s28  ;;  %s10284_s26 = int_to_ptr.vmem [resolvable:$true] %s168_s26 }
  0x49   : > { %p10014_p0 = pneg %p10280_p11  ;;  %s10017_s30 = scalar_lea.hbm %s10797_s0, 82944 }
  0x4a   : > { %p10018_p13 = scmp.lt.u32.totalorder %s10278_s17, %s10797_s0  ;;  %p10019_p6 = scmp.lt.u32.totalorder %s10017_s30, %s10012_s28 }
  0x4b   : > { %p10015_p2 = pnand %p10014_p0, %p10013_p12  ;;  %p10021_p3 = scmp.lt.u32.totalorder %s10012_s28, %s10278_s17 }
  0x4c   : > { %p10020_p10 = por %p10019_p6, %p10018_p13 }
  0x4d   : > { %p10016_p1 = pneg %p10015_p2 }
  0x4e   : > { %p10022_p5 = por %p10021_p3, %p10020_p10 }
  0x50   : > { %p10023_p7 = pnand %p10022_p5, %p10016_p1 }
  0x52   : > { %10026 = shalt.err (!%p10023_p7)
}
  0x53   : > { %s10027_s8 = scalar_lea.vmem %s10284_s26, 41472  ;;  %s10118_s9 = smov [#allocation2]  }
  0x54   : > { %p10028_p12 = scmp.ne.s32.totalorder %s10284_s26, %s10027_s8  ;;  %s10032_s25 = sshll.u32 %s10118_s9, 4  ;;  %s10033_s25 = int_to_ptr.vmem [resolvable:$false] %s10032_s25 }
  0x55   : > { %s10034_s10 = scalar_lea.vmem %s10033_s25, 82944  ;;  %p10035_p4 = scmp.lt.s32.totalorder %s10284_s26, %s10033_s25 }
  0x56   : > { %p10030_p2 = pnand %p10028_p12, %p10014_p0  ;;  %p10036_p13 = scmp.lt.s32.totalorder %s10034_s10, %s10027_s8 }
  0x58   : > { %p10031_p9 = pneg %p10030_p2  ;;  %p10037_p6 = por %p10036_p13, %p10035_p4 }
  0x5a   : > { %p10038_p10 = pnand %p10037_p6, %p10031_p9 }
  0x5c   : > { %10041 = shalt.err (!%p10038_p10)
}
  0x5d   : > { %s10119_s11 = smov 1728   ;;  %s10120_s24 = smov 108  }
  0x5e   : > { %8775 = dma.hbm_to_vmem [thread:$0]  (!%p10280_p11), %s10278_s17, 41472, %s10284_s26, %s10286_s27, %s10119_s11, %s10119_s11, %s10120_s24  }
  0x5f   : > { %180 = sbr.rel (%p10185_p8) target bundleno = 1073 (0x431), region = 32  ;;  %s10317_s28 = sand.u32 (!%p10185_p8), 1, %s10104_s13  }
  0x60   : > { %s8751_s22 = smul.u32 (!%p10185_p8), 2592, %s10317_s28  ;;  %s183_s29 = scalar_lea.sflag (!%p10185_p8), [#allocation3], %s10317_s28 }
  0x61   : > { %p10811_p4 = scmp.ne.s32.totalorder (!%p10185_p8), %s10804_s18, 0 }
  0x62   : > { %s10321_s30 = scalar_lea.vmem (!%p10185_p8), [#allocation2], %s8751_s22 }
  0x66   : > { %10087 = dma.done.wait (%p10811_p4), %s183_s29, 41472  }
  0x67   : > { %10089 = vsyncadd (%p10811_p4), %s183_s29, 4294925824  ;;  %p10812_p9 = scmp.eq.s32.totalorder %s10166_s16, 0 }
  0x69   : > { %10091 = dma.done.wait (%p10812_p9), [#allocation6], 55328   ;;  %p10813_p8 = pmov %p10812_p9 }
  0x6a   : > { %v8828_v0 = vld [vmem:[#allocation5 + $0x4] ss:$8 sps:$4 sm:$0xff]   ;;  %v8832_v2 = vld [vmem:[#allocation5] ss:$8 sps:$4 sm:$0xff]   ;;  %v8834_v4 = vld [vmem:[#allocation5 + $0x14] ss:$8 sps:$4 sm:$0xff]  }
  0x6b   : > { %10093 = vsyncadd (%p10813_p8), [#allocation6], 4294911968  ;;  %v8830_v1 = vld [vmem:[#allocation5 + $0x704] ss:$8 sps:$4 sm:$0xff]   ;;  %4792 = vmatprep.subr.bf16.mxu1 %v8828_v0  ;;  %v8833_v3 = vld [vmem:[#allocation5 + $0x700] ss:$8 sps:$4 sm:$0xff]  }
  0x6c   : > { %5863 = vmatprep.subr.bf16.mxu0 %v8830_v1  ;;  %4793 = vmatpush1.bf16.msra.mxu1 %v8832_v2  ;;  %v8836_v5 = vld [vmem:[#allocation5 + $0x714] ss:$8 sps:$4 sm:$0xff]   ;;  %v8838_v6 = vld [vmem:[#allocation5 + $0x10] ss:$8 sps:$4 sm:$0xff]   ;;  %v8840_v8 = vld [vmem:[#allocation5 + $0x24] ss:$8 sps:$4 sm:$0xff]  }
  0x6d   : > { %5864 = vmatpush1.bf16.msra.mxu0 %v8833_v3  ;;  %4794 = vmatprep.subr.bf16.mxu1 %v8834_v4  ;;  %v8839_v7 = vld [vmem:[#allocation5 + $0x710] ss:$8 sps:$4 sm:$0xff]   ;;  %v8842_v9 = vld [vmem:[#allocation5 + $0x724] ss:$8 sps:$4 sm:$0xff]   ;;  %v8844_v10 = vld [vmem:[#allocation5 + $0x20] ss:$8 sps:$4 sm:$0xff]  }
  0x6e   : > { %5865 = vmatprep.subr.bf16.mxu0 %v8836_v5  ;;  %v8845_v11 = vld [vmem:[#allocation5 + $0x720] ss:$8 sps:$4 sm:$0xff]   ;;  %v8846_v12 = vld [vmem:[#allocation5 + $0x34] ss:$8 sps:$4 sm:$0xff]   ;;  %v8850_v14 = vld [vmem:[#allocation5 + $0x30] ss:$8 sps:$4 sm:$0xff]  }
  0x6f   : > { %v8848_v13 = vld [vmem:[#allocation5 + $0x734] ss:$8 sps:$4 sm:$0xff]   ;;  %v8851_v15 = vld [vmem:[#allocation5 + $0x730] ss:$8 sps:$4 sm:$0xff]   ;;  %v8852_v16 = vld [vmem:[#allocation5 + $0x44] ss:$8 sps:$4 sm:$0xff]  }
  0x70   : > { %4795 = vmatpush1.bf16.msra.mxu1 %v8838_v6  ;;  %v8854_v17 = vld [vmem:[#allocation5 + $0x744] ss:$8 sps:$4 sm:$0xff]   ;;  %v8856_v18 = vld [vmem:[#allocation5 + $0x40] ss:$8 sps:$4 sm:$0xff]   ;;  %v8858_v20 = vld [vmem:[#allocation5 + $0x54] ss:$8 sps:$4 sm:$0xff]  }
  0x71   : > { %5866 = vmatpush1.bf16.msra.mxu0 %v8839_v7  ;;  %4796 = vmatprep.subr.bf16.mxu1 %v8840_v8  ;;  %v8857_v19 = vld [vmem:[#allocation5 + $0x740] ss:$8 sps:$4 sm:$0xff]   ;;  %v8860_v21 = vld [vmem:[#allocation5 + $0x754] ss:$8 sps:$4 sm:$0xff]   ;;  %v8862_v22 = vld [vmem:[#allocation5 + $0x50] ss:$8 sps:$4 sm:$0xff]  }
  0x72   : > { %5867 = vmatprep.subr.bf16.mxu0 %v8842_v9  ;;  %v8863_v23 = vld [vmem:[#allocation5 + $0x750] ss:$8 sps:$4 sm:$0xff]   ;;  %v8864_v24 = vld [vmem:[#allocation5 + $0x64] ss:$8 sps:$4 sm:$0xff]   ;;  %v8868_v26 = vld [vmem:[#allocation5 + $0x60] ss:$8 sps:$4 sm:$0xff]  }
  0x73   : > { %v8866_v25 = vld [vmem:[#allocation5 + $0x764] ss:$8 sps:$4 sm:$0xff]   ;;  %v8869_v27 = vld [vmem:[#allocation5 + $0x760] ss:$8 sps:$4 sm:$0xff]   ;;  %v8870_v28 = vld [vmem:[#allocation5 + $0x74] ss:$8 sps:$4 sm:$0xff]  }
  0x74   : > { %4797 = vmatpush1.bf16.msra.mxu1 %v8844_v10  ;;  %v8872_v29 = vld [vmem:[#allocation5 + $0x774] ss:$8 sps:$4 sm:$0xff]   ;;  %v8874_v30 = vld [vmem:[#allocation5 + $0x70] ss:$8 sps:$4 sm:$0xff]   ;;  %v8876_v32 = vld [vmem:[#allocation5 + $0x84] ss:$8 sps:$4 sm:$0xff]  }
  0x75   : > { %5868 = vmatpush1.bf16.msra.mxu0 %v8845_v11  ;;  %4798 = vmatprep.subr.bf16.mxu1 %v8846_v12  ;;  %v8875_v31 = vld [vmem:[#allocation5 + $0x770] ss:$8 sps:$4 sm:$0xff]   ;;  %v8878_v33 = vld [vmem:[#allocation5 + $0x784] ss:$8 sps:$4 sm:$0xff]   ;;  %v8880_v34 = vld [vmem:[#allocation5 + $0x80] ss:$8 sps:$4 sm:$0xff]  }
  0x76   : > { %5869 = vmatprep.subr.bf16.mxu0 %v8848_v13  ;;  %v8881_v35 = vld [vmem:[#allocation5 + $0x780] ss:$8 sps:$4 sm:$0xff]   ;;  %v8882_v36 = vld [vmem:[#allocation5 + $0x94] ss:$8 sps:$4 sm:$0xff]   ;;  %v8886_v38 = vld [vmem:[#allocation5 + $0x90] ss:$8 sps:$4 sm:$0xff]  }
  0x77   : > { %v8884_v37 = vld [vmem:[#allocation5 + $0x794] ss:$8 sps:$4 sm:$0xff]   ;;  %v8887_v39 = vld [vmem:[#allocation5 + $0x790] ss:$8 sps:$4 sm:$0xff]   ;;  %v8888_v40 = vld [vmem:[#allocation5 + $0xa4] ss:$8 sps:$4 sm:$0xff]  }
  0x78   : > { %4799 = vmatpush1.bf16.msra.mxu1 %v8850_v14  ;;  %v8890_v41 = vld [vmem:[#allocation5 + $0x7a4] ss:$8 sps:$4 sm:$0xff]   ;;  %v8892_v42 = vld [vmem:[#allocation5 + $0xa0] ss:$8 sps:$4 sm:$0xff]   ;;  %v8894_v44 = vld [vmem:[#allocation5 + $0xb4] ss:$8 sps:$4 sm:$0xff]  }
  0x79   : > { %5870 = vmatpush1.bf16.msra.mxu0 %v8851_v15  ;;  %4800 = vmatprep.subr.bf16.mxu1 %v8852_v16  ;;  %v8893_v43 = vld [vmem:[#allocation5 + $0x7a0] ss:$8 sps:$4 sm:$0xff]   ;;  %v8896_v45 = vld [vmem:[#allocation5 + $0x7b4] ss:$8 sps:$4 sm:$0xff]   ;;  %v8898_v46 = vld [vmem:[#allocation5 + $0xb0] ss:$8 sps:$4 sm:$0xff]  }
  0x7a   : > { %5871 = vmatprep.subr.bf16.mxu0 %v8854_v17  ;;  %v8899_v47 = vld [vmem:[#allocation5 + $0x7b0] ss:$8 sps:$4 sm:$0xff]   ;;  %v8900_v48 = vld [vmem:[#allocation5 + $0xc4] ss:$8 sps:$4 sm:$0xff]   ;;  %v8929_v51 = vld [vmem:[%s10321_s30 + $0x3c] ss:$108 sps:$4 sm:$0xff]  }
  0x7b   : > { %v8926_v49 = vld [vmem:[%s10321_s30 + $0x4] ss:$108 sps:$4 sm:$0xff]   ;;  %v8904_v52 = vld [vmem:[#allocation5 + $0xc0] ss:$8 sps:$4 sm:$0xff]   ;;  %5895 = vmatprep.mubr.bf16.mxu0 %v8929_v51  ;;  %v8906_v54 = vld [vmem:[#allocation5 + $0xd4] ss:$8 sps:$4 sm:$0xff]  }
  0x7c   : > { %4801 = vmatpush1.bf16.msra.mxu1 %v8856_v18  ;;  %v8902_v50 = vld [vmem:[#allocation5 + $0x7c4] ss:$8 sps:$4 sm:$0xff]   ;;  %4824 = vmatprep.mubr.bf16.mxu1 %v8926_v49  ;;  %v8905_v53 = vld [vmem:[#allocation5 + $0x7c0] ss:$8 sps:$4 sm:$0xff]   ;;  %v8908_v55 = vld [vmem:[#allocation5 + $0x7d4] ss:$8 sps:$4 sm:$0xff]  }
  0x7d   : > { %5872 = vmatpush1.bf16.msra.mxu0 %v8857_v19  ;;  %4802 = vmatprep.subr.bf16.mxu1 %v8858_v20  ;;  %v8910_v56 = vld [vmem:[#allocation5 + $0xd0] ss:$8 sps:$4 sm:$0xff]   ;;  %v8912_v58 = vld [vmem:[#allocation5 + $0xe4] ss:$8 sps:$4 sm:$0xff]   ;;  %v8916_v60 = vld [vmem:[#allocation5 + $0xe0] ss:$8 sps:$4 sm:$0xff]  }
  0x7e   : > { %5873 = vmatprep.subr.bf16.mxu0 %v8860_v21  ;;  %v8911_v57 = vld [vmem:[#allocation5 + $0x7d0] ss:$8 sps:$4 sm:$0xff]   ;;  %v8914_v59 = vld [vmem:[#allocation5 + $0x7e4] ss:$8 sps:$4 sm:$0xff]   ;;  %v8917_v61 = vld [vmem:[#allocation5 + $0x7e0] ss:$8 sps:$4 sm:$0xff]  }
  0x7f   : > { %v8918_v62 = vld [vmem:[#allocation5 + $0xf4] ss:$8 sps:$4 sm:$0xff]   ;;  %v8922_v0 = vld [vmem:[#allocation5 + $0xf0] ss:$8 sps:$4 sm:$0xff]   ;;  %v8932_v2 = vld [vmem:[#allocation5 + $0x104] ss:$8 sps:$4 sm:$0xff]  }
  0x80   : > { %4803 = vmatpush1.bf16.msra.mxu1 %v8862_v22  ;;  %v8920_v63 = vld [vmem:[#allocation5 + $0x7f4] ss:$8 sps:$4 sm:$0xff]   ;;  %v8923_v1 = vld [vmem:[#allocation5 + $0x7f0] ss:$8 sps:$4 sm:$0xff]   ;;  %v8935_v3 = vld [vmem:[#allocation5 + $0x804] ss:$8 sps:$4 sm:$0xff]  }
  0x81   : > { %5874 = vmatpush1.bf16.msra.mxu0 %v8863_v23  ;;  %4804 = vmatprep.subr.bf16.mxu1 %v8864_v24  ;;  %v8924_v4 = vld [vmem:[%s10321_s30] ss:$108 sps:$4 sm:$0xff]   ;;  %v8927_v5 = vld [vmem:[%s10321_s30 + $0x38] ss:$108 sps:$4 sm:$0xff]   ;;  %v8938_v8 = vld [vmem:[#allocation5 + $0x114] ss:$8 sps:$4 sm:$0xff]  }
  0x82   : > { %5875 = vmatprep.subr.bf16.mxu0 %v8866_v25  ;;  %v8930_v6 = vld [vmem:[#allocation5 + $0x100] ss:$8 sps:$4 sm:$0xff]   ;;  %v8947_v11 = vld [vmem:[#allocation5 + $0x814] ss:$8 sps:$4 sm:$0xff]   ;;  %v8936_v12 = vld [vmem:[#allocation5 + $0x110] ss:$8 sps:$4 sm:$0xff]  }
  0x83   : > { %v8933_v7 = vld [vmem:[#allocation5 + $0x800] ss:$8 sps:$4 sm:$0xff]   ;;  %v8945_v13 = vld [vmem:[#allocation5 + $0x810] ss:$8 sps:$4 sm:$0xff]   ;;  %v8950_v14 = vld [vmem:[#allocation5 + $0x124] ss:$8 sps:$4 sm:$0xff]  }
  0x84   : > { %4805 = vmatpush1.bf16.msra.mxu1 %v8868_v26  ;;  %v8939_v9 = vld [vmem:[%s10321_s30 + $0xdc] ss:$108 sps:$4 sm:$0xff]   ;;  %v8941_v10 = vld [vmem:[%s10321_s30 + $0x114] ss:$108 sps:$4 sm:$0xff]   ;;  %v8953_v15 = vld [vmem:[#allocation5 + $0x824] ss:$8 sps:$4 sm:$0xff]  }
  0x85   : > { %5876 = vmatpush1.bf16.msra.mxu0 %v8869_v27  ;;  %4806 = vmatprep.subr.bf16.mxu1 %v8870_v28  ;;  %v8943_v16 = vld [vmem:[%s10321_s30 + $0xd8] ss:$108 sps:$4 sm:$0xff]   ;;  %v8944_v17 = vld [vmem:[%s10321_s30 + $0x110] ss:$108 sps:$4 sm:$0xff]   ;;  %v8948_v18 = vld [vmem:[#allocation5 + $0x120] ss:$8 sps:$4 sm:$0xff]  }
  0x86   : > { %5877 = vmatprep.subr.bf16.mxu0 %v8872_v29  ;;  %v8951_v19 = vld [vmem:[#allocation5 + $0x820] ss:$8 sps:$4 sm:$0xff]   ;;  %v8956_v21 = vld [vmem:[%s10321_s30 + $0x1ec] ss:$108 sps:$4 sm:$0xff]   ;;  %v8962_v22 = vld [vmem:[#allocation5 + $0x134] ss:$8 sps:$4 sm:$0xff]  }
  0x87   : > { %v8954_v20 = vld [vmem:[%s10321_s30 + $0x1b4] ss:$108 sps:$4 sm:$0xff]   ;;  %v8960_v24 = vld [vmem:[#allocation5 + $0x130] ss:$8 sps:$4 sm:$0xff]   ;;  %v8973_v28 = vld [vmem:[#allocation5 + $0x144] ss:$8 sps:$4 sm:$0xff]  }
  0x88   : > { %4807 = vmatpush1.bf16.msra.mxu1 %v8874_v30  ;;  %v8965_v23 = vld [vmem:[#allocation5 + $0x834] ss:$8 sps:$4 sm:$0xff]   ;;  %v8963_v25 = vld [vmem:[#allocation5 + $0x830] ss:$8 sps:$4 sm:$0xff]   ;;  %v8977_v30 = vld [vmem:[#allocation5 + $0x844] ss:$8 sps:$4 sm:$0xff]  }
  0x89   : > { %5878 = vmatpush1.bf16.msra.mxu0 %v8875_v31  ;;  %4808 = vmatprep.subr.bf16.mxu1 %v8876_v32  ;;  %v8958_v26 = vld [vmem:[%s10321_s30 + $0x1b0] ss:$108 sps:$4 sm:$0xff]   ;;  %v8959_v27 = vld [vmem:[%s10321_s30 + $0x1e8] ss:$108 sps:$4 sm:$0xff]   ;;  %v8966_v29 = vld [vmem:[%s10321_s30 + $0x28c] ss:$108 sps:$4 sm:$0xff]  }
  0x8a   : > { %5879 = vmatprep.subr.bf16.mxu0 %v8878_v33  ;;  %v8968_v31 = vld [vmem:[%s10321_s30 + $0x2c4] ss:$108 sps:$4 sm:$0xff]   ;;  %v8971_v32 = vld [vmem:[#allocation5 + $0x140] ss:$8 sps:$4 sm:$0xff]   ;;  %s8752_s18 = smul.u32 192, %s10317_s28  ;;  %p10814_p0 = scmp.ne.s32.totalorder %s10809_s7, 0 }
  0x8b   : > { %v8975_v33 = vld [vmem:[#allocation5 + $0x840] ss:$8 sps:$4 sm:$0xff]   ;;  %v9005_v49 = vld [vmem:[#allocation5 + $0x870] ss:$8 sps:$4 sm:$0xff]   ;;  %v9015_v51 = vld [vmem:[#allocation5 + $0x184] ss:$8 sps:$4 sm:$0xff]  }
  0x8c   : > { %4809 = vmatpush1.bf16.msra.mxu1 %v8880_v34  ;;  %v8980_v34 = vld [vmem:[#allocation5 + $0x154] ss:$8 sps:$4 sm:$0xff]   ;;  %s10677_s20 = scalar_lea.vmem [#allocation8], %s8752_s18  ;;  %s8076_s17 = smul.u32 3072, %s10166_s16 }
  0x8d   : > { %5880 = vmatpush1.bf16.msra.mxu0 %v8881_v35  ;;  %4810 = vmatprep.subr.bf16.mxu1 %v8882_v36  ;;  %v8989_v35 = vld [vmem:[#allocation5 + $0x854] ss:$8 sps:$4 sm:$0xff]   ;;  %v8978_v36 = vld [vmem:[#allocation5 + $0x150] ss:$8 sps:$4 sm:$0xff]   ;;  %s7165_s21 = sshll.u32 %s10677_s20, 4  ;;  %s7151_s16 = scalar_lea.sflag [#allocation4], %s10317_s28  ;;  %s10751_s21 = int_to_ptr.vmem [resolvable:$true] %s7165_s21 }
  0x8e   : > { %5881 = vmatprep.subr.bf16.mxu0 %v8884_v37  ;;  %v8970_v37 = vld [vmem:[%s10321_s30 + $0x288] ss:$108 sps:$4 sm:$0xff]   ;;  %s10749_s23 = scalar_lea.hbm %s10800_s3, %s8076_s17  ;;  %s10042_s5 = scalar_lea.vmem %s10751_s21, 3072 }
  0x8f   : > { %p10043_p11 = scmp.ne.s32.totalorder %s10751_s21, %s10042_s5  ;;  %s10122_s8 = smov [#allocation8]  }
  0x90   : > { %4811 = vmatpush1.bf16.msra.mxu1 %v8886_v38  ;;  %v8974_v38 = vld [vmem:[%s10321_s30 + $0x2c0] ss:$108 sps:$4 sm:$0xff]   ;;  %s10046_s9 = sshll.u32 %s10122_s8, 4  ;;  %s10047_s9 = int_to_ptr.vmem [resolvable:$false] %s10046_s9 }
  0x91   : > { %5882 = vmatpush1.bf16.msra.mxu0 %v8887_v39  ;;  %4812 = vmatprep.subr.bf16.mxu1 %v8888_v40  ;;  %v8987_v39 = vld [vmem:[#allocation5 + $0x850] ss:$8 sps:$4 sm:$0xff]   ;;  %v8992_v40 = vld [vmem:[#allocation5 + $0x164] ss:$8 sps:$4 sm:$0xff]   ;;  %p10044_p1 = pnand %p10043_p11, %p10814_p0  ;;  %s10048_s25 = scalar_lea.vmem %s10047_s9, 6144 }
  0x92   : > { %5883 = vmatprep.subr.bf16.mxu0 %v8890_v41  ;;  %v8995_v41 = vld [vmem:[#allocation5 + $0x864] ss:$8 sps:$4 sm:$0xff]   ;;  %p10049_p5 = scmp.lt.s32.totalorder %s10751_s21, %s10047_s9  ;;  %p10050_p7 = scmp.lt.s32.totalorder %s10048_s25, %s10042_s5 }
  0x93   : > { %p10045_p3 = pneg %p10044_p1 }
  0x94   : > { %4813 = vmatpush1.bf16.msra.mxu1 %v8892_v42  ;;  %v8981_v42 = vld [vmem:[%s10321_s30 + $0x364] ss:$108 sps:$4 sm:$0xff]   ;;  %p10051_p12 = por %p10050_p7, %p10049_p5 }
  0x95   : > { %5884 = vmatpush1.bf16.msra.mxu0 %v8893_v43  ;;  %4814 = vmatprep.subr.bf16.mxu1 %v8894_v44  ;;  %v8983_v43 = vld [vmem:[%s10321_s30 + $0x39c] ss:$108 sps:$4 sm:$0xff]  }
  0x96   : > { %5885 = vmatprep.subr.bf16.mxu0 %v8896_v45  ;;  %v8990_v44 = vld [vmem:[#allocation5 + $0x160] ss:$8 sps:$4 sm:$0xff]   ;;  %p10052_p2 = pnand %p10051_p12, %p10045_p3 }
  0x97   : > { %v8993_v45 = vld [vmem:[#allocation5 + $0x860] ss:$8 sps:$4 sm:$0xff]  }
  0x98   : > { %4815 = vmatpush1.bf16.msra.mxu1 %v8898_v46  ;;  %v9004_v46 = vld [vmem:[#allocation5 + $0x174] ss:$8 sps:$4 sm:$0xff]  }
  0x99   : > { %5886 = vmatpush1.bf16.msra.mxu0 %v8899_v47  ;;  %4816 = vmatprep.subr.bf16.mxu1 %v8900_v48  ;;  %v9007_v47 = vld [vmem:[#allocation5 + $0x874] ss:$8 sps:$4 sm:$0xff]   ;;  %v9002_v48 = vld [vmem:[#allocation5 + $0x170] ss:$8 sps:$4 sm:$0xff]  }
  0x9a   : > { %5887 = vmatprep.subr.bf16.mxu0 %v8902_v50  ;;  %v8985_v50 = vld [vmem:[%s10321_s30 + $0x360] ss:$108 sps:$4 sm:$0xff]  }
  0x9c   : > { %4817 = vmatpush1.bf16.msra.mxu1 %v8904_v52  ;;  %v9019_v52 = vld [vmem:[#allocation5 + $0x884] ss:$8 sps:$4 sm:$0xff]  }
  0x9d   : > { %5888 = vmatpush1.bf16.msra.mxu0 %v8905_v53  ;;  %4818 = vmatprep.subr.bf16.mxu1 %v8906_v54  ;;  %v8986_v53 = vld [vmem:[%s10321_s30 + $0x398] ss:$108 sps:$4 sm:$0xff]   ;;  %v8996_v54 = vld [vmem:[%s10321_s30 + $0x43c] ss:$108 sps:$4 sm:$0xff]  }
  0x9e   : > { %5889 = vmatprep.subr.bf16.mxu0 %v8908_v55  ;;  %v8998_v55 = vld [vmem:[%s10321_s30 + $0x474] ss:$108 sps:$4 sm:$0xff]  }
  0xa0   : > { %4819 = vmatpush1.bf16.msra.mxu1 %v8910_v56  ;;  %v9013_v56 = vld [vmem:[#allocation5 + $0x180] ss:$8 sps:$4 sm:$0xff]  }
  0xa1   : > { %5890 = vmatpush1.bf16.msra.mxu0 %v8911_v57  ;;  %4820 = vmatprep.subr.bf16.mxu1 %v8912_v58  ;;  %v9017_v57 = vld [vmem:[#allocation5 + $0x880] ss:$8 sps:$4 sm:$0xff]   ;;  %v9022_v58 = vld [vmem:[#allocation5 + $0x194] ss:$8 sps:$4 sm:$0xff]  }
  0xa2   : > { %5891 = vmatprep.subr.bf16.mxu0 %v8914_v59  ;;  %v9031_v59 = vld [vmem:[#allocation5 + $0x894] ss:$8 sps:$4 sm:$0xff]  }
  0xa4   : > { %4821 = vmatpush1.bf16.msra.mxu1 %v8916_v60  ;;  %v9020_v60 = vld [vmem:[#allocation5 + $0x190] ss:$8 sps:$4 sm:$0xff]  }
  0xa5   : > { %5892 = vmatpush1.bf16.msra.mxu0 %v8917_v61  ;;  %4822 = vmatprep.subr.bf16.mxu1 %v8918_v62  ;;  %v9000_v61 = vld [vmem:[%s10321_s30 + $0x438] ss:$108 sps:$4 sm:$0xff]   ;;  %v9001_v62 = vld [vmem:[%s10321_s30 + $0x470] ss:$108 sps:$4 sm:$0xff]  }
  0xa6   : > { %5893 = vmatprep.subr.bf16.mxu0 %v8920_v63  ;;  %v9029_v63 = vld [vmem:[#allocation5 + $0x890] ss:$8 sps:$4 sm:$0xff]  }
  0xa8   : > { %4823 = vmatpush1.bf16.msra.mxu1 %v8922_v0  ;;  %v9008_v0 = vld [vmem:[%s10321_s30 + $0x514] ss:$108 sps:$4 sm:$0xff]  }
  0xa9   : > { %5894 = vmatpush1.bf16.msra.mxu0 %v8923_v1  ;;  %4945 = vmatprep.subr.bf16.mxu1 %v8932_v2  ;;  %v9034_v1 = vld [vmem:[#allocation5 + $0x1a4] ss:$8 sps:$4 sm:$0xff]  }
  0xaa   : > { %6016 = vmatprep.subr.bf16.mxu0 %v8935_v3  ;;  %v9037_v2 = vld [vmem:[#allocation5 + $0x8a4] ss:$8 sps:$4 sm:$0xff]  }
  0xab   : > { %4825 = vmatmul.mubr.bf16.vlgmr.msra.gmra.mrb[0].mxu1 %v8924_v4  ;;  %v9010_v3 = vld [vmem:[%s10321_s30 + $0x54c] ss:$108 sps:$4 sm:$0xff]   ;;  %v9032_v4 = vld [vmem:[#allocation5 + $0x1a0] ss:$8 sps:$4 sm:$0xff]  }
  0xac   : > { %5896 = vmatmul.mubr.bf16.vlgmr.msra.gmra.mrb[0].mxu0 %v8927_v5  ;;  %4946 = vmatpush1.bf16.msra.mxu1 %v8930_v6  ;;  %v9035_v5 = vld [vmem:[#allocation5 + $0x8a0] ss:$8 sps:$4 sm:$0xff]   ;;  %v9046_v6 = vld [vmem:[#allocation5 + $0x1b4] ss:$8 sps:$4 sm:$0xff]  }
  0xad   : > { %6017 = vmatpush1.bf16.msra.mxu0 %v8933_v7  ;;  %4947 = vmatprep.subr.bf16.mxu1 %v8938_v8  ;;  %v9049_v7 = vld [vmem:[#allocation5 + $0x8b4] ss:$8 sps:$4 sm:$0xff]   ;;  %v9044_v8 = vld [vmem:[#allocation5 + $0x1b0] ss:$8 sps:$4 sm:$0xff]  }
  0xae   : > { %4834 = vmatprep.mubr.bf16.mxu1 %v8939_v9  ;;  %5905 = vmatprep.mubr.bf16.mxu0 %v8941_v10  ;;  %v9012_v9 = vld [vmem:[%s10321_s30 + $0x510] ss:$108 sps:$4 sm:$0xff]   ;;  %v9016_v10 = vld [vmem:[%s10321_s30 + $0x548] ss:$108 sps:$4 sm:$0xff]  }
  0xaf   : > { %6018 = vmatprep.subr.bf16.mxu0 %v8947_v11  ;;  %v9047_v11 = vld [vmem:[#allocation5 + $0x8b0] ss:$8 sps:$4 sm:$0xff]  }
  0xb0   : > { %4948 = vmatpush1.bf16.msra.mxu1 %v8936_v12  ;;  %v9057_v12 = vld [vmem:[#allocation5 + $0x1c4] ss:$8 sps:$4 sm:$0xff]  }
  0xb1   : > { %6019 = vmatpush1.bf16.msra.mxu0 %v8945_v13  ;;  %4949 = vmatprep.subr.bf16.mxu1 %v8950_v14  ;;  %v9061_v13 = vld [vmem:[#allocation5 + $0x8c4] ss:$8 sps:$4 sm:$0xff]  }
  0xb2   : > { %6020 = vmatprep.subr.bf16.mxu0 %v8953_v15  ;;  %v9023_v14 = vld [vmem:[%s10321_s30 + $0x5ec] ss:$108 sps:$4 sm:$0xff]   ;;  %v9025_v15 = vld [vmem:[%s10321_s30 + $0x624] ss:$108 sps:$4 sm:$0xff]  }
  0xb3   : > { %4835 = vmatmul.mubr.bf16.gmra.mrb[4].mxu1 %v8943_v16  ;;  %v9055_v16 = vld [vmem:[#allocation5 + $0x1c0] ss:$8 sps:$4 sm:$0xff]  }
  0xb4   : > { %5906 = vmatmul.mubr.bf16.gmra.mrb[4].mxu0 %v8944_v17  ;;  %4950 = vmatpush1.bf16.msra.mxu1 %v8948_v18  ;;  %v9059_v17 = vld [vmem:[#allocation5 + $0x8c0] ss:$8 sps:$4 sm:$0xff]   ;;  %v9064_v18 = vld [vmem:[#allocation5 + $0x1d4] ss:$8 sps:$4 sm:$0xff]  }
  0xb5   : > { %4844 = vmatprep.mubr.bf16.mxu1 %v8954_v20  ;;  %5915 = vmatprep.mubr.bf16.mxu0 %v8956_v21  ;;  %v9062_v20 = vld [vmem:[#allocation5 + $0x1d0] ss:$8 sps:$4 sm:$0xff]   ;;  %v9027_v21 = vld [vmem:[%s10321_s30 + $0x5e8] ss:$108 sps:$4 sm:$0xff]  }
  0xb6   : > { %6021 = vmatpush1.bf16.msra.mxu0 %v8951_v19  ;;  %4951 = vmatprep.subr.bf16.mxu1 %v8962_v22  ;;  %v9073_v19 = vld [vmem:[#allocation5 + $0x8d4] ss:$8 sps:$4 sm:$0xff]   ;;  %v9028_v22 = vld [vmem:[%s10321_s30 + $0x620] ss:$108 sps:$4 sm:$0xff]  }
  0xb7   : > { %6022 = vmatprep.subr.bf16.mxu0 %v8965_v23  ;;  %v9071_v23 = vld [vmem:[#allocation5 + $0x8d0] ss:$8 sps:$4 sm:$0xff]  }
  0xb8   : > { %4952 = vmatpush1.bf16.msra.mxu1 %v8960_v24  ;;  %v9076_v24 = vld [vmem:[#allocation5 + $0x1e4] ss:$8 sps:$4 sm:$0xff]  }
  0xb9   : > { %4953 = vmatprep.subr.bf16.mxu1 %v8973_v28  ;;  %v9074_v28 = vld [vmem:[#allocation5 + $0x1e0] ss:$8 sps:$4 sm:$0xff]  }
  0xba   : > { %6023 = vmatpush1.bf16.msra.mxu0 %v8963_v25  ;;  %v9079_v25 = vld [vmem:[#allocation5 + $0x8e4] ss:$8 sps:$4 sm:$0xff]  }
  0xbb   : > { %6024 = vmatprep.subr.bf16.mxu0 %v8977_v30  ;;  %4845 = vmatmul.mubr.bf16.gmra.mrb[8].mxu1 %v8958_v26  ;;  %v9038_v26 = vld [vmem:[%s10321_s30 + $0x6c4] ss:$108 sps:$4 sm:$0xff]   ;;  %v9088_v30 = vld [vmem:[#allocation5 + $0x1f4] ss:$8 sps:$4 sm:$0xff]  }
  0xbc   : > { %5916 = vmatmul.mubr.bf16.gmra.mrb[8].mxu0 %v8959_v27  ;;  %4854 = vmatprep.mubr.bf16.mxu1 %v8966_v29  ;;  %v9040_v27 = vld [vmem:[%s10321_s30 + $0x6fc] ss:$108 sps:$4 sm:$0xff]  }
  0xbd   : > { %5925 = vmatprep.mubr.bf16.mxu0 %v8968_v31  ;;  %4954 = vmatpush1.bf16.msra.mxu1 %v8971_v32  ;;  %v9077_v29 = vld [vmem:[#allocation5 + $0x8e0] ss:$8 sps:$4 sm:$0xff]   ;;  %v9091_v31 = vld [vmem:[#allocation5 + $0x8f4] ss:$8 sps:$4 sm:$0xff]   ;;  %v9086_v32 = vld [vmem:[#allocation5 + $0x1f0] ss:$8 sps:$4 sm:$0xff]  }
  0xbe   : > { %6025 = vmatpush1.bf16.msra.mxu0 %v8975_v33  ;;  %4955 = vmatprep.subr.bf16.mxu1 %v8980_v34  ;;  %v9042_v33 = vld [vmem:[%s10321_s30 + $0x6c0] ss:$108 sps:$4 sm:$0xff]   ;;  %v9089_v34 = vld [vmem:[#allocation5 + $0x8f0] ss:$8 sps:$4 sm:$0xff]  }
  0xbf   : > { %6026 = vmatprep.subr.bf16.mxu0 %v8989_v35  ;;  %v9100_v35 = vld [vmem:[#allocation5 + $0x204] ss:$8 sps:$4 sm:$0xff]  }
  0xc1   : > { %4956 = vmatpush1.bf16.msra.mxu1 %v8978_v36  ;;  %v9103_v36 = vld [vmem:[#allocation5 + $0x904] ss:$8 sps:$4 sm:$0xff]  }
  0xc2   : > { %6027 = vmatpush1.bf16.msra.mxu0 %v8987_v39  ;;  %4957 = vmatprep.subr.bf16.mxu1 %v8992_v40  ;;  %v9052_v39 = vld [vmem:[%s10321_s30 + $0x7d4] ss:$108 sps:$4 sm:$0xff]   ;;  %v9054_v40 = vld [vmem:[%s10321_s30 + $0x798] ss:$108 sps:$4 sm:$0xff]  }
  0xc3   : > { %6028 = vmatprep.subr.bf16.mxu0 %v8995_v41  ;;  %4855 = vmatmul.mubr.bf16.gmra.mrb[12].mxu1 %v8970_v37  ;;  %v9043_v37 = vld [vmem:[%s10321_s30 + $0x6f8] ss:$108 sps:$4 sm:$0xff]   ;;  %v9058_v41 = vld [vmem:[%s10321_s30 + $0x7d0] ss:$108 sps:$4 sm:$0xff]  }
  0xc4   : > { %5926 = vmatmul.mubr.bf16.gmra.mrb[12].mxu0 %v8974_v38  ;;  %4864 = vmatprep.mubr.bf16.mxu1 %v8981_v42  ;;  %v9050_v38 = vld [vmem:[%s10321_s30 + $0x79c] ss:$108 sps:$4 sm:$0xff]   ;;  %v9065_v42 = vld [vmem:[%s10321_s30 + $0x874] ss:$108 sps:$4 sm:$0xff]  }
  0xc5   : > { %5935 = vmatprep.mubr.bf16.mxu0 %v8983_v43  ;;  %4958 = vmatpush1.bf16.msra.mxu1 %v8990_v44  ;;  %v9067_v43 = vld [vmem:[%s10321_s30 + $0x8ac] ss:$108 sps:$4 sm:$0xff]   ;;  %v9069_v44 = vld [vmem:[%s10321_s30 + $0x870] ss:$108 sps:$4 sm:$0xff]  }
  0xc6   : > { %6029 = vmatpush1.bf16.msra.mxu0 %v8993_v45  ;;  %4959 = vmatprep.subr.bf16.mxu1 %v9004_v46  ;;  %v9070_v45 = vld [vmem:[%s10321_s30 + $0x8a8] ss:$108 sps:$4 sm:$0xff]   ;;  %v9080_v46 = vld [vmem:[%s10321_s30 + $0x94c] ss:$108 sps:$4 sm:$0xff]  }
  0xc7   : > { %6030 = vmatprep.subr.bf16.mxu0 %v9007_v47  ;;  %v9082_v47 = vld [vmem:[%s10321_s30 + $0x984] ss:$108 sps:$4 sm:$0xff]  }
  0xc9   : > { %4960 = vmatpush1.bf16.msra.mxu1 %v9002_v48  ;;  %v9084_v48 = vld [vmem:[%s10321_s30 + $0x948] ss:$108 sps:$4 sm:$0xff]  }
  0xca   : > { %6031 = vmatpush1.bf16.msra.mxu0 %v9005_v49  ;;  %4961 = vmatprep.subr.bf16.mxu1 %v9015_v51  ;;  %v9085_v49 = vld [vmem:[%s10321_s30 + $0x980] ss:$108 sps:$4 sm:$0xff]   ;;  %v9097_v51 = vld [vmem:[%s10321_s30 + $0x44] ss:$108 sps:$4 sm:$0xff]  }
  0xcb   : > { %6032 = vmatprep.subr.bf16.mxu0 %v9019_v52  ;;  %4865 = vmatmul.mubr.bf16.gmra.mrb[16].mxu1 %v8985_v50  ;;  %v9094_v50 = vld [vmem:[%s10321_s30 + $0xc] ss:$108 sps:$4 sm:$0xff]   ;;  %v9092_v52 = vld [vmem:[%s10321_s30 + $0x8] ss:$108 sps:$4 sm:$0xff]  }
  0xcc   : > { %5936 = vmatmul.mubr.bf16.gmra.mrb[16].mxu0 %v8986_v53  ;;  %4874 = vmatprep.mubr.bf16.mxu1 %v8996_v54  ;;  %v9095_v53 = vld [vmem:[%s10321_s30 + $0x40] ss:$108 sps:$4 sm:$0xff]  }
  0xcd   : > { %5945 = vmatprep.mubr.bf16.mxu0 %v8998_v55  ;;  %4962 = vmatpush1.bf16.msra.mxu1 %v9013_v56  ;;  %v9098_v54 = vld [vmem:[#allocation5 + $0x200] ss:$8 sps:$4 sm:$0xff]   ;;  %v9106_v56 = vld [vmem:[#allocation5 + $0x214] ss:$8 sps:$4 sm:$0xff]  }
  0xce   : > { %6033 = vmatpush1.bf16.msra.mxu0 %v9017_v57  ;;  %4963 = vmatprep.subr.bf16.mxu1 %v9022_v58  ;;  %v9101_v55 = vld [vmem:[#allocation5 + $0x900] ss:$8 sps:$4 sm:$0xff]   ;;  %v9107_v57 = vld [vmem:[%s10321_s30 + $0xe4] ss:$108 sps:$4 sm:$0xff]  }
  0xcf   : > { %6034 = vmatprep.subr.bf16.mxu0 %v9031_v59  ;;  %v9109_v58 = vld [vmem:[%s10321_s30 + $0x11c] ss:$108 sps:$4 sm:$0xff]  }
  0xd0   : > { %v9115_v59 = vld [vmem:[#allocation5 + $0x914] ss:$8 sps:$4 sm:$0xff]  }
  0xd1   : > { %4964 = vmatpush1.bf16.msra.mxu1 %v9020_v60  ;;  %v9104_v60 = vld [vmem:[#allocation5 + $0x210] ss:$8 sps:$4 sm:$0xff]  }
  0xd2   : > { %6035 = vmatpush1.bf16.msra.mxu0 %v9029_v63  ;;  %4965 = vmatprep.subr.bf16.mxu1 %v9034_v1  ;;  %v9121_v63 = vld [vmem:[#allocation5 + $0x924] ss:$8 sps:$4 sm:$0xff]  }
  0xd3   : > { %6036 = vmatprep.subr.bf16.mxu0 %v9037_v2  ;;  %4875 = vmatmul.mubr.bf16.gmra.mrb[20].mxu1 %v9000_v61  ;;  %v9113_v61 = vld [vmem:[#allocation5 + $0x910] ss:$8 sps:$4 sm:$0xff]   ;;  %v9116_v2 = vld [vmem:[#allocation5 + $0x220] ss:$8 sps:$4 sm:$0xff]  }
  0xd4   : > { %5946 = vmatmul.mubr.bf16.gmra.mrb[20].mxu0 %v9001_v62  ;;  %4884 = vmatprep.mubr.bf16.mxu1 %v9008_v0  ;;  %v9118_v62 = vld [vmem:[#allocation5 + $0x224] ss:$8 sps:$4 sm:$0xff]  }
  0xd5   : > { %5955 = vmatprep.mubr.bf16.mxu0 %v9010_v3  ;;  %4966 = vmatpush1.bf16.msra.mxu1 %v9032_v4  ;;  %v9111_v0 = vld [vmem:[%s10321_s30 + $0xe0] ss:$108 sps:$4 sm:$0xff]   ;;  %v9112_v1 = vld [vmem:[%s10321_s30 + $0x118] ss:$108 sps:$4 sm:$0xff]   ;;  %v9122_v4 = vld [vmem:[%s10321_s30 + $0x1bc] ss:$108 sps:$4 sm:$0xff]  }
  0xd6   : > { %6037 = vmatpush1.bf16.msra.mxu0 %v9035_v5  ;;  %4967 = vmatprep.subr.bf16.mxu1 %v9046_v6  ;;  %v9119_v3 = vld [vmem:[#allocation5 + $0x920] ss:$8 sps:$4 sm:$0xff]   ;;  %v9130_v6 = vld [vmem:[#allocation5 + $0x234] ss:$8 sps:$4 sm:$0xff]  }
  0xd7   : > { %6038 = vmatprep.subr.bf16.mxu0 %v9049_v7  ;;  %v9124_v5 = vld [vmem:[%s10321_s30 + $0x1f4] ss:$108 sps:$4 sm:$0xff]  }
  0xd8   : > { %v9133_v7 = vld [vmem:[#allocation5 + $0x934] ss:$8 sps:$4 sm:$0xff]  }
  0xd9   : > { %4968 = vmatpush1.bf16.msra.mxu1 %v9044_v8  ;;  %v9128_v8 = vld [vmem:[#allocation5 + $0x230] ss:$8 sps:$4 sm:$0xff]  }
  0xda   : > { %6039 = vmatpush1.bf16.msra.mxu0 %v9047_v11  ;;  %4969 = vmatprep.subr.bf16.mxu1 %v9057_v12  ;;  %v9141_v11 = vld [vmem:[#allocation5 + $0x244] ss:$8 sps:$4 sm:$0xff]  }
  0xdb   : > { %6040 = vmatprep.subr.bf16.mxu0 %v9061_v13  ;;  %4885 = vmatmul.mubr.bf16.gmra.mrb[24].mxu1 %v9012_v9  ;;  %v9131_v9 = vld [vmem:[#allocation5 + $0x930] ss:$8 sps:$4 sm:$0xff]   ;;  %v9145_v12 = vld [vmem:[#allocation5 + $0x944] ss:$8 sps:$4 sm:$0xff]  }
  0xdc   : > { %5956 = vmatmul.mubr.bf16.gmra.mrb[24].mxu0 %v9016_v10  ;;  %4894 = vmatprep.mubr.bf16.mxu1 %v9023_v14  ;;  %v9126_v10 = vld [vmem:[%s10321_s30 + $0x1b8] ss:$108 sps:$4 sm:$0xff]   ;;  %v9127_v13 = vld [vmem:[%s10321_s30 + $0x1f0] ss:$108 sps:$4 sm:$0xff]   ;;  %v9134_v14 = vld [vmem:[%s10321_s30 + $0x294] ss:$108 sps:$4 sm:$0xff]  }
  0xdd   : > { %5965 = vmatprep.mubr.bf16.mxu0 %v9025_v15  ;;  %4970 = vmatpush1.bf16.msra.mxu1 %v9055_v16  ;;  %v9136_v15 = vld [vmem:[%s10321_s30 + $0x2cc] ss:$108 sps:$4 sm:$0xff]   ;;  %v9139_v16 = vld [vmem:[#allocation5 + $0x240] ss:$8 sps:$4 sm:$0xff]  }
  0xde   : > { %6041 = vmatpush1.bf16.msra.mxu0 %v9059_v17  ;;  %4971 = vmatprep.subr.bf16.mxu1 %v9064_v18  ;;  %v9143_v17 = vld [vmem:[#allocation5 + $0x940] ss:$8 sps:$4 sm:$0xff]   ;;  %v9148_v18 = vld [vmem:[#allocation5 + $0x254] ss:$8 sps:$4 sm:$0xff]  }
  0xdf   : > { %6042 = vmatprep.subr.bf16.mxu0 %v9073_v19  ;;  %v9157_v19 = vld [vmem:[#allocation5 + $0x954] ss:$8 sps:$4 sm:$0xff]  }
  0xe1   : > { %4972 = vmatpush1.bf16.msra.mxu1 %v9062_v20  ;;  %v9146_v20 = vld [vmem:[#allocation5 + $0x250] ss:$8 sps:$4 sm:$0xff]  }
  0xe2   : > { %6043 = vmatpush1.bf16.msra.mxu0 %v9071_v23  ;;  %4973 = vmatprep.subr.bf16.mxu1 %v9076_v24  ;;  %v9155_v23 = vld [vmem:[#allocation5 + $0x950] ss:$8 sps:$4 sm:$0xff]   ;;  %v9160_v24 = vld [vmem:[#allocation5 + $0x264] ss:$8 sps:$4 sm:$0xff]  }
  0xe3   : > { %6044 = vmatprep.subr.bf16.mxu0 %v9079_v25  ;;  %4895 = vmatmul.mubr.bf16.gmra.mrb[28].mxu1 %v9027_v21  ;;  %v9138_v21 = vld [vmem:[%s10321_s30 + $0x290] ss:$108 sps:$4 sm:$0xff]   ;;  %v9163_v25 = vld [vmem:[#allocation5 + $0x964] ss:$8 sps:$4 sm:$0xff]  }
  0xe4   : > { %5966 = vmatmul.mubr.bf16.gmra.mrb[28].mxu0 %v9028_v22  ;;  %4904 = vmatprep.mubr.bf16.mxu1 %v9038_v26  ;;  %v9142_v22 = vld [vmem:[%s10321_s30 + $0x2c8] ss:$108 sps:$4 sm:$0xff]   ;;  %v9149_v26 = vld [vmem:[%s10321_s30 + $0x36c] ss:$108 sps:$4 sm:$0xff]  }
  0xe5   : > { %5975 = vmatprep.mubr.bf16.mxu0 %v9040_v27  ;;  %4974 = vmatpush1.bf16.msra.mxu1 %v9074_v28  ;;  %v9151_v27 = vld [vmem:[%s10321_s30 + $0x3a4] ss:$108 sps:$4 sm:$0xff]   ;;  %v9158_v28 = vld [vmem:[#allocation5 + $0x260] ss:$8 sps:$4 sm:$0xff]  }
  0xe6   : > { %6045 = vmatpush1.bf16.msra.mxu0 %v9077_v29  ;;  %4975 = vmatprep.subr.bf16.mxu1 %v9088_v30  ;;  %v9161_v29 = vld [vmem:[#allocation5 + $0x960] ss:$8 sps:$4 sm:$0xff]   ;;  %v9172_v30 = vld [vmem:[#allocation5 + $0x274] ss:$8 sps:$4 sm:$0xff]  }
  0xe7   : > { %6046 = vmatprep.subr.bf16.mxu0 %v9091_v31  ;;  %v9175_v31 = vld [vmem:[#allocation5 + $0x974] ss:$8 sps:$4 sm:$0xff]  }
  0xe9   : > { %4976 = vmatpush1.bf16.msra.mxu1 %v9086_v32  ;;  %v9170_v32 = vld [vmem:[#allocation5 + $0x270] ss:$8 sps:$4 sm:$0xff]  }
  0xea   : > { %6047 = vmatpush1.bf16.msra.mxu0 %v9089_v34  ;;  %5098 = vmatprep.subr.bf16.mxu1 %v9100_v35  ;;  %v9154_v34 = vld [vmem:[%s10321_s30 + $0x3a0] ss:$108 sps:$4 sm:$0xff]   ;;  %v9173_v35 = vld [vmem:[#allocation5 + $0x970] ss:$8 sps:$4 sm:$0xff]  }
  0xeb   : > { %6169 = vmatprep.subr.bf16.mxu0 %v9103_v36  ;;  %4905 = vmatmul.mubr.bf16.gmra.mrb[32].mxu1 %v9042_v33  ;;  %v9153_v33 = vld [vmem:[%s10321_s30 + $0x368] ss:$108 sps:$4 sm:$0xff]   ;;  %v9183_v36 = vld [vmem:[#allocation5 + $0x284] ss:$8 sps:$4 sm:$0xff]  }
  0xec   : > { %5976 = vmatmul.mubr.bf16.gmra.mrb[32].mxu0 %v9043_v37  ;;  %4914 = vmatprep.mubr.bf16.mxu1 %v9050_v38  ;;  %v9187_v37 = vld [vmem:[#allocation5 + $0x984] ss:$8 sps:$4 sm:$0xff]  }
  0xed   : > { %5985 = vmatprep.mubr.bf16.mxu0 %v9052_v39  ;;  %v9164_v38 = vld [vmem:[%s10321_s30 + $0x444] ss:$108 sps:$4 sm:$0xff]   ;;  %v9166_v39 = vld [vmem:[%s10321_s30 + $0x47c] ss:$108 sps:$4 sm:$0xff]  }
  0xf3   : > { %4915 = vmatmul.mubr.bf16.gmra.mrb[36].mxu1 %v9054_v40  ;;  %v9181_v40 = vld [vmem:[#allocation5 + $0x280] ss:$8 sps:$4 sm:$0xff]  }
  0xf4   : > { %5986 = vmatmul.mubr.bf16.gmra.mrb[36].mxu0 %v9058_v41  ;;  %4924 = vmatprep.mubr.bf16.mxu1 %v9065_v42  ;;  %v9185_v41 = vld [vmem:[#allocation5 + $0x980] ss:$8 sps:$4 sm:$0xff]   ;;  %v9190_v42 = vld [vmem:[#allocation5 + $0x294] ss:$8 sps:$4 sm:$0xff]  }
  0xf5   : > { %5995 = vmatprep.mubr.bf16.mxu0 %v9067_v43  ;;  %v9199_v43 = vld [vmem:[#allocation5 + $0x994] ss:$8 sps:$4 sm:$0xff]  }
  0xfb   : > { %4925 = vmatmul.mubr.bf16.gmra.mrb[40].mxu1 %v9069_v44  ;;  %v9188_v44 = vld [vmem:[#allocation5 + $0x290] ss:$8 sps:$4 sm:$0xff]  }
  0xfc   : > { %5996 = vmatmul.mubr.bf16.gmra.mrb[40].mxu0 %v9070_v45  ;;  %4934 = vmatprep.mubr.bf16.mxu1 %v9080_v46  ;;  %v9168_v45 = vld [vmem:[%s10321_s30 + $0x440] ss:$108 sps:$4 sm:$0xff]   ;;  %v9169_v46 = vld [vmem:[%s10321_s30 + $0x478] ss:$108 sps:$4 sm:$0xff]  }
  0xfd   : > { %6005 = vmatprep.mubr.bf16.mxu0 %v9082_v47  ;;  %v9197_v47 = vld [vmem:[#allocation5 + $0x990] ss:$8 sps:$4 sm:$0xff]  }
 0x103   : > { %4935 = vmatmul.mubr.bf16.gmra.mrb[44].mxu1 %v9084_v48  ;;  %v9202_v48 = vld [vmem:[#allocation5 + $0x2a4] ss:$8 sps:$4 sm:$0xff]  }
 0x104   : > { %6006 = vmatmul.mubr.bf16.gmra.mrb[44].mxu0 %v9085_v49  ;;  %4977 = vmatprep.mubr.bf16.mxu1 %v9094_v50  ;;  %v9205_v49 = vld [vmem:[#allocation5 + $0x9a4] ss:$8 sps:$4 sm:$0xff]   ;;  %v9176_v50 = vld [vmem:[%s10321_s30 + $0x51c] ss:$108 sps:$4 sm:$0xff]  }
 0x105   : > { %6048 = vmatprep.mubr.bf16.mxu0 %v9097_v51  ;;  %v9178_v51 = vld [vmem:[%s10321_s30 + $0x554] ss:$108 sps:$4 sm:$0xff]  }
 0x10b   : > { %4978 = vmatmul.mubr.bf16.vlgmr.msra.gmra.mrb[0].mxu1 %v9092_v52  ;;  %v9200_v52 = vld [vmem:[#allocation5 + $0x2a0] ss:$8 sps:$4 sm:$0xff]  }
 0x10c   : > { %6049 = vmatmul.mubr.bf16.vlgmr.msra.gmra.mrb[0].mxu0 %v9095_v53  ;;  %5099 = vmatpush1.bf16.msra.mxu1 %v9098_v54  ;;  %v9203_v53 = vld [vmem:[#allocation5 + $0x9a0] ss:$8 sps:$4 sm:$0xff]   ;;  %v9214_v54 = vld [vmem:[#allocation5 + $0x2b4] ss:$8 sps:$4 sm:$0xff]  }
 0x10d   : > { %6170 = vmatpush1.bf16.msra.mxu0 %v9101_v55  ;;  %5100 = vmatprep.subr.bf16.mxu1 %v9106_v56  ;;  %v9217_v55 = vld [vmem:[#allocation5 + $0x9b4] ss:$8 sps:$4 sm:$0xff]   ;;  %v9212_v56 = vld [vmem:[#allocation5 + $0x2b0] ss:$8 sps:$4 sm:$0xff]  }
 0x10e   : > { %4987 = vmatprep.mubr.bf16.mxu1 %v9107_v57  ;;  %6058 = vmatprep.mubr.bf16.mxu0 %v9109_v58  ;;  %v9215_v57 = vld [vmem:[#allocation5 + $0x9b0] ss:$8 sps:$4 sm:$0xff]  }
 0x10f   : > { %6171 = vmatprep.subr.bf16.mxu0 %v9115_v59  ;;  %v9180_v58 = vld [vmem:[%s10321_s30 + $0x518] ss:$108 sps:$4 sm:$0xff]  }
 0x110   : > { %5101 = vmatpush1.bf16.msra.mxu1 %v9104_v60  ;;  %v9225_v59 = vld [vmem:[#allocation5 + $0x2c4] ss:$8 sps:$4 sm:$0xff]  }
 0x111   : > { %6172 = vmatpush1.bf16.msra.mxu0 %v9113_v61  ;;  %5102 = vmatprep.subr.bf16.mxu1 %v9118_v62  ;;  %v9229_v60 = vld [vmem:[#allocation5 + $0x9c4] ss:$8 sps:$4 sm:$0xff]   ;;  %v9184_v61 = vld [vmem:[%s10321_s30 + $0x550] ss:$108 sps:$4 sm:$0xff]   ;;  %v9191_v62 = vld [vmem:[%s10321_s30 + $0x5f4] ss:$108 sps:$4 sm:$0xff]  }
 0x112   : > { %6173 = vmatprep.subr.bf16.mxu0 %v9121_v63  ;;  %v9193_v63 = vld [vmem:[%s10321_s30 + $0x62c] ss:$108 sps:$4 sm:$0xff]  }
 0x113   : > { %4988 = vmatmul.mubr.bf16.gmra.mrb[4].mxu1 %v9111_v0  ;;  %v9223_v0 = vld [vmem:[#allocation5 + $0x2c0] ss:$8 sps:$4 sm:$0xff]  }
 0x114   : > { %6059 = vmatmul.mubr.bf16.gmra.mrb[4].mxu0 %v9112_v1  ;;  %5103 = vmatpush1.bf16.msra.mxu1 %v9116_v2  ;;  %v9227_v1 = vld [vmem:[#allocation5 + $0x9c0] ss:$8 sps:$4 sm:$0xff]   ;;  %v9232_v2 = vld [vmem:[#allocation5 + $0x2d4] ss:$8 sps:$4 sm:$0xff]  }
 0x115   : > { %4997 = vmatprep.mubr.bf16.mxu1 %v9122_v4  ;;  %6068 = vmatprep.mubr.bf16.mxu0 %v9124_v5  ;;  %v9230_v4 = vld [vmem:[#allocation5 + $0x2d0] ss:$8 sps:$4 sm:$0xff]  }
 0x116   : > { %6174 = vmatpush1.bf16.msra.mxu0 %v9119_v3  ;;  %5104 = vmatprep.subr.bf16.mxu1 %v9130_v6  ;;  %v9241_v3 = vld [vmem:[#allocation5 + $0x9d4] ss:$8 sps:$4 sm:$0xff]  }
 0x117   : > { %6175 = vmatprep.subr.bf16.mxu0 %v9133_v7  ;;  %v9195_v5 = vld [vmem:[%s10321_s30 + $0x5f0] ss:$108 sps:$4 sm:$0xff]   ;;  %v9196_v6 = vld [vmem:[%s10321_s30 + $0x628] ss:$108 sps:$4 sm:$0xff]  }
 0x118   : > { %5105 = vmatpush1.bf16.msra.mxu1 %v9128_v8  ;;  %v9239_v7 = vld [vmem:[#allocation5 + $0x9d0] ss:$8 sps:$4 sm:$0xff]  }
 0x119   : > { %5106 = vmatprep.subr.bf16.mxu1 %v9141_v11  ;;  %v9206_v8 = vld [vmem:[%s10321_s30 + $0x6cc] ss:$108 sps:$4 sm:$0xff]   ;;  %v9208_v11 = vld [vmem:[%s10321_s30 + $0x704] ss:$108 sps:$4 sm:$0xff]  }
 0x11a   : > { %6176 = vmatpush1.bf16.msra.mxu0 %v9131_v9  ;;  %v9244_v9 = vld [vmem:[#allocation5 + $0x2e4] ss:$8 sps:$4 sm:$0xff]  }
 0x11b   : > { %6177 = vmatprep.subr.bf16.mxu0 %v9145_v12  ;;  %4998 = vmatmul.mubr.bf16.gmra.mrb[8].mxu1 %v9126_v10  ;;  %v9247_v10 = vld [vmem:[#allocation5 + $0x9e4] ss:$8 sps:$4 sm:$0xff]   ;;  %v9242_v12 = vld [vmem:[#allocation5 + $0x2e0] ss:$8 sps:$4 sm:$0xff]  }
 0x11c   : > { %6069 = vmatmul.mubr.bf16.gmra.mrb[8].mxu0 %v9127_v13  ;;  %5007 = vmatprep.mubr.bf16.mxu1 %v9134_v14  ;;  %v9245_v13 = vld [vmem:[#allocation5 + $0x9e0] ss:$8 sps:$4 sm:$0xff]   ;;  %v9256_v14 = vld [vmem:[#allocation5 + $0x2f4] ss:$8 sps:$4 sm:$0xff]  }
 0x11d   : > { %6078 = vmatprep.mubr.bf16.mxu0 %v9136_v15  ;;  %5107 = vmatpush1.bf16.msra.mxu1 %v9139_v16  ;;  %v9259_v15 = vld [vmem:[#allocation5 + $0x9f4] ss:$8 sps:$4 sm:$0xff]   ;;  %v9254_v16 = vld [vmem:[#allocation5 + $0x2f0] ss:$8 sps:$4 sm:$0xff]  }
 0x11e   : > { %6178 = vmatpush1.bf16.msra.mxu0 %v9143_v17  ;;  %5108 = vmatprep.subr.bf16.mxu1 %v9148_v18  ;;  %v9210_v17 = vld [vmem:[%s10321_s30 + $0x6c8] ss:$108 sps:$4 sm:$0xff]   ;;  %v9257_v18 = vld [vmem:[#allocation5 + $0x9f0] ss:$8 sps:$4 sm:$0xff]  }
 0x11f   : > { %6179 = vmatprep.subr.bf16.mxu0 %v9157_v19  ;;  %v9268_v19 = vld [vmem:[#allocation5 + $0x304] ss:$8 sps:$4 sm:$0xff]  }
 0x121   : > { %5109 = vmatpush1.bf16.msra.mxu1 %v9146_v20  ;;  %v9271_v20 = vld [vmem:[#allocation5 + $0xa04] ss:$8 sps:$4 sm:$0xff]  }
 0x122   : > { %6180 = vmatpush1.bf16.msra.mxu0 %v9155_v23  ;;  %5110 = vmatprep.subr.bf16.mxu1 %v9160_v24  ;;  %v9220_v23 = vld [vmem:[%s10321_s30 + $0x7dc] ss:$108 sps:$4 sm:$0xff]   ;;  %v9222_v24 = vld [vmem:[%s10321_s30 + $0x7a0] ss:$108 sps:$4 sm:$0xff]  }
 0x123   : > { %6181 = vmatprep.subr.bf16.mxu0 %v9163_v25  ;;  %5008 = vmatmul.mubr.bf16.gmra.mrb[12].mxu1 %v9138_v21  ;;  %v9211_v21 = vld [vmem:[%s10321_s30 + $0x700] ss:$108 sps:$4 sm:$0xff]   ;;  %v9226_v25 = vld [vmem:[%s10321_s30 + $0x7d8] ss:$108 sps:$4 sm:$0xff]  }
 0x124   : > { %6079 = vmatmul.mubr.bf16.gmra.mrb[12].mxu0 %v9142_v22  ;;  %5017 = vmatprep.mubr.bf16.mxu1 %v9149_v26  ;;  %v9218_v22 = vld [vmem:[%s10321_s30 + $0x7a4] ss:$108 sps:$4 sm:$0xff]   ;;  %v9233_v26 = vld [vmem:[%s10321_s30 + $0x87c] ss:$108 sps:$4 sm:$0xff]  }
 0x125   : > { %6088 = vmatprep.mubr.bf16.mxu0 %v9151_v27  ;;  %5111 = vmatpush1.bf16.msra.mxu1 %v9158_v28  ;;  %v9235_v27 = vld [vmem:[%s10321_s30 + $0x8b4] ss:$108 sps:$4 sm:$0xff]   ;;  %v9237_v28 = vld [vmem:[%s10321_s30 + $0x878] ss:$108 sps:$4 sm:$0xff]  }
 0x126   : > { %6182 = vmatpush1.bf16.msra.mxu0 %v9161_v29  ;;  %5112 = vmatprep.subr.bf16.mxu1 %v9172_v30  ;;  %v9238_v29 = vld [vmem:[%s10321_s30 + $0x8b0] ss:$108 sps:$4 sm:$0xff]   ;;  %v9248_v30 = vld [vmem:[%s10321_s30 + $0x954] ss:$108 sps:$4 sm:$0xff]  }
 0x127   : > { %6183 = vmatprep.subr.bf16.mxu0 %v9175_v31  ;;  %v9250_v31 = vld [vmem:[%s10321_s30 + $0x98c] ss:$108 sps:$4 sm:$0xff]  }
 0x129   : > { %5113 = vmatpush1.bf16.msra.mxu1 %v9170_v32  ;;  %v9252_v32 = vld [vmem:[%s10321_s30 + $0x950] ss:$108 sps:$4 sm:$0xff]  }
 0x12a   : > { %6184 = vmatpush1.bf16.msra.mxu0 %v9173_v35  ;;  %5114 = vmatprep.subr.bf16.mxu1 %v9183_v36  ;;  %v9265_v35 = vld [vmem:[%s10321_s30 + $0x4c] ss:$108 sps:$4 sm:$0xff]   ;;  %v9260_v36 = vld [vmem:[%s10321_s30 + $0x10] ss:$108 sps:$4 sm:$0xff]  }
 0x12b   : > { %6185 = vmatprep.subr.bf16.mxu0 %v9187_v37  ;;  %5018 = vmatmul.mubr.bf16.gmra.mrb[16].mxu1 %v9153_v33  ;;  %v9253_v33 = vld [vmem:[%s10321_s30 + $0x988] ss:$108 sps:$4 sm:$0xff]  }
 0x12c   : > { %6089 = vmatmul.mubr.bf16.gmra.mrb[16].mxu0 %v9154_v34  ;;  %5027 = vmatprep.mubr.bf16.mxu1 %v9164_v38  ;;  %v9262_v34 = vld [vmem:[%s10321_s30 + $0x14] ss:$108 sps:$4 sm:$0xff]  }
 0x12d   : > { %6098 = vmatprep.mubr.bf16.mxu0 %v9166_v39  ;;  %5115 = vmatpush1.bf16.msra.mxu1 %v9181_v40  ;;  %v9263_v37 = vld [vmem:[%s10321_s30 + $0x48] ss:$108 sps:$4 sm:$0xff]  }
 0x12e   : > { %6186 = vmatpush1.bf16.msra.mxu0 %v9185_v41  ;;  %5116 = vmatprep.subr.bf16.mxu1 %v9190_v42  ;;  %v9266_v38 = vld [vmem:[#allocation5 + $0x300] ss:$8 sps:$4 sm:$0xff]   ;;  %v9274_v40 = vld [vmem:[#allocation5 + $0x314] ss:$8 sps:$4 sm:$0xff]   ;;  %v9275_v41 = vld [vmem:[%s10321_s30 + $0xec] ss:$108 sps:$4 sm:$0xff]  }
 0x12f   : > { %6187 = vmatprep.subr.bf16.mxu0 %v9199_v43  ;;  %v9269_v39 = vld [vmem:[#allocation5 + $0xa00] ss:$8 sps:$4 sm:$0xff]   ;;  %v9277_v42 = vld [vmem:[%s10321_s30 + $0x124] ss:$108 sps:$4 sm:$0xff]   ;;  %v9283_v43 = vld [vmem:[#allocation5 + $0xa14] ss:$8 sps:$4 sm:$0xff]  }
 0x131   : > { %5117 = vmatpush1.bf16.msra.mxu1 %v9188_v44  ;;  %v9272_v44 = vld [vmem:[#allocation5 + $0x310] ss:$8 sps:$4 sm:$0xff]  }
 0x132   : > { %6188 = vmatpush1.bf16.msra.mxu0 %v9197_v47  ;;  %5118 = vmatprep.subr.bf16.mxu1 %v9202_v48  ;;  %v9289_v47 = vld [vmem:[#allocation5 + $0xa24] ss:$8 sps:$4 sm:$0xff]   ;;  %v9279_v48 = vld [vmem:[%s10321_s30 + $0xe8] ss:$108 sps:$4 sm:$0xff]  }
 0x133   : > { %6189 = vmatprep.subr.bf16.mxu0 %v9205_v49  ;;  %5028 = vmatmul.mubr.bf16.gmra.mrb[20].mxu1 %v9168_v45  ;;  %v9281_v45 = vld [vmem:[#allocation5 + $0xa10] ss:$8 sps:$4 sm:$0xff]   ;;  %v9280_v49 = vld [vmem:[%s10321_s30 + $0x120] ss:$108 sps:$4 sm:$0xff]  }
 0x134   : > { %6099 = vmatmul.mubr.bf16.gmra.mrb[20].mxu0 %v9169_v46  ;;  %5037 = vmatprep.mubr.bf16.mxu1 %v9176_v50  ;;  %v9286_v46 = vld [vmem:[#allocation5 + $0x324] ss:$8 sps:$4 sm:$0xff]   ;;  %v9284_v50 = vld [vmem:[#allocation5 + $0x320] ss:$8 sps:$4 sm:$0xff]  }
 0x135   : > { %6108 = vmatprep.mubr.bf16.mxu0 %v9178_v51  ;;  %5119 = vmatpush1.bf16.msra.mxu1 %v9200_v52  ;;  %v9287_v51 = vld [vmem:[#allocation5 + $0xa20] ss:$8 sps:$4 sm:$0xff]   ;;  %v9290_v52 = vld [vmem:[%s10321_s30 + $0x1c4] ss:$108 sps:$4 sm:$0xff]  }
 0x136   : > { %6190 = vmatpush1.bf16.msra.mxu0 %v9203_v53  ;;  %5120 = vmatprep.subr.bf16.mxu1 %v9214_v54  ;;  %v9292_v53 = vld [vmem:[%s10321_s30 + $0x1fc] ss:$108 sps:$4 sm:$0xff]  }
 0x137   : > { %6191 = vmatprep.subr.bf16.mxu0 %v9217_v55  ;;  %v9298_v54 = vld [vmem:[#allocation5 + $0x334] ss:$8 sps:$4 sm:$0xff]  }
 0x138   : > { %v9301_v55 = vld [vmem:[#allocation5 + $0xa34] ss:$8 sps:$4 sm:$0xff]  }
 0x139   : > { %5121 = vmatpush1.bf16.msra.mxu1 %v9212_v56  ;;  %v9296_v56 = vld [vmem:[#allocation5 + $0x330] ss:$8 sps:$4 sm:$0xff]  }
 0x13a   : > { %6192 = vmatpush1.bf16.msra.mxu0 %v9215_v57  ;;  %5122 = vmatprep.subr.bf16.mxu1 %v9225_v59  ;;  %v9299_v57 = vld [vmem:[#allocation5 + $0xa30] ss:$8 sps:$4 sm:$0xff]  }
 0x13b   : > { %6193 = vmatprep.subr.bf16.mxu0 %v9229_v60  ;;  %5038 = vmatmul.mubr.bf16.gmra.mrb[24].mxu1 %v9180_v58  ;;  %v9294_v58 = vld [vmem:[%s10321_s30 + $0x1c0] ss:$108 sps:$4 sm:$0xff]   ;;  %v9295_v59 = vld [vmem:[%s10321_s30 + $0x1f8] ss:$108 sps:$4 sm:$0xff]  }
 0x13c   : > { %6109 = vmatmul.mubr.bf16.gmra.mrb[24].mxu0 %v9184_v61  ;;  %5047 = vmatprep.mubr.bf16.mxu1 %v9191_v62  ;;  %v9309_v60 = vld [vmem:[#allocation5 + $0x344] ss:$8 sps:$4 sm:$0xff]   ;;  %v9302_v61 = vld [vmem:[%s10321_s30 + $0x29c] ss:$108 sps:$4 sm:$0xff]  }
 0x13d   : > { %6118 = vmatprep.mubr.bf16.mxu0 %v9193_v63  ;;  %5123 = vmatpush1.bf16.msra.mxu1 %v9223_v0  ;;  %v9313_v62 = vld [vmem:[#allocation5 + $0xa44] ss:$8 sps:$4 sm:$0xff]   ;;  %v9304_v63 = vld [vmem:[%s10321_s30 + $0x2d4] ss:$108 sps:$4 sm:$0xff]  }
 0x13e   : > { %6194 = vmatpush1.bf16.msra.mxu0 %v9227_v1  ;;  %5124 = vmatprep.subr.bf16.mxu1 %v9232_v2  ;;  %v9307_v0 = vld [vmem:[#allocation5 + $0x340] ss:$8 sps:$4 sm:$0xff]   ;;  %v9316_v2 = vld [vmem:[#allocation5 + $0x354] ss:$8 sps:$4 sm:$0xff]  }
 0x13f   : > { %6195 = vmatprep.subr.bf16.mxu0 %v9241_v3  ;;  %v9311_v1 = vld [vmem:[#allocation5 + $0xa40] ss:$8 sps:$4 sm:$0xff]   ;;  %v9325_v3 = vld [vmem:[#allocation5 + $0xa54] ss:$8 sps:$4 sm:$0xff]  }
 0x141   : > { %5125 = vmatpush1.bf16.msra.mxu1 %v9230_v4  ;;  %v9314_v4 = vld [vmem:[#allocation5 + $0x350] ss:$8 sps:$4 sm:$0xff]  }
 0x142   : > { %6196 = vmatpush1.bf16.msra.mxu0 %v9239_v7  ;;  %5126 = vmatprep.subr.bf16.mxu1 %v9244_v9  ;;  %v9323_v7 = vld [vmem:[#allocation5 + $0xa50] ss:$8 sps:$4 sm:$0xff]   ;;  %v9331_v9 = vld [vmem:[#allocation5 + $0xa64] ss:$8 sps:$4 sm:$0xff]  }
 0x143   : > { %6197 = vmatprep.subr.bf16.mxu0 %v9247_v10  ;;  %5048 = vmatmul.mubr.bf16.gmra.mrb[28].mxu1 %v9195_v5  ;;  %v9306_v5 = vld [vmem:[%s10321_s30 + $0x298] ss:$108 sps:$4 sm:$0xff]   ;;  %v9317_v10 = vld [vmem:[%s10321_s30 + $0x374] ss:$108 sps:$4 sm:$0xff]  }
 0x144   : > { %6119 = vmatmul.mubr.bf16.gmra.mrb[28].mxu0 %v9196_v6  ;;  %5057 = vmatprep.mubr.bf16.mxu1 %v9206_v8  ;;  %v9310_v6 = vld [vmem:[%s10321_s30 + $0x2d0] ss:$108 sps:$4 sm:$0xff]   ;;  %v9328_v8 = vld [vmem:[#allocation5 + $0x364] ss:$8 sps:$4 sm:$0xff]  }
 0x145   : > { %6128 = vmatprep.mubr.bf16.mxu0 %v9208_v11  ;;  %5127 = vmatpush1.bf16.msra.mxu1 %v9242_v12  ;;  %v9319_v11 = vld [vmem:[%s10321_s30 + $0x3ac] ss:$108 sps:$4 sm:$0xff]   ;;  %v9326_v12 = vld [vmem:[#allocation5 + $0x360] ss:$8 sps:$4 sm:$0xff]  }
 0x146   : > { %6198 = vmatpush1.bf16.msra.mxu0 %v9245_v13  ;;  %5128 = vmatprep.subr.bf16.mxu1 %v9256_v14  ;;  %v9329_v13 = vld [vmem:[#allocation5 + $0xa60] ss:$8 sps:$4 sm:$0xff]   ;;  %v9340_v14 = vld [vmem:[#allocation5 + $0x374] ss:$8 sps:$4 sm:$0xff]  }
 0x147   : > { %6199 = vmatprep.subr.bf16.mxu0 %v9259_v15  ;;  %v9343_v15 = vld [vmem:[#allocation5 + $0xa74] ss:$8 sps:$4 sm:$0xff]  }
 0x149   : > { %5129 = vmatpush1.bf16.msra.mxu1 %v9254_v16  ;;  %v9338_v16 = vld [vmem:[#allocation5 + $0x370] ss:$8 sps:$4 sm:$0xff]  }
 0x14a   : > { %6200 = vmatpush1.bf16.msra.mxu0 %v9257_v18  ;;  %5251 = vmatprep.subr.bf16.mxu1 %v9268_v19  ;;  %v9321_v18 = vld [vmem:[%s10321_s30 + $0x370] ss:$108 sps:$4 sm:$0xff]   ;;  %v9351_v19 = vld [vmem:[#allocation5 + $0x384] ss:$8 sps:$4 sm:$0xff]  }
 0x14b   : > { %6322 = vmatprep.subr.bf16.mxu0 %v9271_v20  ;;  %5058 = vmatmul.mubr.bf16.gmra.mrb[32].mxu1 %v9210_v17  ;;  %v9341_v17 = vld [vmem:[#allocation5 + $0xa70] ss:$8 sps:$4 sm:$0xff]   ;;  %v9355_v20 = vld [vmem:[#allocation5 + $0xa84] ss:$8 sps:$4 sm:$0xff]  }
 0x14c   : > { %6129 = vmatmul.mubr.bf16.gmra.mrb[32].mxu0 %v9211_v21  ;;  %5067 = vmatprep.mubr.bf16.mxu1 %v9218_v22  ;;  %v9322_v21 = vld [vmem:[%s10321_s30 + $0x3a8] ss:$108 sps:$4 sm:$0xff]   ;;  %v9332_v22 = vld [vmem:[%s10321_s30 + $0x44c] ss:$108 sps:$4 sm:$0xff]  }
 0x14d   : > { %6138 = vmatprep.mubr.bf16.mxu0 %v9220_v23  ;;  %v9334_v23 = vld [vmem:[%s10321_s30 + $0x484] ss:$108 sps:$4 sm:$0xff]  }
 0x153   : > { %5068 = vmatmul.mubr.bf16.gmra.mrb[36].mxu1 %v9222_v24  ;;  %v9349_v24 = vld [vmem:[#allocation5 + $0x380] ss:$8 sps:$4 sm:$0xff]  }
 0x154   : > { %6139 = vmatmul.mubr.bf16.gmra.mrb[36].mxu0 %v9226_v25  ;;  %5077 = vmatprep.mubr.bf16.mxu1 %v9233_v26  ;;  %v9353_v25 = vld [vmem:[#allocation5 + $0xa80] ss:$8 sps:$4 sm:$0xff]   ;;  %v9358_v26 = vld [vmem:[#allocation5 + $0x394] ss:$8 sps:$4 sm:$0xff]  }
 0x155   : > { %6148 = vmatprep.mubr.bf16.mxu0 %v9235_v27  ;;  %v9367_v27 = vld [vmem:[#allocation5 + $0xa94] ss:$8 sps:$4 sm:$0xff]  }
 0x15b   : > { %5078 = vmatmul.mubr.bf16.gmra.mrb[40].mxu1 %v9237_v28  ;;  %v9356_v28 = vld [vmem:[#allocation5 + $0x390] ss:$8 sps:$4 sm:$0xff]  }
 0x15c   : > { %6149 = vmatmul.mubr.bf16.gmra.mrb[40].mxu0 %v9238_v29  ;;  %5087 = vmatprep.mubr.bf16.mxu1 %v9248_v30  ;;  %v9336_v29 = vld [vmem:[%s10321_s30 + $0x448] ss:$108 sps:$4 sm:$0xff]   ;;  %v9337_v30 = vld [vmem:[%s10321_s30 + $0x480] ss:$108 sps:$4 sm:$0xff]  }
 0x15d   : > { %6158 = vmatprep.mubr.bf16.mxu0 %v9250_v31  ;;  %v9365_v31 = vld [vmem:[#allocation5 + $0xa90] ss:$8 sps:$4 sm:$0xff]  }
 0x163   : > { %5088 = vmatmul.mubr.bf16.gmra.mrb[44].mxu1 %v9252_v32  ;;  %v9370_v32 = vld [vmem:[#allocation5 + $0x3a4] ss:$8 sps:$4 sm:$0xff]  }
 0x164   : > { %6159 = vmatmul.mubr.bf16.gmra.mrb[44].mxu0 %v9253_v33  ;;  %5130 = vmatprep.mubr.bf16.mxu1 %v9262_v34  ;;  %v9373_v33 = vld [vmem:[#allocation5 + $0xaa4] ss:$8 sps:$4 sm:$0xff]  }
 0x165   : > { %6201 = vmatprep.mubr.bf16.mxu0 %v9265_v35  ;;  %v9344_v34 = vld [vmem:[%s10321_s30 + $0x524] ss:$108 sps:$4 sm:$0xff]   ;;  %v9346_v35 = vld [vmem:[%s10321_s30 + $0x55c] ss:$108 sps:$4 sm:$0xff]  }
 0x16b   : > { %5131 = vmatmul.mubr.bf16.vlgmr.msra.gmra.mrb[0].mxu1 %v9260_v36  ;;  %v9368_v36 = vld [vmem:[#allocation5 + $0x3a0] ss:$8 sps:$4 sm:$0xff]  }
 0x16c   : > { %6202 = vmatmul.mubr.bf16.vlgmr.msra.gmra.mrb[0].mxu0 %v9263_v37  ;;  %5252 = vmatpush1.bf16.msra.mxu1 %v9266_v38  ;;  %v9371_v37 = vld [vmem:[#allocation5 + $0xaa0] ss:$8 sps:$4 sm:$0xff]   ;;  %v9382_v38 = vld [vmem:[#allocation5 + $0x3b4] ss:$8 sps:$4 sm:$0xff]  }
 0x16d   : > { %6323 = vmatpush1.bf16.msra.mxu0 %v9269_v39  ;;  %5253 = vmatprep.subr.bf16.mxu1 %v9274_v40  ;;  %v9385_v39 = vld [vmem:[#allocation5 + $0xab4] ss:$8 sps:$4 sm:$0xff]   ;;  %v9380_v40 = vld [vmem:[#allocation5 + $0x3b0] ss:$8 sps:$4 sm:$0xff]  }
 0x16e   : > { %5140 = vmatprep.mubr.bf16.mxu1 %v9275_v41  ;;  %6211 = vmatprep.mubr.bf16.mxu0 %v9277_v42  ;;  %v9348_v41 = vld [vmem:[%s10321_s30 + $0x520] ss:$108 sps:$4 sm:$0xff]   ;;  %v9352_v42 = vld [vmem:[%s10321_s30 + $0x558] ss:$108 sps:$4 sm:$0xff]  }
 0x16f   : > { %6324 = vmatprep.subr.bf16.mxu0 %v9283_v43  ;;  %v9383_v43 = vld [vmem:[#allocation5 + $0xab0] ss:$8 sps:$4 sm:$0xff]  }
 0x170   : > { %5254 = vmatpush1.bf16.msra.mxu1 %v9272_v44  ;;  %v9359_v44 = vld [vmem:[%s10321_s30 + $0x5fc] ss:$108 sps:$4 sm:$0xff]  }
 0x171   : > { %6325 = vmatpush1.bf16.msra.mxu0 %v9281_v45  ;;  %5255 = vmatprep.subr.bf16.mxu1 %v9286_v46  ;;  %v9393_v45 = vld [vmem:[#allocation5 + $0x3c4] ss:$8 sps:$4 sm:$0xff]  }
 0x172   : > { %6326 = vmatprep.subr.bf16.mxu0 %v9289_v47  ;;  %v9397_v46 = vld [vmem:[#allocation5 + $0xac4] ss:$8 sps:$4 sm:$0xff]   ;;  %v9361_v47 = vld [vmem:[%s10321_s30 + $0x634] ss:$108 sps:$4 sm:$0xff]  }
 0x173   : > { %5141 = vmatmul.mubr.bf16.gmra.mrb[4].mxu1 %v9279_v48  ;;  %v9391_v48 = vld [vmem:[#allocation5 + $0x3c0] ss:$8 sps:$4 sm:$0xff]  }
 0x174   : > { %6212 = vmatmul.mubr.bf16.gmra.mrb[4].mxu0 %v9280_v49  ;;  %5256 = vmatpush1.bf16.msra.mxu1 %v9284_v50  ;;  %v9395_v49 = vld [vmem:[#allocation5 + $0xac0] ss:$8 sps:$4 sm:$0xff]   ;;  %v9400_v50 = vld [vmem:[#allocation5 + $0x3d4] ss:$8 sps:$4 sm:$0xff]  }
 0x175   : > { %5150 = vmatprep.mubr.bf16.mxu1 %v9290_v52  ;;  %6221 = vmatprep.mubr.bf16.mxu0 %v9292_v53  ;;  %v9398_v52 = vld [vmem:[#allocation5 + $0x3d0] ss:$8 sps:$4 sm:$0xff]  }
 0x176   : > { %6327 = vmatpush1.bf16.msra.mxu0 %v9287_v51  ;;  %5257 = vmatprep.subr.bf16.mxu1 %v9298_v54  ;;  %v9409_v51 = vld [vmem:[#allocation5 + $0xad4] ss:$8 sps:$4 sm:$0xff]   ;;  %v9363_v53 = vld [vmem:[%s10321_s30 + $0x5f8] ss:$108 sps:$4 sm:$0xff]  }
 0x177   : > { %6328 = vmatprep.subr.bf16.mxu0 %v9301_v55  ;;  %v9364_v54 = vld [vmem:[%s10321_s30 + $0x630] ss:$108 sps:$4 sm:$0xff]  }
 0x178   : > { %5258 = vmatpush1.bf16.msra.mxu1 %v9296_v56  ;;  %v9407_v55 = vld [vmem:[#allocation5 + $0xad0] ss:$8 sps:$4 sm:$0xff]   ;;  %v9412_v56 = vld [vmem:[#allocation5 + $0x3e4] ss:$8 sps:$4 sm:$0xff]  }
 0x179   : > { %5259 = vmatprep.subr.bf16.mxu1 %v9309_v60  ;;  %v9410_v60 = vld [vmem:[#allocation5 + $0x3e0] ss:$8 sps:$4 sm:$0xff]  }
 0x17a   : > { %6329 = vmatpush1.bf16.msra.mxu0 %v9299_v57  ;;  %v9415_v57 = vld [vmem:[#allocation5 + $0xae4] ss:$8 sps:$4 sm:$0xff]  }
 0x17b   : > { %6330 = vmatprep.subr.bf16.mxu0 %v9313_v62  ;;  %5151 = vmatmul.mubr.bf16.gmra.mrb[8].mxu1 %v9294_v58  ;;  %v9374_v58 = vld [vmem:[%s10321_s30 + $0x6d4] ss:$108 sps:$4 sm:$0xff]  }
 0x17c   : > { %6222 = vmatmul.mubr.bf16.gmra.mrb[8].mxu0 %v9295_v59  ;;  %5160 = vmatprep.mubr.bf16.mxu1 %v9302_v61  ;;  %v9376_v59 = vld [vmem:[%s10321_s30 + $0x70c] ss:$108 sps:$4 sm:$0xff]   ;;  %v9413_v61 = vld [vmem:[#allocation5 + $0xae0] ss:$8 sps:$4 sm:$0xff]   ;;  %v9424_v62 = vld [vmem:[#allocation5 + $0x3f4] ss:$8 sps:$4 sm:$0xff]  }
 0x17d   : > { %6231 = vmatprep.mubr.bf16.mxu0 %v9304_v63  ;;  %5260 = vmatpush1.bf16.msra.mxu1 %v9307_v0  ;;  %v9427_v63 = vld [vmem:[#allocation5 + $0xaf4] ss:$8 sps:$4 sm:$0xff]   ;;  %v9422_v0 = vld [vmem:[#allocation5 + $0x3f0] ss:$8 sps:$4 sm:$0xff]  }
 0x17e   : > { %6331 = vmatpush1.bf16.msra.mxu0 %v9311_v1  ;;  %5261 = vmatprep.subr.bf16.mxu1 %v9316_v2  ;;  %v9425_v1 = vld [vmem:[#allocation5 + $0xaf0] ss:$8 sps:$4 sm:$0xff]   ;;  %v9436_v2 = vld [vmem:[#allocation5 + $0x404] ss:$8 sps:$4 sm:$0xff]  }
 0x17f   : > { %6332 = vmatprep.subr.bf16.mxu0 %v9325_v3  ;;  %v9439_v3 = vld [vmem:[#allocation5 + $0xb04] ss:$8 sps:$4 sm:$0xff]  }
 0x181   : > { %5262 = vmatpush1.bf16.msra.mxu1 %v9314_v4  ;;  %v9378_v4 = vld [vmem:[%s10321_s30 + $0x6d0] ss:$108 sps:$4 sm:$0xff]  }
 0x182   : > { %6333 = vmatpush1.bf16.msra.mxu0 %v9323_v7  ;;  %5263 = vmatprep.subr.bf16.mxu1 %v9328_v8  ;;  %v9388_v7 = vld [vmem:[%s10321_s30 + $0x7e4] ss:$108 sps:$4 sm:$0xff]   ;;  %v9390_v8 = vld [vmem:[%s10321_s30 + $0x7a8] ss:$108 sps:$4 sm:$0xff]  }
 0x183   : > { %6334 = vmatprep.subr.bf16.mxu0 %v9331_v9  ;;  %5161 = vmatmul.mubr.bf16.gmra.mrb[12].mxu1 %v9306_v5  ;;  %v9379_v5 = vld [vmem:[%s10321_s30 + $0x708] ss:$108 sps:$4 sm:$0xff]   ;;  %v9394_v9 = vld [vmem:[%s10321_s30 + $0x7e0] ss:$108 sps:$4 sm:$0xff]  }
 0x184   : > { %6232 = vmatmul.mubr.bf16.gmra.mrb[12].mxu0 %v9310_v6  ;;  %5170 = vmatprep.mubr.bf16.mxu1 %v9317_v10  ;;  %v9386_v6 = vld [vmem:[%s10321_s30 + $0x7ac] ss:$108 sps:$4 sm:$0xff]   ;;  %v9401_v10 = vld [vmem:[%s10321_s30 + $0x884] ss:$108 sps:$4 sm:$0xff]  }
 0x185   : > { %6241 = vmatprep.mubr.bf16.mxu0 %v9319_v11  ;;  %5264 = vmatpush1.bf16.msra.mxu1 %v9326_v12  ;;  %v9403_v11 = vld [vmem:[%s10321_s30 + $0x8bc] ss:$108 sps:$4 sm:$0xff]   ;;  %v9405_v12 = vld [vmem:[%s10321_s30 + $0x880] ss:$108 sps:$4 sm:$0xff]  }
 0x186   : > { %6335 = vmatpush1.bf16.msra.mxu0 %v9329_v13  ;;  %5265 = vmatprep.subr.bf16.mxu1 %v9340_v14  ;;  %v9406_v13 = vld [vmem:[%s10321_s30 + $0x8b8] ss:$108 sps:$4 sm:$0xff]   ;;  %v9416_v14 = vld [vmem:[%s10321_s30 + $0x95c] ss:$108 sps:$4 sm:$0xff]  }
 0x187   : > { %6336 = vmatprep.subr.bf16.mxu0 %v9343_v15  ;;  %v9418_v15 = vld [vmem:[%s10321_s30 + $0x994] ss:$108 sps:$4 sm:$0xff]  }
 0x189   : > { %5266 = vmatpush1.bf16.msra.mxu1 %v9338_v16  ;;  %v9420_v16 = vld [vmem:[%s10321_s30 + $0x958] ss:$108 sps:$4 sm:$0xff]  }
 0x18a   : > { %6337 = vmatpush1.bf16.msra.mxu0 %v9341_v17  ;;  %5267 = vmatprep.subr.bf16.mxu1 %v9351_v19  ;;  %v9421_v17 = vld [vmem:[%s10321_s30 + $0x990] ss:$108 sps:$4 sm:$0xff]   ;;  %v9433_v19 = vld [vmem:[%s10321_s30 + $0x54] ss:$108 sps:$4 sm:$0xff]  }
 0x18b   : > { %6338 = vmatprep.subr.bf16.mxu0 %v9355_v20  ;;  %5171 = vmatmul.mubr.bf16.gmra.mrb[16].mxu1 %v9321_v18  ;;  %v9430_v18 = vld [vmem:[%s10321_s30 + $0x1c] ss:$108 sps:$4 sm:$0xff]   ;;  %v9428_v20 = vld [vmem:[%s10321_s30 + $0x18] ss:$108 sps:$4 sm:$0xff]  }
 0x18c   : > { %6242 = vmatmul.mubr.bf16.gmra.mrb[16].mxu0 %v9322_v21  ;;  %5180 = vmatprep.mubr.bf16.mxu1 %v9332_v22  ;;  %v9431_v21 = vld [vmem:[%s10321_s30 + $0x50] ss:$108 sps:$4 sm:$0xff]   ;;  %v9434_v22 = vld [vmem:[#allocation5 + $0x400] ss:$8 sps:$4 sm:$0xff]  }
 0x18d   : > { %6251 = vmatprep.mubr.bf16.mxu0 %v9334_v23  ;;  %5268 = vmatpush1.bf16.msra.mxu1 %v9349_v24  ;;  %v9437_v23 = vld [vmem:[#allocation5 + $0xb00] ss:$8 sps:$4 sm:$0xff]   ;;  %v9442_v24 = vld [vmem:[#allocation5 + $0x414] ss:$8 sps:$4 sm:$0xff]  }
 0x18e   : > { %6339 = vmatpush1.bf16.msra.mxu0 %v9353_v25  ;;  %5269 = vmatprep.subr.bf16.mxu1 %v9358_v26  ;;  %v9443_v25 = vld [vmem:[%s10321_s30 + $0xf4] ss:$108 sps:$4 sm:$0xff]   ;;  %v9445_v26 = vld [vmem:[%s10321_s30 + $0x12c] ss:$108 sps:$4 sm:$0xff]  }
 0x18f   : > { %6340 = vmatprep.subr.bf16.mxu0 %v9367_v27  ;;  %v9451_v27 = vld [vmem:[#allocation5 + $0xb14] ss:$8 sps:$4 sm:$0xff]  }
 0x191   : > { %5270 = vmatpush1.bf16.msra.mxu1 %v9356_v28  ;;  %v9440_v28 = vld [vmem:[#allocation5 + $0x410] ss:$8 sps:$4 sm:$0xff]  }
 0x192   : > { %6341 = vmatpush1.bf16.msra.mxu0 %v9365_v31  ;;  %5271 = vmatprep.subr.bf16.mxu1 %v9370_v32  ;;  %v9447_v31 = vld [vmem:[%s10321_s30 + $0xf0] ss:$108 sps:$4 sm:$0xff]   ;;  %v9457_v32 = vld [vmem:[#allocation5 + $0xb24] ss:$8 sps:$4 sm:$0xff]  }
 0x193   : > { %6342 = vmatprep.subr.bf16.mxu0 %v9373_v33  ;;  %5181 = vmatmul.mubr.bf16.gmra.mrb[20].mxu1 %v9336_v29  ;;  %v9449_v29 = vld [vmem:[#allocation5 + $0xb10] ss:$8 sps:$4 sm:$0xff]   ;;  %v9448_v33 = vld [vmem:[%s10321_s30 + $0x128] ss:$108 sps:$4 sm:$0xff]  }
 0x194   : > { %6252 = vmatmul.mubr.bf16.gmra.mrb[20].mxu0 %v9337_v30  ;;  %5190 = vmatprep.mubr.bf16.mxu1 %v9344_v34  ;;  %v9454_v30 = vld [vmem:[#allocation5 + $0x424] ss:$8 sps:$4 sm:$0xff]   ;;  %v9452_v34 = vld [vmem:[#allocation5 + $0x420] ss:$8 sps:$4 sm:$0xff]  }
 0x195   : > { %6261 = vmatprep.mubr.bf16.mxu0 %v9346_v35  ;;  %5272 = vmatpush1.bf16.msra.mxu1 %v9368_v36  ;;  %v9455_v35 = vld [vmem:[#allocation5 + $0xb20] ss:$8 sps:$4 sm:$0xff]   ;;  %v9458_v36 = vld [vmem:[%s10321_s30 + $0x1cc] ss:$108 sps:$4 sm:$0xff]  }
 0x196   : > { %6343 = vmatpush1.bf16.msra.mxu0 %v9371_v37  ;;  %5273 = vmatprep.subr.bf16.mxu1 %v9382_v38  ;;  %v9460_v37 = vld [vmem:[%s10321_s30 + $0x204] ss:$108 sps:$4 sm:$0xff]   ;;  %v9466_v38 = vld [vmem:[#allocation5 + $0x434] ss:$8 sps:$4 sm:$0xff]  }
 0x197   : > { %6344 = vmatprep.subr.bf16.mxu0 %v9385_v39  ;;  %v9469_v39 = vld [vmem:[#allocation5 + $0xb34] ss:$8 sps:$4 sm:$0xff]  }
 0x199   : > { %5274 = vmatpush1.bf16.msra.mxu1 %v9380_v40  ;;  %v9464_v40 = vld [vmem:[#allocation5 + $0x430] ss:$8 sps:$4 sm:$0xff]  }
 0x19a   : > { %6345 = vmatpush1.bf16.msra.mxu0 %v9383_v43  ;;  %5275 = vmatprep.subr.bf16.mxu1 %v9393_v45  ;;  %v9477_v43 = vld [vmem:[#allocation5 + $0x444] ss:$8 sps:$4 sm:$0xff]  }
 0x19b   : > { %6346 = vmatprep.subr.bf16.mxu0 %v9397_v46  ;;  %5191 = vmatmul.mubr.bf16.gmra.mrb[24].mxu1 %v9348_v41  ;;  %v9467_v41 = vld [vmem:[#allocation5 + $0xb30] ss:$8 sps:$4 sm:$0xff]   ;;  %v9481_v45 = vld [vmem:[#allocation5 + $0xb44] ss:$8 sps:$4 sm:$0xff]  }
 0x19c   : > { %6262 = vmatmul.mubr.bf16.gmra.mrb[24].mxu0 %v9352_v42  ;;  %5200 = vmatprep.mubr.bf16.mxu1 %v9359_v44  ;;  %v9462_v42 = vld [vmem:[%s10321_s30 + $0x1c8] ss:$108 sps:$4 sm:$0xff]   ;;  %v9463_v44 = vld [vmem:[%s10321_s30 + $0x200] ss:$108 sps:$4 sm:$0xff]   ;;  %v9470_v46 = vld [vmem:[%s10321_s30 + $0x2a4] ss:$108 sps:$4 sm:$0xff]  }
 0x19d   : > { %6271 = vmatprep.mubr.bf16.mxu0 %v9361_v47  ;;  %5276 = vmatpush1.bf16.msra.mxu1 %v9391_v48  ;;  %v9472_v47 = vld [vmem:[%s10321_s30 + $0x2dc] ss:$108 sps:$4 sm:$0xff]  }
 0x19e   : > { %6347 = vmatpush1.bf16.msra.mxu0 %v9395_v49  ;;  %5277 = vmatprep.subr.bf16.mxu1 %v9400_v50  ;;  %v9475_v48 = vld [vmem:[#allocation5 + $0x440] ss:$8 sps:$4 sm:$0xff]   ;;  %v9484_v50 = vld [vmem:[#allocation5 + $0x454] ss:$8 sps:$4 sm:$0xff]  }
 0x19f   : > { %6348 = vmatprep.subr.bf16.mxu0 %v9409_v51  ;;  %v9479_v49 = vld [vmem:[#allocation5 + $0xb40] ss:$8 sps:$4 sm:$0xff]   ;;  %v9493_v51 = vld [vmem:[#allocation5 + $0xb54] ss:$8 sps:$4 sm:$0xff]  }
 0x1a1   : > { %5278 = vmatpush1.bf16.msra.mxu1 %v9398_v52  ;;  %v9482_v52 = vld [vmem:[#allocation5 + $0x450] ss:$8 sps:$4 sm:$0xff]  }
 0x1a2   : > { %6349 = vmatpush1.bf16.msra.mxu0 %v9407_v55  ;;  %5279 = vmatprep.subr.bf16.mxu1 %v9412_v56  ;;  %v9496_v55 = vld [vmem:[#allocation5 + $0x464] ss:$8 sps:$4 sm:$0xff]  }
 0x1a3   : > { %6350 = vmatprep.subr.bf16.mxu0 %v9415_v57  ;;  %5201 = vmatmul.mubr.bf16.gmra.mrb[28].mxu1 %v9363_v53  ;;  %v9491_v53 = vld [vmem:[#allocation5 + $0xb50] ss:$8 sps:$4 sm:$0xff]   ;;  %v9499_v56 = vld [vmem:[#allocation5 + $0xb64] ss:$8 sps:$4 sm:$0xff]  }
 0x1a4   : > { %6272 = vmatmul.mubr.bf16.gmra.mrb[28].mxu0 %v9364_v54  ;;  %5210 = vmatprep.mubr.bf16.mxu1 %v9374_v58  ;;  %v9474_v54 = vld [vmem:[%s10321_s30 + $0x2a0] ss:$108 sps:$4 sm:$0xff]   ;;  %v9478_v57 = vld [vmem:[%s10321_s30 + $0x2d8] ss:$108 sps:$4 sm:$0xff]   ;;  %v9485_v58 = vld [vmem:[%s10321_s30 + $0x37c] ss:$108 sps:$4 sm:$0xff]  }
 0x1a5   : > { %6281 = vmatprep.mubr.bf16.mxu0 %v9376_v59  ;;  %5280 = vmatpush1.bf16.msra.mxu1 %v9410_v60  ;;  %v9487_v59 = vld [vmem:[%s10321_s30 + $0x3b4] ss:$108 sps:$4 sm:$0xff]  }
 0x1a6   : > { %6351 = vmatpush1.bf16.msra.mxu0 %v9413_v61  ;;  %5281 = vmatprep.subr.bf16.mxu1 %v9424_v62  ;;  %v9494_v60 = vld [vmem:[#allocation5 + $0x460] ss:$8 sps:$4 sm:$0xff]   ;;  %v9508_v62 = vld [vmem:[#allocation5 + $0x474] ss:$8 sps:$4 sm:$0xff]  }
 0x1a7   : > { %6352 = vmatprep.subr.bf16.mxu0 %v9427_v63  ;;  %v9497_v61 = vld [vmem:[#allocation5 + $0xb60] ss:$8 sps:$4 sm:$0xff]   ;;  %v9511_v63 = vld [vmem:[#allocation5 + $0xb74] ss:$8 sps:$4 sm:$0xff]  }
 0x1a9   : > { %5282 = vmatpush1.bf16.msra.mxu1 %v9422_v0  ;;  %v9506_v0 = vld [vmem:[#allocation5 + $0x470] ss:$8 sps:$4 sm:$0xff]  }
 0x1aa   : > { %6353 = vmatpush1.bf16.msra.mxu0 %v9425_v1  ;;  %5404 = vmatprep.subr.bf16.mxu1 %v9436_v2  ;;  %v9489_v1 = vld [vmem:[%s10321_s30 + $0x378] ss:$108 sps:$4 sm:$0xff]   ;;  %v9490_v2 = vld [vmem:[%s10321_s30 + $0x3b0] ss:$108 sps:$4 sm:$0xff]  }
 0x1ab   : > { %6475 = vmatprep.subr.bf16.mxu0 %v9439_v3  ;;  %5211 = vmatmul.mubr.bf16.gmra.mrb[32].mxu1 %v9378_v4  ;;  %v9509_v3 = vld [vmem:[#allocation5 + $0xb70] ss:$8 sps:$4 sm:$0xff]   ;;  %v9500_v4 = vld [vmem:[%s10321_s30 + $0x454] ss:$108 sps:$4 sm:$0xff]  }
 0x1ac   : > { %6282 = vmatmul.mubr.bf16.gmra.mrb[32].mxu0 %v9379_v5  ;;  %5220 = vmatprep.mubr.bf16.mxu1 %v9386_v6  ;;  %v9519_v5 = vld [vmem:[#allocation5 + $0x484] ss:$8 sps:$4 sm:$0xff]  }
 0x1ad   : > { %6291 = vmatprep.mubr.bf16.mxu0 %v9388_v7  ;;  %v9523_v6 = vld [vmem:[#allocation5 + $0xb84] ss:$8 sps:$4 sm:$0xff]  }
 0x1ae   : > { %v9502_v7 = vld [vmem:[%s10321_s30 + $0x48c] ss:$108 sps:$4 sm:$0xff]  }
 0x1b3   : > { %5221 = vmatmul.mubr.bf16.gmra.mrb[36].mxu1 %v9390_v8  ;;  %v9517_v8 = vld [vmem:[#allocation5 + $0x480] ss:$8 sps:$4 sm:$0xff]  }
 0x1b4   : > { %6292 = vmatmul.mubr.bf16.gmra.mrb[36].mxu0 %v9394_v9  ;;  %5230 = vmatprep.mubr.bf16.mxu1 %v9401_v10  ;;  %v9521_v9 = vld [vmem:[#allocation5 + $0xb80] ss:$8 sps:$4 sm:$0xff]   ;;  %v9526_v10 = vld [vmem:[#allocation5 + $0x494] ss:$8 sps:$4 sm:$0xff]  }
 0x1b5   : > { %6301 = vmatprep.mubr.bf16.mxu0 %v9403_v11  ;;  %v9535_v11 = vld [vmem:[#allocation5 + $0xb94] ss:$8 sps:$4 sm:$0xff]  }
 0x1bb   : > { %5231 = vmatmul.mubr.bf16.gmra.mrb[40].mxu1 %v9405_v12  ;;  %v9524_v12 = vld [vmem:[#allocation5 + $0x490] ss:$8 sps:$4 sm:$0xff]  }
 0x1bc   : > { %6302 = vmatmul.mubr.bf16.gmra.mrb[40].mxu0 %v9406_v13  ;;  %5240 = vmatprep.mubr.bf16.mxu1 %v9416_v14  ;;  %v9504_v13 = vld [vmem:[%s10321_s30 + $0x450] ss:$108 sps:$4 sm:$0xff]   ;;  %v9505_v14 = vld [vmem:[%s10321_s30 + $0x488] ss:$108 sps:$4 sm:$0xff]  }
 0x1bd   : > { %6311 = vmatprep.mubr.bf16.mxu0 %v9418_v15  ;;  %v9533_v15 = vld [vmem:[#allocation5 + $0xb90] ss:$8 sps:$4 sm:$0xff]  }
 0x1c3   : > { %5241 = vmatmul.mubr.bf16.gmra.mrb[44].mxu1 %v9420_v16  ;;  %v9538_v16 = vld [vmem:[#allocation5 + $0x4a4] ss:$8 sps:$4 sm:$0xff]  }
 0x1c4   : > { %6312 = vmatmul.mubr.bf16.gmra.mrb[44].mxu0 %v9421_v17  ;;  %5283 = vmatprep.mubr.bf16.mxu1 %v9430_v18  ;;  %v9541_v17 = vld [vmem:[#allocation5 + $0xba4] ss:$8 sps:$4 sm:$0xff]  }
 0x1c5   : > { %6354 = vmatprep.mubr.bf16.mxu0 %v9433_v19  ;;  %v9512_v18 = vld [vmem:[%s10321_s30 + $0x52c] ss:$108 sps:$4 sm:$0xff]   ;;  %v9514_v19 = vld [vmem:[%s10321_s30 + $0x564] ss:$108 sps:$4 sm:$0xff]  }
 0x1cb   : > { %5284 = vmatmul.mubr.bf16.vlgmr.msra.gmra.mrb[0].mxu1 %v9428_v20  ;;  %v9536_v20 = vld [vmem:[#allocation5 + $0x4a0] ss:$8 sps:$4 sm:$0xff]  }
 0x1cc   : > { %6355 = vmatmul.mubr.bf16.vlgmr.msra.gmra.mrb[0].mxu0 %v9431_v21  ;;  %5405 = vmatpush1.bf16.msra.mxu1 %v9434_v22  ;;  %v9539_v21 = vld [vmem:[#allocation5 + $0xba0] ss:$8 sps:$4 sm:$0xff]   ;;  %v9550_v22 = vld [vmem:[#allocation5 + $0x4b4] ss:$8 sps:$4 sm:$0xff]  }
 0x1cd   : > { %6476 = vmatpush1.bf16.msra.mxu0 %v9437_v23  ;;  %5406 = vmatprep.subr.bf16.mxu1 %v9442_v24  ;;  %v9553_v23 = vld [vmem:[#allocation5 + $0xbb4] ss:$8 sps:$4 sm:$0xff]   ;;  %v9548_v24 = vld [vmem:[#allocation5 + $0x4b0] ss:$8 sps:$4 sm:$0xff]  }
 0x1ce   : > { %5293 = vmatprep.mubr.bf16.mxu1 %v9443_v25  ;;  %6364 = vmatprep.mubr.bf16.mxu0 %v9445_v26  ;;  %v9551_v25 = vld [vmem:[#allocation5 + $0xbb0] ss:$8 sps:$4 sm:$0xff]   ;;  %v9516_v26 = vld [vmem:[%s10321_s30 + $0x528] ss:$108 sps:$4 sm:$0xff]  }
 0x1cf   : > { %6477 = vmatprep.subr.bf16.mxu0 %v9451_v27  ;;  %v9561_v27 = vld [vmem:[#allocation5 + $0x4c4] ss:$8 sps:$4 sm:$0xff]  }
 0x1d0   : > { %5407 = vmatpush1.bf16.msra.mxu1 %v9440_v28  ;;  %v9565_v28 = vld [vmem:[#allocation5 + $0xbc4] ss:$8 sps:$4 sm:$0xff]  }
 0x1d1   : > { %6478 = vmatpush1.bf16.msra.mxu0 %v9449_v29  ;;  %5408 = vmatprep.subr.bf16.mxu1 %v9454_v30  ;;  %v9520_v29 = vld [vmem:[%s10321_s30 + $0x560] ss:$108 sps:$4 sm:$0xff]   ;;  %v9527_v30 = vld [vmem:[%s10321_s30 + $0x604] ss:$108 sps:$4 sm:$0xff]  }
 0x1d2   : > { %6479 = vmatprep.subr.bf16.mxu0 %v9457_v32  ;;  %v9559_v32 = vld [vmem:[#allocation5 + $0x4c0] ss:$8 sps:$4 sm:$0xff]  }
 0x1d3   : > { %5294 = vmatmul.mubr.bf16.gmra.mrb[4].mxu1 %v9447_v31  ;;  %v9529_v31 = vld [vmem:[%s10321_s30 + $0x63c] ss:$108 sps:$4 sm:$0xff]  }
 0x1d4   : > { %6365 = vmatmul.mubr.bf16.gmra.mrb[4].mxu0 %v9448_v33  ;;  %5409 = vmatpush1.bf16.msra.mxu1 %v9452_v34  ;;  %v9563_v33 = vld [vmem:[#allocation5 + $0xbc0] ss:$8 sps:$4 sm:$0xff]   ;;  %v9568_v34 = vld [vmem:[#allocation5 + $0x4d4] ss:$8 sps:$4 sm:$0xff]  }
 0x1d5   : > { %5303 = vmatprep.mubr.bf16.mxu1 %v9458_v36  ;;  %6374 = vmatprep.mubr.bf16.mxu0 %v9460_v37  ;;  %v9566_v36 = vld [vmem:[#allocation5 + $0x4d0] ss:$8 sps:$4 sm:$0xff]   ;;  %v9531_v37 = vld [vmem:[%s10321_s30 + $0x600] ss:$108 sps:$4 sm:$0xff]  }
 0x1d6   : > { %6480 = vmatpush1.bf16.msra.mxu0 %v9455_v35  ;;  %5410 = vmatprep.subr.bf16.mxu1 %v9466_v38  ;;  %v9577_v35 = vld [vmem:[#allocation5 + $0xbd4] ss:$8 sps:$4 sm:$0xff]   ;;  %v9532_v38 = vld [vmem:[%s10321_s30 + $0x638] ss:$108 sps:$4 sm:$0xff]  }
 0x1d7   : > { %6481 = vmatprep.subr.bf16.mxu0 %v9469_v39  ;;  %v9575_v39 = vld [vmem:[#allocation5 + $0xbd0] ss:$8 sps:$4 sm:$0xff]  }
 0x1d8   : > { %5411 = vmatpush1.bf16.msra.mxu1 %v9464_v40  ;;  %v9580_v40 = vld [vmem:[#allocation5 + $0x4e4] ss:$8 sps:$4 sm:$0xff]  }
 0x1d9   : > { %5412 = vmatprep.subr.bf16.mxu1 %v9477_v43  ;;  %v9544_v43 = vld [vmem:[%s10321_s30 + $0x714] ss:$108 sps:$4 sm:$0xff]  }
 0x1da   : > { %6482 = vmatpush1.bf16.msra.mxu0 %v9467_v41  ;;  %v9583_v41 = vld [vmem:[#allocation5 + $0xbe4] ss:$8 sps:$4 sm:$0xff]  }
 0x1db   : > { %6483 = vmatprep.subr.bf16.mxu0 %v9481_v45  ;;  %5304 = vmatmul.mubr.bf16.gmra.mrb[8].mxu1 %v9462_v42  ;;  %v9542_v42 = vld [vmem:[%s10321_s30 + $0x6dc] ss:$108 sps:$4 sm:$0xff]  }
 0x1dc   : > { %6375 = vmatmul.mubr.bf16.gmra.mrb[8].mxu0 %v9463_v44  ;;  %5313 = vmatprep.mubr.bf16.mxu1 %v9470_v46  ;;  %v9578_v44 = vld [vmem:[#allocation5 + $0x4e0] ss:$8 sps:$4 sm:$0xff]   ;;  %v9592_v46 = vld [vmem:[#allocation5 + $0x4f4] ss:$8 sps:$4 sm:$0xff]  }
 0x1dd   : > { %6384 = vmatprep.mubr.bf16.mxu0 %v9472_v47  ;;  %5413 = vmatpush1.bf16.msra.mxu1 %v9475_v48  ;;  %v9581_v45 = vld [vmem:[#allocation5 + $0xbe0] ss:$8 sps:$4 sm:$0xff]   ;;  %v9595_v47 = vld [vmem:[#allocation5 + $0xbf4] ss:$8 sps:$4 sm:$0xff]   ;;  %v9590_v48 = vld [vmem:[#allocation5 + $0x4f0] ss:$8 sps:$4 sm:$0xff]  }
 0x1de   : > { %6484 = vmatpush1.bf16.msra.mxu0 %v9479_v49  ;;  %5414 = vmatprep.subr.bf16.mxu1 %v9484_v50  ;;  %v9546_v49 = vld [vmem:[%s10321_s30 + $0x6d8] ss:$108 sps:$4 sm:$0xff]  }
 0x1df   : > { %6485 = vmatprep.subr.bf16.mxu0 %v9493_v51  ;;  %v9593_v50 = vld [vmem:[#allocation5 + $0xbf0] ss:$8 sps:$4 sm:$0xff]   ;;  %v9604_v51 = vld [vmem:[#allocation5 + $0x504] ss:$8 sps:$4 sm:$0xff]  }
 0x1e1   : > { %5415 = vmatpush1.bf16.msra.mxu1 %v9482_v52  ;;  %v9607_v52 = vld [vmem:[#allocation5 + $0xc04] ss:$8 sps:$4 sm:$0xff]  }
 0x1e2   : > { %6486 = vmatpush1.bf16.msra.mxu0 %v9491_v53  ;;  %5416 = vmatprep.subr.bf16.mxu1 %v9496_v55  ;;  %v9547_v53 = vld [vmem:[%s10321_s30 + $0x710] ss:$108 sps:$4 sm:$0xff]   ;;  %v9556_v55 = vld [vmem:[%s10321_s30 + $0x7ec] ss:$108 sps:$4 sm:$0xff]  }
 0x1e3   : > { %6487 = vmatprep.subr.bf16.mxu0 %v9499_v56  ;;  %5314 = vmatmul.mubr.bf16.gmra.mrb[12].mxu1 %v9474_v54  ;;  %v9554_v54 = vld [vmem:[%s10321_s30 + $0x7b4] ss:$108 sps:$4 sm:$0xff]   ;;  %v9558_v56 = vld [vmem:[%s10321_s30 + $0x7b0] ss:$108 sps:$4 sm:$0xff]  }
 0x1e4   : > { %6385 = vmatmul.mubr.bf16.gmra.mrb[12].mxu0 %v9478_v57  ;;  %5323 = vmatprep.mubr.bf16.mxu1 %v9485_v58  ;;  %v9562_v57 = vld [vmem:[%s10321_s30 + $0x7e8] ss:$108 sps:$4 sm:$0xff]   ;;  %v9569_v58 = vld [vmem:[%s10321_s30 + $0x88c] ss:$108 sps:$4 sm:$0xff]  }
 0x1e5   : > { %6394 = vmatprep.mubr.bf16.mxu0 %v9487_v59  ;;  %5417 = vmatpush1.bf16.msra.mxu1 %v9494_v60  ;;  %v9571_v59 = vld [vmem:[%s10321_s30 + $0x8c4] ss:$108 sps:$4 sm:$0xff]   ;;  %v9573_v60 = vld [vmem:[%s10321_s30 + $0x888] ss:$108 sps:$4 sm:$0xff]  }
 0x1e6   : > { %6488 = vmatpush1.bf16.msra.mxu0 %v9497_v61  ;;  %5418 = vmatprep.subr.bf16.mxu1 %v9508_v62  ;;  %v9574_v61 = vld [vmem:[%s10321_s30 + $0x8c0] ss:$108 sps:$4 sm:$0xff]   ;;  %v9584_v62 = vld [vmem:[%s10321_s30 + $0x964] ss:$108 sps:$4 sm:$0xff]  }
 0x1e7   : > { %6489 = vmatprep.subr.bf16.mxu0 %v9511_v63  ;;  %v9586_v63 = vld [vmem:[%s10321_s30 + $0x99c] ss:$108 sps:$4 sm:$0xff]  }
 0x1e9   : > { %5419 = vmatpush1.bf16.msra.mxu1 %v9506_v0  ;;  %v9588_v0 = vld [vmem:[%s10321_s30 + $0x960] ss:$108 sps:$4 sm:$0xff]  }
 0x1ea   : > { %6490 = vmatpush1.bf16.msra.mxu0 %v9509_v3  ;;  %5420 = vmatprep.subr.bf16.mxu1 %v9519_v5  ;;  %v9601_v3 = vld [vmem:[%s10321_s30 + $0x5c] ss:$108 sps:$4 sm:$0xff]   ;;  %v9599_v5 = vld [vmem:[%s10321_s30 + $0x58] ss:$108 sps:$4 sm:$0xff]  }
 0x1eb   : > { %6491 = vmatprep.subr.bf16.mxu0 %v9523_v6  ;;  %5324 = vmatmul.mubr.bf16.gmra.mrb[16].mxu1 %v9489_v1  ;;  %v9589_v1 = vld [vmem:[%s10321_s30 + $0x998] ss:$108 sps:$4 sm:$0xff]   ;;  %v9602_v6 = vld [vmem:[#allocation5 + $0x500] ss:$8 sps:$4 sm:$0xff]  }
 0x1ec   : > { %6395 = vmatmul.mubr.bf16.gmra.mrb[16].mxu0 %v9490_v2  ;;  %5333 = vmatprep.mubr.bf16.mxu1 %v9500_v4  ;;  %v9598_v2 = vld [vmem:[%s10321_s30 + $0x24] ss:$108 sps:$4 sm:$0xff]   ;;  %v9596_v4 = vld [vmem:[%s10321_s30 + $0x20] ss:$108 sps:$4 sm:$0xff]  }
 0x1ed   : > { %6404 = vmatprep.mubr.bf16.mxu0 %v9502_v7  ;;  %5421 = vmatpush1.bf16.msra.mxu1 %v9517_v8  ;;  %v9605_v7 = vld [vmem:[#allocation5 + $0xc00] ss:$8 sps:$4 sm:$0xff]   ;;  %v9610_v8 = vld [vmem:[#allocation5 + $0x514] ss:$8 sps:$4 sm:$0xff]  }
 0x1ee   : > { %6492 = vmatpush1.bf16.msra.mxu0 %v9521_v9  ;;  %5422 = vmatprep.subr.bf16.mxu1 %v9526_v10  ;;  %v9611_v9 = vld [vmem:[%s10321_s30 + $0xfc] ss:$108 sps:$4 sm:$0xff]   ;;  %v9613_v10 = vld [vmem:[%s10321_s30 + $0x134] ss:$108 sps:$4 sm:$0xff]  }
 0x1ef   : > { %6493 = vmatprep.subr.bf16.mxu0 %v9535_v11  ;;  %v9619_v11 = vld [vmem:[#allocation5 + $0xc14] ss:$8 sps:$4 sm:$0xff]  }
 0x1f1   : > { %5423 = vmatpush1.bf16.msra.mxu1 %v9524_v12  ;;  %v9608_v12 = vld [vmem:[#allocation5 + $0x510] ss:$8 sps:$4 sm:$0xff]  }
 0x1f2   : > { %6494 = vmatpush1.bf16.msra.mxu0 %v9533_v15  ;;  %5424 = vmatprep.subr.bf16.mxu1 %v9538_v16  ;;  %v9615_v15 = vld [vmem:[%s10321_s30 + $0xf8] ss:$108 sps:$4 sm:$0xff]   ;;  %v9616_v16 = vld [vmem:[%s10321_s30 + $0x130] ss:$108 sps:$4 sm:$0xff]  }
 0x1f3   : > { %6495 = vmatprep.subr.bf16.mxu0 %v9541_v17  ;;  %5334 = vmatmul.mubr.bf16.gmra.mrb[20].mxu1 %v9504_v13  ;;  %v9617_v13 = vld [vmem:[#allocation5 + $0xc10] ss:$8 sps:$4 sm:$0xff]   ;;  %v9625_v17 = vld [vmem:[#allocation5 + $0xc24] ss:$8 sps:$4 sm:$0xff]  }
 0x1f4   : > { %6405 = vmatmul.mubr.bf16.gmra.mrb[20].mxu0 %v9505_v14  ;;  %5343 = vmatprep.mubr.bf16.mxu1 %v9512_v18  ;;  %v9622_v14 = vld [vmem:[#allocation5 + $0x524] ss:$8 sps:$4 sm:$0xff]   ;;  %v9620_v18 = vld [vmem:[#allocation5 + $0x520] ss:$8 sps:$4 sm:$0xff]  }
 0x1f5   : > { %6414 = vmatprep.mubr.bf16.mxu0 %v9514_v19  ;;  %5425 = vmatpush1.bf16.msra.mxu1 %v9536_v20  ;;  %v9626_v19 = vld [vmem:[%s10321_s30 + $0x1d4] ss:$108 sps:$4 sm:$0xff]  }
 0x1f6   : > { %6496 = vmatpush1.bf16.msra.mxu0 %v9539_v21  ;;  %5426 = vmatprep.subr.bf16.mxu1 %v9550_v22  ;;  %v9623_v20 = vld [vmem:[#allocation5 + $0xc20] ss:$8 sps:$4 sm:$0xff]   ;;  %v9628_v21 = vld [vmem:[%s10321_s30 + $0x20c] ss:$108 sps:$4 sm:$0xff]   ;;  %v9634_v22 = vld [vmem:[#allocation5 + $0x534] ss:$8 sps:$4 sm:$0xff]  }
 0x1f7   : > { %6497 = vmatprep.subr.bf16.mxu0 %v9553_v23  ;;  %v9637_v23 = vld [vmem:[#allocation5 + $0xc34] ss:$8 sps:$4 sm:$0xff]  }
 0x1f9   : > { %5427 = vmatpush1.bf16.msra.mxu1 %v9548_v24  ;;  %v9632_v24 = vld [vmem:[#allocation5 + $0x530] ss:$8 sps:$4 sm:$0xff]  }
 0x1fa   : > { %6498 = vmatpush1.bf16.msra.mxu0 %v9551_v25  ;;  %5428 = vmatprep.subr.bf16.mxu1 %v9561_v27  ;;  %v9635_v25 = vld [vmem:[#allocation5 + $0xc30] ss:$8 sps:$4 sm:$0xff]   ;;  %v9649_v27 = vld [vmem:[#allocation5 + $0xc44] ss:$8 sps:$4 sm:$0xff]  }
 0x1fb   : > { %6499 = vmatprep.subr.bf16.mxu0 %v9565_v28  ;;  %5344 = vmatmul.mubr.bf16.gmra.mrb[24].mxu1 %v9516_v26  ;;  %v9645_v26 = vld [vmem:[#allocation5 + $0x544] ss:$8 sps:$4 sm:$0xff]   ;;  %v9630_v28 = vld [vmem:[%s10321_s30 + $0x1d0] ss:$108 sps:$4 sm:$0xff]  }
 0x1fc   : > { %6415 = vmatmul.mubr.bf16.gmra.mrb[24].mxu0 %v9520_v29  ;;  %5353 = vmatprep.mubr.bf16.mxu1 %v9527_v30  ;;  %v9631_v29 = vld [vmem:[%s10321_s30 + $0x208] ss:$108 sps:$4 sm:$0xff]   ;;  %v9638_v30 = vld [vmem:[%s10321_s30 + $0x2ac] ss:$108 sps:$4 sm:$0xff]  }
 0x1fd   : > { %6424 = vmatprep.mubr.bf16.mxu0 %v9529_v31  ;;  %5429 = vmatpush1.bf16.msra.mxu1 %v9559_v32  ;;  %v9640_v31 = vld [vmem:[%s10321_s30 + $0x2e4] ss:$108 sps:$4 sm:$0xff]   ;;  %v9643_v32 = vld [vmem:[#allocation5 + $0x540] ss:$8 sps:$4 sm:$0xff]  }
 0x1fe   : > { %6500 = vmatpush1.bf16.msra.mxu0 %v9563_v33  ;;  %5430 = vmatprep.subr.bf16.mxu1 %v9568_v34  ;;  %v9647_v33 = vld [vmem:[#allocation5 + $0xc40] ss:$8 sps:$4 sm:$0xff]   ;;  %v9652_v34 = vld [vmem:[#allocation5 + $0x554] ss:$8 sps:$4 sm:$0xff]  }
 0x1ff   : > { %6501 = vmatprep.subr.bf16.mxu0 %v9577_v35  ;;  %v9661_v35 = vld [vmem:[#allocation5 + $0xc54] ss:$8 sps:$4 sm:$0xff]  }
 0x201   : > { %5431 = vmatpush1.bf16.msra.mxu1 %v9566_v36  ;;  %v9650_v36 = vld [vmem:[#allocation5 + $0x550] ss:$8 sps:$4 sm:$0xff]  }
 0x202   : > { %6502 = vmatpush1.bf16.msra.mxu0 %v9575_v39  ;;  %5432 = vmatprep.subr.bf16.mxu1 %v9580_v40  ;;  %v9659_v39 = vld [vmem:[#allocation5 + $0xc50] ss:$8 sps:$4 sm:$0xff]   ;;  %v9664_v40 = vld [vmem:[#allocation5 + $0x564] ss:$8 sps:$4 sm:$0xff]  }
 0x203   : > { %6503 = vmatprep.subr.bf16.mxu0 %v9583_v41  ;;  %5354 = vmatmul.mubr.bf16.gmra.mrb[28].mxu1 %v9531_v37  ;;  %v9642_v37 = vld [vmem:[%s10321_s30 + $0x2a8] ss:$108 sps:$4 sm:$0xff]   ;;  %v9667_v41 = vld [vmem:[#allocation5 + $0xc64] ss:$8 sps:$4 sm:$0xff]  }
 0x204   : > { %6425 = vmatmul.mubr.bf16.gmra.mrb[28].mxu0 %v9532_v38  ;;  %5363 = vmatprep.mubr.bf16.mxu1 %v9542_v42  ;;  %v9646_v38 = vld [vmem:[%s10321_s30 + $0x2e0] ss:$108 sps:$4 sm:$0xff]   ;;  %v9653_v42 = vld [vmem:[%s10321_s30 + $0x384] ss:$108 sps:$4 sm:$0xff]  }
 0x205   : > { %6434 = vmatprep.mubr.bf16.mxu0 %v9544_v43  ;;  %5433 = vmatpush1.bf16.msra.mxu1 %v9578_v44  ;;  %v9655_v43 = vld [vmem:[%s10321_s30 + $0x3bc] ss:$108 sps:$4 sm:$0xff]  }
 0x206   : > { %6504 = vmatpush1.bf16.msra.mxu0 %v9581_v45  ;;  %5434 = vmatprep.subr.bf16.mxu1 %v9592_v46  ;;  %v9662_v44 = vld [vmem:[#allocation5 + $0x560] ss:$8 sps:$4 sm:$0xff]   ;;  %v9676_v46 = vld [vmem:[#allocation5 + $0x574] ss:$8 sps:$4 sm:$0xff]  }
 0x207   : > { %6505 = vmatprep.subr.bf16.mxu0 %v9595_v47  ;;  %v9665_v45 = vld [vmem:[#allocation5 + $0xc60] ss:$8 sps:$4 sm:$0xff]   ;;  %v9679_v47 = vld [vmem:[#allocation5 + $0xc74] ss:$8 sps:$4 sm:$0xff]  }
 0x209   : > { %5435 = vmatpush1.bf16.msra.mxu1 %v9590_v48  ;;  %v9674_v48 = vld [vmem:[#allocation5 + $0x570] ss:$8 sps:$4 sm:$0xff]  }
 0x20a   : > { %6506 = vmatpush1.bf16.msra.mxu0 %v9593_v50  ;;  %5557 = vmatprep.subr.bf16.mxu1 %v9604_v51  ;;  %v9687_v50 = vld [vmem:[#allocation5 + $0x584] ss:$8 sps:$4 sm:$0xff]  }
 0x20b   : > { %6628 = vmatprep.subr.bf16.mxu0 %v9607_v52  ;;  %5364 = vmatmul.mubr.bf16.gmra.mrb[32].mxu1 %v9546_v49  ;;  %v9677_v49 = vld [vmem:[#allocation5 + $0xc70] ss:$8 sps:$4 sm:$0xff]   ;;  %v9657_v51 = vld [vmem:[%s10321_s30 + $0x380] ss:$108 sps:$4 sm:$0xff]  }
 0x20c   : > { %6435 = vmatmul.mubr.bf16.gmra.mrb[32].mxu0 %v9547_v53  ;;  %5373 = vmatprep.mubr.bf16.mxu1 %v9554_v54  ;;  %v9658_v52 = vld [vmem:[%s10321_s30 + $0x3b8] ss:$108 sps:$4 sm:$0xff]   ;;  %v9668_v54 = vld [vmem:[%s10321_s30 + $0x45c] ss:$108 sps:$4 sm:$0xff]  }
 0x20d   : > { %6444 = vmatprep.mubr.bf16.mxu0 %v9556_v55  ;;  %v9691_v53 = vld [vmem:[#allocation5 + $0xc84] ss:$8 sps:$4 sm:$0xff]   ;;  %v9670_v55 = vld [vmem:[%s10321_s30 + $0x494] ss:$108 sps:$4 sm:$0xff]  }
 0x213   : > { %5374 = vmatmul.mubr.bf16.gmra.mrb[36].mxu1 %v9558_v56  ;;  %v9685_v56 = vld [vmem:[#allocation5 + $0x580] ss:$8 sps:$4 sm:$0xff]  }
 0x214   : > { %6445 = vmatmul.mubr.bf16.gmra.mrb[36].mxu0 %v9562_v57  ;;  %5383 = vmatprep.mubr.bf16.mxu1 %v9569_v58  ;;  %v9689_v57 = vld [vmem:[#allocation5 + $0xc80] ss:$8 sps:$4 sm:$0xff]   ;;  %v9694_v58 = vld [vmem:[#allocation5 + $0x594] ss:$8 sps:$4 sm:$0xff]  }
 0x215   : > { %6454 = vmatprep.mubr.bf16.mxu0 %v9571_v59  ;;  %v9703_v59 = vld [vmem:[#allocation5 + $0xc94] ss:$8 sps:$4 sm:$0xff]  }
 0x21b   : > { %5384 = vmatmul.mubr.bf16.gmra.mrb[40].mxu1 %v9573_v60  ;;  %v9692_v60 = vld [vmem:[#allocation5 + $0x590] ss:$8 sps:$4 sm:$0xff]  }
 0x21c   : > { %6455 = vmatmul.mubr.bf16.gmra.mrb[40].mxu0 %v9574_v61  ;;  %5393 = vmatprep.mubr.bf16.mxu1 %v9584_v62  ;;  %v9701_v61 = vld [vmem:[#allocation5 + $0xc90] ss:$8 sps:$4 sm:$0xff]   ;;  %v9706_v62 = vld [vmem:[#allocation5 + $0x5a4] ss:$8 sps:$4 sm:$0xff]  }
 0x21d   : > { %6464 = vmatprep.mubr.bf16.mxu0 %v9586_v63  ;;  %v9709_v63 = vld [vmem:[#allocation5 + $0xca4] ss:$8 sps:$4 sm:$0xff]  }
 0x223   : > { %5394 = vmatmul.mubr.bf16.gmra.mrb[44].mxu1 %v9588_v0  ;;  %v9672_v0 = vld [vmem:[%s10321_s30 + $0x458] ss:$108 sps:$4 sm:$0xff]  }
 0x224   : > { %6465 = vmatmul.mubr.bf16.gmra.mrb[44].mxu0 %v9589_v1  ;;  %5436 = vmatprep.mubr.bf16.mxu1 %v9598_v2  ;;  %v9673_v1 = vld [vmem:[%s10321_s30 + $0x490] ss:$108 sps:$4 sm:$0xff]   ;;  %v9680_v2 = vld [vmem:[%s10321_s30 + $0x534] ss:$108 sps:$4 sm:$0xff]  }
 0x225   : > { %6507 = vmatprep.mubr.bf16.mxu0 %v9601_v3  ;;  %v9682_v3 = vld [vmem:[%s10321_s30 + $0x56c] ss:$108 sps:$4 sm:$0xff]  }
 0x22b   : > { %5437 = vmatmul.mubr.bf16.vlgmr.msra.gmra.mrb[0].mxu1 %v9596_v4  ;;  %v9704_v4 = vld [vmem:[#allocation5 + $0x5a0] ss:$8 sps:$4 sm:$0xff]  }
 0x22c   : > { %6508 = vmatmul.mubr.bf16.vlgmr.msra.gmra.mrb[0].mxu0 %v9599_v5  ;;  %5558 = vmatpush1.bf16.msra.mxu1 %v9602_v6  ;;  %v9707_v5 = vld [vmem:[#allocation5 + $0xca0] ss:$8 sps:$4 sm:$0xff]   ;;  %v9718_v6 = vld [vmem:[#allocation5 + $0x5b4] ss:$8 sps:$4 sm:$0xff]  }
 0x22d   : > { %6629 = vmatpush1.bf16.msra.mxu0 %v9605_v7  ;;  %5559 = vmatprep.subr.bf16.mxu1 %v9610_v8  ;;  %v9721_v7 = vld [vmem:[#allocation5 + $0xcb4] ss:$8 sps:$4 sm:$0xff]   ;;  %v9716_v8 = vld [vmem:[#allocation5 + $0x5b0] ss:$8 sps:$4 sm:$0xff]  }
 0x22e   : > { %5446 = vmatprep.mubr.bf16.mxu1 %v9611_v9  ;;  %6517 = vmatprep.mubr.bf16.mxu0 %v9613_v10  ;;  %v9719_v9 = vld [vmem:[#allocation5 + $0xcb0] ss:$8 sps:$4 sm:$0xff]   ;;  %v9729_v10 = vld [vmem:[#allocation5 + $0x5c4] ss:$8 sps:$4 sm:$0xff]  }
 0x22f   : > { %6630 = vmatprep.subr.bf16.mxu0 %v9619_v11  ;;  %v9733_v11 = vld [vmem:[#allocation5 + $0xcc4] ss:$8 sps:$4 sm:$0xff]  }
 0x230   : > { %5560 = vmatpush1.bf16.msra.mxu1 %v9608_v12  ;;  %v9684_v12 = vld [vmem:[%s10321_s30 + $0x530] ss:$108 sps:$4 sm:$0xff]  }
 0x231   : > { %6631 = vmatpush1.bf16.msra.mxu0 %v9617_v13  ;;  %5561 = vmatprep.subr.bf16.mxu1 %v9622_v14  ;;  %v9688_v13 = vld [vmem:[%s10321_s30 + $0x568] ss:$108 sps:$4 sm:$0xff]   ;;  %v9695_v14 = vld [vmem:[%s10321_s30 + $0x60c] ss:$108 sps:$4 sm:$0xff]  }
 0x232   : > { %6632 = vmatprep.subr.bf16.mxu0 %v9625_v17  ;;  %v9731_v17 = vld [vmem:[#allocation5 + $0xcc0] ss:$8 sps:$4 sm:$0xff]  }
 0x233   : > { %5447 = vmatmul.mubr.bf16.gmra.mrb[4].mxu1 %v9615_v15  ;;  %v9697_v15 = vld [vmem:[%s10321_s30 + $0x644] ss:$108 sps:$4 sm:$0xff]  }
 0x234   : > { %6518 = vmatmul.mubr.bf16.gmra.mrb[4].mxu0 %v9616_v16  ;;  %5562 = vmatpush1.bf16.msra.mxu1 %v9620_v18  ;;  %v9727_v16 = vld [vmem:[#allocation5 + $0x5c0] ss:$8 sps:$4 sm:$0xff]   ;;  %v9736_v18 = vld [vmem:[#allocation5 + $0x5d4] ss:$8 sps:$4 sm:$0xff]  }
 0x235   : > { %5456 = vmatprep.mubr.bf16.mxu1 %v9626_v19  ;;  %6527 = vmatprep.mubr.bf16.mxu0 %v9628_v21  ;;  %v9745_v19 = vld [vmem:[#allocation5 + $0xcd4] ss:$8 sps:$4 sm:$0xff]   ;;  %v9743_v21 = vld [vmem:[#allocation5 + $0xcd0] ss:$8 sps:$4 sm:$0xff]  }
 0x236   : > { %6633 = vmatpush1.bf16.msra.mxu0 %v9623_v20  ;;  %5563 = vmatprep.subr.bf16.mxu1 %v9634_v22  ;;  %v9734_v20 = vld [vmem:[#allocation5 + $0x5d0] ss:$8 sps:$4 sm:$0xff]   ;;  %v9748_v22 = vld [vmem:[#allocation5 + $0x5e4] ss:$8 sps:$4 sm:$0xff]  }
 0x237   : > { %6634 = vmatprep.subr.bf16.mxu0 %v9637_v23  ;;  %v9751_v23 = vld [vmem:[#allocation5 + $0xce4] ss:$8 sps:$4 sm:$0xff]  }
 0x238   : > { %5564 = vmatpush1.bf16.msra.mxu1 %v9632_v24  ;;  %v9699_v24 = vld [vmem:[%s10321_s30 + $0x608] ss:$108 sps:$4 sm:$0xff]  }
 0x239   : > { %5565 = vmatprep.subr.bf16.mxu1 %v9645_v26  ;;  %v9710_v26 = vld [vmem:[%s10321_s30 + $0x6e4] ss:$108 sps:$4 sm:$0xff]  }
 0x23a   : > { %6635 = vmatpush1.bf16.msra.mxu0 %v9635_v25  ;;  %v9700_v25 = vld [vmem:[%s10321_s30 + $0x640] ss:$108 sps:$4 sm:$0xff]  }
 0x23b   : > { %6636 = vmatprep.subr.bf16.mxu0 %v9649_v27  ;;  %5457 = vmatmul.mubr.bf16.gmra.mrb[8].mxu1 %v9630_v28  ;;  %v9712_v27 = vld [vmem:[%s10321_s30 + $0x71c] ss:$108 sps:$4 sm:$0xff]  }
 0x23c   : > { %6528 = vmatmul.mubr.bf16.gmra.mrb[8].mxu0 %v9631_v29  ;;  %5466 = vmatprep.mubr.bf16.mxu1 %v9638_v30  ;;  %v9746_v28 = vld [vmem:[#allocation5 + $0x5e0] ss:$8 sps:$4 sm:$0xff]   ;;  %v9760_v30 = vld [vmem:[#allocation5 + $0x5f4] ss:$8 sps:$4 sm:$0xff]  }
 0x23d   : > { %6537 = vmatprep.mubr.bf16.mxu0 %v9640_v31  ;;  %5566 = vmatpush1.bf16.msra.mxu1 %v9643_v32  ;;  %v9749_v29 = vld [vmem:[#allocation5 + $0xce0] ss:$8 sps:$4 sm:$0xff]   ;;  %v9763_v31 = vld [vmem:[#allocation5 + $0xcf4] ss:$8 sps:$4 sm:$0xff]   ;;  %v9758_v32 = vld [vmem:[#allocation5 + $0x5f0] ss:$8 sps:$4 sm:$0xff]  }
 0x23e   : > { %6637 = vmatpush1.bf16.msra.mxu0 %v9647_v33  ;;  %5567 = vmatprep.subr.bf16.mxu1 %v9652_v34  ;;  %v9761_v33 = vld [vmem:[#allocation5 + $0xcf0] ss:$8 sps:$4 sm:$0xff]   ;;  %v9772_v34 = vld [vmem:[#allocation5 + $0x604] ss:$8 sps:$4 sm:$0xff]  }
 0x23f   : > { %6638 = vmatprep.subr.bf16.mxu0 %v9661_v35  ;;  %v9775_v35 = vld [vmem:[#allocation5 + $0xd04] ss:$8 sps:$4 sm:$0xff]  }
 0x241   : > { %5568 = vmatpush1.bf16.msra.mxu1 %v9650_v36  ;;  %v9714_v36 = vld [vmem:[%s10321_s30 + $0x6e0] ss:$108 sps:$4 sm:$0xff]  }
 0x242   : > { %6639 = vmatpush1.bf16.msra.mxu0 %v9659_v39  ;;  %5569 = vmatprep.subr.bf16.mxu1 %v9664_v40  ;;  %v9724_v39 = vld [vmem:[%s10321_s30 + $0x7f4] ss:$108 sps:$4 sm:$0xff]   ;;  %v9726_v40 = vld [vmem:[%s10321_s30 + $0x7b8] ss:$108 sps:$4 sm:$0xff]  }
 0x243   : > { %6640 = vmatprep.subr.bf16.mxu0 %v9667_v41  ;;  %5467 = vmatmul.mubr.bf16.gmra.mrb[12].mxu1 %v9642_v37  ;;  %v9715_v37 = vld [vmem:[%s10321_s30 + $0x718] ss:$108 sps:$4 sm:$0xff]   ;;  %v9730_v41 = vld [vmem:[%s10321_s30 + $0x7f0] ss:$108 sps:$4 sm:$0xff]  }
 0x244   : > { %6538 = vmatmul.mubr.bf16.gmra.mrb[12].mxu0 %v9646_v38  ;;  %5476 = vmatprep.mubr.bf16.mxu1 %v9653_v42  ;;  %v9722_v38 = vld [vmem:[%s10321_s30 + $0x7bc] ss:$108 sps:$4 sm:$0xff]   ;;  %v9737_v42 = vld [vmem:[%s10321_s30 + $0x894] ss:$108 sps:$4 sm:$0xff]  }
 0x245   : > { %6547 = vmatprep.mubr.bf16.mxu0 %v9655_v43  ;;  %5570 = vmatpush1.bf16.msra.mxu1 %v9662_v44  ;;  %v9739_v43 = vld [vmem:[%s10321_s30 + $0x8cc] ss:$108 sps:$4 sm:$0xff]   ;;  %v9741_v44 = vld [vmem:[%s10321_s30 + $0x890] ss:$108 sps:$4 sm:$0xff]  }
 0x246   : > { %6641 = vmatpush1.bf16.msra.mxu0 %v9665_v45  ;;  %5571 = vmatprep.subr.bf16.mxu1 %v9676_v46  ;;  %v9742_v45 = vld [vmem:[%s10321_s30 + $0x8c8] ss:$108 sps:$4 sm:$0xff]   ;;  %v9752_v46 = vld [vmem:[%s10321_s30 + $0x96c] ss:$108 sps:$4 sm:$0xff]  }
 0x247   : > { %6642 = vmatprep.subr.bf16.mxu0 %v9679_v47  ;;  %v9754_v47 = vld [vmem:[%s10321_s30 + $0x9a4] ss:$108 sps:$4 sm:$0xff]  }
 0x249   : > { %5572 = vmatpush1.bf16.msra.mxu1 %v9674_v48  ;;  %v9756_v48 = vld [vmem:[%s10321_s30 + $0x968] ss:$108 sps:$4 sm:$0xff]  }
 0x24a   : > { %6643 = vmatpush1.bf16.msra.mxu0 %v9677_v49  ;;  %5573 = vmatprep.subr.bf16.mxu1 %v9687_v50  ;;  %v9757_v49 = vld [vmem:[%s10321_s30 + $0x9a0] ss:$108 sps:$4 sm:$0xff]  }
 0x24b   : > { %6644 = vmatprep.subr.bf16.mxu0 %v9691_v53  ;;  %5477 = vmatmul.mubr.bf16.gmra.mrb[16].mxu1 %v9657_v51  ;;  %v9766_v50 = vld [vmem:[%s10321_s30 + $0x2c] ss:$108 sps:$4 sm:$0xff]   ;;  %v9769_v51 = vld [vmem:[%s10321_s30 + $0x64] ss:$108 sps:$4 sm:$0xff]  }
 0x24c   : > { %6548 = vmatmul.mubr.bf16.gmra.mrb[16].mxu0 %v9658_v52  ;;  %5486 = vmatprep.mubr.bf16.mxu1 %v9668_v54  ;;  %v9764_v52 = vld [vmem:[%s10321_s30 + $0x28] ss:$108 sps:$4 sm:$0xff]   ;;  %v9767_v53 = vld [vmem:[%s10321_s30 + $0x60] ss:$108 sps:$4 sm:$0xff]  }
 0x24d   : > { %6557 = vmatprep.mubr.bf16.mxu0 %v9670_v55  ;;  %5574 = vmatpush1.bf16.msra.mxu1 %v9685_v56  ;;  %v9770_v54 = vld [vmem:[#allocation5 + $0x600] ss:$8 sps:$4 sm:$0xff]   ;;  %v9778_v56 = vld [vmem:[#allocation5 + $0x614] ss:$8 sps:$4 sm:$0xff]  }
 0x24e   : > { %6645 = vmatpush1.bf16.msra.mxu0 %v9689_v57  ;;  %5575 = vmatprep.subr.bf16.mxu1 %v9694_v58  ;;  %v9773_v55 = vld [vmem:[#allocation5 + $0xd00] ss:$8 sps:$4 sm:$0xff]   ;;  %v9779_v57 = vld [vmem:[%s10321_s30 + $0x104] ss:$108 sps:$4 sm:$0xff]  }
 0x24f   : > { %6646 = vmatprep.subr.bf16.mxu0 %v9703_v59  ;;  %v9781_v58 = vld [vmem:[%s10321_s30 + $0x13c] ss:$108 sps:$4 sm:$0xff]  }
 0x250   : > { %v9790_v59 = vld [vmem:[#allocation5 + $0xd14] ss:$8 sps:$4 sm:$0xff]  }
 0x251   : > { %5576 = vmatpush1.bf16.msra.mxu1 %v9692_v60  ;;  %v9776_v60 = vld [vmem:[#allocation5 + $0x610] ss:$8 sps:$4 sm:$0xff]  }
 0x252   : > { %6647 = vmatpush1.bf16.msra.mxu0 %v9701_v61  ;;  %5577 = vmatprep.subr.bf16.mxu1 %v9706_v62  ;;  %v9788_v61 = vld [vmem:[#allocation5 + $0xd10] ss:$8 sps:$4 sm:$0xff]   ;;  %v9787_v62 = vld [vmem:[#allocation5 + $0x624] ss:$8 sps:$4 sm:$0xff]  }
 0x253   : > { %6648 = vmatprep.subr.bf16.mxu0 %v9709_v63  ;;  %5487 = vmatmul.mubr.bf16.gmra.mrb[20].mxu1 %v9672_v0  ;;  %v9811_v63 = vld [vmem:[#allocation5 + $0xd24] ss:$8 sps:$4 sm:$0xff]  }
 0x254   : > { %6558 = vmatmul.mubr.bf16.gmra.mrb[20].mxu0 %v9673_v1  ;;  %5496 = vmatprep.mubr.bf16.mxu1 %v9680_v2  ;;  %v9783_v0 = vld [vmem:[%s10321_s30 + $0x100] ss:$108 sps:$4 sm:$0xff]   ;;  %v9784_v1 = vld [vmem:[%s10321_s30 + $0x138] ss:$108 sps:$4 sm:$0xff]  }
 0x255   : > { %6567 = vmatprep.mubr.bf16.mxu0 %v9682_v3  ;;  %5578 = vmatpush1.bf16.msra.mxu1 %v9704_v4  ;;  %v9785_v2 = vld [vmem:[#allocation5 + $0x620] ss:$8 sps:$4 sm:$0xff]  }
 0x256   : > { %6649 = vmatpush1.bf16.msra.mxu0 %v9707_v5  ;;  %5579 = vmatprep.subr.bf16.mxu1 %v9718_v6  ;;  %v9791_v3 = vld [vmem:[%s10321_s30 + $0x1dc] ss:$108 sps:$4 sm:$0xff]   ;;  %v9793_v4 = vld [vmem:[%s10321_s30 + $0x214] ss:$108 sps:$4 sm:$0xff]  }
 0x257   : > { %6650 = vmatprep.subr.bf16.mxu0 %v9721_v7  ;;  %v9799_v5 = vld [vmem:[#allocation5 + $0x634] ss:$8 sps:$4 sm:$0xff]   ;;  %v9809_v6 = vld [vmem:[#allocation5 + $0xd20] ss:$8 sps:$4 sm:$0xff]  }
 0x258   : > { %v9826_v7 = vld [vmem:[#allocation5 + $0xd34] ss:$8 sps:$4 sm:$0xff]  }
 0x259   : > { %5580 = vmatpush1.bf16.msra.mxu1 %v9716_v8  ;;  %v9797_v8 = vld [vmem:[#allocation5 + $0x630] ss:$8 sps:$4 sm:$0xff]  }
 0x25a   : > { %6651 = vmatpush1.bf16.msra.mxu0 %v9719_v9  ;;  %5581 = vmatprep.subr.bf16.mxu1 %v9729_v10  ;;  %v9807_v9 = vld [vmem:[#allocation5 + $0x644] ss:$8 sps:$4 sm:$0xff]   ;;  %v9824_v10 = vld [vmem:[#allocation5 + $0xd30] ss:$8 sps:$4 sm:$0xff]  }
 0x25b   : > { %6652 = vmatprep.subr.bf16.mxu0 %v9733_v11  ;;  %5497 = vmatmul.mubr.bf16.gmra.mrb[24].mxu1 %v9684_v12  ;;  %v9795_v11 = vld [vmem:[%s10321_s30 + $0x1d8] ss:$108 sps:$4 sm:$0xff]   ;;  %v9796_v12 = vld [vmem:[%s10321_s30 + $0x210] ss:$108 sps:$4 sm:$0xff]  }
 0x25c   : > { %6568 = vmatmul.mubr.bf16.gmra.mrb[24].mxu0 %v9688_v13  ;;  %5506 = vmatprep.mubr.bf16.mxu1 %v9695_v14  ;;  %v9800_v13 = vld [vmem:[%s10321_s30 + $0x2b4] ss:$108 sps:$4 sm:$0xff]   ;;  %v9802_v14 = vld [vmem:[%s10321_s30 + $0x2ec] ss:$108 sps:$4 sm:$0xff]  }
 0x25d   : > { %6577 = vmatprep.mubr.bf16.mxu0 %v9697_v15  ;;  %5582 = vmatpush1.bf16.msra.mxu1 %v9727_v16  ;;  %v9805_v15 = vld [vmem:[#allocation5 + $0x640] ss:$8 sps:$4 sm:$0xff]   ;;  %v9847_v16 = vld [vmem:[#allocation5 + $0xd44] ss:$8 sps:$4 sm:$0xff]  }
 0x25e   : > { %6653 = vmatpush1.bf16.msra.mxu0 %v9731_v17  ;;  %5583 = vmatprep.subr.bf16.mxu1 %v9736_v18  ;;  %v9814_v17 = vld [vmem:[#allocation5 + $0x654] ss:$8 sps:$4 sm:$0xff]   ;;  %v9845_v18 = vld [vmem:[#allocation5 + $0xd40] ss:$8 sps:$4 sm:$0xff]  }
 0x25f   : > { %6654 = vmatprep.subr.bf16.mxu0 %v9745_v19  ;;  %v9862_v19 = vld [vmem:[#allocation5 + $0xd54] ss:$8 sps:$4 sm:$0xff]  }
 0x261   : > { %5584 = vmatpush1.bf16.msra.mxu1 %v9734_v20  ;;  %v9812_v20 = vld [vmem:[#allocation5 + $0x650] ss:$8 sps:$4 sm:$0xff]  }
 0x262   : > { %6655 = vmatpush1.bf16.msra.mxu0 %v9743_v21  ;;  %5585 = vmatprep.subr.bf16.mxu1 %v9748_v22  ;;  %v9823_v21 = vld [vmem:[#allocation5 + $0x664] ss:$8 sps:$4 sm:$0xff]   ;;  %v9860_v22 = vld [vmem:[#allocation5 + $0xd50] ss:$8 sps:$4 sm:$0xff]  }
 0x263   : > { %6656 = vmatprep.subr.bf16.mxu0 %v9751_v23  ;;  %5507 = vmatmul.mubr.bf16.gmra.mrb[28].mxu1 %v9699_v24  ;;  %v9804_v23 = vld [vmem:[%s10321_s30 + $0x2b0] ss:$108 sps:$4 sm:$0xff]   ;;  %v9808_v24 = vld [vmem:[%s10321_s30 + $0x2e8] ss:$108 sps:$4 sm:$0xff]  }
 0x264   : > { %6578 = vmatmul.mubr.bf16.gmra.mrb[28].mxu0 %v9700_v25  ;;  %5516 = vmatprep.mubr.bf16.mxu1 %v9710_v26  ;;  %v9815_v25 = vld [vmem:[%s10321_s30 + $0x38c] ss:$108 sps:$4 sm:$0xff]   ;;  %v9817_v26 = vld [vmem:[%s10321_s30 + $0x3c4] ss:$108 sps:$4 sm:$0xff]  }
 0x265   : > { %6587 = vmatprep.mubr.bf16.mxu0 %v9712_v27  ;;  %5586 = vmatpush1.bf16.msra.mxu1 %v9746_v28  ;;  %v9821_v27 = vld [vmem:[#allocation5 + $0x660] ss:$8 sps:$4 sm:$0xff]   ;;  %v9883_v28 = vld [vmem:[#allocation5 + $0xd64] ss:$8 sps:$4 sm:$0xff]  }
 0x266   : > { %6657 = vmatpush1.bf16.msra.mxu0 %v9749_v29  ;;  %5587 = vmatprep.subr.bf16.mxu1 %v9760_v30  ;;  %v9835_v29 = vld [vmem:[#allocation5 + $0x674] ss:$8 sps:$4 sm:$0xff]   ;;  %v9881_v30 = vld [vmem:[#allocation5 + $0xd60] ss:$8 sps:$4 sm:$0xff]  }
 0x267   : > { %6658 = vmatprep.subr.bf16.mxu0 %v9763_v31  ;;  %v9898_v31 = vld [vmem:[#allocation5 + $0xd74] ss:$8 sps:$4 sm:$0xff]  }
 0x269   : > { %5588 = vmatpush1.bf16.msra.mxu1 %v9758_v32  ;;  %v9833_v32 = vld [vmem:[#allocation5 + $0x670] ss:$8 sps:$4 sm:$0xff]  }
 0x26a   : > { %6659 = vmatpush1.bf16.msra.mxu0 %v9761_v33  ;;  %5710 = vmatprep.subr.bf16.mxu1 %v9772_v34  ;;  %v9843_v33 = vld [vmem:[#allocation5 + $0x684] ss:$8 sps:$4 sm:$0xff]   ;;  %v9896_v34 = vld [vmem:[#allocation5 + $0xd70] ss:$8 sps:$4 sm:$0xff]  }
 0x26b   : > { %6781 = vmatprep.subr.bf16.mxu0 %v9775_v35  ;;  %5517 = vmatmul.mubr.bf16.gmra.mrb[32].mxu1 %v9714_v36  ;;  %v9819_v35 = vld [vmem:[%s10321_s30 + $0x388] ss:$108 sps:$4 sm:$0xff]   ;;  %v9820_v36 = vld [vmem:[%s10321_s30 + $0x3c0] ss:$108 sps:$4 sm:$0xff]  }
 0x26c   : > { %6588 = vmatmul.mubr.bf16.gmra.mrb[32].mxu0 %v9715_v37  ;;  %5526 = vmatprep.mubr.bf16.mxu1 %v9722_v38  ;;  %v9827_v37 = vld [vmem:[%s10321_s30 + $0x464] ss:$108 sps:$4 sm:$0xff]   ;;  %v9829_v38 = vld [vmem:[%s10321_s30 + $0x49c] ss:$108 sps:$4 sm:$0xff]  }
 0x26d   : > { %6597 = vmatprep.mubr.bf16.mxu0 %v9724_v39  ;;  %v9841_v39 = vld [vmem:[#allocation5 + $0x680] ss:$8 sps:$4 sm:$0xff]  }
 0x273   : > { %5527 = vmatmul.mubr.bf16.gmra.mrb[36].mxu1 %v9726_v40  ;;  %v9850_v40 = vld [vmem:[#allocation5 + $0x694] ss:$8 sps:$4 sm:$0xff]  }
 0x274   : > { %6598 = vmatmul.mubr.bf16.gmra.mrb[36].mxu0 %v9730_v41  ;;  %5536 = vmatprep.mubr.bf16.mxu1 %v9737_v42  ;;  %v9848_v41 = vld [vmem:[#allocation5 + $0x690] ss:$8 sps:$4 sm:$0xff]   ;;  %v9859_v42 = vld [vmem:[#allocation5 + $0x6a4] ss:$8 sps:$4 sm:$0xff]  }
 0x275   : > { %6607 = vmatprep.mubr.bf16.mxu0 %v9739_v43  ;;  %v9831_v43 = vld [vmem:[%s10321_s30 + $0x460] ss:$108 sps:$4 sm:$0xff]  }
 0x27b   : > { %5537 = vmatmul.mubr.bf16.gmra.mrb[40].mxu1 %v9741_v44  ;;  %v9832_v44 = vld [vmem:[%s10321_s30 + $0x498] ss:$108 sps:$4 sm:$0xff]  }
 0x27c   : > { %6608 = vmatmul.mubr.bf16.gmra.mrb[40].mxu0 %v9742_v45  ;;  %5546 = vmatprep.mubr.bf16.mxu1 %v9752_v46  ;;  %v9836_v45 = vld [vmem:[%s10321_s30 + $0x53c] ss:$108 sps:$4 sm:$0xff]   ;;  %v9838_v46 = vld [vmem:[%s10321_s30 + $0x574] ss:$108 sps:$4 sm:$0xff]  }
 0x27d   : > { %6617 = vmatprep.mubr.bf16.mxu0 %v9754_v47  ;;  %v9857_v47 = vld [vmem:[#allocation5 + $0x6a0] ss:$8 sps:$4 sm:$0xff]  }
 0x283   : > { %5547 = vmatmul.mubr.bf16.gmra.mrb[44].mxu1 %v9756_v48  ;;  %v9871_v48 = vld [vmem:[#allocation5 + $0x6b4] ss:$8 sps:$4 sm:$0xff]  }
 0x284   : > { %6618 = vmatmul.mubr.bf16.gmra.mrb[44].mxu0 %v9757_v49  ;;  %5589 = vmatprep.mubr.bf16.mxu1 %v9766_v50  ;;  %v9869_v49 = vld [vmem:[#allocation5 + $0x6b0] ss:$8 sps:$4 sm:$0xff]   ;;  %v9879_v50 = vld [vmem:[#allocation5 + $0x6c4] ss:$8 sps:$4 sm:$0xff]  }
 0x285   : > { %6660 = vmatprep.mubr.bf16.mxu0 %v9769_v51  ;;  %v9840_v51 = vld [vmem:[%s10321_s30 + $0x538] ss:$108 sps:$4 sm:$0xff]  }
 0x28b   : > { %5590 = vmatmul.mubr.bf16.vlgmr.msra.gmra.mrb[0].mxu1 %v9764_v52  ;;  %v9844_v52 = vld [vmem:[%s10321_s30 + $0x570] ss:$108 sps:$4 sm:$0xff]  }
 0x28c   : > { %6661 = vmatmul.mubr.bf16.vlgmr.msra.gmra.mrb[0].mxu0 %v9767_v53  ;;  %5711 = vmatpush1.bf16.msra.mxu1 %v9770_v54  ;;  %v9851_v53 = vld [vmem:[%s10321_s30 + $0x614] ss:$108 sps:$4 sm:$0xff]   ;;  %v9853_v54 = vld [vmem:[%s10321_s30 + $0x64c] ss:$108 sps:$4 sm:$0xff]  }
 0x28d   : > { %6782 = vmatpush1.bf16.msra.mxu0 %v9773_v55  ;;  %5712 = vmatprep.subr.bf16.mxu1 %v9778_v56  ;;  %v9877_v55 = vld [vmem:[#allocation5 + $0x6c0] ss:$8 sps:$4 sm:$0xff]   ;;  %v9886_v56 = vld [vmem:[#allocation5 + $0x6d4] ss:$8 sps:$4 sm:$0xff]  }
 0x28e   : > { %5599 = vmatprep.mubr.bf16.mxu1 %v9779_v57  ;;  %6670 = vmatprep.mubr.bf16.mxu0 %v9781_v58  ;;  %v9884_v57 = vld [vmem:[#allocation5 + $0x6d0] ss:$8 sps:$4 sm:$0xff]   ;;  %v9895_v58 = vld [vmem:[#allocation5 + $0x6e4] ss:$8 sps:$4 sm:$0xff]  }
 0x28f   : > { %6783 = vmatprep.subr.bf16.mxu0 %v9790_v59  ;;  %v9855_v59 = vld [vmem:[%s10321_s30 + $0x610] ss:$108 sps:$4 sm:$0xff]  }
 0x290   : > { %5713 = vmatpush1.bf16.msra.mxu1 %v9776_v60  ;;  %v9856_v60 = vld [vmem:[%s10321_s30 + $0x648] ss:$108 sps:$4 sm:$0xff]  }
 0x291   : > { %6784 = vmatpush1.bf16.msra.mxu0 %v9788_v61  ;;  %5714 = vmatprep.subr.bf16.mxu1 %v9787_v62  ;;  %v9863_v61 = vld [vmem:[%s10321_s30 + $0x6ec] ss:$108 sps:$4 sm:$0xff]   ;;  %v9865_v62 = vld [vmem:[%s10321_s30 + $0x724] ss:$108 sps:$4 sm:$0xff]  }
 0x292   : > { %6785 = vmatprep.subr.bf16.mxu0 %v9811_v63  ;;  %v9893_v63 = vld [vmem:[#allocation5 + $0x6e0] ss:$8 sps:$4 sm:$0xff]  }
 0x293   : > { %5600 = vmatmul.mubr.bf16.gmra.mrb[4].mxu1 %v9783_v0  ;;  %v9907_v0 = vld [vmem:[#allocation5 + $0x6f4] ss:$8 sps:$4 sm:$0xff]  }
 0x294   : > { %6671 = vmatmul.mubr.bf16.gmra.mrb[4].mxu0 %v9784_v1  ;;  %5715 = vmatpush1.bf16.msra.mxu1 %v9785_v2  ;;  %v9905_v1 = vld [vmem:[#allocation5 + $0x6f0] ss:$8 sps:$4 sm:$0xff]   ;;  %v9867_v2 = vld [vmem:[%s10321_s30 + $0x6e8] ss:$108 sps:$4 sm:$0xff]  }
 0x295   : > { %5609 = vmatprep.mubr.bf16.mxu1 %v9791_v3  ;;  %6680 = vmatprep.mubr.bf16.mxu0 %v9793_v4  ;;  %v9868_v3 = vld [vmem:[%s10321_s30 + $0x720] ss:$108 sps:$4 sm:$0xff]   ;;  %v9872_v4 = vld [vmem:[%s10321_s30 + $0x7c4] ss:$108 sps:$4 sm:$0xff]  }
 0x296   : > { %5716 = vmatprep.subr.bf16.mxu1 %v9799_v5  ;;  %6786 = vmatpush1.bf16.msra.mxu0 %v9809_v6  ;;  %v9874_v5 = vld [vmem:[%s10321_s30 + $0x7fc] ss:$108 sps:$4 sm:$0xff]   ;;  %v9876_v6 = vld [vmem:[%s10321_s30 + $0x7c0] ss:$108 sps:$4 sm:$0xff]  }
 0x297   : > { %6787 = vmatprep.subr.bf16.mxu0 %v9826_v7  ;;  %v9880_v7 = vld [vmem:[%s10321_s30 + $0x7f8] ss:$108 sps:$4 sm:$0xff]  }
 0x298   : > { %5717 = vmatpush1.bf16.msra.mxu1 %v9797_v8  ;;  %v9887_v8 = vld [vmem:[%s10321_s30 + $0x89c] ss:$108 sps:$4 sm:$0xff]  }
 0x299   : > { %5718 = vmatprep.subr.bf16.mxu1 %v9807_v9  ;;  %v9889_v9 = vld [vmem:[%s10321_s30 + $0x8d4] ss:$108 sps:$4 sm:$0xff]  }
 0x29a   : > { %6788 = vmatpush1.bf16.msra.mxu0 %v9824_v10  ;;  %v9891_v10 = vld [vmem:[%s10321_s30 + $0x898] ss:$108 sps:$4 sm:$0xff]  }
 0x29b   : > { %5610 = vmatmul.mubr.bf16.gmra.mrb[8].mxu1 %v9795_v11  ;;  %6789 = vmatprep.subr.bf16.mxu0 %v9847_v16  ;;  %v9892_v11 = vld [vmem:[%s10321_s30 + $0x8d0] ss:$108 sps:$4 sm:$0xff]   ;;  %v9910_v16 = vld [vmem:[%s10321_s30 + $0x34] ss:$108 sps:$4 sm:$0xff]  }
 0x29c   : > { %6681 = vmatmul.mubr.bf16.gmra.mrb[8].mxu0 %v9796_v12  ;;  %5619 = vmatprep.mubr.bf16.mxu1 %v9800_v13  ;;  %v9899_v12 = vld [vmem:[%s10321_s30 + $0x974] ss:$108 sps:$4 sm:$0xff]   ;;  %v9901_v13 = vld [vmem:[%s10321_s30 + $0x9ac] ss:$108 sps:$4 sm:$0xff]  }
 0x29d   : > { %6690 = vmatprep.mubr.bf16.mxu0 %v9802_v14  ;;  %5719 = vmatpush1.bf16.msra.mxu1 %v9805_v15  ;;  %v9903_v14 = vld [vmem:[%s10321_s30 + $0x970] ss:$108 sps:$4 sm:$0xff]   ;;  %v9904_v15 = vld [vmem:[%s10321_s30 + $0x9a8] ss:$108 sps:$4 sm:$0xff]  }
 0x29e   : > { %5720 = vmatprep.subr.bf16.mxu1 %v9814_v17  ;;  %6790 = vmatpush1.bf16.msra.mxu0 %v9845_v18  ;;  %v10121_v17 = vmov 0   ;;  %v9908_v18 = vld [vmem:[%s10321_s30 + $0x30] ss:$108 sps:$4 sm:$0xff]  }
 0x29f   : > { %6791 = vmatprep.subr.bf16.mxu0 %v9862_v19  ;;  %v9911_v19 = vld [vmem:[%s10321_s30 + $0x68] ss:$108 sps:$4 sm:$0xff]  }
 0x2a1   : > { %5721 = vmatpush1.bf16.msra.mxu1 %v9812_v20  ;;  %v9912_v20 = vld [vmem:[%s10321_s30 + $0x10c] ss:$108 sps:$4 sm:$0xff]  }
 0x2a2   : > { %5722 = vmatprep.subr.bf16.mxu1 %v9823_v21  ;;  %6792 = vmatpush1.bf16.msra.mxu0 %v9860_v22  ;;  %v9914_v21 = vld [vmem:[%s10321_s30 + $0x108] ss:$108 sps:$4 sm:$0xff]   ;;  %v9915_v22 = vld [vmem:[%s10321_s30 + $0x140] ss:$108 sps:$4 sm:$0xff]  }
 0x2a3   : > { %5620 = vmatmul.mubr.bf16.gmra.mrb[12].mxu1 %v9804_v23  ;;  %6793 = vmatprep.subr.bf16.mxu0 %v9883_v28  ;;  %v9916_v23 = vld [vmem:[%s10321_s30 + $0x1e4] ss:$108 sps:$4 sm:$0xff]  }
 0x2a4   : > { %6691 = vmatmul.mubr.bf16.gmra.mrb[12].mxu0 %v9808_v24  ;;  %5629 = vmatprep.mubr.bf16.mxu1 %v9815_v25  ;;  %v9918_v24 = vld [vmem:[%s10321_s30 + $0x1e0] ss:$108 sps:$4 sm:$0xff]   ;;  %v9919_v25 = vld [vmem:[%s10321_s30 + $0x218] ss:$108 sps:$4 sm:$0xff]   ;;  %v9923_v28 = vld [vmem:[%s10321_s30 + $0x2f0] ss:$108 sps:$4 sm:$0xff]  }
 0x2a5   : > { %6700 = vmatprep.mubr.bf16.mxu0 %v9817_v26  ;;  %5723 = vmatpush1.bf16.msra.mxu1 %v9821_v27  ;;  %v9920_v26 = vld [vmem:[%s10321_s30 + $0x2bc] ss:$108 sps:$4 sm:$0xff]   ;;  %v9922_v27 = vld [vmem:[%s10321_s30 + $0x2b8] ss:$108 sps:$4 sm:$0xff]  }
 0x2a6   : > { %5724 = vmatprep.subr.bf16.mxu1 %v9835_v29  ;;  %6794 = vmatpush1.bf16.msra.mxu0 %v9881_v30  ;;  %v9924_v29 = vld [vmem:[%s10321_s30 + $0x394] ss:$108 sps:$4 sm:$0xff]   ;;  %v9926_v30 = vld [vmem:[%s10321_s30 + $0x390] ss:$108 sps:$4 sm:$0xff]  }
 0x2a7   : > { %6795 = vmatprep.subr.bf16.mxu0 %v9898_v31  ;;  %v9927_v31 = vld [vmem:[%s10321_s30 + $0x3c8] ss:$108 sps:$4 sm:$0xff]  }
 0x2a9   : > { %5725 = vmatpush1.bf16.msra.mxu1 %v9833_v32  ;;  %v9928_v32 = vld [vmem:[%s10321_s30 + $0x46c] ss:$108 sps:$4 sm:$0xff]  }
 0x2aa   : > { %5726 = vmatprep.subr.bf16.mxu1 %v9843_v33  ;;  %6796 = vmatpush1.bf16.msra.mxu0 %v9896_v34  ;;  %v9930_v33 = vld [vmem:[%s10321_s30 + $0x468] ss:$108 sps:$4 sm:$0xff]   ;;  %v9931_v34 = vld [vmem:[%s10321_s30 + $0x4a0] ss:$108 sps:$4 sm:$0xff]  }
 0x2ab   : > { %5630 = vmatmul.mubr.bf16.gmra.mrb[16].mxu1 %v9819_v35  ;;  %v9932_v35 = vld [vmem:[%s10321_s30 + $0x544] ss:$108 sps:$4 sm:$0xff]  }
 0x2ac   : > { %6701 = vmatmul.mubr.bf16.gmra.mrb[16].mxu0 %v9820_v36  ;;  %5639 = vmatprep.mubr.bf16.mxu1 %v9827_v37  ;;  %v9934_v36 = vld [vmem:[%s10321_s30 + $0x540] ss:$108 sps:$4 sm:$0xff]   ;;  %v9935_v37 = vld [vmem:[%s10321_s30 + $0x578] ss:$108 sps:$4 sm:$0xff]  }
 0x2ad   : > { %6710 = vmatprep.mubr.bf16.mxu0 %v9829_v38  ;;  %5727 = vmatpush1.bf16.msra.mxu1 %v9841_v39  ;;  %v9936_v38 = vld [vmem:[%s10321_s30 + $0x61c] ss:$108 sps:$4 sm:$0xff]   ;;  %v9938_v39 = vld [vmem:[%s10321_s30 + $0x618] ss:$108 sps:$4 sm:$0xff]  }
 0x2ae   : > { %5728 = vmatprep.subr.bf16.mxu1 %v9850_v40  ;;  %v9939_v40 = vld [vmem:[%s10321_s30 + $0x650] ss:$108 sps:$4 sm:$0xff]  }
 0x2b1   : > { %5729 = vmatpush1.bf16.msra.mxu1 %v9848_v41  ;;  %v9940_v41 = vld [vmem:[%s10321_s30 + $0x6f4] ss:$108 sps:$4 sm:$0xff]  }
 0x2b2   : > { %5730 = vmatprep.subr.bf16.mxu1 %v9859_v42  ;;  %v9942_v42 = vld [vmem:[%s10321_s30 + $0x6f0] ss:$108 sps:$4 sm:$0xff]  }
 0x2b3   : > { %5640 = vmatmul.mubr.bf16.gmra.mrb[20].mxu1 %v9831_v43  ;;  %v9943_v43 = vld [vmem:[%s10321_s30 + $0x728] ss:$108 sps:$4 sm:$0xff]  }
 0x2b4   : > { %6711 = vmatmul.mubr.bf16.gmra.mrb[20].mxu0 %v9832_v44  ;;  %5649 = vmatprep.mubr.bf16.mxu1 %v9836_v45  ;;  %v9944_v44 = vld [vmem:[%s10321_s30 + $0x7cc] ss:$108 sps:$4 sm:$0xff]   ;;  %v9946_v45 = vld [vmem:[%s10321_s30 + $0x7c8] ss:$108 sps:$4 sm:$0xff]  }
 0x2b5   : > { %6720 = vmatprep.mubr.bf16.mxu0 %v9838_v46  ;;  %5731 = vmatpush1.bf16.msra.mxu1 %v9857_v47  ;;  %v9947_v46 = vld [vmem:[%s10321_s30 + $0x800] ss:$108 sps:$4 sm:$0xff]   ;;  %v9948_v47 = vld [vmem:[%s10321_s30 + $0x8a4] ss:$108 sps:$4 sm:$0xff]  }
 0x2b6   : > { %5732 = vmatprep.subr.bf16.mxu1 %v9871_v48  ;;  %v9950_v48 = vld [vmem:[%s10321_s30 + $0x8a0] ss:$108 sps:$4 sm:$0xff]  }
 0x2b9   : > { %5733 = vmatpush1.bf16.msra.mxu1 %v9869_v49  ;;  %v9951_v49 = vld [vmem:[%s10321_s30 + $0x8d8] ss:$108 sps:$4 sm:$0xff]  }
 0x2ba   : > { %5734 = vmatprep.subr.bf16.mxu1 %v9879_v50  ;;  %v9952_v50 = vld [vmem:[%s10321_s30 + $0x97c] ss:$108 sps:$4 sm:$0xff]  }
 0x2bb   : > { %5650 = vmatmul.mubr.bf16.gmra.mrb[24].mxu1 %v9840_v51  ;;  %v9954_v51 = vld [vmem:[%s10321_s30 + $0x978] ss:$108 sps:$4 sm:$0xff]  }
 0x2bc   : > { %6721 = vmatmul.mubr.bf16.gmra.mrb[24].mxu0 %v9844_v52  ;;  %5659 = vmatprep.mubr.bf16.mxu1 %v9851_v53  ;;  %v9955_v52 = vld [vmem:[%s10321_s30 + $0x9b0] ss:$108 sps:$4 sm:$0xff]   ;;  %v990_v53 = vlaneseq }
 0x2bd   : > { %6730 = vmatprep.mubr.bf16.mxu0 %v9853_v54  ;;  %5735 = vmatpush1.bf16.msra.mxu1 %v9877_v55 }
 0x2be   : > { %5736 = vmatprep.subr.bf16.mxu1 %v9886_v56  ;;  %v991_v54 = vshrl.u32 %v990_v53, 7  ;;  %v988_v56 = vld [vmem:[#allocation7] sm:$0x3] }
 0x2c0   : > { %v992_v55 = vsub.s32 0, %v991_v54 }
 0x2c1   : > { %5737 = vmatpush1.bf16.msra.mxu1 %v9884_v57  ;;  %v996_v57 = vsub.s32 1, %v991_v54 }
 0x2c2   : > { %5738 = vmatprep.subr.bf16.mxu1 %v9895_v58  ;;  %v10667_v58 = vrot.slane %v988_v56, %v992_v55 }
 0x2c3   : > { %5660 = vmatmul.mubr.bf16.gmra.mrb[28].mxu1 %v9855_v59  ;;  %v10669_v59 = vrot.slane %v988_v56, %v996_v57 }
 0x2c4   : > { %6731 = vmatmul.mubr.bf16.gmra.mrb[28].mxu0 %v9856_v60  ;;  %5669 = vmatprep.mubr.bf16.mxu1 %v9863_v61 }
 0x2c5   : > { %6740 = vmatprep.mubr.bf16.mxu0 %v9865_v62  ;;  %5739 = vmatpush1.bf16.msra.mxu1 %v9893_v63 }
 0x2c6   : > { %5740 = vmatprep.subr.bf16.mxu1 %v9907_v0 }
 0x2c9   : > { %5741 = vmatpush1.bf16.msra.mxu1 %v9905_v1 }
 0x2cb   : > { %5670 = vmatmul.mubr.bf16.gmra.mrb[32].mxu1 %v9867_v2 }
 0x2cc   : > { %6741 = vmatmul.mubr.bf16.gmra.mrb[32].mxu0 %v9868_v3  ;;  %5679 = vmatprep.mubr.bf16.mxu1 %v9872_v4 }
 0x2cd   : > { %6750 = vmatprep.mubr.bf16.mxu0 %v9874_v5 }
 0x2d3   : > { %5680 = vmatmul.mubr.bf16.gmra.mrb[36].mxu1 %v9876_v6 }
 0x2d4   : > { %6751 = vmatmul.mubr.bf16.gmra.mrb[36].mxu0 %v9880_v7  ;;  %5689 = vmatprep.mubr.bf16.mxu1 %v9887_v8 }
 0x2d5   : > { %6760 = vmatprep.mubr.bf16.mxu0 %v9889_v9 }
 0x2db   : > { %5690 = vmatmul.mubr.bf16.gmra.mrb[40].mxu1 %v9891_v10 }
 0x2dc   : > { %6761 = vmatmul.mubr.bf16.gmra.mrb[40].mxu0 %v9892_v11  ;;  %5699 = vmatprep.mubr.bf16.mxu1 %v9899_v12 }
 0x2dd   : > { %6770 = vmatprep.mubr.bf16.mxu0 %v9901_v13 }
 0x2e3   : > { %5700 = vmatmul.mubr.bf16.gmra.mrb[44].mxu1 %v9903_v14 }
 0x2e4   : > { %6771 = vmatmul.mubr.bf16.gmra.mrb[44].mxu0 %v9904_v15  ;;  %5742 = vmatprep.mubr.bf16.mxu1 %v9910_v16 }
 0x2e5   : > { %6813 = vmatprep.mubr.bf16.mxu0 %v10121_v17 }
 0x2eb   : > { %5743 = vmatmul.mubr.bf16.vlgmr.msra.gmra.mrb[0].mxu1 %v9908_v18 }
 0x2ec   : > { %6814 = vmatmul.mubr.bf16.vlgmr.msra.gmra.mrb[0].mxu0 %v9911_v19  ;;  %5752 = vmatprep.mubr.bf16.mxu1 %v9912_v20 }
 0x2ed   : > { %6823 = vmatprep.mubr.bf16.mxu0 %v10121_v17 }
 0x2f3   : > { %5753 = vmatmul.mubr.bf16.gmra.mrb[4].mxu1 %v9914_v21 }
 0x2f4   : > { %6824 = vmatmul.mubr.bf16.gmra.mrb[4].mxu0 %v9915_v22  ;;  %5762 = vmatprep.mubr.bf16.mxu1 %v9916_v23 }
 0x2f5   : > { %6833 = vmatprep.mubr.bf16.mxu0 %v10121_v17 }
 0x2fb   : > { %5763 = vmatmul.mubr.bf16.gmra.mrb[8].mxu1 %v9918_v24 }
 0x2fc   : > { %6834 = vmatmul.mubr.bf16.gmra.mrb[8].mxu0 %v9919_v25  ;;  %5772 = vmatprep.mubr.bf16.mxu1 %v9920_v26 }
 0x2fd   : > { %6843 = vmatprep.mubr.bf16.mxu0 %v10121_v17 }
 0x303   : > { %5773 = vmatmul.mubr.bf16.gmra.mrb[12].mxu1 %v9922_v27 }
 0x304   : > { %6844 = vmatmul.mubr.bf16.gmra.mrb[12].mxu0 %v9923_v28  ;;  %5782 = vmatprep.mubr.bf16.mxu1 %v9924_v29 }
 0x305   : > { %6853 = vmatprep.mubr.bf16.mxu0 %v10121_v17 }
 0x30b   : > { %5783 = vmatmul.mubr.bf16.gmra.mrb[16].mxu1 %v9926_v30 }
 0x30c   : > { %6854 = vmatmul.mubr.bf16.gmra.mrb[16].mxu0 %v9927_v31  ;;  %5792 = vmatprep.mubr.bf16.mxu1 %v9928_v32 }
 0x30d   : > { %6863 = vmatprep.mubr.bf16.mxu0 %v10121_v17 }
 0x313   : > { %5793 = vmatmul.mubr.bf16.gmra.mrb[20].mxu1 %v9930_v33 }
 0x314   : > { %6864 = vmatmul.mubr.bf16.gmra.mrb[20].mxu0 %v9931_v34  ;;  %5802 = vmatprep.mubr.bf16.mxu1 %v9932_v35 }
 0x315   : > { %6873 = vmatprep.mubr.bf16.mxu0 %v10121_v17 }
 0x31b   : > { %5803 = vmatmul.mubr.bf16.gmra.mrb[24].mxu1 %v9934_v36 }
 0x31c   : > { %6874 = vmatmul.mubr.bf16.gmra.mrb[24].mxu0 %v9935_v37  ;;  %5812 = vmatprep.mubr.bf16.mxu1 %v9936_v38 }
 0x31d   : > { %6883 = vmatprep.mubr.bf16.mxu0 %v10121_v17 }
 0x323   : > { %5813 = vmatmul.mubr.bf16.gmra.mrb[28].mxu1 %v9938_v39 }
 0x324   : > { %6884 = vmatmul.mubr.bf16.gmra.mrb[28].mxu0 %v9939_v40  ;;  %5822 = vmatprep.mubr.bf16.mxu1 %v9940_v41 }
 0x325   : > { %6893 = vmatprep.mubr.bf16.mxu0 %v10121_v17 }
 0x32b   : > { %5823 = vmatmul.mubr.bf16.gmra.mrb[32].mxu1 %v9942_v42 }
 0x32c   : > { %6894 = vmatmul.mubr.bf16.gmra.mrb[32].mxu0 %v9943_v43  ;;  %5832 = vmatprep.mubr.bf16.mxu1 %v9944_v44 }
 0x32d   : > { %6903 = vmatprep.mubr.bf16.mxu0 %v10121_v17 }
 0x333   : > { %5833 = vmatmul.mubr.bf16.gmra.mrb[36].mxu1 %v9946_v45 }
 0x334   : > { %6904 = vmatmul.mubr.bf16.gmra.mrb[36].mxu0 %v9947_v46  ;;  %5842 = vmatprep.mubr.bf16.mxu1 %v9948_v47 }
 0x335   : > { %6913 = vmatprep.mubr.bf16.mxu0 %v10121_v17 }
 0x33b   : > { %5843 = vmatmul.mubr.bf16.gmra.mrb[40].mxu1 %v9950_v48 }
 0x33c   : > { %6914 = vmatmul.mubr.bf16.gmra.mrb[40].mxu0 %v9951_v49  ;;  %5852 = vmatprep.mubr.bf16.mxu1 %v9952_v50 }
 0x33d   : > { %6923 = vmatprep.mubr.bf16.mxu0 %v10121_v17 }
 0x343   : > { %5853 = vmatmul.mubr.bf16.gmra.mrb[44].mxu1 %v9954_v51 }
 0x344   : > { %6924 = vmatmul.mubr.bf16.gmra.mrb[44].mxu0 %v9955_v52 }
 0x3be   : > { %v5744_v60 = vpop.f32.mrb[0].mxu1 }
 0x3bf   : > { %v6815_v61 = vpop.f32.mrb[0].mxu0  ;;  %v8077_v62 = vadd.f32 %v5744_v60, %v10667_v58  ;;  %v5746_v63 = vpop.f32.mrb[1].mxu1 }
 0x3c0   : > { %v6817_v0 = vpop.f32.mrb[1].mxu0  ;;  %v8079_v1 = vadd.f32 %v5746_v63, %v10669_v59  ;;  %v5748_v2 = vpop.f32.mrb[2].mxu1 }
 0x3c1   : > { %v6819_v3 = vpop.f32.mrb[2].mxu0  ;;  %v8078_v4 = vadd.f32 %v8077_v62, %v6815_v61  ;;  %v8081_v5 = vadd.f32 %v5748_v2, %v10667_v58  ;;  %v5750_v6 = vpop.f32.mrb[3].mxu1 }
 0x3c2   : > { %v6821_v7 = vpop.f32.mrb[3].mxu0  ;;  %v8080_v8 = vadd.f32 %v8079_v1, %v6817_v0  ;;  %v8083_v9 = vadd.f32 %v5750_v6, %v10669_v59 }
 0x3c3   : > { %v6934_v10 = vmax.f32 %v8078_v4, 0.0  ;;  %v8082_v11 = vadd.f32 %v8081_v5, %v6819_v3 }
 0x3c4   : > { %v6935_v12 = vmax.f32 %v8080_v8, 0.0  ;;  %v8084_v13 = vadd.f32 %v8083_v9, %v6821_v7 }
 0x3c5   : > { %v6936_v14 = vmax.f32 %v8082_v11, 0.0 }
 0x3c6   : > { %v8050_v15 = vpack.c.bf16 %v6935_v12, %v6934_v10  ;;  %v6937_v16 = vmax.f32 %v8084_v13, 0.0  ;;  %v5754_v17 = vpop.f32.mrb[4].mxu1 }
 0x3c7   : > { %v6825_v18 = vpop.f32.mrb[4].mxu0  ;;  %v8085_v19 = vadd.f32 %v5754_v17, %v10667_v58  ;;  %v5756_v20 = vpop.f32.mrb[5].mxu1 }
 0x3c8   : > { %v6827_v21 = vpop.f32.mrb[5].mxu0  ;;  %7126 = vst [vmem:[%s10677_s20] sm:$0xff] %v8050_v15  ;;  %v8051_v22 = vpack.c.bf16 %v6937_v16, %v6936_v14  ;;  %v8087_v23 = vadd.f32 %v5756_v20, %v10669_v59  ;;  %v5758_v24 = vpop.f32.mrb[6].mxu1 }
 0x3c9   : > { %v6829_v25 = vpop.f32.mrb[6].mxu0  ;;  %v8086_v26 = vadd.f32 %v8085_v19, %v6825_v18  ;;  %v8089_v27 = vadd.f32 %v5758_v24, %v10667_v58  ;;  %v5760_v28 = vpop.f32.mrb[7].mxu1 }
 0x3ca   : > { %v6831_v29 = vpop.f32.mrb[7].mxu0  ;;  %7127 = vst [vmem:[%s10677_s20 + $0x8] sm:$0xff] %v8051_v22  ;;  %v8088_v30 = vadd.f32 %v8087_v23, %v6827_v21  ;;  %v8091_v31 = vadd.f32 %v5760_v28, %v10669_v59 }
 0x3cb   : > { %v6938_v32 = vmax.f32 %v8086_v26, 0.0  ;;  %v8090_v33 = vadd.f32 %v8089_v27, %v6829_v25 }
 0x3cc   : > { %v6939_v34 = vmax.f32 %v8088_v30, 0.0  ;;  %v8092_v35 = vadd.f32 %v8091_v31, %v6831_v29 }
 0x3cd   : > { %v6940_v36 = vmax.f32 %v8090_v33, 0.0 }
 0x3ce   : > { %v8052_v37 = vpack.c.bf16 %v6939_v34, %v6938_v32  ;;  %v6941_v38 = vmax.f32 %v8092_v35, 0.0  ;;  %v5764_v39 = vpop.f32.mrb[8].mxu1 }
 0x3cf   : > { %v6835_v40 = vpop.f32.mrb[8].mxu0  ;;  %v8093_v41 = vadd.f32 %v5764_v39, %v10667_v58  ;;  %v5766_v42 = vpop.f32.mrb[9].mxu1 }
 0x3d0   : > { %v6837_v43 = vpop.f32.mrb[9].mxu0  ;;  %7128 = vst [vmem:[%s10677_s20 + $0x10] sm:$0xff] %v8052_v37  ;;  %v8053_v44 = vpack.c.bf16 %v6941_v38, %v6940_v36  ;;  %v8095_v45 = vadd.f32 %v5766_v42, %v10669_v59  ;;  %v5768_v46 = vpop.f32.mrb[10].mxu1 }
 0x3d1   : > { %v6839_v47 = vpop.f32.mrb[10].mxu0  ;;  %v8094_v48 = vadd.f32 %v8093_v41, %v6835_v40  ;;  %v8097_v49 = vadd.f32 %v5768_v46, %v10667_v58  ;;  %v5770_v50 = vpop.f32.mrb[11].mxu1 }
 0x3d2   : > { %v6841_v51 = vpop.f32.mrb[11].mxu0  ;;  %7129 = vst [vmem:[%s10677_s20 + $0x18] sm:$0xff] %v8053_v44  ;;  %v8096_v52 = vadd.f32 %v8095_v45, %v6837_v43  ;;  %v8099_v53 = vadd.f32 %v5770_v50, %v10669_v59 }
 0x3d3   : > { %v6942_v54 = vmax.f32 %v8094_v48, 0.0  ;;  %v8098_v55 = vadd.f32 %v8097_v49, %v6839_v47 }
 0x3d4   : > { %v6943_v56 = vmax.f32 %v8096_v52, 0.0  ;;  %v8100_v57 = vadd.f32 %v8099_v53, %v6841_v51 }
 0x3d5   : > { %v6944_v60 = vmax.f32 %v8098_v55, 0.0 }
 0x3d6   : > { %v8054_v61 = vpack.c.bf16 %v6943_v56, %v6942_v54  ;;  %v6945_v62 = vmax.f32 %v8100_v57, 0.0  ;;  %v5774_v63 = vpop.f32.mrb[12].mxu1 }
 0x3d7   : > { %v6845_v0 = vpop.f32.mrb[12].mxu0  ;;  %v8101_v1 = vadd.f32 %v5774_v63, %v10667_v58  ;;  %v5776_v2 = vpop.f32.mrb[13].mxu1 }
 0x3d8   : > { %v6847_v3 = vpop.f32.mrb[13].mxu0  ;;  %7130 = vst [vmem:[%s10677_s20 + $0x20] sm:$0xff] %v8054_v61  ;;  %v8055_v4 = vpack.c.bf16 %v6945_v62, %v6944_v60  ;;  %v8103_v5 = vadd.f32 %v5776_v2, %v10669_v59  ;;  %v5778_v6 = vpop.f32.mrb[14].mxu1 }
 0x3d9   : > { %v6849_v7 = vpop.f32.mrb[14].mxu0  ;;  %v8102_v8 = vadd.f32 %v8101_v1, %v6845_v0  ;;  %v8105_v9 = vadd.f32 %v5778_v6, %v10667_v58  ;;  %v5780_v10 = vpop.f32.mrb[15].mxu1 }
 0x3da   : > { %v6851_v11 = vpop.f32.mrb[15].mxu0  ;;  %7131 = vst [vmem:[%s10677_s20 + $0x28] sm:$0xff] %v8055_v4  ;;  %v8104_v12 = vadd.f32 %v8103_v5, %v6847_v3  ;;  %v8107_v13 = vadd.f32 %v5780_v10, %v10669_v59 }
 0x3db   : > { %v6946_v14 = vmax.f32 %v8102_v8, 0.0  ;;  %v8106_v15 = vadd.f32 %v8105_v9, %v6849_v7 }
 0x3dc   : > { %v6947_v16 = vmax.f32 %v8104_v12, 0.0  ;;  %v8108_v17 = vadd.f32 %v8107_v13, %v6851_v11 }
 0x3dd   : > { %v6948_v18 = vmax.f32 %v8106_v15, 0.0 }
 0x3de   : > { %v8056_v19 = vpack.c.bf16 %v6947_v16, %v6946_v14  ;;  %v6949_v20 = vmax.f32 %v8108_v17, 0.0  ;;  %v5784_v21 = vpop.f32.mrb[16].mxu1 }
 0x3df   : > { %v6855_v22 = vpop.f32.mrb[16].mxu0  ;;  %v8109_v23 = vadd.f32 %v5784_v21, %v10667_v58  ;;  %v5786_v24 = vpop.f32.mrb[17].mxu1 }
 0x3e0   : > { %v6857_v25 = vpop.f32.mrb[17].mxu0  ;;  %7132 = vst [vmem:[%s10677_s20 + $0x30] sm:$0xff] %v8056_v19  ;;  %v8057_v26 = vpack.c.bf16 %v6949_v20, %v6948_v18  ;;  %v8111_v27 = vadd.f32 %v5786_v24, %v10669_v59  ;;  %v5788_v28 = vpop.f32.mrb[18].mxu1 }
 0x3e1   : > { %v6859_v29 = vpop.f32.mrb[18].mxu0  ;;  %v8110_v30 = vadd.f32 %v8109_v23, %v6855_v22  ;;  %v8113_v31 = vadd.f32 %v5788_v28, %v10667_v58  ;;  %v5790_v32 = vpop.f32.mrb[19].mxu1 }
 0x3e2   : > { %v6861_v33 = vpop.f32.mrb[19].mxu0  ;;  %7133 = vst [vmem:[%s10677_s20 + $0x38] sm:$0xff] %v8057_v26  ;;  %v8112_v34 = vadd.f32 %v8111_v27, %v6857_v25  ;;  %v8115_v35 = vadd.f32 %v5790_v32, %v10669_v59 }
 0x3e3   : > { %v6950_v36 = vmax.f32 %v8110_v30, 0.0  ;;  %v8114_v37 = vadd.f32 %v8113_v31, %v6859_v29 }
 0x3e4   : > { %v6951_v38 = vmax.f32 %v8112_v34, 0.0  ;;  %v8116_v39 = vadd.f32 %v8115_v35, %v6861_v33 }
 0x3e5   : > { %v6952_v40 = vmax.f32 %v8114_v37, 0.0 }
 0x3e6   : > { %v8058_v41 = vpack.c.bf16 %v6951_v38, %v6950_v36  ;;  %v6953_v42 = vmax.f32 %v8116_v39, 0.0  ;;  %v5794_v43 = vpop.f32.mrb[20].mxu1 }
 0x3e7   : > { %v6865_v44 = vpop.f32.mrb[20].mxu0  ;;  %v8117_v45 = vadd.f32 %v5794_v43, %v10667_v58  ;;  %v5796_v46 = vpop.f32.mrb[21].mxu1 }
 0x3e8   : > { %v6867_v47 = vpop.f32.mrb[21].mxu0  ;;  %7134 = vst [vmem:[%s10677_s20 + $0x40] sm:$0xff] %v8058_v41  ;;  %v8059_v48 = vpack.c.bf16 %v6953_v42, %v6952_v40  ;;  %v8119_v49 = vadd.f32 %v5796_v46, %v10669_v59  ;;  %v5798_v50 = vpop.f32.mrb[22].mxu1 }
 0x3e9   : > { %v6869_v51 = vpop.f32.mrb[22].mxu0  ;;  %v8118_v52 = vadd.f32 %v8117_v45, %v6865_v44  ;;  %v8121_v53 = vadd.f32 %v5798_v50, %v10667_v58  ;;  %v5800_v54 = vpop.f32.mrb[23].mxu1 }
 0x3ea   : > { %v6871_v55 = vpop.f32.mrb[23].mxu0  ;;  %7135 = vst [vmem:[%s10677_s20 + $0x48] sm:$0xff] %v8059_v48  ;;  %v8120_v56 = vadd.f32 %v8119_v49, %v6867_v47  ;;  %v8123_v57 = vadd.f32 %v5800_v54, %v10669_v59 }
 0x3eb   : > { %v6954_v60 = vmax.f32 %v8118_v52, 0.0  ;;  %v8122_v61 = vadd.f32 %v8121_v53, %v6869_v51 }
 0x3ec   : > { %v6955_v62 = vmax.f32 %v8120_v56, 0.0  ;;  %v8124_v63 = vadd.f32 %v8123_v57, %v6871_v55 }
 0x3ed   : > { %v6956_v0 = vmax.f32 %v8122_v61, 0.0 }
 0x3ee   : > { %v8060_v1 = vpack.c.bf16 %v6955_v62, %v6954_v60  ;;  %v6957_v2 = vmax.f32 %v8124_v63, 0.0  ;;  %v5804_v3 = vpop.f32.mrb[24].mxu1 }
 0x3ef   : > { %v6875_v4 = vpop.f32.mrb[24].mxu0  ;;  %v8125_v5 = vadd.f32 %v5804_v3, %v10667_v58  ;;  %v5806_v6 = vpop.f32.mrb[25].mxu1 }
 0x3f0   : > { %v6877_v7 = vpop.f32.mrb[25].mxu0  ;;  %7136 = vst [vmem:[%s10677_s20 + $0x50] sm:$0xff] %v8060_v1  ;;  %v8061_v8 = vpack.c.bf16 %v6957_v2, %v6956_v0  ;;  %v8127_v9 = vadd.f32 %v5806_v6, %v10669_v59  ;;  %v5808_v10 = vpop.f32.mrb[26].mxu1 }
 0x3f1   : > { %v6879_v11 = vpop.f32.mrb[26].mxu0  ;;  %v8126_v12 = vadd.f32 %v8125_v5, %v6875_v4  ;;  %v8129_v13 = vadd.f32 %v5808_v10, %v10667_v58  ;;  %v5810_v14 = vpop.f32.mrb[27].mxu1 }
 0x3f2   : > { %v6881_v15 = vpop.f32.mrb[27].mxu0  ;;  %7137 = vst [vmem:[%s10677_s20 + $0x58] sm:$0xff] %v8061_v8  ;;  %v8128_v16 = vadd.f32 %v8127_v9, %v6877_v7  ;;  %v8131_v17 = vadd.f32 %v5810_v14, %v10669_v59 }
 0x3f3   : > { %v6958_v18 = vmax.f32 %v8126_v12, 0.0  ;;  %v8130_v19 = vadd.f32 %v8129_v13, %v6879_v11 }
 0x3f4   : > { %v6959_v20 = vmax.f32 %v8128_v16, 0.0  ;;  %v8132_v21 = vadd.f32 %v8131_v17, %v6881_v15 }
 0x3f5   : > { %v6960_v22 = vmax.f32 %v8130_v19, 0.0 }
 0x3f6   : > { %v8062_v23 = vpack.c.bf16 %v6959_v20, %v6958_v18  ;;  %v6961_v24 = vmax.f32 %v8132_v21, 0.0  ;;  %v5814_v25 = vpop.f32.mrb[28].mxu1 }
 0x3f7   : > { %v6885_v26 = vpop.f32.mrb[28].mxu0  ;;  %v8133_v27 = vadd.f32 %v5814_v25, %v10667_v58  ;;  %v5816_v28 = vpop.f32.mrb[29].mxu1 }
 0x3f8   : > { %v6887_v29 = vpop.f32.mrb[29].mxu0  ;;  %7138 = vst [vmem:[%s10677_s20 + $0x60] sm:$0xff] %v8062_v23  ;;  %v8063_v30 = vpack.c.bf16 %v6961_v24, %v6960_v22  ;;  %v8135_v31 = vadd.f32 %v5816_v28, %v10669_v59  ;;  %v5818_v32 = vpop.f32.mrb[30].mxu1 }
 0x3f9   : > { %v6889_v33 = vpop.f32.mrb[30].mxu0  ;;  %v8134_v34 = vadd.f32 %v8133_v27, %v6885_v26  ;;  %v8137_v35 = vadd.f32 %v5818_v32, %v10667_v58  ;;  %v5820_v36 = vpop.f32.mrb[31].mxu1 }
 0x3fa   : > { %v6891_v37 = vpop.f32.mrb[31].mxu0  ;;  %7139 = vst [vmem:[%s10677_s20 + $0x68] sm:$0xff] %v8063_v30  ;;  %v8136_v38 = vadd.f32 %v8135_v31, %v6887_v29  ;;  %v8139_v39 = vadd.f32 %v5820_v36, %v10669_v59 }
 0x3fb   : > { %v6962_v40 = vmax.f32 %v8134_v34, 0.0  ;;  %v8138_v41 = vadd.f32 %v8137_v35, %v6889_v33 }
 0x3fc   : > { %v6963_v42 = vmax.f32 %v8136_v38, 0.0  ;;  %v8140_v43 = vadd.f32 %v8139_v39, %v6891_v37 }
 0x3fd   : > { %v6964_v44 = vmax.f32 %v8138_v41, 0.0 }
 0x3fe   : > { %v8064_v45 = vpack.c.bf16 %v6963_v42, %v6962_v40  ;;  %v6965_v46 = vmax.f32 %v8140_v43, 0.0  ;;  %v5824_v47 = vpop.f32.mrb[32].mxu1 }
 0x3ff   : > { %v6895_v48 = vpop.f32.mrb[32].mxu0  ;;  %v8141_v49 = vadd.f32 %v5824_v47, %v10667_v58  ;;  %v5826_v50 = vpop.f32.mrb[33].mxu1 }
 0x400   : > { %v6897_v51 = vpop.f32.mrb[33].mxu0  ;;  %7140 = vst [vmem:[%s10677_s20 + $0x70] sm:$0xff] %v8064_v45  ;;  %v8065_v52 = vpack.c.bf16 %v6965_v46, %v6964_v44  ;;  %v8143_v53 = vadd.f32 %v5826_v50, %v10669_v59  ;;  %v5828_v54 = vpop.f32.mrb[34].mxu1 }
 0x401   : > { %v6899_v55 = vpop.f32.mrb[34].mxu0  ;;  %v8142_v56 = vadd.f32 %v8141_v49, %v6895_v48  ;;  %v8145_v57 = vadd.f32 %v5828_v54, %v10667_v58  ;;  %v5830_v60 = vpop.f32.mrb[35].mxu1 }
 0x402   : > { %v6901_v61 = vpop.f32.mrb[35].mxu0  ;;  %7141 = vst [vmem:[%s10677_s20 + $0x78] sm:$0xff] %v8065_v52  ;;  %v8144_v62 = vadd.f32 %v8143_v53, %v6897_v51  ;;  %v8147_v63 = vadd.f32 %v5830_v60, %v10669_v59 }
 0x403   : > { %v6966_v0 = vmax.f32 %v8142_v56, 0.0  ;;  %v8146_v1 = vadd.f32 %v8145_v57, %v6899_v55 }
 0x404   : > { %v6967_v2 = vmax.f32 %v8144_v62, 0.0  ;;  %v8148_v3 = vadd.f32 %v8147_v63, %v6901_v61 }
 0x405   : > { %v6968_v4 = vmax.f32 %v8146_v1, 0.0 }
 0x406   : > { %v8066_v5 = vpack.c.bf16 %v6967_v2, %v6966_v0  ;;  %v6969_v6 = vmax.f32 %v8148_v3, 0.0  ;;  %v5834_v7 = vpop.f32.mrb[36].mxu1 }
 0x407   : > { %v6905_v8 = vpop.f32.mrb[36].mxu0  ;;  %v8149_v9 = vadd.f32 %v5834_v7, %v10667_v58  ;;  %v5836_v10 = vpop.f32.mrb[37].mxu1 }
 0x408   : > { %v6907_v11 = vpop.f32.mrb[37].mxu0  ;;  %7142 = vst [vmem:[%s10677_s20 + $0x80] sm:$0xff] %v8066_v5  ;;  %v8067_v12 = vpack.c.bf16 %v6969_v6, %v6968_v4  ;;  %v8151_v13 = vadd.f32 %v5836_v10, %v10669_v59  ;;  %v5838_v14 = vpop.f32.mrb[38].mxu1 }
 0x409   : > { %v6909_v15 = vpop.f32.mrb[38].mxu0  ;;  %v8150_v16 = vadd.f32 %v8149_v9, %v6905_v8  ;;  %v8153_v17 = vadd.f32 %v5838_v14, %v10667_v58  ;;  %v5840_v18 = vpop.f32.mrb[39].mxu1 }
 0x40a   : > { %v6911_v19 = vpop.f32.mrb[39].mxu0  ;;  %7143 = vst [vmem:[%s10677_s20 + $0x88] sm:$0xff] %v8067_v12  ;;  %v8152_v20 = vadd.f32 %v8151_v13, %v6907_v11  ;;  %v8155_v21 = vadd.f32 %v5840_v18, %v10669_v59 }
 0x40b   : > { %v6970_v22 = vmax.f32 %v8150_v16, 0.0  ;;  %v8154_v23 = vadd.f32 %v8153_v17, %v6909_v15 }
 0x40c   : > { %v6971_v24 = vmax.f32 %v8152_v20, 0.0  ;;  %v8156_v25 = vadd.f32 %v8155_v21, %v6911_v19 }
 0x40d   : > { %v6972_v26 = vmax.f32 %v8154_v23, 0.0 }
 0x40e   : > { %v8068_v27 = vpack.c.bf16 %v6971_v24, %v6970_v22  ;;  %v6973_v28 = vmax.f32 %v8156_v25, 0.0  ;;  %v5844_v29 = vpop.f32.mrb[40].mxu1 }
 0x40f   : > { %v6915_v30 = vpop.f32.mrb[40].mxu0  ;;  %v8157_v31 = vadd.f32 %v5844_v29, %v10667_v58  ;;  %v5846_v32 = vpop.f32.mrb[41].mxu1 }
 0x410   : > { %v6917_v33 = vpop.f32.mrb[41].mxu0  ;;  %7144 = vst [vmem:[%s10677_s20 + $0x90] sm:$0xff] %v8068_v27  ;;  %v8069_v34 = vpack.c.bf16 %v6973_v28, %v6972_v26  ;;  %v8159_v35 = vadd.f32 %v5846_v32, %v10669_v59  ;;  %v5848_v36 = vpop.f32.mrb[42].mxu1 }
 0x411   : > { %v6919_v37 = vpop.f32.mrb[42].mxu0  ;;  %v8158_v38 = vadd.f32 %v8157_v31, %v6915_v30  ;;  %v8161_v39 = vadd.f32 %v5848_v36, %v10667_v58  ;;  %v5850_v40 = vpop.f32.mrb[43].mxu1 }
 0x412   : > { %v6921_v41 = vpop.f32.mrb[43].mxu0  ;;  %7145 = vst [vmem:[%s10677_s20 + $0x98] sm:$0xff] %v8069_v34  ;;  %v8160_v42 = vadd.f32 %v8159_v35, %v6917_v33  ;;  %v8163_v43 = vadd.f32 %v5850_v40, %v10669_v59 }
 0x413   : > { %v6974_v44 = vmax.f32 %v8158_v38, 0.0  ;;  %v8162_v45 = vadd.f32 %v8161_v39, %v6919_v37 }
 0x414   : > { %v6975_v46 = vmax.f32 %v8160_v42, 0.0  ;;  %v8164_v47 = vadd.f32 %v8163_v43, %v6921_v41 }
 0x415   : > { %v6976_v48 = vmax.f32 %v8162_v45, 0.0 }
 0x416   : > { %v8070_v49 = vpack.c.bf16 %v6975_v46, %v6974_v44  ;;  %v6977_v50 = vmax.f32 %v8164_v47, 0.0  ;;  %v5854_v51 = vpop.f32.mrb[44].mxu1 }
 0x417   : > { %v6925_v52 = vpop.f32.mrb[44].mxu0  ;;  %v8165_v53 = vadd.f32 %v5854_v51, %v10667_v58  ;;  %v5856_v54 = vpop.f32.mrb[45].mxu1 }
 0x418   : > { %v6927_v55 = vpop.f32.mrb[45].mxu0  ;;  %7146 = vst [vmem:[%s10677_s20 + $0xa0] sm:$0xff] %v8070_v49  ;;  %v8071_v56 = vpack.c.bf16 %v6977_v50, %v6976_v48  ;;  %v8167_v57 = vadd.f32 %v5856_v54, %v10669_v59  ;;  %v5858_v60 = vpop.f32.mrb[46].mxu1 }
 0x419   : > { %v6929_v61 = vpop.f32.mrb[46].mxu0  ;;  %v8166_v62 = vadd.f32 %v8165_v53, %v6925_v52  ;;  %v8169_v63 = vadd.f32 %v5858_v60, %v10667_v58  ;;  %v5860_v0 = vpop.f32.mrb[47].mxu1 }
 0x41a   : > { %v6931_v1 = vpop.f32.mrb[47].mxu0  ;;  %7147 = vst [vmem:[%s10677_s20 + $0xa8] sm:$0xff] %v8071_v56  ;;  %v8168_v2 = vadd.f32 %v8167_v57, %v6927_v55  ;;  %v8171_v3 = vadd.f32 %v5860_v0, %v10669_v59 }
 0x41b   : > { %v6978_v4 = vmax.f32 %v8166_v62, 0.0  ;;  %v8170_v5 = vadd.f32 %v8169_v63, %v6929_v61 }
 0x41c   : > { %v6979_v6 = vmax.f32 %v8168_v2, 0.0  ;;  %v8172_v7 = vadd.f32 %v8171_v3, %v6931_v1 }
 0x41d   : > { %v6980_v8 = vmax.f32 %v8170_v5, 0.0 }
 0x41e   : > { %v8072_v9 = vpack.c.bf16 %v6979_v6, %v6978_v4  ;;  %v6981_v10 = vmax.f32 %v8172_v7, 0.0 }
 0x420   : > { %7148 = vst [vmem:[%s10677_s20 + $0xb0] sm:$0xff] %v8072_v9  ;;  %v8073_v58 = vpack.c.bf16 %v6981_v10, %v6980_v8 }
 0x422   : > { %7149 = vst [vmem:[%s10677_s20 + $0xb8] sm:$0xff] %v8073_v58 }
 0x423   : > { %10055 = shalt.err (!%p10052_p2)
}
 0x424   : > { %s10056_s10 = scalar_lea.hbm %s10749_s23, 3072  ;;  %s10060_s22 = scalar_lea.hbm %s10800_s3, 6144 }
 0x425   : > { %p10057_p13 = scmp.ne.s32.totalorder %s10749_s23, %s10056_s10  ;;  %p10061_p4 = scmp.lt.u32.totalorder %s10749_s23, %s10800_s3 }
 0x426   : > { %p10062_p9 = scmp.lt.u32.totalorder %s10060_s22, %s10056_s10  ;;  %p10064_p11 = scmp.lt.u32.totalorder %s10056_s10, %s10749_s23 }
 0x427   : > { %p10058_p6 = pnand %p10057_p13, %p10814_p0 }
 0x428   : > { %p10063_p8 = por %p10062_p9, %p10061_p4 }
 0x429   : > { %p10059_p10 = pneg %p10058_p6 }
 0x42a   : > { %p10065_p1 = por %p10064_p11, %p10063_p8 }
 0x42c   : > { %p10066_p3 = pnand %p10065_p1, %p10059_p10 }
 0x42e   : > { %10069 = shalt.err (!%p10066_p3)
}
 0x42f   : > { %s10123_s18 = smov 128   ;;  %s10124_s20 = smov 8  }
 0x430   : > { %8763 = dma.vmem_to_hbm [thread:$0]  (%p10814_p0), %s10751_s21, 3072, %s10749_s23, %s7151_s16, %s10123_s18, %s10123_s18, %s10124_s20  }
 0x431 PF: > { %s7180_s17 = sand.u32 1, %s10100_s12   ;;  %p10815_p5 = scmp.ne.s32.totalorder %s10805_s19, 0 }
 0x432   : > { %p10816_p7 = scmp.ge.s32.totalorder %s10112_s15, 2  ;;  %s7181_s26 = scalar_lea.sflag [#allocation4], %s7180_s17 }
 0x434   : > { %p8777_p12 = pnand %p10816_p7, %p10815_p5 }
 0x436   : > { %10095 = dma.done.wait (!%p8777_p12), %s7181_s26, 3072  }
 0x437   : > { %10097 = vsyncadd (!%p8777_p12), %s7181_s26, 4294964224  ;;  %p17_p2 = scmp.ge.s32.totalorder %s10255_s4, 4   ;;  %s10817_s12 = smov %s10104_s13 }
 0x438   : > { %s10818_s13 = smov %s10108_s14  ;;  %s10819_s14 = smov %s10265_s6 }
 0x439   : > { %s10820_s15 = smov %s10255_s4  ;;  %19 = sbr.rel (!%p17_p2) target bundleno = 6 (0x6), region = 85 }
 0x440   :  { %7186 = vsyncpa [#allocation3], 1 }
 0x441   :  { %7188 = vsyncpa [#allocation3 + $0x1], 1 }
 0x442   :  { %7189 = vsyncpa [#allocation6], 1 }
 0x443   :  { %7190 = vsyncpa [#allocation4], 1 }
 0x444   :  { %7192 = vsyncpa [#allocation4 + $0x1], 1 }

// kernel: ufe_forward.6
= control target key start
LH: loop header
LB: loop body
LE: loop exit
PB: predicated region body
PF: predicated region fallthrough
CT: control target
= control target key end

     0   :  { %11 = vsyncpa [#allocation3], 0  ;;  %s5226_s0 = inlined_call_operand.hbm [shape: bf16[384,256], index: 0, kind: input, shape index: {}]   ;;  %s5227_s1 = inlined_call_operand.hbm [shape: bf16[256,1024], index: 1, kind: input, shape index: {}]   ;;  %s5228_s2 = inlined_call_operand.hbm [shape: f32[1,1024], index: 2, kind: input, shape index: {}]   ;;  %s5229_s3 = inlined_call_operand.hbm [shape: f32[6,384], index: 3, kind: input, shape index: {}]   ;;  %s5230_s4 = inlined_call_operand.hbm [shape: f32[384,1024], index: 4, kind: output, shape index: {0}]   ;;  %s5231_s5 = inlined_call_operand.hbm [shape: f32[6,1024], index: 5, kind: output, shape index: {1}]  }
   0x1   :  { %12 = vsyncpa [#allocation6], 0 }
   0x2   :  { %13 = vsyncpa [#allocation9], 0 }
   0x3   :  { %14 = vsyncpa [#allocation4], 0 }
   0x4   :  { %15 = vsyncpa [#allocation12], 0  ;;  %s4463_s18 = smov [#allocation5]   ;;  %s4321_s22 = scalar_lea.hbm %s5227_s1, 16384 }
   0x5   :  { %s33_s19 = sshll.u32 %s4463_s18, 4  ;;  %p4322_p0 = scmp.ne.s32.totalorder %s5227_s1, %s4321_s22  ;;  %s34_s19 = int_to_ptr.vmem [resolvable:$true] %s33_s19 }
   0x6   :  { %p4325_p1 = scmp.lt.u32.totalorder %s4321_s22, %s5227_s1 }
   0x8   :  { %p4327_p2 = pnand %p4325_p1, %p4322_p0 }
   0xa   :  { %4330 = shalt.err (!%p4327_p2)
}
   0xb   :  { %s4331_s27 = scalar_lea.vmem %s34_s19, 16384  ;;  %p4336_p4 = scmp.lt.s32.totalorder %s34_s19, %s34_s19 }
   0xc   :  { %p4332_p3 = scmp.ne.s32.totalorder %s34_s19, %s4331_s27  ;;  %p4337_p5 = scmp.lt.s32.totalorder %s4331_s27, %s4331_s27 }
   0xe   :  { %p4338_p6 = por %p4337_p5, %p4336_p4 }
  0x10   :  { %p4339_p7 = pnand %p4338_p6, %p4332_p3 }
  0x12   :  { %4342 = shalt.err (!%p4339_p7)
}
  0x13   :  { %s4464_s28 = smov 512   ;;  %s4465_s29 = smov 32  }
  0x14   :  { %39 = dma.hbm_to_vmem [thread:$0]  %s5227_s1, 16384, %s34_s19, [#allocation6], %s4464_s28, %s4464_s28, %s4465_s29  }
  0x15   :  { %s4466_s7 = smov [#allocation2]   ;;  %s4343_s11 = scalar_lea.hbm %s5226_s0, 6144 }
  0x16   :  { %s21_s8 = sshll.u32 %s4466_s7, 4  ;;  %p4344_p8 = scmp.ne.s32.totalorder %s5226_s0, %s4343_s11  ;;  %s22_s8 = int_to_ptr.vmem [resolvable:$true] %s21_s8 }
  0x17   :  { %p4347_p9 = scmp.lt.u32.totalorder %s4343_s11, %s5226_s0 }
  0x19   :  { %p4349_p10 = pnand %p4347_p9, %p4344_p8 }
  0x1b   :  { %4352 = shalt.err (!%p4349_p10)
}
  0x1c   :  { %s4353_s16 = scalar_lea.vmem %s22_s8, 6144  ;;  %p4358_p12 = scmp.lt.s32.totalorder %s22_s8, %s22_s8 }
  0x1d   :  { %p4354_p11 = scmp.ne.s32.totalorder %s22_s8, %s4353_s16  ;;  %p4359_p13 = scmp.lt.s32.totalorder %s4353_s16, %s4353_s16 }
  0x1f   :  { %p4360_p0 = por %p4359_p13, %p4358_p12 }
  0x21   :  { %p4361_p1 = pnand %p4360_p0, %p4354_p11 }
  0x23   :  { %4364 = shalt.err (!%p4361_p1)
}
  0x24   :  { %s4467_s1 = smov 128   ;;  %s4468_s17 = smov 8  }
  0x25   :  { %27 = dma.hbm_to_vmem [thread:$0]  %s5226_s0, 6144, %s22_s8, [#allocation3], %s4467_s1, %s4467_s1, %s4468_s17  }
  0x26   :  { %s4469_s20 = smov [#allocation7]   ;;  %s4470_s22 = smov [#allocation8]  }
  0x27   :  { %s46_s21 = sshll.u32 %s4469_s20, 4  ;;  %s56_s23 = sshll.u32 %s4470_s22, 4  ;;  %s47_s21 = int_to_ptr.vmem [resolvable:$true] %s46_s21  ;;  %s57_s23 = int_to_ptr.vmem [resolvable:$true] %s56_s23 }
  0x28   :  { %s4365_s26 = scalar_lea.hbm %s5228_s2, 128 }
  0x29   :  { %p4366_p2 = scmp.ne.s32.totalorder %s5228_s2, %s4365_s26  ;;  %p4369_p3 = scmp.lt.u32.totalorder %s4365_s26, %s5228_s2 }
  0x2b   :  { %p4371_p4 = pnand %p4369_p3, %p4366_p2 }
  0x2d   :  { %4374 = shalt.err (!%p4371_p4)
}
  0x2e   :  { %s4375_s0 = scalar_lea.vmem %s47_s21, 128  ;;  %p4380_p6 = scmp.lt.s32.totalorder %s47_s21, %s47_s21 }
  0x2f   :  { %p4376_p5 = scmp.ne.s32.totalorder %s47_s21, %s4375_s0  ;;  %p4381_p7 = scmp.lt.s32.totalorder %s4375_s0, %s4375_s0 }
  0x31   :  { %p4382_p8 = por %p4381_p7, %p4380_p6 }
  0x33   :  { %p4383_p9 = pnand %p4382_p8, %p4376_p5 }
  0x35   :  { %4386 = shalt.err (!%p4383_p9)
}
  0x36   :  { %49 = dma.hbm_to_vmem [thread:$0]  %s5228_s2, 128, %s47_s21, [#allocation6]  }
  0x37   :  { %s4387_s10 = scalar_lea.hbm %s5229_s3, 384 }
  0x38   :  { %p4388_p10 = scmp.ne.s32.totalorder %s5229_s3, %s4387_s10  ;;  %p4391_p11 = scmp.lt.u32.totalorder %s4387_s10, %s5229_s3 }
  0x3a   :  { %p4393_p12 = pnand %p4391_p11, %p4388_p10 }
  0x3c   :  { %4396 = shalt.err (!%p4393_p12)
}
  0x3d   :  { %s4397_s15 = scalar_lea.vmem %s57_s23, 384  ;;  %p4402_p0 = scmp.lt.s32.totalorder %s57_s23, %s57_s23 }
  0x3e   :  { %p4398_p13 = scmp.ne.s32.totalorder %s57_s23, %s4397_s15  ;;  %p4403_p1 = scmp.lt.s32.totalorder %s4397_s15, %s4397_s15 }
  0x40   :  { %p4404_p2 = por %p4403_p1, %p4402_p0 }
  0x42   :  { %p4405_p3 = pnand %p4404_p2, %p4398_p13 }
  0x44   :  { %4408 = shalt.err (!%p4405_p3)
}
  0x45   :  { %59 = dma.hbm_to_vmem [thread:$0]  %s5229_s3, 384, %s57_s23, [#allocation9]  }
  0x46   :  { %4453 = dma.done.wait [#allocation3], 6144  }
  0x47   :  { %4454 = vsyncadd [#allocation3], 4294961152 }
  0x48   :  { %4455 = dma.done.wait [#allocation6], 16512  }
  0x49   :  { %4456 = vsyncadd [#allocation6], 4294950784 }
  0x4a   :  { %4457 = dma.done.wait [#allocation9], 384  }
  0x4b   :  { %4458 = vsyncadd [#allocation9], 4294966912  ;;  %v120_v0 = vld [vmem:[#allocation5] sm:$0xff]  ;;  %v121_v2 = vld [vmem:[#allocation5 + $0x8] sm:$0xff]  ;;  %s4472_s3 = smov [#allocation10]  }
  0x4c   :  { %v124_v1 = vld [vmem:[#allocation5 + $0x20] sm:$0xff]  ;;  %v125_v4 = vld [vmem:[#allocation5 + $0x28] sm:$0xff]  ;;  %s3614_s1 = sshll.u32 %s4472_s3, 4  ;;  %s3615_s1 = int_to_ptr.vmem [resolvable:$true] %s3614_s1 }
  0x4d   :  { %v3691_v3 = vcombine.high %v120_v0, %v124_v1  ;;  %v3690_v5 = vcombine.low %v120_v0, %v124_v1  ;;  %v128_v6 = vld [vmem:[#allocation5 + $0x40] sm:$0xff]  ;;  %v3693_v8 = vcombine.high %v121_v2, %v125_v4  ;;  %v3692_v9 = vcombine.low %v121_v2, %v125_v4  ;;  %v129_v11 = vld [vmem:[#allocation5 + $0x48] sm:$0xff]  ;;  %s4409_s17 = scalar_lea.vmem %s3615_s1, 49152  ;;  %p4414_p5 = scmp.lt.s32.totalorder %s3615_s1, %s3615_s1 }
  0x4e   :  { %v132_v7 = vld [vmem:[#allocation5 + $0x60] sm:$0xff]  ;;  %v133_v12 = vld [vmem:[#allocation5 + $0x68] sm:$0xff]  ;;  %p4410_p4 = scmp.ne.s32.totalorder %s3615_s1, %s4409_s17  ;;  %p4415_p6 = scmp.lt.s32.totalorder %s4409_s17, %s4409_s17 }
  0x4f   :  { %v3699_v10 = vcombine.high %v128_v6, %v132_v7  ;;  %v136_v13 = vld [vmem:[#allocation5 + $0x80] sm:$0xff]  ;;  %1170 = vmatprep.subr.bf16.mxu0 %v3691_v3  ;;  %v3701_v14 = vcombine.high %v129_v11, %v133_v12  ;;  %v137_v16 = vld [vmem:[#allocation5 + $0x88] sm:$0xff]  ;;  %1443 = vmatprep.subr.bf16.mxu1 %v3693_v8  ;;  %v3698_v18 = vcombine.low %v128_v6, %v132_v7 }
  0x50   :  { %v140_v15 = vld [vmem:[#allocation5 + $0xa0] sm:$0xff]  ;;  %v141_v17 = vld [vmem:[#allocation5 + $0xa8] sm:$0xff]  ;;  %1171 = vmatpush1.bf16.msra.mxu0 %v3690_v5  ;;  %1444 = vmatpush1.bf16.msra.mxu1 %v3692_v9  ;;  %v3700_v19 = vcombine.low %v129_v11, %v133_v12  ;;  %p4416_p7 = por %p4415_p6, %p4414_p5 }
  0x51   :  { %1172 = vmatprep.subr.bf16.mxu0 %v3699_v10  ;;  %v3707_v20 = vcombine.high %v136_v13, %v140_v15  ;;  %1445 = vmatprep.subr.bf16.mxu1 %v3701_v14  ;;  %v3709_v21 = vcombine.high %v137_v16, %v141_v17  ;;  %v144_v22 = vld [vmem:[#allocation5 + $0xc0] sm:$0xff]  ;;  %v145_v24 = vld [vmem:[#allocation5 + $0xc8] sm:$0xff]  ;;  %v3706_v26 = vcombine.low %v136_v13, %v140_v15 }
  0x52   :  { %v148_v23 = vld [vmem:[#allocation5 + $0xe0] sm:$0xff]  ;;  %v149_v25 = vld [vmem:[#allocation5 + $0xe8] sm:$0xff]  ;;  %v3708_v27 = vcombine.low %v137_v16, %v141_v17  ;;  %p4417_p8 = pnand %p4416_p7, %p4410_p4 }
  0x53   :  { %v3715_v28 = vcombine.high %v144_v22, %v148_v23  ;;  %v3717_v29 = vcombine.high %v145_v24, %v149_v25  ;;  %v152_v30 = vld [vmem:[#allocation5 + $0x100] sm:$0xff]  ;;  %v153_v32 = vld [vmem:[#allocation5 + $0x108] sm:$0xff]  ;;  %v3714_v34 = vcombine.low %v144_v22, %v148_v23  ;;  %v3716_v35 = vcombine.low %v145_v24, %v149_v25 }
  0x54   :  { %1173 = vmatpush1.bf16.msra.mxu0 %v3698_v18  ;;  %1446 = vmatpush1.bf16.msra.mxu1 %v3700_v19  ;;  %v156_v31 = vld [vmem:[#allocation5 + $0x120] sm:$0xff]  ;;  %v157_v33 = vld [vmem:[#allocation5 + $0x128] sm:$0xff] }
  0x55   :  { %1174 = vmatprep.subr.bf16.mxu0 %v3707_v20  ;;  %1447 = vmatprep.subr.bf16.mxu1 %v3709_v21  ;;  %v3723_v36 = vcombine.high %v152_v30, %v156_v31  ;;  %v3725_v37 = vcombine.high %v153_v32, %v157_v33  ;;  %v160_v38 = vld [vmem:[#allocation5 + $0x140] sm:$0xff]  ;;  %v161_v40 = vld [vmem:[#allocation5 + $0x148] sm:$0xff]  ;;  %v3722_v42 = vcombine.low %v152_v30, %v156_v31 }
  0x56   :  { %v164_v39 = vld [vmem:[#allocation5 + $0x160] sm:$0xff]  ;;  %v165_v41 = vld [vmem:[#allocation5 + $0x168] sm:$0xff]  ;;  %v3724_v43 = vcombine.low %v153_v32, %v157_v33 }
  0x57   :  { %v3731_v44 = vcombine.high %v160_v38, %v164_v39  ;;  %v3733_v45 = vcombine.high %v161_v40, %v165_v41  ;;  %v168_v46 = vld [vmem:[#allocation5 + $0x180] sm:$0xff]  ;;  %v169_v48 = vld [vmem:[#allocation5 + $0x188] sm:$0xff]  ;;  %v3730_v50 = vcombine.low %v160_v38, %v164_v39  ;;  %v3732_v51 = vcombine.low %v161_v40, %v165_v41 }
  0x58   :  { %1175 = vmatpush1.bf16.msra.mxu0 %v3706_v26  ;;  %1448 = vmatpush1.bf16.msra.mxu1 %v3708_v27  ;;  %v172_v47 = vld [vmem:[#allocation5 + $0x1a0] sm:$0xff]  ;;  %v173_v49 = vld [vmem:[#allocation5 + $0x1a8] sm:$0xff] }
  0x59   :  { %1176 = vmatprep.subr.bf16.mxu0 %v3715_v28  ;;  %1449 = vmatprep.subr.bf16.mxu1 %v3717_v29  ;;  %v3739_v52 = vcombine.high %v168_v46, %v172_v47  ;;  %v3741_v53 = vcombine.high %v169_v48, %v173_v49  ;;  %v176_v54 = vld [vmem:[#allocation5 + $0x1c0] sm:$0xff]  ;;  %v177_v57 = vld [vmem:[#allocation5 + $0x1c8] sm:$0xff]  ;;  %v3738_v59 = vcombine.low %v168_v46, %v172_v47 }
  0x5a   :  { %v180_v55 = vld [vmem:[#allocation5 + $0x1e0] sm:$0xff]  ;;  %v181_v58 = vld [vmem:[#allocation5 + $0x1e8] sm:$0xff]  ;;  %v3740_v60 = vcombine.low %v169_v48, %v173_v49 }
  0x5b   :  { %v4554_v56 = vld [vmem:[#allocation2 + $0x4] ss:$8 sps:$4 sm:$0xff]   ;;  %v3747_v61 = vcombine.high %v176_v54, %v180_v55  ;;  %v3749_v62 = vcombine.high %v177_v57, %v181_v58  ;;  %v3746_v3 = vcombine.low %v176_v54, %v180_v55  ;;  %v3748_v4 = vcombine.low %v177_v57, %v181_v58 }
  0x5c   :  { %1177 = vmatpush1.bf16.msra.mxu0 %v3714_v34  ;;  %1450 = vmatpush1.bf16.msra.mxu1 %v3716_v35  ;;  %v184_v63 = vld [vmem:[#allocation5 + $0x200] sm:$0xff]  ;;  %v185_v1 = vld [vmem:[#allocation5 + $0x208] sm:$0xff] }
  0x5d   :  { %1178 = vmatprep.subr.bf16.mxu0 %v3723_v36  ;;  %1451 = vmatprep.subr.bf16.mxu1 %v3725_v37  ;;  %v188_v0 = vld [vmem:[#allocation5 + $0x220] sm:$0xff]  ;;  %v189_v2 = vld [vmem:[#allocation5 + $0x228] sm:$0xff] }
  0x5e   :  { %1202 = vmatprep.mubr.bf16.mxu0 %v4554_v56  ;;  %1475 = vmatprep.mubr.bf16.mxu1 %v4554_v56  ;;  %v3755_v5 = vcombine.high %v184_v63, %v188_v0  ;;  %v3757_v6 = vcombine.high %v185_v1, %v189_v2  ;;  %v192_v7 = vld [vmem:[#allocation5 + $0x240] sm:$0xff]  ;;  %v193_v9 = vld [vmem:[#allocation5 + $0x248] sm:$0xff]  ;;  %v3754_v11 = vcombine.low %v184_v63, %v188_v0 }
  0x5f   :  { %v196_v8 = vld [vmem:[#allocation5 + $0x260] sm:$0xff]  ;;  %v197_v10 = vld [vmem:[#allocation5 + $0x268] sm:$0xff]  ;;  %v3756_v12 = vcombine.low %v185_v1, %v189_v2  ;;  %v123_v1 = vld [vmem:[#allocation5 + $0x18] sm:$0xff] }
  0x60   :  { %1179 = vmatpush1.bf16.msra.mxu0 %v3722_v42  ;;  %1452 = vmatpush1.bf16.msra.mxu1 %v3724_v43  ;;  %v3763_v13 = vcombine.high %v192_v7, %v196_v8  ;;  %v3765_v14 = vcombine.high %v193_v9, %v197_v10  ;;  %v200_v15 = vld [vmem:[#allocation5 + $0x280] sm:$0xff]  ;;  %v201_v17 = vld [vmem:[#allocation5 + $0x288] sm:$0xff]  ;;  %v3762_v19 = vcombine.low %v192_v7, %v196_v8  ;;  %v127_v2 = vld [vmem:[#allocation5 + $0x38] sm:$0xff] }
  0x61   :  { %1180 = vmatprep.subr.bf16.mxu0 %v3731_v44  ;;  %1453 = vmatprep.subr.bf16.mxu1 %v3733_v45  ;;  %v204_v16 = vld [vmem:[#allocation5 + $0x2a0] sm:$0xff]  ;;  %v205_v18 = vld [vmem:[#allocation5 + $0x2a8] sm:$0xff]  ;;  %v3764_v20 = vcombine.low %v193_v9, %v197_v10  ;;  %v3697_v8 = vcombine.high %v123_v1, %v127_v2  ;;  %v130_v9 = vld [vmem:[#allocation5 + $0x50] sm:$0xff] }
  0x62   :  { %v3771_v21 = vcombine.high %v200_v15, %v204_v16  ;;  %v3773_v22 = vcombine.high %v201_v17, %v205_v18  ;;  %v208_v23 = vld [vmem:[#allocation5 + $0x2c0] sm:$0xff]  ;;  %v209_v25 = vld [vmem:[#allocation5 + $0x2c8] sm:$0xff]  ;;  %v3770_v27 = vcombine.low %v200_v15, %v204_v16  ;;  %v3772_v28 = vcombine.low %v201_v17, %v205_v18  ;;  %v134_v10 = vld [vmem:[#allocation5 + $0x70] sm:$0xff] }
  0x63   :  { %v212_v24 = vld [vmem:[#allocation5 + $0x2e0] sm:$0xff]  ;;  %v213_v26 = vld [vmem:[#allocation5 + $0x2e8] sm:$0xff]  ;;  %v4560_v15 = vld [vmem:[#allocation2 + $0x14] ss:$8 sps:$4 sm:$0xff]   ;;  %v3703_v16 = vcombine.high %v130_v9, %v134_v10 }
  0x64   :  { %1181 = vmatpush1.bf16.msra.mxu0 %v3730_v50  ;;  %1454 = vmatpush1.bf16.msra.mxu1 %v3732_v51  ;;  %v3779_v29 = vcombine.high %v208_v23, %v212_v24  ;;  %v3781_v30 = vcombine.high %v209_v25, %v213_v26  ;;  %v216_v31 = vld [vmem:[#allocation5 + $0x300] sm:$0xff]  ;;  %v217_v33 = vld [vmem:[#allocation5 + $0x308] sm:$0xff]  ;;  %v3778_v35 = vcombine.low %v208_v23, %v212_v24  ;;  %v138_v17 = vld [vmem:[#allocation5 + $0x90] sm:$0xff] }
  0x65   :  { %1182 = vmatprep.subr.bf16.mxu0 %v3739_v52  ;;  %1455 = vmatprep.subr.bf16.mxu1 %v3741_v53  ;;  %v220_v32 = vld [vmem:[#allocation5 + $0x320] sm:$0xff]  ;;  %v221_v34 = vld [vmem:[#allocation5 + $0x328] sm:$0xff]  ;;  %v3780_v36 = vcombine.low %v209_v25, %v213_v26  ;;  %v142_v18 = vld [vmem:[#allocation5 + $0xb0] sm:$0xff] }
  0x66   :  { %v3787_v37 = vcombine.high %v216_v31, %v220_v32  ;;  %v3789_v38 = vcombine.high %v217_v33, %v221_v34  ;;  %v224_v39 = vld [vmem:[#allocation5 + $0x340] sm:$0xff]  ;;  %v225_v41 = vld [vmem:[#allocation5 + $0x348] sm:$0xff]  ;;  %v3786_v43 = vcombine.low %v216_v31, %v220_v32  ;;  %v3788_v44 = vcombine.low %v217_v33, %v221_v34  ;;  %v4566_v26 = vld [vmem:[#allocation2 + $0x10] ss:$8 sps:$4 sm:$0xff]  }
  0x67   :  { %v228_v40 = vld [vmem:[#allocation5 + $0x360] sm:$0xff]  ;;  %v229_v42 = vld [vmem:[#allocation5 + $0x368] sm:$0xff]  ;;  %v3711_v24 = vcombine.high %v138_v17, %v142_v18  ;;  %v151_v31 = vld [vmem:[#allocation5 + $0xf8] sm:$0xff]  ;;  %v3710_v32 = vcombine.low %v138_v17, %v142_v18 }
  0x68   :  { %1183 = vmatpush1.bf16.msra.mxu0 %v3738_v59  ;;  %1456 = vmatpush1.bf16.msra.mxu1 %v3740_v60  ;;  %v3795_v45 = vcombine.high %v224_v39, %v228_v40  ;;  %v3797_v46 = vcombine.high %v225_v41, %v229_v42  ;;  %v232_v47 = vld [vmem:[#allocation5 + $0x380] sm:$0xff]  ;;  %v233_v49 = vld [vmem:[#allocation5 + $0x388] sm:$0xff]  ;;  %v3794_v51 = vcombine.low %v224_v39, %v228_v40  ;;  %v159_v39 = vld [vmem:[#allocation5 + $0x138] sm:$0xff] }
  0x69   :  { %1184 = vmatprep.subr.bf16.mxu0 %v3747_v61  ;;  %1457 = vmatprep.subr.bf16.mxu1 %v3749_v62  ;;  %v236_v48 = vld [vmem:[#allocation5 + $0x3a0] sm:$0xff]  ;;  %v237_v50 = vld [vmem:[#allocation5 + $0x3a8] sm:$0xff]  ;;  %v3796_v52 = vcombine.low %v225_v41, %v229_v42  ;;  %v122_v61 = vld [vmem:[#allocation5 + $0x10] sm:$0xff] }
  0x6a   :  { %v3803_v53 = vcombine.high %v232_v47, %v236_v48  ;;  %v3805_v54 = vcombine.high %v233_v49, %v237_v50  ;;  %v240_v55 = vld [vmem:[#allocation5 + $0x3c0] sm:$0xff]  ;;  %v241_v58 = vld [vmem:[#allocation5 + $0x3c8] sm:$0xff]  ;;  %v3802_v60 = vcombine.low %v232_v47, %v236_v48  ;;  %v126_v62 = vld [vmem:[#allocation5 + $0x30] sm:$0xff]  ;;  %v3804_v63 = vcombine.low %v233_v49, %v237_v50 }
  0x6b   :  { %v244_v57 = vld [vmem:[#allocation5 + $0x3e0] sm:$0xff]  ;;  %v245_v59 = vld [vmem:[#allocation5 + $0x3e8] sm:$0xff]  ;;  %v3695_v7 = vcombine.high %v122_v61, %v126_v62  ;;  %v4576_v47 = vld [vmem:[#allocation2 + $0x34] ss:$8 sps:$4 sm:$0xff]  }
  0x6c   :  { %1185 = vmatpush1.bf16.msra.mxu0 %v3746_v3  ;;  %1458 = vmatpush1.bf16.msra.mxu1 %v3748_v4  ;;  %v3811_v0 = vcombine.high %v240_v55, %v244_v57  ;;  %v3813_v3 = vcombine.high %v241_v58, %v245_v59  ;;  %v3810_v4 = vcombine.low %v240_v55, %v244_v57  ;;  %v163_v48 = vld [vmem:[#allocation5 + $0x158] sm:$0xff]  ;;  %v174_v55 = vld [vmem:[#allocation5 + $0x1b0] sm:$0xff]  ;;  %v4590_v18 = vld [vmem:[#allocation2 + $0x40] ss:$8 sps:$4 sm:$0xff]  }
  0x6d   :  { %1186 = vmatprep.subr.bf16.mxu0 %v3755_v5  ;;  %1459 = vmatprep.subr.bf16.mxu1 %v3757_v6  ;;  %v3812_v5 = vcombine.low %v241_v58, %v245_v59  ;;  %v4558_v6 = vld [vmem:[#allocation2] ss:$8 sps:$4 sm:$0xff]   ;;  %v167_v49 = vld [vmem:[#allocation5 + $0x178] sm:$0xff] }
  0x6e   :  { %v171_v57 = vld [vmem:[#allocation5 + $0x198] sm:$0xff] }
  0x6f   :  { %v175_v58 = vld [vmem:[#allocation5 + $0x1b8] sm:$0xff] }
  0x70   :  { %1187 = vmatpush1.bf16.msra.mxu0 %v3754_v11  ;;  %1460 = vmatpush1.bf16.msra.mxu1 %v3756_v12  ;;  %v3694_v11 = vcombine.low %v122_v61, %v126_v62  ;;  %v131_v12 = vld [vmem:[#allocation5 + $0x58] sm:$0xff] }
  0x71   :  { %1188 = vmatprep.subr.bf16.mxu0 %v3763_v13  ;;  %1461 = vmatprep.subr.bf16.mxu1 %v3765_v14  ;;  %v135_v13 = vld [vmem:[#allocation5 + $0x78] sm:$0xff]  ;;  %v3696_v14 = vcombine.low %v123_v1, %v127_v2  ;;  %v182_v1 = vld [vmem:[#allocation5 + $0x1f0] sm:$0xff]  ;;  %v4584_v2 = vld [vmem:[#allocation2 + $0x44] ss:$8 sps:$4 sm:$0xff]  }
  0x72   :  { %v3704_v23 = vcombine.low %v131_v12, %v135_v13  ;;  %v4582_v62 = vld [vmem:[#allocation2 + $0x30] ss:$8 sps:$4 sm:$0xff]  }
  0x74   :  { %1189 = vmatpush1.bf16.msra.mxu0 %v3762_v19  ;;  %1462 = vmatpush1.bf16.msra.mxu1 %v3764_v20  ;;  %v3705_v19 = vcombine.high %v131_v12, %v135_v13  ;;  %v139_v20 = vld [vmem:[#allocation5 + $0x98] sm:$0xff] }
  0x75   :  { %1190 = vmatprep.subr.bf16.mxu0 %v3771_v21  ;;  %1463 = vmatprep.subr.bf16.mxu1 %v3773_v22  ;;  %v143_v21 = vld [vmem:[#allocation5 + $0xb8] sm:$0xff]  ;;  %v3702_v22 = vcombine.low %v130_v9, %v134_v10  ;;  %v186_v10 = vld [vmem:[#allocation5 + $0x210] sm:$0xff] }
  0x76   :  { %v3713_v25 = vcombine.high %v139_v20, %v143_v21  ;;  %v3712_v33 = vcombine.low %v139_v20, %v143_v21  ;;  %v187_v12 = vld [vmem:[#allocation5 + $0x218] sm:$0xff]  ;;  %v194_v20 = vld [vmem:[#allocation5 + $0x250] sm:$0xff] }
  0x77   :  { %v191_v13 = vld [vmem:[#allocation5 + $0x238] sm:$0xff]  ;;  %v198_v21 = vld [vmem:[#allocation5 + $0x270] sm:$0xff] }
  0x78   :  { %1191 = vmatpush1.bf16.msra.mxu0 %v3770_v27  ;;  %1464 = vmatpush1.bf16.msra.mxu1 %v3772_v28  ;;  %v146_v27 = vld [vmem:[#allocation5 + $0xd0] sm:$0xff] }
  0x79   :  { %1192 = vmatprep.subr.bf16.mxu0 %v3779_v29  ;;  %1465 = vmatprep.subr.bf16.mxu1 %v3781_v30  ;;  %v150_v28 = vld [vmem:[#allocation5 + $0xf0] sm:$0xff]  ;;  %v4568_v29 = vld [vmem:[#allocation2 + $0x24] ss:$8 sps:$4 sm:$0xff]   ;;  %v147_v30 = vld [vmem:[#allocation5 + $0xd8] sm:$0xff] }
  0x7a   :  { %v3719_v34 = vcombine.high %v146_v27, %v150_v28  ;;  %v3718_v40 = vcombine.low %v146_v27, %v150_v28  ;;  %v3720_v41 = vcombine.low %v147_v30, %v151_v31  ;;  %v3760_v27 = vcombine.low %v187_v12, %v191_v13 }
  0x7b   :  { %v3767_v28 = vcombine.high %v194_v20, %v198_v21 }
  0x7c   :  { %1193 = vmatpush1.bf16.msra.mxu0 %v3778_v35  ;;  %1466 = vmatpush1.bf16.msra.mxu1 %v3780_v36  ;;  %v3721_v35 = vcombine.high %v147_v30, %v151_v31  ;;  %v154_v36 = vld [vmem:[#allocation5 + $0x110] sm:$0xff] }
  0x7d   :  { %1194 = vmatprep.subr.bf16.mxu0 %v3787_v37  ;;  %1467 = vmatprep.subr.bf16.mxu1 %v3789_v38  ;;  %v158_v37 = vld [vmem:[#allocation5 + $0x130] sm:$0xff]  ;;  %v155_v38 = vld [vmem:[#allocation5 + $0x118] sm:$0xff] }
  0x7e   :  { %v3727_v42 = vcombine.high %v154_v36, %v158_v37  ;;  %v3726_v50 = vcombine.low %v154_v36, %v158_v37  ;;  %v202_v31 = vld [vmem:[#allocation5 + $0x290] sm:$0xff] }
  0x80   :  { %1195 = vmatpush1.bf16.msra.mxu0 %v3786_v43  ;;  %1468 = vmatpush1.bf16.msra.mxu1 %v3788_v44  ;;  %v4574_v43 = vld [vmem:[#allocation2 + $0x20] ss:$8 sps:$4 sm:$0xff]   ;;  %v3729_v44 = vcombine.high %v155_v38, %v159_v39 }
  0x81   :  { %1196 = vmatprep.subr.bf16.mxu0 %v3795_v45  ;;  %1469 = vmatprep.subr.bf16.mxu1 %v3797_v46  ;;  %v162_v45 = vld [vmem:[#allocation5 + $0x150] sm:$0xff] }
  0x82   :  { %v166_v46 = vld [vmem:[#allocation5 + $0x170] sm:$0xff] }
  0x83   :  { %v3734_v59 = vcombine.low %v162_v45, %v166_v46 }
  0x84   :  { %1197 = vmatpush1.bf16.msra.mxu0 %v3794_v51  ;;  %1470 = vmatpush1.bf16.msra.mxu1 %v3796_v52  ;;  %v3728_v51 = vcombine.low %v155_v38, %v159_v39  ;;  %v3735_v52 = vcombine.high %v162_v45, %v166_v46  ;;  %v4598_v38 = vld [vmem:[#allocation2 + $0x50] ss:$8 sps:$4 sm:$0xff]  }
  0x85   :  { %1198 = vmatprep.subr.bf16.mxu0 %v3803_v53  ;;  %1471 = vmatprep.subr.bf16.mxu1 %v3805_v54  ;;  %v3737_v53 = vcombine.high %v163_v48, %v167_v49  ;;  %v170_v54 = vld [vmem:[#allocation5 + $0x190] sm:$0xff]  ;;  %v215_v45 = vld [vmem:[#allocation5 + $0x2f8] sm:$0xff] }
  0x86   :  { %v3743_v61 = vcombine.high %v170_v54, %v174_v55 }
  0x88   :  { %1199 = vmatpush1.bf16.msra.mxu0 %v3802_v60  ;;  %1472 = vmatpush1.bf16.msra.mxu1 %v3804_v63  ;;  %v3736_v60 = vcombine.low %v163_v48, %v167_v49  ;;  %v3745_v63 = vcombine.high %v171_v57, %v175_v58 }
  0x89   :  { %1200 = vmatprep.subr.bf16.mxu0 %v3811_v0  ;;  %1473 = vmatprep.subr.bf16.mxu1 %v3813_v3  ;;  %v178_v0 = vld [vmem:[#allocation5 + $0x1d0] sm:$0xff]  ;;  %v179_v3 = vld [vmem:[#allocation5 + $0x1d8] sm:$0xff] }
  0x8c   :  { %1201 = vmatpush1.bf16.msra.mxu0 %v3810_v4  ;;  %1474 = vmatpush1.bf16.msra.mxu1 %v3812_v5  ;;  %v183_v4 = vld [vmem:[#allocation5 + $0x1f8] sm:$0xff]  ;;  %v3742_v5 = vcombine.low %v170_v54, %v174_v55 }
  0x8d   :  { %1716 = vmatprep.subr.bf16.mxu0 %v3695_v7  ;;  %1989 = vmatprep.subr.bf16.mxu1 %v3697_v8  ;;  %v3744_v7 = vcombine.low %v171_v57, %v175_v58  ;;  %v3751_v8 = vcombine.high %v178_v0, %v182_v1  ;;  %v3753_v9 = vcombine.high %v179_v3, %v183_v4  ;;  %v223_v54 = vld [vmem:[#allocation5 + $0x338] sm:$0xff] }
  0x8f   :  { %1203 = vmatmul.mubr.bf16.vlgmr.msra.gmra.mrb[0].mxu0 %v4558_v6  ;;  %1476 = vmatmul.mubr.bf16.vlgmr.msra.gmra.mrb[0].mxu1 %v4558_v6 }
  0x90   :  { %1717 = vmatpush1.bf16.msra.mxu0 %v3694_v11  ;;  %1990 = vmatpush1.bf16.msra.mxu1 %v3696_v14  ;;  %v190_v11 = vld [vmem:[#allocation5 + $0x230] sm:$0xff]  ;;  %v3750_v14 = vcombine.low %v178_v0, %v182_v1  ;;  %v227_v1 = vld [vmem:[#allocation5 + $0x358] sm:$0xff] }
  0x91   :  { %1212 = vmatprep.mubr.bf16.mxu0 %v4560_v15  ;;  %1485 = vmatprep.mubr.bf16.mxu1 %v4560_v15  ;;  %v3759_v17 = vcombine.high %v186_v10, %v190_v11  ;;  %v4608_v0 = vld [vmem:[#allocation2 + $0x74] ss:$8 sps:$4 sm:$0xff]  }
  0x92   :  { %1718 = vmatprep.subr.bf16.mxu0 %v3703_v16  ;;  %1991 = vmatprep.subr.bf16.mxu1 %v3705_v19  ;;  %v3752_v16 = vcombine.low %v179_v3, %v183_v4  ;;  %v3761_v19 = vcombine.high %v187_v12, %v191_v13  ;;  %v231_v3 = vld [vmem:[#allocation5 + $0x378] sm:$0xff] }
  0x93   :  { %v239_v12 = vld [vmem:[#allocation5 + $0x3b8] sm:$0xff] }
  0x94   :  { %1719 = vmatpush1.bf16.msra.mxu0 %v3702_v22  ;;  %1992 = vmatpush1.bf16.msra.mxu1 %v3704_v23  ;;  %v4592_v22 = vld [vmem:[#allocation2 + $0x54] ss:$8 sps:$4 sm:$0xff]  }
  0x95   :  { %1720 = vmatprep.subr.bf16.mxu0 %v3711_v24  ;;  %1993 = vmatprep.subr.bf16.mxu1 %v3713_v25  ;;  %v195_v23 = vld [vmem:[#allocation5 + $0x258] sm:$0xff]  ;;  %v3758_v25 = vcombine.low %v186_v10, %v190_v11  ;;  %v238_v10 = vld [vmem:[#allocation5 + $0x3b0] sm:$0xff] }
  0x96   :  { %v199_v24 = vld [vmem:[#allocation5 + $0x278] sm:$0xff] }
  0x97   :  { %1213 = vmatmul.mubr.bf16.gmra.mrb[4].mxu0 %v4566_v26  ;;  %1486 = vmatmul.mubr.bf16.gmra.mrb[4].mxu1 %v4566_v26  ;;  %v3769_v30 = vcombine.high %v195_v23, %v199_v24  ;;  %v3768_v36 = vcombine.low %v195_v23, %v199_v24  ;;  %v235_v11 = vld [vmem:[#allocation5 + $0x398] sm:$0xff]  ;;  %v4616_v23 = vld [vmem:[#allocation2 + $0x84] ss:$8 sps:$4 sm:$0xff]  }
  0x98   :  { %1222 = vmatprep.mubr.bf16.mxu0 %v4568_v29  ;;  %1495 = vmatprep.mubr.bf16.mxu1 %v4568_v29  ;;  %v243_v24 = vld [vmem:[#allocation5 + $0x3d8] sm:$0xff] }
  0x99   :  { %1721 = vmatpush1.bf16.msra.mxu0 %v3710_v32  ;;  %1994 = vmatpush1.bf16.msra.mxu1 %v3712_v33  ;;  %v206_v32 = vld [vmem:[#allocation5 + $0x2b0] sm:$0xff]  ;;  %v203_v33 = vld [vmem:[#allocation5 + $0x298] sm:$0xff] }
  0x9a   :  { %1722 = vmatprep.subr.bf16.mxu0 %v3719_v34  ;;  %1995 = vmatprep.subr.bf16.mxu1 %v3721_v35  ;;  %v207_v34 = vld [vmem:[#allocation5 + $0x2b8] sm:$0xff]  ;;  %v3766_v35 = vcombine.low %v194_v20, %v198_v21  ;;  %v3775_v37 = vcombine.high %v202_v31, %v206_v32  ;;  %v3774_v46 = vcombine.low %v202_v31, %v206_v32  ;;  %v242_v20 = vld [vmem:[#allocation5 + $0x3d0] sm:$0xff] }
  0x9b   :  { %v3777_v39 = vcombine.high %v203_v33, %v207_v34  ;;  %v3776_v48 = vcombine.low %v203_v33, %v207_v34  ;;  %v246_v21 = vld [vmem:[#allocation5 + $0x3f0] sm:$0xff]  ;;  %v4622_v34 = vld [vmem:[#allocation2 + $0x80] ss:$8 sps:$4 sm:$0xff]  }
  0x9c   :  { %v3814_v32 = vcombine.low %v242_v20, %v246_v21 }
  0x9d   :  { %1723 = vmatpush1.bf16.msra.mxu0 %v3718_v40  ;;  %1996 = vmatpush1.bf16.msra.mxu1 %v3720_v41  ;;  %v210_v40 = vld [vmem:[#allocation5 + $0x2d0] sm:$0xff] }
  0x9e   :  { %1724 = vmatprep.subr.bf16.mxu0 %v3727_v42  ;;  %1997 = vmatprep.subr.bf16.mxu1 %v3729_v44  ;;  %v214_v41 = vld [vmem:[#allocation5 + $0x2f0] sm:$0xff]  ;;  %v4600_v42 = vld [vmem:[#allocation2 + $0x64] ss:$8 sps:$4 sm:$0xff]   ;;  %v211_v44 = vld [vmem:[#allocation5 + $0x2d8] sm:$0xff] }
  0x9f   :  { %1223 = vmatmul.mubr.bf16.gmra.mrb[8].mxu0 %v4574_v43  ;;  %1496 = vmatmul.mubr.bf16.gmra.mrb[8].mxu1 %v4574_v43  ;;  %v3783_v49 = vcombine.high %v210_v40, %v214_v41  ;;  %v3782_v55 = vcombine.low %v210_v40, %v214_v41  ;;  %v3784_v57 = vcombine.low %v211_v44, %v215_v45  ;;  %v4640_v40 = vld [vmem:[#allocation2 + $0xb4] ss:$8 sps:$4 sm:$0xff]   ;;  %v4646_v41 = vld [vmem:[#allocation2 + $0xb0] ss:$8 sps:$4 sm:$0xff]  }
  0xa0   :  { %1232 = vmatprep.mubr.bf16.mxu0 %v4576_v47  ;;  %1505 = vmatprep.mubr.bf16.mxu1 %v4576_v47 }
  0xa1   :  { %1725 = vmatpush1.bf16.msra.mxu0 %v3726_v50  ;;  %1998 = vmatpush1.bf16.msra.mxu1 %v3728_v51  ;;  %v3785_v50 = vcombine.high %v211_v44, %v215_v45  ;;  %v218_v51 = vld [vmem:[#allocation5 + $0x310] sm:$0xff]  ;;  %v4648_v44 = vld [vmem:[#allocation2 + $0xc4] ss:$8 sps:$4 sm:$0xff]   ;;  %v4261_v45 = vld [vmem:[#allocation2 + $0xc0] ss:$8 sps:$4 sm:$0xff]  }
  0xa2   :  { %1726 = vmatprep.subr.bf16.mxu0 %v3735_v52  ;;  %1999 = vmatprep.subr.bf16.mxu1 %v3737_v53  ;;  %v222_v52 = vld [vmem:[#allocation5 + $0x330] sm:$0xff]  ;;  %v219_v53 = vld [vmem:[#allocation5 + $0x318] sm:$0xff] }
  0xa3   :  { %v3791_v58 = vcombine.high %v218_v51, %v222_v52  ;;  %v3790_v4 = vcombine.low %v218_v51, %v222_v52  ;;  %v4268_v51 = vld [vmem:[#allocation2 + $0xf4] ss:$8 sps:$4 sm:$0xff]   ;;  %v4270_v52 = vld [vmem:[#allocation2 + $0xf0] ss:$8 sps:$4 sm:$0xff]  }
  0xa5   :  { %1727 = vmatpush1.bf16.msra.mxu0 %v3734_v59  ;;  %2000 = vmatpush1.bf16.msra.mxu1 %v3736_v60  ;;  %v4606_v59 = vld [vmem:[#allocation2 + $0x60] ss:$8 sps:$4 sm:$0xff]   ;;  %v3793_v60 = vcombine.high %v219_v53, %v223_v54 }
  0xa6   :  { %1728 = vmatprep.subr.bf16.mxu0 %v3743_v61  ;;  %2001 = vmatprep.subr.bf16.mxu1 %v3745_v63  ;;  %v226_v61 = vld [vmem:[#allocation5 + $0x350] sm:$0xff] }
  0xa7   :  { %1233 = vmatmul.mubr.bf16.gmra.mrb[12].mxu0 %v4582_v62  ;;  %1506 = vmatmul.mubr.bf16.gmra.mrb[12].mxu1 %v4582_v62  ;;  %v230_v63 = vld [vmem:[#allocation5 + $0x370] sm:$0xff] }
  0xa8   :  { %1242 = vmatprep.mubr.bf16.mxu0 %v4584_v2  ;;  %1515 = vmatprep.mubr.bf16.mxu1 %v4584_v2  ;;  %v3798_v13 = vcombine.low %v226_v61, %v230_v63 }
  0xa9   :  { %1729 = vmatpush1.bf16.msra.mxu0 %v3742_v5  ;;  %2002 = vmatpush1.bf16.msra.mxu1 %v3744_v7  ;;  %v3792_v5 = vcombine.low %v219_v53, %v223_v54  ;;  %v3799_v7 = vcombine.high %v226_v61, %v230_v63  ;;  %v4271_v53 = vld [vmem:[#allocation2 + $0x104] ss:$8 sps:$4 sm:$0xff]   ;;  %v4273_v54 = vld [vmem:[#allocation2 + $0x100] ss:$8 sps:$4 sm:$0xff]   ;;  %v4280_v61 = vld [vmem:[#allocation2 + $0x134] ss:$8 sps:$4 sm:$0xff]  }
  0xaa   :  { %1730 = vmatprep.subr.bf16.mxu0 %v3751_v8  ;;  %2003 = vmatprep.subr.bf16.mxu1 %v3753_v9  ;;  %v3801_v8 = vcombine.high %v227_v1, %v231_v3  ;;  %v234_v9 = vld [vmem:[#allocation5 + $0x390] sm:$0xff] }
  0xab   :  { %v4282_v63 = vld [vmem:[#allocation2 + $0x130] ss:$8 sps:$4 sm:$0xff]  }
  0xad   :  { %1731 = vmatpush1.bf16.msra.mxu0 %v3750_v14  ;;  %2004 = vmatpush1.bf16.msra.mxu1 %v3752_v16  ;;  %v3800_v14 = vcombine.low %v227_v1, %v231_v3  ;;  %v3807_v16 = vcombine.high %v234_v9, %v238_v10  ;;  %v4283_v1 = vld [vmem:[#allocation2 + $0x144] ss:$8 sps:$4 sm:$0xff]   ;;  %v4285_v3 = vld [vmem:[#allocation2 + $0x140] ss:$8 sps:$4 sm:$0xff]  }
  0xae   :  { %1732 = vmatprep.subr.bf16.mxu0 %v3759_v17  ;;  %2005 = vmatprep.subr.bf16.mxu1 %v3761_v19  ;;  %v4614_v17 = vld [vmem:[#allocation2 + $0x70] ss:$8 sps:$4 sm:$0xff]   ;;  %v3809_v19 = vcombine.high %v235_v11, %v239_v12 }
  0xaf   :  { %1243 = vmatmul.mubr.bf16.gmra.mrb[16].mxu0 %v4590_v18  ;;  %1516 = vmatmul.mubr.bf16.gmra.mrb[16].mxu1 %v4590_v18 }
  0xb0   :  { %1252 = vmatprep.mubr.bf16.mxu0 %v4592_v22  ;;  %1525 = vmatprep.mubr.bf16.mxu1 %v4592_v22 }
  0xb1   :  { %1733 = vmatpush1.bf16.msra.mxu0 %v3758_v25  ;;  %2006 = vmatpush1.bf16.msra.mxu1 %v3760_v27  ;;  %v247_v25 = vld [vmem:[#allocation5 + $0x3f8] sm:$0xff]  ;;  %v3806_v27 = vcombine.low %v234_v9, %v238_v10 }
  0xb2   :  { %1734 = vmatprep.subr.bf16.mxu0 %v3767_v28  ;;  %2007 = vmatprep.subr.bf16.mxu1 %v3769_v30  ;;  %v3808_v28 = vcombine.low %v235_v11, %v239_v12  ;;  %v3815_v30 = vcombine.high %v242_v20, %v246_v21  ;;  %v3817_v31 = vcombine.high %v243_v24, %v247_v25  ;;  %v4292_v9 = vld [vmem:[#allocation2 + $0x174] ss:$8 sps:$4 sm:$0xff]   ;;  %v4294_v10 = vld [vmem:[#allocation2 + $0x170] ss:$8 sps:$4 sm:$0xff]   ;;  %v250_v11 = vlaneseq }
  0xb3   :  { %v3816_v33 = vcombine.low %v243_v24, %v247_v25 }
  0xb4   :  { %v4661_v12 = vshrl.u32 %v250_v11, 7 }
  0xb5   :  { %1735 = vmatpush1.bf16.msra.mxu0 %v3766_v35  ;;  %2008 = vmatpush1.bf16.msra.mxu1 %v3768_v36  ;;  %v4624_v35 = vld [vmem:[#allocation2 + $0x94] ss:$8 sps:$4 sm:$0xff]   ;;  %v4630_v36 = vld [vmem:[#allocation2 + $0x90] ss:$8 sps:$4 sm:$0xff]  }
  0xb6   :  { %1736 = vmatprep.subr.bf16.mxu0 %v3775_v37  ;;  %2009 = vmatprep.subr.bf16.mxu1 %v3777_v39  ;;  %v4632_v37 = vld [vmem:[#allocation2 + $0xa4] ss:$8 sps:$4 sm:$0xff]   ;;  %v4638_v39 = vld [vmem:[#allocation2 + $0xa0] ss:$8 sps:$4 sm:$0xff]  }
  0xb7   :  { %1253 = vmatmul.mubr.bf16.gmra.mrb[20].mxu0 %v4598_v38  ;;  %1526 = vmatmul.mubr.bf16.gmra.mrb[20].mxu1 %v4598_v38 }
  0xb8   :  { %1262 = vmatprep.mubr.bf16.mxu0 %v4600_v42  ;;  %1535 = vmatprep.mubr.bf16.mxu1 %v4600_v42 }
  0xb9   :  { %1737 = vmatpush1.bf16.msra.mxu0 %v3774_v46  ;;  %2010 = vmatpush1.bf16.msra.mxu1 %v3776_v48  ;;  %v4262_v46 = vld [vmem:[#allocation2 + $0xd4] ss:$8 sps:$4 sm:$0xff]   ;;  %v4264_v48 = vld [vmem:[#allocation2 + $0xd0] ss:$8 sps:$4 sm:$0xff]  }
  0xba   :  { %1738 = vmatprep.subr.bf16.mxu0 %v3783_v49  ;;  %2011 = vmatprep.subr.bf16.mxu1 %v3785_v50  ;;  %v4265_v49 = vld [vmem:[#allocation2 + $0xe4] ss:$8 sps:$4 sm:$0xff]   ;;  %v4267_v50 = vld [vmem:[#allocation2 + $0xe0] ss:$8 sps:$4 sm:$0xff]  }
  0xbd   :  { %1739 = vmatpush1.bf16.msra.mxu0 %v3782_v55  ;;  %2012 = vmatpush1.bf16.msra.mxu1 %v3784_v57  ;;  %v4274_v55 = vld [vmem:[#allocation2 + $0x114] ss:$8 sps:$4 sm:$0xff]   ;;  %v4276_v57 = vld [vmem:[#allocation2 + $0x110] ss:$8 sps:$4 sm:$0xff]  }
  0xbe   :  { %1740 = vmatprep.subr.bf16.mxu0 %v3791_v58  ;;  %2013 = vmatprep.subr.bf16.mxu1 %v3793_v60  ;;  %v4277_v58 = vld [vmem:[#allocation2 + $0x124] ss:$8 sps:$4 sm:$0xff]   ;;  %v4279_v60 = vld [vmem:[#allocation2 + $0x120] ss:$8 sps:$4 sm:$0xff]  }
  0xbf   :  { %1263 = vmatmul.mubr.bf16.gmra.mrb[24].mxu0 %v4606_v59  ;;  %1536 = vmatmul.mubr.bf16.gmra.mrb[24].mxu1 %v4606_v59 }
  0xc0   :  { %1272 = vmatprep.mubr.bf16.mxu0 %v4608_v0  ;;  %1545 = vmatprep.mubr.bf16.mxu1 %v4608_v0 }
  0xc1   :  { %1741 = vmatpush1.bf16.msra.mxu0 %v3790_v4  ;;  %2014 = vmatpush1.bf16.msra.mxu1 %v3792_v5  ;;  %v4286_v4 = vld [vmem:[#allocation2 + $0x154] ss:$8 sps:$4 sm:$0xff]   ;;  %v4288_v5 = vld [vmem:[#allocation2 + $0x150] ss:$8 sps:$4 sm:$0xff]  }
  0xc2   :  { %1742 = vmatprep.subr.bf16.mxu0 %v3799_v7  ;;  %2015 = vmatprep.subr.bf16.mxu1 %v3801_v8  ;;  %v4289_v7 = vld [vmem:[#allocation2 + $0x164] ss:$8 sps:$4 sm:$0xff]   ;;  %v4291_v8 = vld [vmem:[#allocation2 + $0x160] ss:$8 sps:$4 sm:$0xff]  }
  0xc5   :  { %1743 = vmatpush1.bf16.msra.mxu0 %v3798_v13  ;;  %2016 = vmatpush1.bf16.msra.mxu1 %v3800_v14  ;;  %v248_v13 = vld [vmem:[#allocation7] sm:$0xff]  ;;  %v256_v14 = vsub.s32 1, %v4661_v12 }
  0xc6   :  { %1744 = vmatprep.subr.bf16.mxu0 %v3807_v16  ;;  %2017 = vmatprep.subr.bf16.mxu1 %v3809_v19 }
  0xc7   :  { %1273 = vmatmul.mubr.bf16.gmra.mrb[28].mxu0 %v4614_v17  ;;  %1546 = vmatmul.mubr.bf16.gmra.mrb[28].mxu1 %v4614_v17  ;;  %v4676_v19 = vrot.slane %v248_v13, %v256_v14 }
  0xc8   :  { %1282 = vmatprep.mubr.bf16.mxu0 %v4616_v23  ;;  %1555 = vmatprep.mubr.bf16.mxu1 %v4616_v23 }
  0xc9   :  { %1745 = vmatpush1.bf16.msra.mxu0 %v3806_v27  ;;  %2018 = vmatpush1.bf16.msra.mxu1 %v3808_v28 }
  0xca   :  { %1746 = vmatprep.subr.bf16.mxu0 %v3815_v30  ;;  %2019 = vmatprep.subr.bf16.mxu1 %v3817_v31 }
  0xcd   :  { %1747 = vmatpush1.bf16.msra.mxu0 %v3814_v32  ;;  %2020 = vmatpush1.bf16.msra.mxu1 %v3816_v33 }
  0xcf   :  { %1283 = vmatmul.mubr.bf16.gmra.mrb[32].mxu0 %v4622_v34  ;;  %1556 = vmatmul.mubr.bf16.gmra.mrb[32].mxu1 %v4622_v34 }
  0xd0   :  { %1292 = vmatprep.mubr.bf16.mxu0 %v4624_v35  ;;  %1565 = vmatprep.mubr.bf16.mxu1 %v4624_v35 }
  0xd7   :  { %1293 = vmatmul.mubr.bf16.gmra.mrb[36].mxu0 %v4630_v36  ;;  %1566 = vmatmul.mubr.bf16.gmra.mrb[36].mxu1 %v4630_v36 }
  0xd8   :  { %1302 = vmatprep.mubr.bf16.mxu0 %v4632_v37  ;;  %1575 = vmatprep.mubr.bf16.mxu1 %v4632_v37 }
  0xdf   :  { %1303 = vmatmul.mubr.bf16.gmra.mrb[40].mxu0 %v4638_v39  ;;  %1576 = vmatmul.mubr.bf16.gmra.mrb[40].mxu1 %v4638_v39 }
  0xe0   :  { %1312 = vmatprep.mubr.bf16.mxu0 %v4640_v40  ;;  %1585 = vmatprep.mubr.bf16.mxu1 %v4640_v40 }
  0xe7   :  { %1313 = vmatmul.mubr.bf16.gmra.mrb[44].mxu0 %v4646_v41  ;;  %1586 = vmatmul.mubr.bf16.gmra.mrb[44].mxu1 %v4646_v41 }
  0xe8   :  { %1322 = vmatprep.mubr.bf16.mxu0 %v4648_v44  ;;  %1595 = vmatprep.mubr.bf16.mxu1 %v4648_v44 }
  0xef   :  { %1323 = vmatmul.mubr.bf16.gmra.mrb[48].mxu0 %v4261_v45  ;;  %1596 = vmatmul.mubr.bf16.gmra.mrb[48].mxu1 %v4261_v45 }
  0xf0   :  { %1332 = vmatprep.mubr.bf16.mxu0 %v4262_v46  ;;  %1605 = vmatprep.mubr.bf16.mxu1 %v4262_v46 }
  0xf7   :  { %1333 = vmatmul.mubr.bf16.gmra.mrb[52].mxu0 %v4264_v48  ;;  %1606 = vmatmul.mubr.bf16.gmra.mrb[52].mxu1 %v4264_v48 }
  0xf8   :  { %1342 = vmatprep.mubr.bf16.mxu0 %v4265_v49  ;;  %1615 = vmatprep.mubr.bf16.mxu1 %v4265_v49 }
  0xff   :  { %1343 = vmatmul.mubr.bf16.gmra.mrb[56].mxu0 %v4267_v50  ;;  %1616 = vmatmul.mubr.bf16.gmra.mrb[56].mxu1 %v4267_v50 }
 0x100   :  { %1352 = vmatprep.mubr.bf16.mxu0 %v4268_v51  ;;  %1625 = vmatprep.mubr.bf16.mxu1 %v4268_v51 }
 0x107   :  { %1353 = vmatmul.mubr.bf16.gmra.mrb[60].mxu0 %v4270_v52  ;;  %1626 = vmatmul.mubr.bf16.gmra.mrb[60].mxu1 %v4270_v52 }
 0x108   :  { %1362 = vmatprep.mubr.bf16.mxu0 %v4271_v53  ;;  %1635 = vmatprep.mubr.bf16.mxu1 %v4271_v53 }
 0x10f   :  { %1363 = vmatmul.mubr.bf16.gmra.mrb[64].mxu0 %v4273_v54  ;;  %1636 = vmatmul.mubr.bf16.gmra.mrb[64].mxu1 %v4273_v54 }
 0x110   :  { %1372 = vmatprep.mubr.bf16.mxu0 %v4274_v55  ;;  %1645 = vmatprep.mubr.bf16.mxu1 %v4274_v55 }
 0x117   :  { %1373 = vmatmul.mubr.bf16.gmra.mrb[68].mxu0 %v4276_v57  ;;  %1646 = vmatmul.mubr.bf16.gmra.mrb[68].mxu1 %v4276_v57 }
 0x118   :  { %1382 = vmatprep.mubr.bf16.mxu0 %v4277_v58  ;;  %1655 = vmatprep.mubr.bf16.mxu1 %v4277_v58 }
 0x11f   :  { %1383 = vmatmul.mubr.bf16.gmra.mrb[72].mxu0 %v4279_v60  ;;  %1656 = vmatmul.mubr.bf16.gmra.mrb[72].mxu1 %v4279_v60 }
 0x120   :  { %1392 = vmatprep.mubr.bf16.mxu0 %v4280_v61  ;;  %1665 = vmatprep.mubr.bf16.mxu1 %v4280_v61 }
 0x127   :  { %1393 = vmatmul.mubr.bf16.gmra.mrb[76].mxu0 %v4282_v63  ;;  %1666 = vmatmul.mubr.bf16.gmra.mrb[76].mxu1 %v4282_v63 }
 0x128   :  { %1402 = vmatprep.mubr.bf16.mxu0 %v4283_v1  ;;  %1675 = vmatprep.mubr.bf16.mxu1 %v4283_v1 }
 0x12f   :  { %1403 = vmatmul.mubr.bf16.gmra.mrb[80].mxu0 %v4285_v3  ;;  %1676 = vmatmul.mubr.bf16.gmra.mrb[80].mxu1 %v4285_v3 }
 0x130   :  { %1412 = vmatprep.mubr.bf16.mxu0 %v4286_v4  ;;  %1685 = vmatprep.mubr.bf16.mxu1 %v4286_v4 }
 0x137   :  { %1413 = vmatmul.mubr.bf16.gmra.mrb[84].mxu0 %v4288_v5  ;;  %1686 = vmatmul.mubr.bf16.gmra.mrb[84].mxu1 %v4288_v5 }
 0x138   :  { %1422 = vmatprep.mubr.bf16.mxu0 %v4289_v7  ;;  %1695 = vmatprep.mubr.bf16.mxu1 %v4289_v7 }
 0x13f   :  { %1423 = vmatmul.mubr.bf16.gmra.mrb[88].mxu0 %v4291_v8  ;;  %1696 = vmatmul.mubr.bf16.gmra.mrb[88].mxu1 %v4291_v8 }
 0x140   :  { %1432 = vmatprep.mubr.bf16.mxu0 %v4292_v9  ;;  %1705 = vmatprep.mubr.bf16.mxu1 %v4292_v9 }
 0x147   :  { %1433 = vmatmul.mubr.bf16.gmra.mrb[92].mxu0 %v4294_v10  ;;  %1706 = vmatmul.mubr.bf16.gmra.mrb[92].mxu1 %v4294_v10 }
 0x148   :  { %1748 = vmatprep.mubr.bf16.mxu0 %v4554_v56  ;;  %2021 = vmatprep.mubr.bf16.mxu1 %v4554_v56  ;;  %v252_v56 = vsub.s32 0, %v4661_v12 }
 0x14a   :  { %v4671_v16 = vrot.slane %v248_v13, %v252_v56 }
 0x14f   :  { %1749 = vmatmul.mubr.bf16.vlgmr.msra.gmra.mrb[96].mxu0 %v4558_v6  ;;  %2022 = vmatmul.mubr.bf16.vlgmr.msra.gmra.mrb[96].mxu1 %v4558_v6  ;;  %v260_v6 = vsub.s32 2, %v4661_v12 }
 0x150   :  { %1758 = vmatprep.mubr.bf16.mxu0 %v4560_v15  ;;  %2031 = vmatprep.mubr.bf16.mxu1 %v4560_v15  ;;  %v264_v15 = vsub.s32 3, %v4661_v12 }
 0x157   :  { %1759 = vmatmul.mubr.bf16.gmra.mrb[100].mxu0 %v4566_v26  ;;  %2032 = vmatmul.mubr.bf16.gmra.mrb[100].mxu1 %v4566_v26  ;;  %v4674_v26 = vrot.slane %v248_v13, %v260_v6 }
 0x158   :  { %1768 = vmatprep.mubr.bf16.mxu0 %v4568_v29  ;;  %2041 = vmatprep.mubr.bf16.mxu1 %v4568_v29  ;;  %v4679_v29 = vrot.slane %v248_v13, %v264_v15 }
 0x15f   :  { %1769 = vmatmul.mubr.bf16.gmra.mrb[104].mxu0 %v4574_v43  ;;  %2042 = vmatmul.mubr.bf16.gmra.mrb[104].mxu1 %v4574_v43 }
 0x160   :  { %1778 = vmatprep.mubr.bf16.mxu0 %v4576_v47  ;;  %2051 = vmatprep.mubr.bf16.mxu1 %v4576_v47 }
 0x162   :  { %v1204_v20 = vpop.f32.mrb[0].mxu0  ;;  %v1477_v24 = vpop.f32.mrb[0].mxu1 }
 0x163   :  { %v1205_v21 = vadd.f32 %v1204_v20, %v4671_v16  ;;  %v1206_v25 = vpop.f32.mrb[1].mxu0  ;;  %v1478_v27 = vadd.f32 %v1477_v24, %v4674_v26  ;;  %v1479_v43 = vpop.f32.mrb[1].mxu1 }
 0x164   :  { %v1207_v28 = vadd.f32 %v1206_v25, %v4676_v19  ;;  %v1208_v30 = vpop.f32.mrb[2].mxu0  ;;  %v1480_v32 = vadd.f32 %v1479_v43, %v4679_v29  ;;  %v1481_v45 = vpop.f32.mrb[2].mxu1 }
 0x165   :  { %v2262_v31 = vmax.f32 %v1205_v21, 0.0  ;;  %v1209_v33 = vadd.f32 %v1208_v30, %v4671_v16  ;;  %v1210_v46 = vpop.f32.mrb[3].mxu0  ;;  %v2264_v48 = vmax.f32 %v1478_v27, 0.0  ;;  %v1482_v49 = vadd.f32 %v1481_v45, %v4674_v26  ;;  %v1483_v51 = vpop.f32.mrb[3].mxu1 }
 0x166   :  { %v2263_v47 = vmax.f32 %v1207_v28, 0.0  ;;  %v1211_v50 = vadd.f32 %v1210_v46, %v4676_v19  ;;  %v2265_v52 = vmax.f32 %v1480_v32, 0.0  ;;  %v1484_v54 = vadd.f32 %v1483_v51, %v4679_v29 }
 0x167   :  { %2646 = vst [vmem:[#allocation10] sm:$0xff] %v2262_v31  ;;  %v2270_v53 = vmax.f32 %v1209_v33, 0.0  ;;  %1779 = vmatmul.mubr.bf16.gmra.mrb[108].mxu0 %v4582_v62  ;;  %2648 = vst [vmem:[#allocation10 + $0x10] sm:$0xff] %v2264_v48  ;;  %v2272_v55 = vmax.f32 %v1482_v49, 0.0  ;;  %2052 = vmatmul.mubr.bf16.gmra.mrb[108].mxu1 %v4582_v62 }
 0x168   :  { %2647 = vst [vmem:[#allocation10 + $0x8] sm:$0xff] %v2263_v47  ;;  %v2271_v57 = vmax.f32 %v1211_v50, 0.0  ;;  %1788 = vmatprep.mubr.bf16.mxu0 %v4584_v2  ;;  %2649 = vst [vmem:[#allocation10 + $0x18] sm:$0xff] %v2265_v52  ;;  %v2273_v60 = vmax.f32 %v1484_v54, 0.0  ;;  %2061 = vmatprep.mubr.bf16.mxu1 %v4584_v2 }
 0x169   :  { %2654 = vst [vmem:[#allocation10 + $0x40] sm:$0xff] %v2270_v53  ;;  %v3820_v58 = vpack.c.bf16 %v2270_v53, %v2262_v31  ;;  %2656 = vst [vmem:[#allocation10 + $0x50] sm:$0xff] %v2272_v55  ;;  %v3916_v61 = vpack.c.bf16 %v2272_v55, %v2264_v48 }
 0x16a   :  { %2655 = vst [vmem:[#allocation10 + $0x48] sm:$0xff] %v2271_v57  ;;  %v3818_v63 = vpack.c.bf16 %v2271_v57, %v2263_v47  ;;  %v1214_v1 = vpop.f32.mrb[4].mxu0  ;;  %2657 = vst [vmem:[#allocation10 + $0x58] sm:$0xff] %v2273_v60  ;;  %v3914_v3 = vpack.c.bf16 %v2273_v60, %v2265_v52  ;;  %v1487_v5 = vpop.f32.mrb[4].mxu1 }
 0x16b   :  { %v1215_v4 = vadd.f32 %v1214_v1, %v4671_v16  ;;  %v1216_v7 = vpop.f32.mrb[5].mxu0  ;;  %v1488_v62 = vadd.f32 %v1487_v5, %v4674_v26  ;;  %v1489_v9 = vpop.f32.mrb[5].mxu1 }
 0x16c   :  { %v1217_v8 = vadd.f32 %v1216_v7, %v4676_v19  ;;  %v1218_v10 = vpop.f32.mrb[6].mxu0  ;;  %3819 = vmatprep.subr.bf16.mxu0 %v3818_v63  ;;  %v1490_v2 = vadd.f32 %v1489_v9, %v4679_v29  ;;  %v1491_v13 = vpop.f32.mrb[6].mxu1  ;;  %3915 = vmatprep.subr.bf16.mxu1 %v3914_v3 }
 0x16d   :  { %v2278_v11 = vmax.f32 %v1215_v4, 0.0  ;;  %v1219_v56 = vadd.f32 %v1218_v10, %v4671_v16  ;;  %v1220_v6 = vpop.f32.mrb[7].mxu0  ;;  %3821 = vmatpush1.bf16.msra.mxu0 %v3820_v58  ;;  %v2280_v14 = vmax.f32 %v1488_v62, 0.0  ;;  %v1492_v20 = vadd.f32 %v1491_v13, %v4674_v26  ;;  %v1493_v24 = vpop.f32.mrb[7].mxu1  ;;  %3917 = vmatpush1.bf16.msra.mxu1 %v3916_v61 }
 0x16e   :  { %v2279_v15 = vmax.f32 %v1217_v8, 0.0  ;;  %v1221_v21 = vadd.f32 %v1220_v6, %v4676_v19  ;;  %v2281_v25 = vmax.f32 %v1490_v2, 0.0  ;;  %v1494_v28 = vadd.f32 %v1493_v24, %v4679_v29 }
 0x16f   :  { %2662 = vst [vmem:[#allocation10 + $0x80] sm:$0xff] %v2278_v11  ;;  %v2286_v27 = vmax.f32 %v1219_v56, 0.0  ;;  %1789 = vmatmul.mubr.bf16.gmra.mrb[112].mxu0 %v4590_v18  ;;  %2664 = vst [vmem:[#allocation10 + $0x90] sm:$0xff] %v2280_v14  ;;  %v2288_v43 = vmax.f32 %v1492_v20, 0.0  ;;  %2062 = vmatmul.mubr.bf16.gmra.mrb[112].mxu1 %v4590_v18 }
 0x170   :  { %2663 = vst [vmem:[#allocation10 + $0x88] sm:$0xff] %v2279_v15  ;;  %v2287_v30 = vmax.f32 %v1221_v21, 0.0  ;;  %1798 = vmatprep.mubr.bf16.mxu0 %v4592_v22  ;;  %2665 = vst [vmem:[#allocation10 + $0x98] sm:$0xff] %v2281_v25  ;;  %v2289_v32 = vmax.f32 %v1494_v28, 0.0  ;;  %2071 = vmatprep.mubr.bf16.mxu1 %v4592_v22 }
 0x171   :  { %2670 = vst [vmem:[#allocation10 + $0xc0] sm:$0xff] %v2286_v27  ;;  %v3824_v31 = vpack.c.bf16 %v2286_v27, %v2278_v11  ;;  %2672 = vst [vmem:[#allocation10 + $0xd0] sm:$0xff] %v2288_v43  ;;  %v3920_v33 = vpack.c.bf16 %v2288_v43, %v2280_v14 }
 0x172   :  { %2671 = vst [vmem:[#allocation10 + $0xc8] sm:$0xff] %v2287_v30  ;;  %v3822_v45 = vpack.c.bf16 %v2287_v30, %v2279_v15  ;;  %v1224_v46 = vpop.f32.mrb[8].mxu0  ;;  %2673 = vst [vmem:[#allocation10 + $0xd8] sm:$0xff] %v2289_v32  ;;  %v3918_v48 = vpack.c.bf16 %v2289_v32, %v2281_v25  ;;  %v1497_v49 = vpop.f32.mrb[8].mxu1 }
 0x173   :  { %v1225_v47 = vadd.f32 %v1224_v46, %v4671_v16  ;;  %v1226_v50 = vpop.f32.mrb[9].mxu0  ;;  %v1498_v18 = vadd.f32 %v1497_v49, %v4674_v26  ;;  %v1499_v52 = vpop.f32.mrb[9].mxu1 }
 0x174   :  { %v1227_v51 = vadd.f32 %v1226_v50, %v4676_v19  ;;  %v1228_v53 = vpop.f32.mrb[10].mxu0  ;;  %3823 = vmatprep.subr.bf16.mxu0 %v3822_v45  ;;  %v1500_v22 = vadd.f32 %v1499_v52, %v4679_v29  ;;  %v1501_v57 = vpop.f32.mrb[10].mxu1  ;;  %3919 = vmatprep.subr.bf16.mxu1 %v3918_v48 }
 0x175   :  { %v2294_v54 = vmax.f32 %v1225_v47, 0.0  ;;  %v1229_v55 = vadd.f32 %v1228_v53, %v4671_v16  ;;  %v1230_v58 = vpop.f32.mrb[11].mxu0  ;;  %3825 = vmatpush1.bf16.msra.mxu0 %v3824_v31  ;;  %v2296_v60 = vmax.f32 %v1498_v18, 0.0  ;;  %v1502_v63 = vadd.f32 %v1501_v57, %v4674_v26  ;;  %v1503_v3 = vpop.f32.mrb[11].mxu1  ;;  %3921 = vmatpush1.bf16.msra.mxu1 %v3920_v33 }
 0x176   :  { %v2295_v61 = vmax.f32 %v1227_v51, 0.0  ;;  %v1231_v1 = vadd.f32 %v1230_v58, %v4676_v19  ;;  %v2297_v4 = vmax.f32 %v1500_v22, 0.0  ;;  %v1504_v7 = vadd.f32 %v1503_v3, %v4679_v29 }
 0x177   :  { %2678 = vst [vmem:[#allocation10 + $0x100] sm:$0xff] %v2294_v54  ;;  %v2302_v5 = vmax.f32 %v1229_v55, 0.0  ;;  %1799 = vmatmul.mubr.bf16.gmra.mrb[116].mxu0 %v4598_v38  ;;  %2680 = vst [vmem:[#allocation10 + $0x110] sm:$0xff] %v2296_v60  ;;  %v2304_v62 = vmax.f32 %v1502_v63, 0.0  ;;  %2072 = vmatmul.mubr.bf16.gmra.mrb[116].mxu1 %v4598_v38 }
 0x178   :  { %2679 = vst [vmem:[#allocation10 + $0x108] sm:$0xff] %v2295_v61  ;;  %v2303_v8 = vmax.f32 %v1231_v1, 0.0  ;;  %1808 = vmatprep.mubr.bf16.mxu0 %v4600_v42  ;;  %2681 = vst [vmem:[#allocation10 + $0x118] sm:$0xff] %v2297_v4  ;;  %v2305_v10 = vmax.f32 %v1504_v7, 0.0  ;;  %2081 = vmatprep.mubr.bf16.mxu1 %v4600_v42 }
 0x179   :  { %2686 = vst [vmem:[#allocation10 + $0x140] sm:$0xff] %v2302_v5  ;;  %v3828_v9 = vpack.c.bf16 %v2302_v5, %v2294_v54  ;;  %2688 = vst [vmem:[#allocation10 + $0x150] sm:$0xff] %v2304_v62  ;;  %v3924_v11 = vpack.c.bf16 %v2304_v62, %v2296_v60 }
 0x17a   :  { %2687 = vst [vmem:[#allocation10 + $0x148] sm:$0xff] %v2303_v8  ;;  %v3826_v2 = vpack.c.bf16 %v2303_v8, %v2295_v61  ;;  %v1234_v56 = vpop.f32.mrb[12].mxu0  ;;  %2689 = vst [vmem:[#allocation10 + $0x158] sm:$0xff] %v2305_v10  ;;  %v3922_v13 = vpack.c.bf16 %v2305_v10, %v2297_v4  ;;  %v1507_v14 = vpop.f32.mrb[12].mxu1 }
 0x17b   :  { %v1235_v6 = vadd.f32 %v1234_v56, %v4671_v16  ;;  %v1236_v15 = vpop.f32.mrb[13].mxu0  ;;  %v1508_v38 = vadd.f32 %v1507_v14, %v4674_v26  ;;  %v1509_v21 = vpop.f32.mrb[13].mxu1 }
 0x17c   :  { %v1237_v20 = vadd.f32 %v1236_v15, %v4676_v19  ;;  %v1238_v24 = vpop.f32.mrb[14].mxu0  ;;  %3827 = vmatprep.subr.bf16.mxu0 %v3826_v2  ;;  %v1510_v42 = vadd.f32 %v1509_v21, %v4679_v29  ;;  %v1511_v28 = vpop.f32.mrb[14].mxu1  ;;  %3923 = vmatprep.subr.bf16.mxu1 %v3922_v13 }
 0x17d   :  { %v2310_v25 = vmax.f32 %v1235_v6, 0.0  ;;  %v1239_v27 = vadd.f32 %v1238_v24, %v4671_v16  ;;  %v1240_v43 = vpop.f32.mrb[15].mxu0  ;;  %3829 = vmatpush1.bf16.msra.mxu0 %v3828_v9  ;;  %v2312_v30 = vmax.f32 %v1508_v38, 0.0  ;;  %v1512_v32 = vadd.f32 %v1511_v28, %v4674_v26  ;;  %v1513_v45 = vpop.f32.mrb[15].mxu1  ;;  %3925 = vmatpush1.bf16.msra.mxu1 %v3924_v11 }
 0x17e   :  { %v2311_v31 = vmax.f32 %v1237_v20, 0.0  ;;  %v1241_v33 = vadd.f32 %v1240_v43, %v4676_v19  ;;  %v2313_v46 = vmax.f32 %v1510_v42, 0.0  ;;  %v1514_v47 = vadd.f32 %v1513_v45, %v4679_v29 }
 0x17f   :  { %2694 = vst [vmem:[#allocation10 + $0x180] sm:$0xff] %v2310_v25  ;;  %v2318_v48 = vmax.f32 %v1239_v27, 0.0  ;;  %1809 = vmatmul.mubr.bf16.gmra.mrb[120].mxu0 %v4606_v59  ;;  %2696 = vst [vmem:[#allocation10 + $0x190] sm:$0xff] %v2312_v30  ;;  %v2320_v49 = vmax.f32 %v1512_v32, 0.0  ;;  %2082 = vmatmul.mubr.bf16.gmra.mrb[120].mxu1 %v4606_v59 }
 0x180   :  { %2695 = vst [vmem:[#allocation10 + $0x188] sm:$0xff] %v2311_v31  ;;  %v2319_v50 = vmax.f32 %v1241_v33, 0.0  ;;  %1818 = vmatprep.mubr.bf16.mxu0 %v4608_v0  ;;  %2697 = vst [vmem:[#allocation10 + $0x198] sm:$0xff] %v2313_v46  ;;  %v2321_v51 = vmax.f32 %v1514_v47, 0.0  ;;  %2091 = vmatprep.mubr.bf16.mxu1 %v4608_v0 }
 0x181   :  { %2702 = vst [vmem:[#allocation10 + $0x1c0] sm:$0xff] %v2318_v48  ;;  %v3832_v18 = vpack.c.bf16 %v2318_v48, %v2310_v25  ;;  %2704 = vst [vmem:[#allocation10 + $0x1d0] sm:$0xff] %v2320_v49  ;;  %v3928_v52 = vpack.c.bf16 %v2320_v49, %v2312_v30 }
 0x182   :  { %2703 = vst [vmem:[#allocation10 + $0x1c8] sm:$0xff] %v2319_v50  ;;  %v3830_v53 = vpack.c.bf16 %v2319_v50, %v2311_v31  ;;  %v1244_v54 = vpop.f32.mrb[16].mxu0  ;;  %2705 = vst [vmem:[#allocation10 + $0x1d8] sm:$0xff] %v2321_v51  ;;  %v3926_v22 = vpack.c.bf16 %v2321_v51, %v2313_v46  ;;  %v1517_v57 = vpop.f32.mrb[16].mxu1 }
 0x183   :  { %v1245_v55 = vadd.f32 %v1244_v54, %v4671_v16  ;;  %v1246_v58 = vpop.f32.mrb[17].mxu0  ;;  %v1518_v59 = vadd.f32 %v1517_v57, %v4674_v26  ;;  %v1519_v61 = vpop.f32.mrb[17].mxu1 }
 0x184   :  { %v1247_v60 = vadd.f32 %v1246_v58, %v4676_v19  ;;  %v1248_v63 = vpop.f32.mrb[18].mxu0  ;;  %3831 = vmatprep.subr.bf16.mxu0 %v3830_v53  ;;  %v1520_v0 = vadd.f32 %v1519_v61, %v4679_v29  ;;  %v1521_v4 = vpop.f32.mrb[18].mxu1  ;;  %3927 = vmatprep.subr.bf16.mxu1 %v3926_v22 }
 0x185   :  { %v2326_v1 = vmax.f32 %v1245_v55, 0.0  ;;  %v1249_v3 = vadd.f32 %v1248_v63, %v4671_v16  ;;  %v1250_v5 = vpop.f32.mrb[19].mxu0  ;;  %3833 = vmatpush1.bf16.msra.mxu0 %v3832_v18  ;;  %v2328_v7 = vmax.f32 %v1518_v59, 0.0  ;;  %v1522_v8 = vadd.f32 %v1521_v4, %v4674_v26  ;;  %v1523_v10 = vpop.f32.mrb[19].mxu1  ;;  %3929 = vmatpush1.bf16.msra.mxu1 %v3928_v52 }
 0x186   :  { %v2327_v62 = vmax.f32 %v1247_v60, 0.0  ;;  %v1251_v9 = vadd.f32 %v1250_v5, %v4676_v19  ;;  %v2329_v11 = vmax.f32 %v1520_v0, 0.0  ;;  %v1524_v56 = vadd.f32 %v1523_v10, %v4679_v29 }
 0x187   :  { %2710 = vst [vmem:[#allocation10 + $0x200] sm:$0xff] %v2326_v1  ;;  %v2334_v2 = vmax.f32 %v1249_v3, 0.0  ;;  %1819 = vmatmul.mubr.bf16.gmra.mrb[124].mxu0 %v4614_v17  ;;  %2712 = vst [vmem:[#allocation10 + $0x210] sm:$0xff] %v2328_v7  ;;  %v2336_v13 = vmax.f32 %v1522_v8, 0.0  ;;  %2092 = vmatmul.mubr.bf16.gmra.mrb[124].mxu1 %v4614_v17 }
 0x188   :  { %2711 = vst [vmem:[#allocation10 + $0x208] sm:$0xff] %v2327_v62  ;;  %v2335_v6 = vmax.f32 %v1251_v9, 0.0  ;;  %1828 = vmatprep.mubr.bf16.mxu0 %v4616_v23  ;;  %2713 = vst [vmem:[#allocation10 + $0x218] sm:$0xff] %v2329_v11  ;;  %v2337_v15 = vmax.f32 %v1524_v56, 0.0  ;;  %2101 = vmatprep.mubr.bf16.mxu1 %v4616_v23 }
 0x189   :  { %2718 = vst [vmem:[#allocation10 + $0x240] sm:$0xff] %v2334_v2  ;;  %v3836_v14 = vpack.c.bf16 %v2334_v2, %v2326_v1  ;;  %2720 = vst [vmem:[#allocation10 + $0x250] sm:$0xff] %v2336_v13  ;;  %v3932_v38 = vpack.c.bf16 %v2336_v13, %v2328_v7 }
 0x18a   :  { %2719 = vst [vmem:[#allocation10 + $0x248] sm:$0xff] %v2335_v6  ;;  %v3834_v20 = vpack.c.bf16 %v2335_v6, %v2327_v62  ;;  %v1254_v21 = vpop.f32.mrb[20].mxu0  ;;  %2721 = vst [vmem:[#allocation10 + $0x258] sm:$0xff] %v2337_v15  ;;  %v3930_v24 = vpack.c.bf16 %v2337_v15, %v2329_v11  ;;  %v1527_v42 = vpop.f32.mrb[20].mxu1 }
 0x18b   :  { %v1255_v25 = vadd.f32 %v1254_v21, %v4671_v16  ;;  %v1256_v27 = vpop.f32.mrb[21].mxu0  ;;  %v1528_v17 = vadd.f32 %v1527_v42, %v4674_v26  ;;  %v1529_v43 = vpop.f32.mrb[21].mxu1 }
 0x18c   :  { %v1257_v28 = vadd.f32 %v1256_v27, %v4676_v19  ;;  %v1258_v30 = vpop.f32.mrb[22].mxu0  ;;  %3835 = vmatprep.subr.bf16.mxu0 %v3834_v20  ;;  %v1530_v23 = vadd.f32 %v1529_v43, %v4679_v29  ;;  %v1531_v33 = vpop.f32.mrb[22].mxu1  ;;  %3931 = vmatprep.subr.bf16.mxu1 %v3930_v24 }
 0x18d   :  { %v2342_v31 = vmax.f32 %v1255_v25, 0.0  ;;  %v1259_v32 = vadd.f32 %v1258_v30, %v4671_v16  ;;  %v1260_v45 = vpop.f32.mrb[23].mxu0  ;;  %3837 = vmatpush1.bf16.msra.mxu0 %v3836_v14  ;;  %v2344_v46 = vmax.f32 %v1528_v17, 0.0  ;;  %v1532_v47 = vadd.f32 %v1531_v33, %v4674_v26  ;;  %v1533_v50 = vpop.f32.mrb[23].mxu1  ;;  %3933 = vmatpush1.bf16.msra.mxu1 %v3932_v38 }
 0x18e   :  { %v2343_v48 = vmax.f32 %v1257_v28, 0.0  ;;  %v1261_v49 = vadd.f32 %v1260_v45, %v4676_v19  ;;  %v2345_v18 = vmax.f32 %v1530_v23, 0.0  ;;  %v1534_v52 = vadd.f32 %v1533_v50, %v4679_v29 }
 0x18f   :  { %2726 = vst [vmem:[#allocation10 + $0x280] sm:$0xff] %v2342_v31  ;;  %v2350_v51 = vmax.f32 %v1259_v32, 0.0  ;;  %1829 = vmatmul.mubr.bf16.gmra.mrb[128].mxu0 %v4622_v34  ;;  %2728 = vst [vmem:[#allocation10 + $0x290] sm:$0xff] %v2344_v46  ;;  %v2352_v53 = vmax.f32 %v1532_v47, 0.0  ;;  %2102 = vmatmul.mubr.bf16.gmra.mrb[128].mxu1 %v4622_v34 }
 0x190   :  { %2727 = vst [vmem:[#allocation10 + $0x288] sm:$0xff] %v2343_v48  ;;  %v2351_v54 = vmax.f32 %v1261_v49, 0.0  ;;  %1838 = vmatprep.mubr.bf16.mxu0 %v4624_v35  ;;  %2729 = vst [vmem:[#allocation10 + $0x298] sm:$0xff] %v2345_v18  ;;  %v2353_v55 = vmax.f32 %v1534_v52, 0.0  ;;  %2111 = vmatprep.mubr.bf16.mxu1 %v4624_v35 }
 0x191   :  { %2734 = vst [vmem:[#allocation10 + $0x2c0] sm:$0xff] %v2350_v51  ;;  %v3840_v22 = vpack.c.bf16 %v2350_v51, %v2342_v31  ;;  %2736 = vst [vmem:[#allocation10 + $0x2d0] sm:$0xff] %v2352_v53  ;;  %v3936_v57 = vpack.c.bf16 %v2352_v53, %v2344_v46 }
 0x192   :  { %2735 = vst [vmem:[#allocation10 + $0x2c8] sm:$0xff] %v2351_v54  ;;  %v3838_v58 = vpack.c.bf16 %v2351_v54, %v2343_v48  ;;  %v1264_v59 = vpop.f32.mrb[24].mxu0  ;;  %2737 = vst [vmem:[#allocation10 + $0x2d8] sm:$0xff] %v2353_v55  ;;  %v3934_v60 = vpack.c.bf16 %v2353_v55, %v2345_v18  ;;  %v1537_v63 = vpop.f32.mrb[24].mxu1 }
 0x193   :  { %v1265_v61 = vadd.f32 %v1264_v59, %v4671_v16  ;;  %v1266_v1 = vpop.f32.mrb[25].mxu0  ;;  %v1538_v34 = vadd.f32 %v1537_v63, %v4674_v26  ;;  %v1539_v3 = vpop.f32.mrb[25].mxu1 }
 0x194   :  { %v1267_v0 = vadd.f32 %v1266_v1, %v4676_v19  ;;  %v1268_v4 = vpop.f32.mrb[26].mxu0  ;;  %3839 = vmatprep.subr.bf16.mxu0 %v3838_v58  ;;  %v1540_v35 = vadd.f32 %v1539_v3, %v4679_v29  ;;  %v1541_v62 = vpop.f32.mrb[26].mxu1  ;;  %3935 = vmatprep.subr.bf16.mxu1 %v3934_v60 }
 0x195   :  { %v2358_v5 = vmax.f32 %v1265_v61, 0.0  ;;  %v1269_v7 = vadd.f32 %v1268_v4, %v4671_v16  ;;  %v1270_v8 = vpop.f32.mrb[27].mxu0  ;;  %3841 = vmatpush1.bf16.msra.mxu0 %v3840_v22  ;;  %v2360_v9 = vmax.f32 %v1538_v34, 0.0  ;;  %v1542_v11 = vadd.f32 %v1541_v62, %v4674_v26  ;;  %v1543_v56 = vpop.f32.mrb[27].mxu1  ;;  %3937 = vmatpush1.bf16.msra.mxu1 %v3936_v57 }
 0x196   :  { %v2359_v10 = vmax.f32 %v1267_v0, 0.0  ;;  %v1271_v2 = vadd.f32 %v1270_v8, %v4676_v19  ;;  %v2361_v13 = vmax.f32 %v1540_v35, 0.0  ;;  %v1544_v14 = vadd.f32 %v1543_v56, %v4679_v29 }
 0x197   :  { %2742 = vst [vmem:[#allocation10 + $0x300] sm:$0xff] %v2358_v5  ;;  %v2366_v6 = vmax.f32 %v1269_v7, 0.0  ;;  %1839 = vmatmul.mubr.bf16.gmra.mrb[132].mxu0 %v4630_v36  ;;  %2744 = vst [vmem:[#allocation10 + $0x310] sm:$0xff] %v2360_v9  ;;  %v2368_v15 = vmax.f32 %v1542_v11, 0.0  ;;  %2112 = vmatmul.mubr.bf16.gmra.mrb[132].mxu1 %v4630_v36 }
 0x198   :  { %2743 = vst [vmem:[#allocation10 + $0x308] sm:$0xff] %v2359_v10  ;;  %v2367_v38 = vmax.f32 %v1271_v2, 0.0  ;;  %1848 = vmatprep.mubr.bf16.mxu0 %v4632_v37  ;;  %2745 = vst [vmem:[#allocation10 + $0x318] sm:$0xff] %v2361_v13  ;;  %v2369_v21 = vmax.f32 %v1544_v14, 0.0  ;;  %2121 = vmatprep.mubr.bf16.mxu1 %v4632_v37 }
 0x199   :  { %2750 = vst [vmem:[#allocation10 + $0x340] sm:$0xff] %v2366_v6  ;;  %v3844_v20 = vpack.c.bf16 %v2366_v6, %v2358_v5  ;;  %2752 = vst [vmem:[#allocation10 + $0x350] sm:$0xff] %v2368_v15  ;;  %v3940_v24 = vpack.c.bf16 %v2368_v15, %v2360_v9 }
 0x19a   :  { %2751 = vst [vmem:[#allocation10 + $0x348] sm:$0xff] %v2367_v38  ;;  %v3842_v25 = vpack.c.bf16 %v2367_v38, %v2359_v10  ;;  %v1274_v42 = vpop.f32.mrb[28].mxu0  ;;  %2753 = vst [vmem:[#allocation10 + $0x358] sm:$0xff] %v2369_v21  ;;  %v3938_v27 = vpack.c.bf16 %v2369_v21, %v2361_v13  ;;  %v1547_v28 = vpop.f32.mrb[28].mxu1 }
 0x19b   :  { %v1275_v17 = vadd.f32 %v1274_v42, %v4671_v16  ;;  %v1276_v43 = vpop.f32.mrb[29].mxu0  ;;  %v1548_v36 = vadd.f32 %v1547_v28, %v4674_v26  ;;  %v1549_v31 = vpop.f32.mrb[29].mxu1 }
 0x19c   :  { %v1277_v30 = vadd.f32 %v1276_v43, %v4676_v19  ;;  %v1278_v23 = vpop.f32.mrb[30].mxu0  ;;  %3843 = vmatprep.subr.bf16.mxu0 %v3842_v25  ;;  %v1550_v37 = vadd.f32 %v1549_v31, %v4679_v29  ;;  %v1551_v45 = vpop.f32.mrb[30].mxu1  ;;  %3939 = vmatprep.subr.bf16.mxu1 %v3938_v27 }
 0x19d   :  { %v2374_v32 = vmax.f32 %v1275_v17, 0.0  ;;  %v1279_v33 = vadd.f32 %v1278_v23, %v4671_v16  ;;  %v1280_v46 = vpop.f32.mrb[31].mxu0  ;;  %3845 = vmatpush1.bf16.msra.mxu0 %v3844_v20  ;;  %v2376_v48 = vmax.f32 %v1548_v36, 0.0  ;;  %v1552_v49 = vadd.f32 %v1551_v45, %v4674_v26  ;;  %v1553_v18 = vpop.f32.mrb[31].mxu1  ;;  %3941 = vmatpush1.bf16.msra.mxu1 %v3940_v24 }
 0x19e   :  { %v2375_v47 = vmax.f32 %v1277_v30, 0.0  ;;  %v1281_v50 = vadd.f32 %v1280_v46, %v4676_v19  ;;  %v2377_v51 = vmax.f32 %v1550_v37, 0.0  ;;  %v1554_v53 = vadd.f32 %v1553_v18, %v4679_v29 }
 0x19f   :  { %2758 = vst [vmem:[#allocation10 + $0x380] sm:$0xff] %v2374_v32  ;;  %v2382_v52 = vmax.f32 %v1279_v33, 0.0  ;;  %1849 = vmatmul.mubr.bf16.gmra.mrb[136].mxu0 %v4638_v39  ;;  %2760 = vst [vmem:[#allocation10 + $0x390] sm:$0xff] %v2376_v48  ;;  %v2384_v54 = vmax.f32 %v1552_v49, 0.0  ;;  %2122 = vmatmul.mubr.bf16.gmra.mrb[136].mxu1 %v4638_v39 }
 0x1a0   :  { %2759 = vst [vmem:[#allocation10 + $0x388] sm:$0xff] %v2375_v47  ;;  %v2383_v22 = vmax.f32 %v1281_v50, 0.0  ;;  %1858 = vmatprep.mubr.bf16.mxu0 %v4640_v40  ;;  %2761 = vst [vmem:[#allocation10 + $0x398] sm:$0xff] %v2377_v51  ;;  %v2385_v57 = vmax.f32 %v1554_v53, 0.0  ;;  %2131 = vmatprep.mubr.bf16.mxu1 %v4640_v40 }
 0x1a1   :  { %2766 = vst [vmem:[#allocation10 + $0x3c0] sm:$0xff] %v2382_v52  ;;  %v3848_v55 = vpack.c.bf16 %v2382_v52, %v2374_v32  ;;  %2768 = vst [vmem:[#allocation10 + $0x3d0] sm:$0xff] %v2384_v54  ;;  %v3944_v58 = vpack.c.bf16 %v2384_v54, %v2376_v48  ;;  %v4296_v54 = vld [vmem:[#allocation2 + $0xd4] ss:$8 sps:$4 sm:$0xff]  }
 0x1a2   :  { %2767 = vst [vmem:[#allocation10 + $0x3c8] sm:$0xff] %v2383_v22  ;;  %v3846_v59 = vpack.c.bf16 %v2383_v22, %v2375_v47  ;;  %v1284_v60 = vpop.f32.mrb[32].mxu0  ;;  %2769 = vst [vmem:[#allocation10 + $0x3d8] sm:$0xff] %v2385_v57  ;;  %v3942_v61 = vpack.c.bf16 %v2385_v57, %v2377_v51  ;;  %v1557_v1 = vpop.f32.mrb[32].mxu1  ;;  %v4295_v51 = vld [vmem:[#allocation2 + $0xc0] ss:$8 sps:$4 sm:$0xff]  }
 0x1a3   :  { %v1285_v63 = vadd.f32 %v1284_v60, %v4671_v16  ;;  %v1286_v34 = vpop.f32.mrb[33].mxu0  ;;  %v1558_v39 = vadd.f32 %v1557_v1, %v4674_v26  ;;  %v1559_v3 = vpop.f32.mrb[33].mxu1 }
 0x1a4   :  { %v1287_v0 = vadd.f32 %v1286_v34, %v4676_v19  ;;  %v1288_v4 = vpop.f32.mrb[34].mxu0  ;;  %3847 = vmatprep.subr.bf16.mxu0 %v3846_v59  ;;  %v1560_v40 = vadd.f32 %v1559_v3, %v4679_v29  ;;  %v1561_v7 = vpop.f32.mrb[34].mxu1  ;;  %3943 = vmatprep.subr.bf16.mxu1 %v3942_v61 }
 0x1a5   :  { %v2390_v5 = vmax.f32 %v1285_v63, 0.0  ;;  %v1289_v35 = vadd.f32 %v1288_v4, %v4671_v16  ;;  %v1290_v62 = vpop.f32.mrb[35].mxu0  ;;  %3849 = vmatpush1.bf16.msra.mxu0 %v3848_v55  ;;  %v2392_v8 = vmax.f32 %v1558_v39, 0.0  ;;  %v1562_v10 = vadd.f32 %v1561_v7, %v4674_v26  ;;  %v1563_v2 = vpop.f32.mrb[35].mxu1  ;;  %3945 = vmatpush1.bf16.msra.mxu1 %v3944_v58 }
 0x1a6   :  { %v2391_v9 = vmax.f32 %v1287_v0, 0.0  ;;  %v1291_v11 = vadd.f32 %v1290_v62, %v4676_v19  ;;  %v2393_v56 = vmax.f32 %v1560_v40, 0.0  ;;  %v1564_v6 = vadd.f32 %v1563_v2, %v4679_v29 }
 0x1a7   :  { %2774 = vst [vmem:[#allocation10 + $0x400] sm:$0xff] %v2390_v5  ;;  %v2398_v13 = vmax.f32 %v1289_v35, 0.0  ;;  %1859 = vmatmul.mubr.bf16.gmra.mrb[140].mxu0 %v4646_v41  ;;  %2776 = vst [vmem:[#allocation10 + $0x410] sm:$0xff] %v2392_v8  ;;  %v2400_v14 = vmax.f32 %v1562_v10, 0.0  ;;  %2132 = vmatmul.mubr.bf16.gmra.mrb[140].mxu1 %v4646_v41 }
 0x1a8   :  { %2775 = vst [vmem:[#allocation10 + $0x408] sm:$0xff] %v2391_v9  ;;  %v2399_v15 = vmax.f32 %v1291_v11, 0.0  ;;  %1868 = vmatprep.mubr.bf16.mxu0 %v4648_v44  ;;  %2777 = vst [vmem:[#allocation10 + $0x418] sm:$0xff] %v2393_v56  ;;  %v2401_v20 = vmax.f32 %v1564_v6, 0.0  ;;  %2141 = vmatprep.mubr.bf16.mxu1 %v4648_v44  ;;  %v4297_v6 = vld [vmem:[#allocation2 + $0xd0] ss:$8 sps:$4 sm:$0xff]  }
 0x1a9   :  { %2782 = vst [vmem:[#allocation10 + $0x440] sm:$0xff] %v2398_v13  ;;  %v3852_v38 = vpack.c.bf16 %v2398_v13, %v2390_v5  ;;  %2784 = vst [vmem:[#allocation10 + $0x450] sm:$0xff] %v2400_v14  ;;  %v3948_v21 = vpack.c.bf16 %v2400_v14, %v2392_v8 }
 0x1aa   :  { %2783 = vst [vmem:[#allocation10 + $0x448] sm:$0xff] %v2399_v15  ;;  %v3850_v24 = vpack.c.bf16 %v2399_v15, %v2391_v9  ;;  %v1294_v25 = vpop.f32.mrb[36].mxu0  ;;  %2785 = vst [vmem:[#allocation10 + $0x458] sm:$0xff] %v2401_v20  ;;  %v3946_v42 = vpack.c.bf16 %v2401_v20, %v2393_v56  ;;  %v1567_v17 = vpop.f32.mrb[36].mxu1 }
 0x1ab   :  { %v1295_v27 = vadd.f32 %v1294_v25, %v4671_v16  ;;  %v1296_v28 = vpop.f32.mrb[37].mxu0  ;;  %v1568_v41 = vadd.f32 %v1567_v17, %v4674_v26  ;;  %v1569_v36 = vpop.f32.mrb[37].mxu1 }
 0x1ac   :  { %v1297_v43 = vadd.f32 %v1296_v28, %v4676_v19  ;;  %v1298_v30 = vpop.f32.mrb[38].mxu0  ;;  %3851 = vmatprep.subr.bf16.mxu0 %v3850_v24  ;;  %v1570_v44 = vadd.f32 %v1569_v36, %v4679_v29  ;;  %v1571_v32 = vpop.f32.mrb[38].mxu1  ;;  %3947 = vmatprep.subr.bf16.mxu1 %v3946_v42 }
 0x1ad   :  { %v2406_v31 = vmax.f32 %v1295_v27, 0.0  ;;  %v1299_v23 = vadd.f32 %v1298_v30, %v4671_v16  ;;  %v1300_v37 = vpop.f32.mrb[39].mxu0  ;;  %3853 = vmatpush1.bf16.msra.mxu0 %v3852_v38  ;;  %v2408_v33 = vmax.f32 %v1568_v41, 0.0  ;;  %v1572_v46 = vadd.f32 %v1571_v32, %v4674_v26  ;;  %v1573_v47 = vpop.f32.mrb[39].mxu1  ;;  %3949 = vmatpush1.bf16.msra.mxu1 %v3948_v21  ;;  %v4298_v38 = vld [vmem:[#allocation2 + $0xe4] ss:$8 sps:$4 sm:$0xff]  }
 0x1ae   :  { %v2407_v45 = vmax.f32 %v1297_v43, 0.0  ;;  %v1301_v48 = vadd.f32 %v1300_v37, %v4676_v19  ;;  %v2409_v49 = vmax.f32 %v1570_v44, 0.0  ;;  %v1574_v18 = vadd.f32 %v1573_v47, %v4679_v29 }
 0x1af   :  { %2790 = vst [vmem:[#allocation10 + $0x480] sm:$0xff] %v2406_v31  ;;  %v2414_v50 = vmax.f32 %v1299_v23, 0.0  ;;  %1869 = vmatmul.mubr.bf16.gmra.mrb[144].mxu0 %v4295_v51  ;;  %2792 = vst [vmem:[#allocation10 + $0x490] sm:$0xff] %v2408_v33  ;;  %v2416_v52 = vmax.f32 %v1572_v46, 0.0  ;;  %2142 = vmatmul.mubr.bf16.gmra.mrb[144].mxu1 %v4295_v51 }
 0x1b0   :  { %2791 = vst [vmem:[#allocation10 + $0x488] sm:$0xff] %v2407_v45  ;;  %v2415_v53 = vmax.f32 %v1301_v48, 0.0  ;;  %1878 = vmatprep.mubr.bf16.mxu0 %v4296_v54  ;;  %2793 = vst [vmem:[#allocation10 + $0x498] sm:$0xff] %v2409_v49  ;;  %v2417_v55 = vmax.f32 %v1574_v18, 0.0  ;;  %2151 = vmatprep.mubr.bf16.mxu1 %v4296_v54 }
 0x1b1   :  { %2798 = vst [vmem:[#allocation10 + $0x4c0] sm:$0xff] %v2414_v50  ;;  %v3856_v22 = vpack.c.bf16 %v2414_v50, %v2406_v31  ;;  %2800 = vst [vmem:[#allocation10 + $0x4d0] sm:$0xff] %v2416_v52  ;;  %v3952_v57 = vpack.c.bf16 %v2416_v52, %v2408_v33  ;;  %v4299_v52 = vld [vmem:[#allocation2 + $0xe0] ss:$8 sps:$4 sm:$0xff]  }
 0x1b2   :  { %2799 = vst [vmem:[#allocation10 + $0x4c8] sm:$0xff] %v2415_v53  ;;  %v3854_v58 = vpack.c.bf16 %v2415_v53, %v2407_v45  ;;  %v1304_v59 = vpop.f32.mrb[40].mxu0  ;;  %2801 = vst [vmem:[#allocation10 + $0x4d8] sm:$0xff] %v2417_v55  ;;  %v3950_v60 = vpack.c.bf16 %v2417_v55, %v2409_v49  ;;  %v1577_v63 = vpop.f32.mrb[40].mxu1 }
 0x1b3   :  { %v1305_v61 = vadd.f32 %v1304_v59, %v4671_v16  ;;  %v1306_v1 = vpop.f32.mrb[41].mxu0  ;;  %v1578_v34 = vadd.f32 %v1577_v63, %v4674_v26  ;;  %v1579_v0 = vpop.f32.mrb[41].mxu1 }
 0x1b4   :  { %v1307_v39 = vadd.f32 %v1306_v1, %v4676_v19  ;;  %v1308_v3 = vpop.f32.mrb[42].mxu0  ;;  %3855 = vmatprep.subr.bf16.mxu0 %v3854_v58  ;;  %v1580_v5 = vadd.f32 %v1579_v0, %v4679_v29  ;;  %v1581_v35 = vpop.f32.mrb[42].mxu1  ;;  %3951 = vmatprep.subr.bf16.mxu1 %v3950_v60 }
 0x1b5   :  { %v2422_v4 = vmax.f32 %v1305_v61, 0.0  ;;  %v1309_v40 = vadd.f32 %v1308_v3, %v4671_v16  ;;  %v1310_v7 = vpop.f32.mrb[43].mxu0  ;;  %3857 = vmatpush1.bf16.msra.mxu0 %v3856_v22  ;;  %v2424_v62 = vmax.f32 %v1578_v34, 0.0  ;;  %v1582_v9 = vadd.f32 %v1581_v35, %v4674_v26  ;;  %v1583_v11 = vpop.f32.mrb[43].mxu1  ;;  %3953 = vmatpush1.bf16.msra.mxu1 %v3952_v57  ;;  %v4300_v22 = vld [vmem:[#allocation2 + $0xf4] ss:$8 sps:$4 sm:$0xff]  }
 0x1b6   :  { %v2423_v8 = vmax.f32 %v1307_v39, 0.0  ;;  %v1311_v10 = vadd.f32 %v1310_v7, %v4676_v19  ;;  %v2425_v2 = vmax.f32 %v1580_v5, 0.0  ;;  %v1584_v13 = vadd.f32 %v1583_v11, %v4679_v29 }
 0x1b7   :  { %2806 = vst [vmem:[#allocation10 + $0x500] sm:$0xff] %v2422_v4  ;;  %v2430_v56 = vmax.f32 %v1309_v40, 0.0  ;;  %1879 = vmatmul.mubr.bf16.gmra.mrb[148].mxu0 %v4297_v6  ;;  %2808 = vst [vmem:[#allocation10 + $0x510] sm:$0xff] %v2424_v62  ;;  %v2432_v14 = vmax.f32 %v1582_v9, 0.0  ;;  %2152 = vmatmul.mubr.bf16.gmra.mrb[148].mxu1 %v4297_v6 }
 0x1b8   :  { %2807 = vst [vmem:[#allocation10 + $0x508] sm:$0xff] %v2423_v8  ;;  %v2431_v15 = vmax.f32 %v1311_v10, 0.0  ;;  %1888 = vmatprep.mubr.bf16.mxu0 %v4298_v38  ;;  %2809 = vst [vmem:[#allocation10 + $0x518] sm:$0xff] %v2425_v2  ;;  %v2433_v21 = vmax.f32 %v1584_v13, 0.0  ;;  %2161 = vmatprep.mubr.bf16.mxu1 %v4298_v38 }
 0x1b9   :  { %2814 = vst [vmem:[#allocation10 + $0x540] sm:$0xff] %v2430_v56  ;;  %v3860_v20 = vpack.c.bf16 %v2430_v56, %v2422_v4  ;;  %2816 = vst [vmem:[#allocation10 + $0x550] sm:$0xff] %v2432_v14  ;;  %v3956_v24 = vpack.c.bf16 %v2432_v14, %v2424_v62  ;;  %v4301_v14 = vld [vmem:[#allocation2 + $0xf0] ss:$8 sps:$4 sm:$0xff]  }
 0x1ba   :  { %2815 = vst [vmem:[#allocation10 + $0x548] sm:$0xff] %v2431_v15  ;;  %v3858_v25 = vpack.c.bf16 %v2431_v15, %v2423_v8  ;;  %v1314_v42 = vpop.f32.mrb[44].mxu0  ;;  %2817 = vst [vmem:[#allocation10 + $0x558] sm:$0xff] %v2433_v21  ;;  %v3954_v27 = vpack.c.bf16 %v2433_v21, %v2425_v2  ;;  %v1587_v28 = vpop.f32.mrb[44].mxu1 }
 0x1bb   :  { %v1315_v17 = vadd.f32 %v1314_v42, %v4671_v16  ;;  %v1316_v41 = vpop.f32.mrb[45].mxu0  ;;  %v1588_v43 = vadd.f32 %v1587_v28, %v4674_v26  ;;  %v1589_v30 = vpop.f32.mrb[45].mxu1 }
 0x1bc   :  { %v1317_v36 = vadd.f32 %v1316_v41, %v4676_v19  ;;  %v1318_v31 = vpop.f32.mrb[46].mxu0  ;;  %3859 = vmatprep.subr.bf16.mxu0 %v3858_v25  ;;  %v1590_v23 = vadd.f32 %v1589_v30, %v4679_v29  ;;  %v1591_v37 = vpop.f32.mrb[46].mxu1  ;;  %3955 = vmatprep.subr.bf16.mxu1 %v3954_v27 }
 0x1bd   :  { %v2438_v44 = vmax.f32 %v1315_v17, 0.0  ;;  %v1319_v32 = vadd.f32 %v1318_v31, %v4671_v16  ;;  %v1320_v33 = vpop.f32.mrb[47].mxu0  ;;  %3861 = vmatpush1.bf16.msra.mxu0 %v3860_v20  ;;  %v2440_v45 = vmax.f32 %v1588_v43, 0.0  ;;  %v1592_v48 = vadd.f32 %v1591_v37, %v4674_v26  ;;  %v1593_v49 = vpop.f32.mrb[47].mxu1  ;;  %3957 = vmatpush1.bf16.msra.mxu1 %v3956_v24  ;;  %v4302_v20 = vld [vmem:[#allocation2 + $0x104] ss:$8 sps:$4 sm:$0xff]  }
 0x1be   :  { %v2439_v46 = vmax.f32 %v1317_v36, 0.0  ;;  %v1321_v47 = vadd.f32 %v1320_v33, %v4676_v19  ;;  %v2441_v50 = vmax.f32 %v1590_v23, 0.0  ;;  %v1594_v51 = vadd.f32 %v1593_v49, %v4679_v29 }
 0x1bf   :  { %2822 = vst [vmem:[#allocation10 + $0x580] sm:$0xff] %v2438_v44  ;;  %v2446_v18 = vmax.f32 %v1319_v32, 0.0  ;;  %1889 = vmatmul.mubr.bf16.gmra.mrb[152].mxu0 %v4299_v52  ;;  %2824 = vst [vmem:[#allocation10 + $0x590] sm:$0xff] %v2440_v45  ;;  %v2448_v53 = vmax.f32 %v1592_v48, 0.0  ;;  %2162 = vmatmul.mubr.bf16.gmra.mrb[152].mxu1 %v4299_v52 }
 0x1c0   :  { %2823 = vst [vmem:[#allocation10 + $0x588] sm:$0xff] %v2439_v46  ;;  %v2447_v54 = vmax.f32 %v1321_v47, 0.0  ;;  %1898 = vmatprep.mubr.bf16.mxu0 %v4300_v22  ;;  %2825 = vst [vmem:[#allocation10 + $0x598] sm:$0xff] %v2441_v50  ;;  %v2449_v57 = vmax.f32 %v1594_v51, 0.0  ;;  %2171 = vmatprep.mubr.bf16.mxu1 %v4300_v22 }
 0x1c1   :  { %2830 = vst [vmem:[#allocation10 + $0x5c0] sm:$0xff] %v2446_v18  ;;  %v3864_v55 = vpack.c.bf16 %v2446_v18, %v2438_v44  ;;  %2832 = vst [vmem:[#allocation10 + $0x5d0] sm:$0xff] %v2448_v53  ;;  %v3960_v58 = vpack.c.bf16 %v2448_v53, %v2440_v45  ;;  %v4303_v53 = vld [vmem:[#allocation2 + $0x100] ss:$8 sps:$4 sm:$0xff]  }
 0x1c2   :  { %2831 = vst [vmem:[#allocation10 + $0x5c8] sm:$0xff] %v2447_v54  ;;  %v3862_v59 = vpack.c.bf16 %v2447_v54, %v2439_v46  ;;  %v1324_v60 = vpop.f32.mrb[48].mxu0  ;;  %2833 = vst [vmem:[#allocation10 + $0x5d8] sm:$0xff] %v2449_v57  ;;  %v3958_v61 = vpack.c.bf16 %v2449_v57, %v2441_v50  ;;  %v1597_v1 = vpop.f32.mrb[48].mxu1 }
 0x1c3   :  { %v1325_v63 = vadd.f32 %v1324_v60, %v4671_v16  ;;  %v1326_v34 = vpop.f32.mrb[49].mxu0  ;;  %v1598_v39 = vadd.f32 %v1597_v1, %v4674_v26  ;;  %v1599_v3 = vpop.f32.mrb[49].mxu1 }
 0x1c4   :  { %v1327_v0 = vadd.f32 %v1326_v34, %v4676_v19  ;;  %v1328_v4 = vpop.f32.mrb[50].mxu0  ;;  %3863 = vmatprep.subr.bf16.mxu0 %v3862_v59  ;;  %v1600_v40 = vadd.f32 %v1599_v3, %v4679_v29  ;;  %v1601_v7 = vpop.f32.mrb[50].mxu1  ;;  %3959 = vmatprep.subr.bf16.mxu1 %v3958_v61 }
 0x1c5   :  { %v2454_v5 = vmax.f32 %v1325_v63, 0.0  ;;  %v1329_v35 = vadd.f32 %v1328_v4, %v4671_v16  ;;  %v1330_v62 = vpop.f32.mrb[51].mxu0  ;;  %3865 = vmatpush1.bf16.msra.mxu0 %v3864_v55  ;;  %v2456_v8 = vmax.f32 %v1598_v39, 0.0  ;;  %v1602_v10 = vadd.f32 %v1601_v7, %v4674_v26  ;;  %v1603_v2 = vpop.f32.mrb[51].mxu1  ;;  %3961 = vmatpush1.bf16.msra.mxu1 %v3960_v58  ;;  %v4304_v55 = vld [vmem:[#allocation2 + $0x114] ss:$8 sps:$4 sm:$0xff]  }
 0x1c6   :  { %v2455_v9 = vmax.f32 %v1327_v0, 0.0  ;;  %v1331_v11 = vadd.f32 %v1330_v62, %v4676_v19  ;;  %v2457_v56 = vmax.f32 %v1600_v40, 0.0  ;;  %v1604_v6 = vadd.f32 %v1603_v2, %v4679_v29 }
 0x1c7   :  { %2838 = vst [vmem:[#allocation10 + $0x600] sm:$0xff] %v2454_v5  ;;  %v2462_v13 = vmax.f32 %v1329_v35, 0.0  ;;  %1899 = vmatmul.mubr.bf16.gmra.mrb[156].mxu0 %v4301_v14  ;;  %2840 = vst [vmem:[#allocation10 + $0x610] sm:$0xff] %v2456_v8  ;;  %v2464_v15 = vmax.f32 %v1602_v10, 0.0  ;;  %2172 = vmatmul.mubr.bf16.gmra.mrb[156].mxu1 %v4301_v14 }
 0x1c8   :  { %2839 = vst [vmem:[#allocation10 + $0x608] sm:$0xff] %v2455_v9  ;;  %v2463_v38 = vmax.f32 %v1331_v11, 0.0  ;;  %1908 = vmatprep.mubr.bf16.mxu0 %v4302_v20  ;;  %2841 = vst [vmem:[#allocation10 + $0x618] sm:$0xff] %v2457_v56  ;;  %v2465_v24 = vmax.f32 %v1604_v6, 0.0  ;;  %2181 = vmatprep.mubr.bf16.mxu1 %v4302_v20 }
 0x1c9   :  { %2846 = vst [vmem:[#allocation10 + $0x640] sm:$0xff] %v2462_v13  ;;  %v3868_v21 = vpack.c.bf16 %v2462_v13, %v2454_v5  ;;  %2848 = vst [vmem:[#allocation10 + $0x650] sm:$0xff] %v2464_v15  ;;  %v3964_v25 = vpack.c.bf16 %v2464_v15, %v2456_v8  ;;  %v4305_v15 = vld [vmem:[#allocation2 + $0x110] ss:$8 sps:$4 sm:$0xff]  }
 0x1ca   :  { %2847 = vst [vmem:[#allocation10 + $0x648] sm:$0xff] %v2463_v38  ;;  %v3866_v42 = vpack.c.bf16 %v2463_v38, %v2455_v9  ;;  %v1334_v27 = vpop.f32.mrb[52].mxu0  ;;  %2849 = vst [vmem:[#allocation10 + $0x658] sm:$0xff] %v2465_v24  ;;  %v3962_v17 = vpack.c.bf16 %v2465_v24, %v2457_v56  ;;  %v1607_v41 = vpop.f32.mrb[52].mxu1 }
 0x1cb   :  { %v1335_v28 = vadd.f32 %v1334_v27, %v4671_v16  ;;  %v1336_v43 = vpop.f32.mrb[53].mxu0  ;;  %v1608_v36 = vadd.f32 %v1607_v41, %v4674_v26  ;;  %v1609_v31 = vpop.f32.mrb[53].mxu1 }
 0x1cc   :  { %v1337_v30 = vadd.f32 %v1336_v43, %v4676_v19  ;;  %v1338_v44 = vpop.f32.mrb[54].mxu0  ;;  %3867 = vmatprep.subr.bf16.mxu0 %v3866_v42  ;;  %v1610_v32 = vadd.f32 %v1609_v31, %v4679_v29  ;;  %v1611_v33 = vpop.f32.mrb[54].mxu1  ;;  %3963 = vmatprep.subr.bf16.mxu1 %v3962_v17 }
 0x1cd   :  { %v2470_v23 = vmax.f32 %v1335_v28, 0.0  ;;  %v1339_v37 = vadd.f32 %v1338_v44, %v4671_v16  ;;  %v1340_v45 = vpop.f32.mrb[55].mxu0  ;;  %3869 = vmatpush1.bf16.msra.mxu0 %v3868_v21  ;;  %v2472_v46 = vmax.f32 %v1608_v36, 0.0  ;;  %v1612_v47 = vadd.f32 %v1611_v33, %v4674_v26  ;;  %v1613_v50 = vpop.f32.mrb[55].mxu1  ;;  %3965 = vmatpush1.bf16.msra.mxu1 %v3964_v25  ;;  %v4306_v21 = vld [vmem:[#allocation2 + $0x124] ss:$8 sps:$4 sm:$0xff]  }
 0x1ce   :  { %v2471_v48 = vmax.f32 %v1337_v30, 0.0  ;;  %v1341_v49 = vadd.f32 %v1340_v45, %v4676_v19  ;;  %v2473_v18 = vmax.f32 %v1610_v32, 0.0  ;;  %v1614_v52 = vadd.f32 %v1613_v50, %v4679_v29 }
 0x1cf   :  { %2854 = vst [vmem:[#allocation10 + $0x680] sm:$0xff] %v2470_v23  ;;  %v2478_v51 = vmax.f32 %v1339_v37, 0.0  ;;  %1909 = vmatmul.mubr.bf16.gmra.mrb[160].mxu0 %v4303_v53  ;;  %2856 = vst [vmem:[#allocation10 + $0x690] sm:$0xff] %v2472_v46  ;;  %v2480_v54 = vmax.f32 %v1612_v47, 0.0  ;;  %2182 = vmatmul.mubr.bf16.gmra.mrb[160].mxu1 %v4303_v53 }
 0x1d0   :  { %2855 = vst [vmem:[#allocation10 + $0x688] sm:$0xff] %v2471_v48  ;;  %v2479_v22 = vmax.f32 %v1341_v49, 0.0  ;;  %1918 = vmatprep.mubr.bf16.mxu0 %v4304_v55  ;;  %2857 = vst [vmem:[#allocation10 + $0x698] sm:$0xff] %v2473_v18  ;;  %v2481_v58 = vmax.f32 %v1614_v52, 0.0  ;;  %2191 = vmatprep.mubr.bf16.mxu1 %v4304_v55 }
 0x1d1   :  { %2862 = vst [vmem:[#allocation10 + $0x6c0] sm:$0xff] %v2478_v51  ;;  %v3872_v57 = vpack.c.bf16 %v2478_v51, %v2470_v23  ;;  %2864 = vst [vmem:[#allocation10 + $0x6d0] sm:$0xff] %v2480_v54  ;;  %v3968_v59 = vpack.c.bf16 %v2480_v54, %v2472_v46  ;;  %v4307_v54 = vld [vmem:[#allocation2 + $0x120] ss:$8 sps:$4 sm:$0xff]  }
 0x1d2   :  { %2863 = vst [vmem:[#allocation10 + $0x6c8] sm:$0xff] %v2479_v22  ;;  %v3870_v60 = vpack.c.bf16 %v2479_v22, %v2471_v48  ;;  %v1344_v61 = vpop.f32.mrb[56].mxu0  ;;  %2865 = vst [vmem:[#allocation10 + $0x6d8] sm:$0xff] %v2481_v58  ;;  %v3966_v63 = vpack.c.bf16 %v2481_v58, %v2473_v18  ;;  %v1617_v34 = vpop.f32.mrb[56].mxu1 }
 0x1d3   :  { %v1345_v1 = vadd.f32 %v1344_v61, %v4671_v16  ;;  %v1346_v39 = vpop.f32.mrb[57].mxu0  ;;  %v1618_v0 = vadd.f32 %v1617_v34, %v4674_v26  ;;  %v1619_v4 = vpop.f32.mrb[57].mxu1 }
 0x1d4   :  { %v1347_v3 = vadd.f32 %v1346_v39, %v4676_v19  ;;  %v1348_v5 = vpop.f32.mrb[58].mxu0  ;;  %3871 = vmatprep.subr.bf16.mxu0 %v3870_v60  ;;  %v1620_v35 = vadd.f32 %v1619_v4, %v4679_v29  ;;  %v1621_v62 = vpop.f32.mrb[58].mxu1  ;;  %3967 = vmatprep.subr.bf16.mxu1 %v3966_v63 }
 0x1d5   :  { %v2486_v40 = vmax.f32 %v1345_v1, 0.0  ;;  %v1349_v7 = vadd.f32 %v1348_v5, %v4671_v16  ;;  %v1350_v8 = vpop.f32.mrb[59].mxu0  ;;  %3873 = vmatpush1.bf16.msra.mxu0 %v3872_v57  ;;  %v2488_v9 = vmax.f32 %v1618_v0, 0.0  ;;  %v1622_v11 = vadd.f32 %v1621_v62, %v4674_v26  ;;  %v1623_v56 = vpop.f32.mrb[59].mxu1  ;;  %3969 = vmatpush1.bf16.msra.mxu1 %v3968_v59  ;;  %v4308_v57 = vld [vmem:[#allocation2 + $0x134] ss:$8 sps:$4 sm:$0xff]  }
 0x1d6   :  { %v2487_v10 = vmax.f32 %v1347_v3, 0.0  ;;  %v1351_v2 = vadd.f32 %v1350_v8, %v4676_v19  ;;  %v2489_v13 = vmax.f32 %v1620_v35, 0.0  ;;  %v1624_v14 = vadd.f32 %v1623_v56, %v4679_v29 }
 0x1d7   :  { %2870 = vst [vmem:[#allocation10 + $0x700] sm:$0xff] %v2486_v40  ;;  %v2494_v6 = vmax.f32 %v1349_v7, 0.0  ;;  %1919 = vmatmul.mubr.bf16.gmra.mrb[164].mxu0 %v4305_v15  ;;  %2872 = vst [vmem:[#allocation10 + $0x710] sm:$0xff] %v2488_v9  ;;  %v2496_v38 = vmax.f32 %v1622_v11, 0.0  ;;  %2192 = vmatmul.mubr.bf16.gmra.mrb[164].mxu1 %v4305_v15 }
 0x1d8   :  { %2871 = vst [vmem:[#allocation10 + $0x708] sm:$0xff] %v2487_v10  ;;  %v2495_v20 = vmax.f32 %v1351_v2, 0.0  ;;  %1928 = vmatprep.mubr.bf16.mxu0 %v4306_v21  ;;  %2873 = vst [vmem:[#allocation10 + $0x718] sm:$0xff] %v2489_v13  ;;  %v2497_v25 = vmax.f32 %v1624_v14, 0.0  ;;  %2201 = vmatprep.mubr.bf16.mxu1 %v4306_v21 }
 0x1d9   :  { %2878 = vst [vmem:[#allocation10 + $0x740] sm:$0xff] %v2494_v6  ;;  %v3876_v24 = vpack.c.bf16 %v2494_v6, %v2486_v40  ;;  %2880 = vst [vmem:[#allocation10 + $0x750] sm:$0xff] %v2496_v38  ;;  %v3972_v42 = vpack.c.bf16 %v2496_v38, %v2488_v9  ;;  %v4309_v38 = vld [vmem:[#allocation2 + $0x130] ss:$8 sps:$4 sm:$0xff]  }
 0x1da   :  { %2879 = vst [vmem:[#allocation10 + $0x748] sm:$0xff] %v2495_v20  ;;  %v3874_v27 = vpack.c.bf16 %v2495_v20, %v2487_v10  ;;  %v1354_v17 = vpop.f32.mrb[60].mxu0  ;;  %2881 = vst [vmem:[#allocation10 + $0x758] sm:$0xff] %v2497_v25  ;;  %v3970_v28 = vpack.c.bf16 %v2497_v25, %v2489_v13  ;;  %v1627_v43 = vpop.f32.mrb[60].mxu1 }
 0x1db   :  { %v1355_v41 = vadd.f32 %v1354_v17, %v4671_v16  ;;  %v1356_v36 = vpop.f32.mrb[61].mxu0  ;;  %v1628_v30 = vadd.f32 %v1627_v43, %v4674_v26  ;;  %v1629_v44 = vpop.f32.mrb[61].mxu1 }
 0x1dc   :  { %v1357_v31 = vadd.f32 %v1356_v36, %v4676_v19  ;;  %v1358_v23 = vpop.f32.mrb[62].mxu0  ;;  %3875 = vmatprep.subr.bf16.mxu0 %v3874_v27  ;;  %v1630_v37 = vadd.f32 %v1629_v44, %v4679_v29  ;;  %v1631_v45 = vpop.f32.mrb[62].mxu1  ;;  %3971 = vmatprep.subr.bf16.mxu1 %v3970_v28 }
 0x1dd   :  { %v2502_v32 = vmax.f32 %v1355_v41, 0.0  ;;  %v1359_v33 = vadd.f32 %v1358_v23, %v4671_v16  ;;  %v1360_v46 = vpop.f32.mrb[63].mxu0  ;;  %3877 = vmatpush1.bf16.msra.mxu0 %v3876_v24  ;;  %v2504_v48 = vmax.f32 %v1628_v30, 0.0  ;;  %v1632_v49 = vadd.f32 %v1631_v45, %v4674_v26  ;;  %v1633_v18 = vpop.f32.mrb[63].mxu1  ;;  %3973 = vmatpush1.bf16.msra.mxu1 %v3972_v42  ;;  %v4310_v24 = vld [vmem:[#allocation2 + $0x144] ss:$8 sps:$4 sm:$0xff]  }
 0x1de   :  { %v2503_v47 = vmax.f32 %v1357_v31, 0.0  ;;  %v1361_v50 = vadd.f32 %v1360_v46, %v4676_v19  ;;  %v2505_v51 = vmax.f32 %v1630_v37, 0.0  ;;  %v1634_v53 = vadd.f32 %v1633_v18, %v4679_v29 }
 0x1df   :  { %2886 = vst [vmem:[#allocation10 + $0x780] sm:$0xff] %v2502_v32  ;;  %v2510_v52 = vmax.f32 %v1359_v33, 0.0  ;;  %1929 = vmatmul.mubr.bf16.gmra.mrb[168].mxu0 %v4307_v54  ;;  %2888 = vst [vmem:[#allocation10 + $0x790] sm:$0xff] %v2504_v48  ;;  %v2512_v22 = vmax.f32 %v1632_v49, 0.0  ;;  %2202 = vmatmul.mubr.bf16.gmra.mrb[168].mxu1 %v4307_v54 }
 0x1e0   :  { %2887 = vst [vmem:[#allocation10 + $0x788] sm:$0xff] %v2503_v47  ;;  %v2511_v55 = vmax.f32 %v1361_v50, 0.0  ;;  %1938 = vmatprep.mubr.bf16.mxu0 %v4308_v57  ;;  %2889 = vst [vmem:[#allocation10 + $0x798] sm:$0xff] %v2505_v51  ;;  %v2513_v59 = vmax.f32 %v1634_v53, 0.0  ;;  %2211 = vmatprep.mubr.bf16.mxu1 %v4308_v57 }
 0x1e1   :  { %2894 = vst [vmem:[#allocation10 + $0x7c0] sm:$0xff] %v2510_v52  ;;  %v3880_v58 = vpack.c.bf16 %v2510_v52, %v2502_v32  ;;  %2896 = vst [vmem:[#allocation10 + $0x7d0] sm:$0xff] %v2512_v22  ;;  %v3976_v60 = vpack.c.bf16 %v2512_v22, %v2504_v48  ;;  %v4311_v22 = vld [vmem:[#allocation2 + $0x140] ss:$8 sps:$4 sm:$0xff]  }
 0x1e2   :  { %2895 = vst [vmem:[#allocation10 + $0x7c8] sm:$0xff] %v2511_v55  ;;  %v3878_v61 = vpack.c.bf16 %v2511_v55, %v2503_v47  ;;  %v1364_v63 = vpop.f32.mrb[64].mxu0  ;;  %2897 = vst [vmem:[#allocation10 + $0x7d8] sm:$0xff] %v2513_v59  ;;  %v3974_v1 = vpack.c.bf16 %v2513_v59, %v2505_v51  ;;  %v1637_v39 = vpop.f32.mrb[64].mxu1 }
 0x1e3   :  { %v1365_v34 = vadd.f32 %v1364_v63, %v4671_v16  ;;  %v1366_v0 = vpop.f32.mrb[65].mxu0  ;;  %v1638_v3 = vadd.f32 %v1637_v39, %v4674_v26  ;;  %v1639_v5 = vpop.f32.mrb[65].mxu1 }
 0x1e4   :  { %v1367_v4 = vadd.f32 %v1366_v0, %v4676_v19  ;;  %v1368_v40 = vpop.f32.mrb[66].mxu0  ;;  %3879 = vmatprep.subr.bf16.mxu0 %v3878_v61  ;;  %v1640_v7 = vadd.f32 %v1639_v5, %v4679_v29  ;;  %v1641_v8 = vpop.f32.mrb[66].mxu1  ;;  %3975 = vmatprep.subr.bf16.mxu1 %v3974_v1 }
 0x1e5   :  { %v2518_v35 = vmax.f32 %v1365_v34, 0.0  ;;  %v1369_v62 = vadd.f32 %v1368_v40, %v4671_v16  ;;  %v1370_v9 = vpop.f32.mrb[67].mxu0  ;;  %3881 = vmatpush1.bf16.msra.mxu0 %v3880_v58  ;;  %v2520_v10 = vmax.f32 %v1638_v3, 0.0  ;;  %v1642_v2 = vadd.f32 %v1641_v8, %v4674_v26  ;;  %v1643_v13 = vpop.f32.mrb[67].mxu1  ;;  %3977 = vmatpush1.bf16.msra.mxu1 %v3976_v60  ;;  %v4312_v58 = vld [vmem:[#allocation2 + $0x154] ss:$8 sps:$4 sm:$0xff]  }
 0x1e6   :  { %v2519_v11 = vmax.f32 %v1367_v4, 0.0  ;;  %v1371_v56 = vadd.f32 %v1370_v9, %v4676_v19  ;;  %v2521_v6 = vmax.f32 %v1640_v7, 0.0  ;;  %v1644_v15 = vadd.f32 %v1643_v13, %v4679_v29 }
 0x1e7   :  { %2902 = vst [vmem:[#allocation10 + $0x800] sm:$0xff] %v2518_v35  ;;  %v2526_v14 = vmax.f32 %v1369_v62, 0.0  ;;  %1939 = vmatmul.mubr.bf16.gmra.mrb[172].mxu0 %v4309_v38  ;;  %2904 = vst [vmem:[#allocation10 + $0x810] sm:$0xff] %v2520_v10  ;;  %v2528_v20 = vmax.f32 %v1642_v2, 0.0  ;;  %2212 = vmatmul.mubr.bf16.gmra.mrb[172].mxu1 %v4309_v38 }
 0x1e8   :  { %2903 = vst [vmem:[#allocation10 + $0x808] sm:$0xff] %v2519_v11  ;;  %v2527_v21 = vmax.f32 %v1371_v56, 0.0  ;;  %1948 = vmatprep.mubr.bf16.mxu0 %v4310_v24  ;;  %2905 = vst [vmem:[#allocation10 + $0x818] sm:$0xff] %v2521_v6  ;;  %v2529_v42 = vmax.f32 %v1644_v15, 0.0  ;;  %2221 = vmatprep.mubr.bf16.mxu1 %v4310_v24 }
 0x1e9   :  { %2910 = vst [vmem:[#allocation10 + $0x840] sm:$0xff] %v2526_v14  ;;  %v4854_v25 = vpack.c.bf16 %v2526_v14, %v2518_v35  ;;  %2912 = vst [vmem:[#allocation10 + $0x850] sm:$0xff] %v2528_v20  ;;  %v4856_v27 = vpack.c.bf16 %v2528_v20, %v2520_v10  ;;  %v4313_v20 = vld [vmem:[#allocation2 + $0x150] ss:$8 sps:$4 sm:$0xff]  }
 0x1ea   :  { %2911 = vst [vmem:[#allocation10 + $0x848] sm:$0xff] %v2527_v21  ;;  %v3882_v17 = vpack.c.bf16 %v2527_v21, %v2519_v11  ;;  %v1374_v28 = vpop.f32.mrb[68].mxu0  ;;  %2913 = vst [vmem:[#allocation10 + $0x858] sm:$0xff] %v2529_v42  ;;  %v3978_v41 = vpack.c.bf16 %v2529_v42, %v2521_v6  ;;  %v1647_v36 = vpop.f32.mrb[68].mxu1  ;;  %v4314_v42 = vld [vmem:[#allocation2 + $0x164] ss:$8 sps:$4 sm:$0xff]  }
 0x1eb   :  { %v1375_v43 = vadd.f32 %v1374_v28, %v4671_v16  ;;  %v1376_v30 = vpop.f32.mrb[69].mxu0  ;;  %v1648_v31 = vadd.f32 %v1647_v36, %v4674_v26  ;;  %v1649_v23 = vpop.f32.mrb[69].mxu1 }
 0x1ec   :  { %v1377_v44 = vadd.f32 %v1376_v30, %v4676_v19  ;;  %v1378_v32 = vpop.f32.mrb[70].mxu0  ;;  %3883 = vmatprep.subr.bf16.mxu0 %v3882_v17  ;;  %v1650_v33 = vadd.f32 %v1649_v23, %v4679_v29  ;;  %v1651_v46 = vpop.f32.mrb[70].mxu1  ;;  %3979 = vmatprep.subr.bf16.mxu1 %v3978_v41 }
 0x1ed   :  { %v2534_v37 = vmax.f32 %v1375_v43, 0.0  ;;  %v1379_v45 = vadd.f32 %v1378_v32, %v4671_v16  ;;  %v1380_v48 = vpop.f32.mrb[71].mxu0  ;;  %v2536_v47 = vmax.f32 %v1648_v31, 0.0  ;;  %v1652_v50 = vadd.f32 %v1651_v46, %v4674_v26  ;;  %v1653_v51 = vpop.f32.mrb[71].mxu1 }
 0x1ee   :  { %v2535_v49 = vmax.f32 %v1377_v44, 0.0  ;;  %v1381_v18 = vadd.f32 %v1380_v48, %v4676_v19  ;;  %v2537_v52 = vmax.f32 %v1650_v33, 0.0  ;;  %v1654_v54 = vadd.f32 %v1653_v51, %v4679_v29 }
 0x1ef   :  { %2918 = vst [vmem:[#allocation10 + $0x880] sm:$0xff] %v2534_v37  ;;  %v2542_v53 = vmax.f32 %v1379_v45, 0.0  ;;  %1949 = vmatmul.mubr.bf16.gmra.mrb[176].mxu0 %v4311_v22  ;;  %2920 = vst [vmem:[#allocation10 + $0x890] sm:$0xff] %v2536_v47  ;;  %v2544_v55 = vmax.f32 %v1652_v50, 0.0  ;;  %2222 = vmatmul.mubr.bf16.gmra.mrb[176].mxu1 %v4311_v22 }
 0x1f0   :  { %2919 = vst [vmem:[#allocation10 + $0x888] sm:$0xff] %v2535_v49  ;;  %v2543_v57 = vmax.f32 %v1381_v18, 0.0  ;;  %1958 = vmatprep.mubr.bf16.mxu0 %v4312_v58  ;;  %2921 = vst [vmem:[#allocation10 + $0x898] sm:$0xff] %v2537_v52  ;;  %v2545_v60 = vmax.f32 %v1654_v54, 0.0  ;;  %2231 = vmatprep.mubr.bf16.mxu1 %v4312_v58  ;;  %v4315_v58 = vld [vmem:[#allocation2 + $0x160] ss:$8 sps:$4 sm:$0xff]  }
 0x1f1   :  { %2926 = vst [vmem:[#allocation10 + $0x8c0] sm:$0xff] %v2542_v53  ;;  %v4866_v59 = vpack.c.bf16 %v2542_v53, %v2534_v37  ;;  %2928 = vst [vmem:[#allocation10 + $0x8d0] sm:$0xff] %v2544_v55  ;;  %v4868_v61 = vpack.c.bf16 %v2544_v55, %v2536_v47 }
 0x1f2   :  { %2927 = vst [vmem:[#allocation10 + $0x8c8] sm:$0xff] %v2543_v57  ;;  %v4870_v63 = vpack.c.bf16 %v2543_v57, %v2535_v49  ;;  %v1384_v1 = vpop.f32.mrb[72].mxu0  ;;  %2929 = vst [vmem:[#allocation10 + $0x8d8] sm:$0xff] %v2545_v60  ;;  %v4872_v34 = vpack.c.bf16 %v2545_v60, %v2537_v52  ;;  %v1657_v0 = vpop.f32.mrb[72].mxu1 }
 0x1f3   :  { %v1385_v39 = vadd.f32 %v1384_v1, %v4671_v16  ;;  %v1386_v3 = vpop.f32.mrb[73].mxu0  ;;  %v1658_v4 = vadd.f32 %v1657_v0, %v4674_v26  ;;  %v1659_v40 = vpop.f32.mrb[73].mxu1 }
 0x1f4   :  { %v1387_v5 = vadd.f32 %v1386_v3, %v4676_v19  ;;  %v1388_v35 = vpop.f32.mrb[74].mxu0  ;;  %v1660_v62 = vadd.f32 %v1659_v40, %v4679_v29  ;;  %v1661_v9 = vpop.f32.mrb[74].mxu1 }
 0x1f5   :  { %v2550_v7 = vmax.f32 %v1385_v39, 0.0  ;;  %v1389_v8 = vadd.f32 %v1388_v35, %v4671_v16  ;;  %v1390_v10 = vpop.f32.mrb[75].mxu0  ;;  %v2552_v11 = vmax.f32 %v1658_v4, 0.0  ;;  %v1662_v56 = vadd.f32 %v1661_v9, %v4674_v26  ;;  %v1663_v6 = vpop.f32.mrb[75].mxu1  ;;  %v4316_v39 = vld [vmem:[#allocation2 + $0x174] ss:$8 sps:$4 sm:$0xff]  }
 0x1f6   :  { %v2551_v2 = vmax.f32 %v1387_v5, 0.0  ;;  %v1391_v13 = vadd.f32 %v1390_v10, %v4676_v19  ;;  %v2553_v14 = vmax.f32 %v1660_v62, 0.0  ;;  %v1664_v38 = vadd.f32 %v1663_v6, %v4679_v29 }
 0x1f7   :  { %2934 = vst [vmem:[#allocation10 + $0x900] sm:$0xff] %v2550_v7  ;;  %v2558_v15 = vmax.f32 %v1389_v8, 0.0  ;;  %1959 = vmatmul.mubr.bf16.gmra.mrb[180].mxu0 %v4313_v20  ;;  %2936 = vst [vmem:[#allocation10 + $0x910] sm:$0xff] %v2552_v11  ;;  %v2560_v21 = vmax.f32 %v1662_v56, 0.0  ;;  %2232 = vmatmul.mubr.bf16.gmra.mrb[180].mxu1 %v4313_v20 }
 0x1f8   :  { %2935 = vst [vmem:[#allocation10 + $0x908] sm:$0xff] %v2551_v2  ;;  %v2559_v24 = vmax.f32 %v1391_v13, 0.0  ;;  %1968 = vmatprep.mubr.bf16.mxu0 %v4314_v42  ;;  %2937 = vst [vmem:[#allocation10 + $0x918] sm:$0xff] %v2553_v14  ;;  %v2561_v28 = vmax.f32 %v1664_v38, 0.0  ;;  %2241 = vmatprep.mubr.bf16.mxu1 %v4314_v42  ;;  %v4911_v38 = vld [vmem:[#allocation8 + $0x8] sm:$0x3f] }
 0x1f9   :  { %2942 = vst [vmem:[#allocation10 + $0x940] sm:$0xff] %v2558_v15  ;;  %v4882_v17 = vpack.c.bf16 %v2558_v15, %v2550_v7  ;;  %2944 = vst [vmem:[#allocation10 + $0x950] sm:$0xff] %v2560_v21  ;;  %v4884_v41 = vpack.c.bf16 %v2560_v21, %v2552_v11 }
 0x1fa   :  { %2943 = vst [vmem:[#allocation10 + $0x948] sm:$0xff] %v2559_v24  ;;  %v4886_v43 = vpack.c.bf16 %v2559_v24, %v2551_v2  ;;  %v1394_v36 = vpop.f32.mrb[76].mxu0  ;;  %2945 = vst [vmem:[#allocation10 + $0x958] sm:$0xff] %v2561_v28  ;;  %v4888_v30 = vpack.c.bf16 %v2561_v28, %v2553_v14  ;;  %v1667_v44 = vpop.f32.mrb[76].mxu1 }
 0x1fb   :  { %v1395_v31 = vadd.f32 %v1394_v36, %v4671_v16  ;;  %v1396_v23 = vpop.f32.mrb[77].mxu0  ;;  %v1668_v32 = vadd.f32 %v1667_v44, %v4674_v26  ;;  %v1669_v33 = vpop.f32.mrb[77].mxu1 }
 0x1fc   :  { %v1397_v37 = vadd.f32 %v1396_v23, %v4676_v19  ;;  %v1398_v45 = vpop.f32.mrb[78].mxu0  ;;  %v1670_v48 = vadd.f32 %v1669_v33, %v4679_v29  ;;  %v1671_v49 = vpop.f32.mrb[78].mxu1  ;;  %v4317_v23 = vld [vmem:[#allocation2 + $0x170] ss:$8 sps:$4 sm:$0xff]  }
 0x1fd   :  { %v2566_v46 = vmax.f32 %v1395_v31, 0.0  ;;  %v1399_v47 = vadd.f32 %v1398_v45, %v4671_v16  ;;  %v1400_v50 = vpop.f32.mrb[79].mxu0  ;;  %v2568_v18 = vmax.f32 %v1668_v32, 0.0  ;;  %v1672_v52 = vadd.f32 %v1671_v49, %v4674_v26  ;;  %v1673_v54 = vpop.f32.mrb[79].mxu1 }
 0x1fe   :  { %v2567_v51 = vmax.f32 %v1397_v37, 0.0  ;;  %v1401_v53 = vadd.f32 %v1400_v50, %v4676_v19  ;;  %v2569_v22 = vmax.f32 %v1670_v48, 0.0  ;;  %v1674_v57 = vadd.f32 %v1673_v54, %v4679_v29 }
 0x1ff   :  { %2950 = vst [vmem:[#allocation10 + $0x980] sm:$0xff] %v2566_v46  ;;  %v2574_v55 = vmax.f32 %v1399_v47, 0.0  ;;  %1969 = vmatmul.mubr.bf16.gmra.mrb[184].mxu0 %v4315_v58  ;;  %2952 = vst [vmem:[#allocation10 + $0x990] sm:$0xff] %v2568_v18  ;;  %v2576_v60 = vmax.f32 %v1672_v52, 0.0  ;;  %2242 = vmatmul.mubr.bf16.gmra.mrb[184].mxu1 %v4315_v58 }
 0x200   :  { %2951 = vst [vmem:[#allocation10 + $0x988] sm:$0xff] %v2567_v51  ;;  %v2575_v1 = vmax.f32 %v1401_v53, 0.0  ;;  %1978 = vmatprep.mubr.bf16.mxu0 %v4316_v39  ;;  %2953 = vst [vmem:[#allocation10 + $0x998] sm:$0xff] %v2569_v22  ;;  %v2577_v3 = vmax.f32 %v1674_v57, 0.0  ;;  %2251 = vmatprep.mubr.bf16.mxu1 %v4316_v39 }
 0x201   :  { %2958 = vst [vmem:[#allocation10 + $0x9c0] sm:$0xff] %v2574_v55  ;;  %v4898_v0 = vpack.c.bf16 %v2574_v55, %v2566_v46  ;;  %2960 = vst [vmem:[#allocation10 + $0x9d0] sm:$0xff] %v2576_v60  ;;  %v4900_v4 = vpack.c.bf16 %v2576_v60, %v2568_v18  ;;  %v3030_v55 = vld [vmem:[#allocation8] sm:$0x3f] }
 0x202   :  { %2959 = vst [vmem:[#allocation10 + $0x9c8] sm:$0xff] %v2575_v1  ;;  %v4902_v5 = vpack.c.bf16 %v2575_v1, %v2567_v51  ;;  %v1404_v40 = vpop.f32.mrb[80].mxu0  ;;  %2961 = vst [vmem:[#allocation10 + $0x9d8] sm:$0xff] %v2577_v3  ;;  %v4904_v35 = vpack.c.bf16 %v2577_v3, %v2569_v22  ;;  %v1677_v62 = vpop.f32.mrb[80].mxu1 }
 0x203   :  { %v1405_v7 = vadd.f32 %v1404_v40, %v4671_v16  ;;  %v1406_v8 = vpop.f32.mrb[81].mxu0  ;;  %v1678_v9 = vadd.f32 %v1677_v62, %v4674_v26  ;;  %v1679_v11 = vpop.f32.mrb[81].mxu1 }
 0x204   :  { %v1407_v10 = vadd.f32 %v1406_v8, %v4676_v19  ;;  %v1408_v2 = vpop.f32.mrb[82].mxu0  ;;  %v1680_v13 = vadd.f32 %v1679_v11, %v4679_v29  ;;  %v1681_v14 = vpop.f32.mrb[82].mxu1 }
 0x205   :  { %v2582_v56 = vmax.f32 %v1405_v7, 0.0  ;;  %v1409_v6 = vadd.f32 %v1408_v2, %v4671_v16  ;;  %v1410_v15 = vpop.f32.mrb[83].mxu0  ;;  %v2584_v20 = vmax.f32 %v1678_v9, 0.0  ;;  %v1682_v24 = vadd.f32 %v1681_v14, %v4674_v26  ;;  %v1683_v28 = vpop.f32.mrb[83].mxu1 }
 0x206   :  { %v2583_v21 = vmax.f32 %v1407_v10, 0.0  ;;  %v1411_v42 = vadd.f32 %v1410_v15, %v4676_v19  ;;  %v2585_v36 = vmax.f32 %v1680_v13, 0.0  ;;  %v1684_v44 = vadd.f32 %v1683_v28, %v4679_v29 }
 0x207   :  { %2966 = vst [vmem:[#allocation10 + $0xa00] sm:$0xff] %v2582_v56  ;;  %v2590_v31 = vmax.f32 %v1409_v6, 0.0  ;;  %1979 = vmatmul.mubr.bf16.gmra.mrb[188].mxu0 %v4317_v23  ;;  %2968 = vst [vmem:[#allocation10 + $0xa10] sm:$0xff] %v2584_v20  ;;  %v2592_v32 = vmax.f32 %v1682_v24, 0.0  ;;  %2252 = vmatmul.mubr.bf16.gmra.mrb[188].mxu1 %v4317_v23 }
 0x208   :  { %2967 = vst [vmem:[#allocation10 + $0xa08] sm:$0xff] %v2583_v21  ;;  %v2591_v37 = vmax.f32 %v1411_v42, 0.0  ;;  %3097 = vmatprep.mubr.f32.mxu0 %v4911_v38  ;;  %2969 = vst [vmem:[#allocation10 + $0xa18] sm:$0xff] %v2585_v36  ;;  %v2593_v45 = vmax.f32 %v1684_v44, 0.0  ;;  %3239 = vmatprep.mubr.f32.mxu1 %v4911_v38 }
 0x209   :  { %2974 = vst [vmem:[#allocation10 + $0xa40] sm:$0xff] %v2590_v31  ;;  %v4917_v33 = vpack.c.bf16 %v2590_v31, %v2582_v56  ;;  %2976 = vst [vmem:[#allocation10 + $0xa50] sm:$0xff] %v2592_v32  ;;  %v4920_v46 = vpack.c.bf16 %v2592_v32, %v2584_v20 }
 0x20a   :  { %2975 = vst [vmem:[#allocation10 + $0xa48] sm:$0xff] %v2591_v37  ;;  %v4922_v48 = vpack.c.bf16 %v2591_v37, %v2583_v21  ;;  %v1414_v47 = vpop.f32.mrb[84].mxu0  ;;  %2977 = vst [vmem:[#allocation10 + $0xa58] sm:$0xff] %v2593_v45  ;;  %v4924_v49 = vpack.c.bf16 %v2593_v45, %v2585_v36  ;;  %v1687_v18 = vpop.f32.mrb[84].mxu1 }
 0x20b   :  { %v1415_v50 = vadd.f32 %v1414_v47, %v4671_v16  ;;  %v1416_v51 = vpop.f32.mrb[85].mxu0  ;;  %v1688_v52 = vadd.f32 %v1687_v18, %v4674_v26  ;;  %v1689_v54 = vpop.f32.mrb[85].mxu1 }
 0x20c   :  { %v1417_v53 = vadd.f32 %v1416_v51, %v4676_v19  ;;  %v1418_v22 = vpop.f32.mrb[86].mxu0  ;;  %v1690_v58 = vadd.f32 %v1689_v54, %v4679_v29  ;;  %v1691_v1 = vpop.f32.mrb[86].mxu1 }
 0x20d   :  { %v2598_v57 = vmax.f32 %v1415_v50, 0.0  ;;  %v1419_v60 = vadd.f32 %v1418_v22, %v4671_v16  ;;  %v1420_v39 = vpop.f32.mrb[87].mxu0  ;;  %v2600_v3 = vmax.f32 %v1688_v52, 0.0  ;;  %v1692_v7 = vadd.f32 %v1691_v1, %v4674_v26  ;;  %v1693_v8 = vpop.f32.mrb[87].mxu1 }
 0x20e   :  { %v2599_v40 = vmax.f32 %v1417_v53, 0.0  ;;  %v1421_v62 = vadd.f32 %v1420_v39, %v4676_v19  ;;  %v2601_v9 = vmax.f32 %v1690_v58, 0.0  ;;  %v1694_v11 = vadd.f32 %v1693_v8, %v4679_v29 }
 0x20f   :  { %2982 = vst [vmem:[#allocation10 + $0xa80] sm:$0xff] %v2598_v57  ;;  %v2606_v10 = vmax.f32 %v1419_v60, 0.0  ;;  %3098 = vmatmul.mubr.f32.vlgmr.msra.gmra.mrb[192].mxu0 %v3030_v55  ;;  %2984 = vst [vmem:[#allocation10 + $0xa90] sm:$0xff] %v2600_v3  ;;  %v2608_v2 = vmax.f32 %v1692_v7, 0.0  ;;  %3240 = vmatmul.mubr.f32.vlgmr.msra.gmra.mrb[192].mxu1 %v3030_v55  ;;  %v272_v7 = vsub.s32 5, %v4661_v12 }
 0x210   :  { %2983 = vst [vmem:[#allocation10 + $0xa88] sm:$0xff] %v2599_v40  ;;  %v2607_v56 = vmax.f32 %v1421_v62, 0.0  ;;  %3885 = vmatpush1.bf16.msra.mxu0 %v4854_v25  ;;  %2985 = vst [vmem:[#allocation10 + $0xa98] sm:$0xff] %v2601_v9  ;;  %v2609_v6 = vmax.f32 %v1694_v11, 0.0  ;;  %3981 = vmatpush1.bf16.msra.mxu1 %v4856_v27  ;;  %v4471_v25 = vmov 0.0  }
 0x211   :  { %2990 = vst [vmem:[#allocation10 + $0xac0] sm:$0xff] %v2606_v10  ;;  %v4935_v13 = vpack.c.bf16 %v2606_v10, %v2598_v57  ;;  %3887 = vmatprep.subr.bf16.mxu0 %v4870_v63  ;;  %2992 = vst [vmem:[#allocation10 + $0xad0] sm:$0xff] %v2608_v2  ;;  %v4939_v14 = vpack.c.bf16 %v2608_v2, %v2600_v3  ;;  %3983 = vmatprep.subr.bf16.mxu1 %v4872_v34  ;;  %v280_v2 = vsub.s32 7, %v4661_v12 }
 0x212   :  { %2991 = vst [vmem:[#allocation10 + $0xac8] sm:$0xff] %v2607_v56  ;;  %v4941_v15 = vpack.c.bf16 %v2607_v56, %v2599_v40  ;;  %v1424_v20 = vpop.f32.mrb[88].mxu0  ;;  %3168 = vmatprep.mubr.f32.mxu0 %v4471_v25  ;;  %2993 = vst [vmem:[#allocation10 + $0xad8] sm:$0xff] %v2609_v6  ;;  %v4945_v21 = vpack.c.bf16 %v2609_v6, %v2601_v9  ;;  %v1697_v27 = vpop.f32.mrb[88].mxu1  ;;  %3310 = vmatprep.mubr.f32.mxu1 %v4471_v25 }
 0x213   :  { %v1425_v24 = vadd.f32 %v1424_v20, %v4671_v16  ;;  %v1426_v42 = vpop.f32.mrb[89].mxu0  ;;  %v1698_v63 = vadd.f32 %v1697_v27, %v4674_v26  ;;  %v1699_v36 = vpop.f32.mrb[89].mxu1 }
 0x214   :  { %v1427_v28 = vadd.f32 %v1426_v42, %v4676_v19  ;;  %3889 = vmatpush1.bf16.msra.mxu0 %v4866_v59  ;;  %v1428_v34 = vpop.f32.mrb[90].mxu0  ;;  %v1700_v44 = vadd.f32 %v1699_v36, %v4679_v29  ;;  %3985 = vmatpush1.bf16.msra.mxu1 %v4868_v61  ;;  %v1701_v32 = vpop.f32.mrb[90].mxu1  ;;  %v4318_v42 = vld [vmem:[#allocation7] sm:$0xff] }
 0x215   :  { %v2614_v31 = vmax.f32 %v1425_v24, 0.0  ;;  %v1429_v23 = vadd.f32 %v1428_v34, %v4671_v16  ;;  %3891 = vmatprep.subr.bf16.mxu0 %v4886_v43  ;;  %v1430_v37 = vpop.f32.mrb[91].mxu0  ;;  %v2616_v45 = vmax.f32 %v1698_v63, 0.0  ;;  %v1702_v50 = vadd.f32 %v1701_v32, %v4674_v26  ;;  %3987 = vmatprep.subr.bf16.mxu1 %v4888_v30  ;;  %v1703_v18 = vpop.f32.mrb[91].mxu1 }
 0x216   :  { %v2615_v47 = vmax.f32 %v1427_v28, 0.0  ;;  %v1431_v59 = vadd.f32 %v1430_v37, %v4676_v19  ;;  %v2617_v51 = vmax.f32 %v1700_v44, 0.0  ;;  %v1704_v61 = vadd.f32 %v1703_v18, %v4679_v29 }
 0x217   :  { %2998 = vst [vmem:[#allocation10 + $0xb00] sm:$0xff] %v2614_v31  ;;  %v2622_v52 = vmax.f32 %v1429_v23, 0.0  ;;  %3000 = vst [vmem:[#allocation10 + $0xb10] sm:$0xff] %v2616_v45  ;;  %v2624_v53 = vmax.f32 %v1702_v50, 0.0 }
 0x218   :  { %2999 = vst [vmem:[#allocation10 + $0xb08] sm:$0xff] %v2615_v47  ;;  %v2623_v54 = vmax.f32 %v1431_v59, 0.0  ;;  %3893 = vmatpush1.bf16.msra.mxu0 %v4882_v17  ;;  %3001 = vst [vmem:[#allocation10 + $0xb18] sm:$0xff] %v2617_v51  ;;  %v2625_v22 = vmax.f32 %v1704_v61, 0.0  ;;  %3989 = vmatpush1.bf16.msra.mxu1 %v4884_v41  ;;  %v268_v41 = vsub.s32 4, %v4661_v12 }
 0x219   :  { %3006 = vst [vmem:[#allocation10 + $0xb40] sm:$0xff] %v2622_v52  ;;  %v4961_v43 = vpack.c.bf16 %v2622_v52, %v2614_v31  ;;  %3895 = vmatprep.subr.bf16.mxu0 %v4902_v5  ;;  %3008 = vst [vmem:[#allocation10 + $0xb50] sm:$0xff] %v2624_v53  ;;  %v4965_v30 = vpack.c.bf16 %v2624_v53, %v2616_v45  ;;  %3991 = vmatprep.subr.bf16.mxu1 %v4904_v35  ;;  %v276_v35 = vsub.s32 6, %v4661_v12 }
 0x21a   :  { %3007 = vst [vmem:[#allocation10 + $0xb48] sm:$0xff] %v2623_v54  ;;  %v4967_v55 = vpack.c.bf16 %v2623_v54, %v2615_v47  ;;  %v1434_v57 = vpop.f32.mrb[92].mxu0  ;;  %3009 = vst [vmem:[#allocation10 + $0xb58] sm:$0xff] %v2625_v22  ;;  %v4970_v17 = vpack.c.bf16 %v2625_v22, %v2617_v51  ;;  %v1707_v60 = vpop.f32.mrb[92].mxu1  ;;  %v4988_v63 = vrot.slane %v4318_v42, %v268_v41 }
 0x21b   :  { %v1435_v58 = vadd.f32 %v1434_v57, %v4671_v16  ;;  %v1436_v1 = vpop.f32.mrb[93].mxu0  ;;  %v1708_v5 = vadd.f32 %v1707_v60, %v4674_v26  ;;  %v1709_v3 = vpop.f32.mrb[93].mxu1 }
 0x21c   :  { %v1437_v39 = vadd.f32 %v1436_v1, %v4676_v19  ;;  %3897 = vmatpush1.bf16.msra.mxu0 %v4898_v0  ;;  %v1438_v40 = vpop.f32.mrb[94].mxu0  ;;  %v1710_v8 = vadd.f32 %v1709_v3, %v4679_v29  ;;  %3993 = vmatpush1.bf16.msra.mxu1 %v4900_v4  ;;  %v1711_v10 = vpop.f32.mrb[94].mxu1 }
 0x21d   :  { %v2630_v62 = vmax.f32 %v1435_v58, 0.0  ;;  %v1439_v9 = vadd.f32 %v1438_v40, %v4671_v16  ;;  %3899 = vmatprep.subr.bf16.mxu0 %v4922_v48  ;;  %v1440_v11 = vpop.f32.mrb[95].mxu0  ;;  %v2632_v56 = vmax.f32 %v1708_v5, 0.0  ;;  %v1712_v6 = vadd.f32 %v1711_v10, %v4674_v26  ;;  %3995 = vmatprep.subr.bf16.mxu1 %v4924_v49  ;;  %v1713_v24 = vpop.f32.mrb[95].mxu1 }
 0x21e   :  { %v2631_v0 = vmax.f32 %v1437_v39, 0.0  ;;  %v1441_v20 = vadd.f32 %v1440_v11, %v4676_v19  ;;  %v2633_v27 = vmax.f32 %v1710_v8, 0.0  ;;  %v1714_v16 = vadd.f32 %v1713_v24, %v4679_v29 }
 0x21f   :  { %3014 = vst [vmem:[#allocation10 + $0xb80] sm:$0xff] %v2630_v62  ;;  %v2638_v4 = vmax.f32 %v1439_v9, 0.0  ;;  %3016 = vst [vmem:[#allocation10 + $0xb90] sm:$0xff] %v2632_v56  ;;  %v2640_v12 = vmax.f32 %v1712_v6, 0.0  ;;  %v4991_v26 = vrot.slane %v4318_v42, %v276_v35  ;;  %v4993_v49 = vrot.slane %v4318_v42, %v272_v7 }
 0x220   :  { %3015 = vst [vmem:[#allocation10 + $0xb88] sm:$0xff] %v2631_v0  ;;  %v2639_v48 = vmax.f32 %v1441_v20, 0.0  ;;  %3901 = vmatpush1.bf16.msra.mxu0 %v4917_v33  ;;  %3017 = vst [vmem:[#allocation10 + $0xb98] sm:$0xff] %v2633_v27  ;;  %v2641_v28 = vmax.f32 %v1714_v16, 0.0  ;;  %3997 = vmatpush1.bf16.msra.mxu1 %v4920_v46  ;;  %v4997_v29 = vrot.slane %v4318_v42, %v280_v2 }
 0x221   :  { %3022 = vst [vmem:[#allocation10 + $0xbc0] sm:$0xff] %v2638_v4  ;;  %v3912_v19 = vpack.c.bf16 %v2638_v4, %v2630_v62  ;;  %3903 = vmatprep.subr.bf16.mxu0 %v4941_v15  ;;  %3024 = vst [vmem:[#allocation10 + $0xbd0] sm:$0xff] %v2640_v12  ;;  %v4008_v36 = vpack.c.bf16 %v2640_v12, %v2632_v56  ;;  %3999 = vmatprep.subr.bf16.mxu1 %v4945_v21  ;;  %v3032_v62 = vld [vmem:[#allocation8 + $0x10] sm:$0x3f] }
 0x222   :  { %3023 = vst [vmem:[#allocation10 + $0xbc8] sm:$0xff] %v2639_v48  ;;  %v3910_v34 = vpack.c.bf16 %v2639_v48, %v2631_v0  ;;  %v1750_v33 = vpop.f32.mrb[96].mxu0  ;;  %3025 = vst [vmem:[#allocation10 + $0xbd8] sm:$0xff] %v2641_v28  ;;  %v4006_v31 = vpack.c.bf16 %v2641_v28, %v2633_v27  ;;  %v2023_v23 = vpop.f32.mrb[96].mxu1 }
 0x223   :  { %v1751_v44 = vadd.f32 %v1750_v33, %v4988_v63  ;;  %v1752_v32 = vpop.f32.mrb[97].mxu0  ;;  %v2024_v37 = vadd.f32 %v2023_v23, %v4991_v26  ;;  %v2025_v15 = vpop.f32.mrb[97].mxu1 }
 0x224   :  { %v1753_v46 = vadd.f32 %v1752_v32, %v4993_v49  ;;  %3905 = vmatpush1.bf16.msra.mxu0 %v4935_v13  ;;  %v1754_v45 = vpop.f32.mrb[98].mxu0  ;;  %v2026_v50 = vadd.f32 %v2025_v15, %v4997_v29  ;;  %4001 = vmatpush1.bf16.msra.mxu1 %v4939_v14  ;;  %v2027_v59 = vpop.f32.mrb[98].mxu1 }
 0x225   :  { %v2266_v47 = vmax.f32 %v1751_v44, 0.0  ;;  %v1755_v21 = vadd.f32 %v1754_v45, %v4988_v63  ;;  %3907 = vmatprep.subr.bf16.mxu0 %v4967_v55  ;;  %v1756_v18 = vpop.f32.mrb[99].mxu0  ;;  %v2268_v51 = vmax.f32 %v2024_v37, 0.0  ;;  %v2028_v61 = vadd.f32 %v2027_v59, %v4991_v26  ;;  %4003 = vmatprep.subr.bf16.mxu1 %v4970_v17  ;;  %v2029_v53 = vpop.f32.mrb[99].mxu1 }
 0x226   :  { %v2267_v52 = vmax.f32 %v1753_v46, 0.0  ;;  %v1757_v13 = vadd.f32 %v1756_v18, %v4993_v49  ;;  %v2269_v54 = vmax.f32 %v2026_v50, 0.0  ;;  %v2030_v14 = vadd.f32 %v2029_v53, %v4997_v29 }
 0x227   :  { %2650 = vst [vmem:[#allocation10 + $0x20] sm:$0xff] %v2266_v47  ;;  %v2274_v22 = vmax.f32 %v1755_v21, 0.0  ;;  %2652 = vst [vmem:[#allocation10 + $0x30] sm:$0xff] %v2268_v51  ;;  %v2276_v57 = vmax.f32 %v2028_v61, 0.0 }
 0x228   :  { %2651 = vst [vmem:[#allocation10 + $0x28] sm:$0xff] %v2267_v52  ;;  %v2275_v58 = vmax.f32 %v1757_v13, 0.0  ;;  %3909 = vmatpush1.bf16.msra.mxu0 %v4961_v43  ;;  %2653 = vst [vmem:[#allocation10 + $0x38] sm:$0xff] %v2269_v54  ;;  %v2277_v60 = vmax.f32 %v2030_v14, 0.0  ;;  %4005 = vmatpush1.bf16.msra.mxu1 %v4965_v30 }
 0x229   :  { %2658 = vst [vmem:[#allocation10 + $0x60] sm:$0xff] %v2274_v22  ;;  %v4012_v55 = vpack.c.bf16 %v2274_v22, %v2266_v47  ;;  %3911 = vmatprep.subr.bf16.mxu0 %v3910_v34  ;;  %2660 = vst [vmem:[#allocation10 + $0x70] sm:$0xff] %v2276_v57  ;;  %v4108_v17 = vpack.c.bf16 %v2276_v57, %v2268_v51  ;;  %4007 = vmatprep.subr.bf16.mxu1 %v4006_v31 }
 0x22a   :  { %2659 = vst [vmem:[#allocation10 + $0x68] sm:$0xff] %v2275_v58  ;;  %v4010_v1 = vpack.c.bf16 %v2275_v58, %v2267_v52  ;;  %v1760_v41 = vpop.f32.mrb[100].mxu0  ;;  %2661 = vst [vmem:[#allocation10 + $0x78] sm:$0xff] %v2277_v60  ;;  %v4106_v5 = vpack.c.bf16 %v2277_v60, %v2269_v54  ;;  %v2033_v3 = vpop.f32.mrb[100].mxu1 }
 0x22b   :  { %v1761_v39 = vadd.f32 %v1760_v41, %v4988_v63  ;;  %v1762_v40 = vpop.f32.mrb[101].mxu0  ;;  %v2034_v43 = vadd.f32 %v2033_v3, %v4991_v26  ;;  %v2035_v7 = vpop.f32.mrb[101].mxu1 }
 0x22c   :  { %v1763_v35 = vadd.f32 %v1762_v40, %v4993_v49  ;;  %3913 = vmatpush1.bf16.msra.mxu0 %v3912_v19  ;;  %v1764_v30 = vpop.f32.mrb[102].mxu0  ;;  %v2036_v9 = vadd.f32 %v2035_v7, %v4997_v29  ;;  %4009 = vmatpush1.bf16.msra.mxu1 %v4008_v36  ;;  %v2037_v11 = vpop.f32.mrb[102].mxu1 }
 0x22d   :  { %v2282_v8 = vmax.f32 %v1761_v39, 0.0  ;;  %v1765_v10 = vadd.f32 %v1764_v30, %v4988_v63  ;;  %4011 = vmatprep.subr.bf16.mxu0 %v4010_v1  ;;  %v1766_v2 = vpop.f32.mrb[103].mxu0  ;;  %v2284_v56 = vmax.f32 %v2034_v43, 0.0  ;;  %v2038_v6 = vadd.f32 %v2037_v11, %v4991_v26  ;;  %4107 = vmatprep.subr.bf16.mxu1 %v4106_v5  ;;  %v2039_v24 = vpop.f32.mrb[103].mxu1 }
 0x22e   :  { %v2283_v0 = vmax.f32 %v1763_v35, 0.0  ;;  %v1767_v20 = vadd.f32 %v1766_v2, %v4993_v49  ;;  %v2285_v27 = vmax.f32 %v2036_v9, 0.0  ;;  %v2040_v16 = vadd.f32 %v2039_v24, %v4997_v29 }
 0x22f   :  { %2666 = vst [vmem:[#allocation10 + $0xa0] sm:$0xff] %v2282_v8  ;;  %v2290_v4 = vmax.f32 %v1765_v10, 0.0  ;;  %3169 = vmatmul.mubr.f32.vlgmr.msra.gmra.mrb[192].mxu0 %v3032_v62  ;;  %2668 = vst [vmem:[#allocation10 + $0xb0] sm:$0xff] %v2284_v56  ;;  %v2292_v42 = vmax.f32 %v2038_v6, 0.0  ;;  %3311 = vmatmul.mubr.f32.vlgmr.msra.gmra.mrb[192].mxu1 %v3032_v62 }
 0x230   :  { %2667 = vst [vmem:[#allocation10 + $0xa8] sm:$0xff] %v2283_v0  ;;  %v2291_v12 = vmax.f32 %v1767_v20, 0.0  ;;  %4013 = vmatpush1.bf16.msra.mxu0 %v4012_v55  ;;  %2669 = vst [vmem:[#allocation10 + $0xb8] sm:$0xff] %v2285_v27  ;;  %v2293_v19 = vmax.f32 %v2040_v16, 0.0  ;;  %4109 = vmatpush1.bf16.msra.mxu1 %v4108_v17 }
 0x231   :  { %2674 = vst [vmem:[#allocation10 + $0xe0] sm:$0xff] %v2290_v4  ;;  %v4016_v48 = vpack.c.bf16 %v2290_v4, %v2282_v8  ;;  %3381 = vmatprep.mubr.f32.mxu0 %v4911_v38  ;;  %2676 = vst [vmem:[#allocation10 + $0xf0] sm:$0xff] %v2292_v42  ;;  %v4112_v28 = vpack.c.bf16 %v2292_v42, %v2284_v56  ;;  %3523 = vmatprep.mubr.f32.mxu1 %v4911_v38 }
 0x232   :  { %2675 = vst [vmem:[#allocation10 + $0xe8] sm:$0xff] %v2291_v12  ;;  %v4014_v36 = vpack.c.bf16 %v2291_v12, %v2283_v0  ;;  %v1770_v34 = vpop.f32.mrb[104].mxu0  ;;  %2677 = vst [vmem:[#allocation10 + $0xf8] sm:$0xff] %v2293_v19  ;;  %v4110_v33 = vpack.c.bf16 %v2293_v19, %v2285_v27  ;;  %v2043_v44 = vpop.f32.mrb[104].mxu1 }
 0x233   :  { %v1771_v31 = vadd.f32 %v1770_v34, %v4988_v63  ;;  %v1772_v23 = vpop.f32.mrb[105].mxu0  ;;  %v2044_v32 = vadd.f32 %v2043_v44, %v4991_v26  ;;  %v2045_v46 = vpop.f32.mrb[105].mxu1 }
 0x234   :  { %v1773_v37 = vadd.f32 %v1772_v23, %v4993_v49  ;;  %v1774_v15 = vpop.f32.mrb[106].mxu0  ;;  %4015 = vmatprep.subr.bf16.mxu0 %v4014_v36  ;;  %v2046_v47 = vadd.f32 %v2045_v46, %v4997_v29  ;;  %v2047_v21 = vpop.f32.mrb[106].mxu1  ;;  %4111 = vmatprep.subr.bf16.mxu1 %v4110_v33 }
 0x235   :  { %v2298_v45 = vmax.f32 %v1771_v31, 0.0  ;;  %v1775_v50 = vadd.f32 %v1774_v15, %v4988_v63  ;;  %v1776_v38 = vpop.f32.mrb[107].mxu0  ;;  %4017 = vmatpush1.bf16.msra.mxu0 %v4016_v48  ;;  %v2300_v59 = vmax.f32 %v2044_v32, 0.0  ;;  %v2048_v51 = vadd.f32 %v2047_v21, %v4991_v26  ;;  %v2049_v61 = vpop.f32.mrb[107].mxu1  ;;  %4113 = vmatpush1.bf16.msra.mxu1 %v4112_v28 }
 0x236   :  { %v2299_v18 = vmax.f32 %v1773_v37, 0.0  ;;  %v1777_v52 = vadd.f32 %v1776_v38, %v4993_v49  ;;  %v2301_v13 = vmax.f32 %v2046_v47, 0.0  ;;  %v2050_v54 = vadd.f32 %v2049_v61, %v4997_v29 }
 0x237   :  { %2682 = vst [vmem:[#allocation10 + $0x120] sm:$0xff] %v2298_v45  ;;  %v2306_v53 = vmax.f32 %v1775_v50, 0.0  ;;  %2684 = vst [vmem:[#allocation10 + $0x130] sm:$0xff] %v2300_v59  ;;  %v2308_v22 = vmax.f32 %v2048_v51, 0.0 }
 0x238   :  { %2683 = vst [vmem:[#allocation10 + $0x128] sm:$0xff] %v2299_v18  ;;  %v2307_v14 = vmax.f32 %v1777_v52, 0.0  ;;  %2685 = vst [vmem:[#allocation10 + $0x138] sm:$0xff] %v2301_v13  ;;  %v2309_v58 = vmax.f32 %v2050_v54, 0.0 }
 0x239   :  { %2690 = vst [vmem:[#allocation10 + $0x160] sm:$0xff] %v2306_v53  ;;  %v4020_v57 = vpack.c.bf16 %v2306_v53, %v2298_v45  ;;  %2692 = vst [vmem:[#allocation10 + $0x170] sm:$0xff] %v2308_v22  ;;  %v4116_v55 = vpack.c.bf16 %v2308_v22, %v2300_v59 }
 0x23a   :  { %2691 = vst [vmem:[#allocation10 + $0x168] sm:$0xff] %v2307_v14  ;;  %v4018_v60 = vpack.c.bf16 %v2307_v14, %v2299_v18  ;;  %v1780_v17 = vpop.f32.mrb[108].mxu0  ;;  %2693 = vst [vmem:[#allocation10 + $0x178] sm:$0xff] %v2309_v58  ;;  %v4114_v1 = vpack.c.bf16 %v2309_v58, %v2301_v13  ;;  %v2053_v5 = vpop.f32.mrb[108].mxu1 }
 0x23b   :  { %v1781_v41 = vadd.f32 %v1780_v17, %v4988_v63  ;;  %v1782_v39 = vpop.f32.mrb[109].mxu0  ;;  %v2054_v3 = vadd.f32 %v2053_v5, %v4991_v26  ;;  %v2055_v43 = vpop.f32.mrb[109].mxu1 }
 0x23c   :  { %v1783_v40 = vadd.f32 %v1782_v39, %v4993_v49  ;;  %v1784_v35 = vpop.f32.mrb[110].mxu0  ;;  %4019 = vmatprep.subr.bf16.mxu0 %v4018_v60  ;;  %v2056_v30 = vadd.f32 %v2055_v43, %v4997_v29  ;;  %v2057_v8 = vpop.f32.mrb[110].mxu1  ;;  %4115 = vmatprep.subr.bf16.mxu1 %v4114_v1 }
 0x23d   :  { %v2314_v7 = vmax.f32 %v1781_v41, 0.0  ;;  %v1785_v62 = vadd.f32 %v1784_v35, %v4988_v63  ;;  %v1786_v9 = vpop.f32.mrb[111].mxu0  ;;  %4021 = vmatpush1.bf16.msra.mxu0 %v4020_v57  ;;  %v2316_v10 = vmax.f32 %v2054_v3, 0.0  ;;  %v2058_v2 = vadd.f32 %v2057_v8, %v4991_v26  ;;  %v2059_v0 = vpop.f32.mrb[111].mxu1  ;;  %4117 = vmatpush1.bf16.msra.mxu1 %v4116_v55 }
 0x23e   :  { %v2315_v11 = vmax.f32 %v1783_v40, 0.0  ;;  %v1787_v56 = vadd.f32 %v1786_v9, %v4993_v49  ;;  %v2317_v6 = vmax.f32 %v2056_v30, 0.0  ;;  %v2060_v24 = vadd.f32 %v2059_v0, %v4997_v29 }
 0x23f   :  { %2698 = vst [vmem:[#allocation10 + $0x1a0] sm:$0xff] %v2314_v7  ;;  %v2322_v20 = vmax.f32 %v1785_v62, 0.0  ;;  %2700 = vst [vmem:[#allocation10 + $0x1b0] sm:$0xff] %v2316_v10  ;;  %v2324_v27 = vmax.f32 %v2058_v2, 0.0 }
 0x240   :  { %2699 = vst [vmem:[#allocation10 + $0x1a8] sm:$0xff] %v2315_v11  ;;  %v2323_v4 = vmax.f32 %v1787_v56, 0.0  ;;  %2701 = vst [vmem:[#allocation10 + $0x1b8] sm:$0xff] %v2317_v6  ;;  %v2325_v42 = vmax.f32 %v2060_v24, 0.0 }
 0x241   :  { %2706 = vst [vmem:[#allocation10 + $0x1e0] sm:$0xff] %v2322_v20  ;;  %v4024_v16 = vpack.c.bf16 %v2322_v20, %v2314_v7  ;;  %2708 = vst [vmem:[#allocation10 + $0x1f0] sm:$0xff] %v2324_v27  ;;  %v4120_v12 = vpack.c.bf16 %v2324_v27, %v2316_v10 }
 0x242   :  { %2707 = vst [vmem:[#allocation10 + $0x1e8] sm:$0xff] %v2323_v4  ;;  %v4022_v48 = vpack.c.bf16 %v2323_v4, %v2315_v11  ;;  %v1790_v19 = vpop.f32.mrb[112].mxu0  ;;  %2709 = vst [vmem:[#allocation10 + $0x1f8] sm:$0xff] %v2325_v42  ;;  %v4118_v28 = vpack.c.bf16 %v2325_v42, %v2317_v6  ;;  %v2063_v34 = vpop.f32.mrb[112].mxu1 }
 0x243   :  { %v1791_v36 = vadd.f32 %v1790_v19, %v4988_v63  ;;  %v1792_v33 = vpop.f32.mrb[113].mxu0  ;;  %v2064_v31 = vadd.f32 %v2063_v34, %v4991_v26  ;;  %v2065_v23 = vpop.f32.mrb[113].mxu1 }
 0x244   :  { %v1793_v44 = vadd.f32 %v1792_v33, %v4993_v49  ;;  %v1794_v32 = vpop.f32.mrb[114].mxu0  ;;  %4023 = vmatprep.subr.bf16.mxu0 %v4022_v48  ;;  %v2066_v46 = vadd.f32 %v2065_v23, %v4997_v29  ;;  %v2067_v45 = vpop.f32.mrb[114].mxu1  ;;  %4119 = vmatprep.subr.bf16.mxu1 %v4118_v28 }
 0x245   :  { %v2330_v37 = vmax.f32 %v1791_v36, 0.0  ;;  %v1795_v15 = vadd.f32 %v1794_v32, %v4988_v63  ;;  %v1796_v47 = vpop.f32.mrb[115].mxu0  ;;  %4025 = vmatpush1.bf16.msra.mxu0 %v4024_v16  ;;  %v2332_v50 = vmax.f32 %v2064_v31, 0.0  ;;  %v2068_v38 = vadd.f32 %v2067_v45, %v4991_v26  ;;  %v2069_v18 = vpop.f32.mrb[115].mxu1  ;;  %4121 = vmatpush1.bf16.msra.mxu1 %v4120_v12 }
 0x246   :  { %v2331_v21 = vmax.f32 %v1793_v44, 0.0  ;;  %v1797_v59 = vadd.f32 %v1796_v47, %v4993_v49  ;;  %v2333_v51 = vmax.f32 %v2066_v46, 0.0  ;;  %v2070_v61 = vadd.f32 %v2069_v18, %v4997_v29 }
 0x247   :  { %2714 = vst [vmem:[#allocation10 + $0x220] sm:$0xff] %v2330_v37  ;;  %v2338_v52 = vmax.f32 %v1795_v15, 0.0  ;;  %2716 = vst [vmem:[#allocation10 + $0x230] sm:$0xff] %v2332_v50  ;;  %v2340_v13 = vmax.f32 %v2068_v38, 0.0 }
 0x248   :  { %2715 = vst [vmem:[#allocation10 + $0x228] sm:$0xff] %v2331_v21  ;;  %v2339_v53 = vmax.f32 %v1797_v59, 0.0  ;;  %2717 = vst [vmem:[#allocation10 + $0x238] sm:$0xff] %v2333_v51  ;;  %v2341_v22 = vmax.f32 %v2070_v61, 0.0 }
 0x249   :  { %2722 = vst [vmem:[#allocation10 + $0x260] sm:$0xff] %v2338_v52  ;;  %v4028_v54 = vpack.c.bf16 %v2338_v52, %v2330_v37  ;;  %2724 = vst [vmem:[#allocation10 + $0x270] sm:$0xff] %v2340_v13  ;;  %v4124_v14 = vpack.c.bf16 %v2340_v13, %v2332_v50 }
 0x24a   :  { %2723 = vst [vmem:[#allocation10 + $0x268] sm:$0xff] %v2339_v53  ;;  %v4026_v57 = vpack.c.bf16 %v2339_v53, %v2331_v21  ;;  %v1800_v58 = vpop.f32.mrb[116].mxu0  ;;  %2725 = vst [vmem:[#allocation10 + $0x278] sm:$0xff] %v2341_v22  ;;  %v4122_v55 = vpack.c.bf16 %v2341_v22, %v2333_v51  ;;  %v2073_v17 = vpop.f32.mrb[116].mxu1 }
 0x24b   :  { %v1801_v60 = vadd.f32 %v1800_v58, %v4988_v63  ;;  %v1802_v1 = vpop.f32.mrb[117].mxu0  ;;  %v2074_v41 = vadd.f32 %v2073_v17, %v4991_v26  ;;  %v2075_v39 = vpop.f32.mrb[117].mxu1 }
 0x24c   :  { %v1803_v5 = vadd.f32 %v1802_v1, %v4993_v49  ;;  %v1804_v3 = vpop.f32.mrb[118].mxu0  ;;  %4027 = vmatprep.subr.bf16.mxu0 %v4026_v57  ;;  %v2076_v43 = vadd.f32 %v2075_v39, %v4997_v29  ;;  %v2077_v7 = vpop.f32.mrb[118].mxu1  ;;  %4123 = vmatprep.subr.bf16.mxu1 %v4122_v55 }
 0x24d   :  { %v2346_v40 = vmax.f32 %v1801_v60, 0.0  ;;  %v1805_v35 = vadd.f32 %v1804_v3, %v4988_v63  ;;  %v1806_v30 = vpop.f32.mrb[119].mxu0  ;;  %4029 = vmatpush1.bf16.msra.mxu0 %v4028_v54  ;;  %v2348_v62 = vmax.f32 %v2074_v41, 0.0  ;;  %v2078_v9 = vadd.f32 %v2077_v7, %v4991_v26  ;;  %v2079_v11 = vpop.f32.mrb[119].mxu1  ;;  %4125 = vmatpush1.bf16.msra.mxu1 %v4124_v14 }
 0x24e   :  { %v2347_v8 = vmax.f32 %v1803_v5, 0.0  ;;  %v1807_v10 = vadd.f32 %v1806_v30, %v4993_v49  ;;  %v2349_v2 = vmax.f32 %v2076_v43, 0.0  ;;  %v2080_v0 = vadd.f32 %v2079_v11, %v4997_v29 }
 0x24f   :  { %2730 = vst [vmem:[#allocation10 + $0x2a0] sm:$0xff] %v2346_v40  ;;  %v2354_v56 = vmax.f32 %v1805_v35, 0.0  ;;  %2732 = vst [vmem:[#allocation10 + $0x2b0] sm:$0xff] %v2348_v62  ;;  %v2356_v6 = vmax.f32 %v2078_v9, 0.0 }
 0x250   :  { %2731 = vst [vmem:[#allocation10 + $0x2a8] sm:$0xff] %v2347_v8  ;;  %v2355_v20 = vmax.f32 %v1807_v10, 0.0  ;;  %2733 = vst [vmem:[#allocation10 + $0x2b8] sm:$0xff] %v2349_v2  ;;  %v2357_v27 = vmax.f32 %v2080_v0, 0.0 }
 0x251   :  { %2738 = vst [vmem:[#allocation10 + $0x2e0] sm:$0xff] %v2354_v56  ;;  %v4032_v24 = vpack.c.bf16 %v2354_v56, %v2346_v40  ;;  %2740 = vst [vmem:[#allocation10 + $0x2f0] sm:$0xff] %v2356_v6  ;;  %v4128_v4 = vpack.c.bf16 %v2356_v6, %v2348_v62 }
 0x252   :  { %2739 = vst [vmem:[#allocation10 + $0x2e8] sm:$0xff] %v2355_v20  ;;  %v4030_v16 = vpack.c.bf16 %v2355_v20, %v2347_v8  ;;  %v1810_v42 = vpop.f32.mrb[120].mxu0  ;;  %2741 = vst [vmem:[#allocation10 + $0x2f8] sm:$0xff] %v2357_v27  ;;  %v4126_v12 = vpack.c.bf16 %v2357_v27, %v2349_v2  ;;  %v2083_v19 = vpop.f32.mrb[120].mxu1 }
 0x253   :  { %v1811_v48 = vadd.f32 %v1810_v42, %v4988_v63  ;;  %v1812_v28 = vpop.f32.mrb[121].mxu0  ;;  %v2084_v36 = vadd.f32 %v2083_v19, %v4991_v26  ;;  %v2085_v33 = vpop.f32.mrb[121].mxu1 }
 0x254   :  { %v1813_v34 = vadd.f32 %v1812_v28, %v4993_v49  ;;  %v1814_v31 = vpop.f32.mrb[122].mxu0  ;;  %4031 = vmatprep.subr.bf16.mxu0 %v4030_v16  ;;  %v2086_v23 = vadd.f32 %v2085_v33, %v4997_v29  ;;  %v2087_v37 = vpop.f32.mrb[122].mxu1  ;;  %4127 = vmatprep.subr.bf16.mxu1 %v4126_v12 }
 0x255   :  { %v2362_v44 = vmax.f32 %v1811_v48, 0.0  ;;  %v1815_v32 = vadd.f32 %v1814_v31, %v4988_v63  ;;  %v1816_v46 = vpop.f32.mrb[123].mxu0  ;;  %4033 = vmatpush1.bf16.msra.mxu0 %v4032_v24  ;;  %v2364_v15 = vmax.f32 %v2084_v36, 0.0  ;;  %v2088_v47 = vadd.f32 %v2087_v37, %v4991_v26  ;;  %v2089_v21 = vpop.f32.mrb[123].mxu1  ;;  %4129 = vmatpush1.bf16.msra.mxu1 %v4128_v4 }
 0x256   :  { %v2363_v45 = vmax.f32 %v1813_v34, 0.0  ;;  %v1817_v50 = vadd.f32 %v1816_v46, %v4993_v49  ;;  %v2365_v38 = vmax.f32 %v2086_v23, 0.0  ;;  %v2090_v18 = vadd.f32 %v2089_v21, %v4997_v29 }
 0x257   :  { %2746 = vst [vmem:[#allocation10 + $0x320] sm:$0xff] %v2362_v44  ;;  %v2370_v59 = vmax.f32 %v1815_v32, 0.0  ;;  %2748 = vst [vmem:[#allocation10 + $0x330] sm:$0xff] %v2364_v15  ;;  %v2372_v51 = vmax.f32 %v2088_v47, 0.0 }
 0x258   :  { %2747 = vst [vmem:[#allocation10 + $0x328] sm:$0xff] %v2363_v45  ;;  %v2371_v52 = vmax.f32 %v1817_v50, 0.0  ;;  %2749 = vst [vmem:[#allocation10 + $0x338] sm:$0xff] %v2365_v38  ;;  %v2373_v13 = vmax.f32 %v2090_v18, 0.0 }
 0x259   :  { %2754 = vst [vmem:[#allocation10 + $0x360] sm:$0xff] %v2370_v59  ;;  %v4036_v61 = vpack.c.bf16 %v2370_v59, %v2362_v44  ;;  %2756 = vst [vmem:[#allocation10 + $0x370] sm:$0xff] %v2372_v51  ;;  %v4132_v53 = vpack.c.bf16 %v2372_v51, %v2364_v15 }
 0x25a   :  { %2755 = vst [vmem:[#allocation10 + $0x368] sm:$0xff] %v2371_v52  ;;  %v4034_v54 = vpack.c.bf16 %v2371_v52, %v2363_v45  ;;  %v1820_v22 = vpop.f32.mrb[124].mxu0  ;;  %2757 = vst [vmem:[#allocation10 + $0x378] sm:$0xff] %v2373_v13  ;;  %v4130_v14 = vpack.c.bf16 %v2373_v13, %v2365_v38  ;;  %v2093_v58 = vpop.f32.mrb[124].mxu1 }
 0x25b   :  { %v1821_v57 = vadd.f32 %v1820_v22, %v4988_v63  ;;  %v1822_v55 = vpop.f32.mrb[125].mxu0  ;;  %v2094_v60 = vadd.f32 %v2093_v58, %v4991_v26  ;;  %v2095_v1 = vpop.f32.mrb[125].mxu1 }
 0x25c   :  { %v1823_v17 = vadd.f32 %v1822_v55, %v4993_v49  ;;  %v1824_v41 = vpop.f32.mrb[126].mxu0  ;;  %4035 = vmatprep.subr.bf16.mxu0 %v4034_v54  ;;  %v2096_v39 = vadd.f32 %v2095_v1, %v4997_v29  ;;  %v2097_v40 = vpop.f32.mrb[126].mxu1  ;;  %4131 = vmatprep.subr.bf16.mxu1 %v4130_v14 }
 0x25d   :  { %v2378_v5 = vmax.f32 %v1821_v57, 0.0  ;;  %v1825_v3 = vadd.f32 %v1824_v41, %v4988_v63  ;;  %v1826_v43 = vpop.f32.mrb[127].mxu0  ;;  %4037 = vmatpush1.bf16.msra.mxu0 %v4036_v61  ;;  %v2380_v35 = vmax.f32 %v2094_v60, 0.0  ;;  %v2098_v30 = vadd.f32 %v2097_v40, %v4991_v26  ;;  %v2099_v8 = vpop.f32.mrb[127].mxu1  ;;  %4133 = vmatpush1.bf16.msra.mxu1 %v4132_v53 }
 0x25e   :  { %v2379_v7 = vmax.f32 %v1823_v17, 0.0  ;;  %v1827_v62 = vadd.f32 %v1826_v43, %v4993_v49  ;;  %v2381_v9 = vmax.f32 %v2096_v39, 0.0  ;;  %v2100_v11 = vadd.f32 %v2099_v8, %v4997_v29 }
 0x25f   :  { %2762 = vst [vmem:[#allocation10 + $0x3a0] sm:$0xff] %v2378_v5  ;;  %v2386_v10 = vmax.f32 %v1825_v3, 0.0  ;;  %2764 = vst [vmem:[#allocation10 + $0x3b0] sm:$0xff] %v2380_v35  ;;  %v2388_v2 = vmax.f32 %v2098_v30, 0.0 }
 0x260   :  { %2763 = vst [vmem:[#allocation10 + $0x3a8] sm:$0xff] %v2379_v7  ;;  %v2387_v56 = vmax.f32 %v1827_v62, 0.0  ;;  %2765 = vst [vmem:[#allocation10 + $0x3b8] sm:$0xff] %v2381_v9  ;;  %v2389_v6 = vmax.f32 %v2100_v11, 0.0 }
 0x261   :  { %2770 = vst [vmem:[#allocation10 + $0x3e0] sm:$0xff] %v2386_v10  ;;  %v4040_v0 = vpack.c.bf16 %v2386_v10, %v2378_v5  ;;  %2772 = vst [vmem:[#allocation10 + $0x3f0] sm:$0xff] %v2388_v2  ;;  %v4136_v20 = vpack.c.bf16 %v2388_v2, %v2380_v35 }
 0x262   :  { %2771 = vst [vmem:[#allocation10 + $0x3e8] sm:$0xff] %v2387_v56  ;;  %v4038_v24 = vpack.c.bf16 %v2387_v56, %v2379_v7  ;;  %v1830_v27 = vpop.f32.mrb[128].mxu0  ;;  %2773 = vst [vmem:[#allocation10 + $0x3f8] sm:$0xff] %v2389_v6  ;;  %v4134_v4 = vpack.c.bf16 %v2389_v6, %v2381_v9  ;;  %v2103_v42 = vpop.f32.mrb[128].mxu1 }
 0x263   :  { %v1831_v16 = vadd.f32 %v1830_v27, %v4988_v63  ;;  %v1832_v12 = vpop.f32.mrb[129].mxu0  ;;  %v2104_v48 = vadd.f32 %v2103_v42, %v4991_v26  ;;  %v2105_v28 = vpop.f32.mrb[129].mxu1 }
 0x264   :  { %v1833_v19 = vadd.f32 %v1832_v12, %v4993_v49  ;;  %v1834_v36 = vpop.f32.mrb[130].mxu0  ;;  %4039 = vmatprep.subr.bf16.mxu0 %v4038_v24  ;;  %v2106_v33 = vadd.f32 %v2105_v28, %v4997_v29  ;;  %v2107_v44 = vpop.f32.mrb[130].mxu1  ;;  %4135 = vmatprep.subr.bf16.mxu1 %v4134_v4 }
 0x265   :  { %v2394_v34 = vmax.f32 %v1831_v16, 0.0  ;;  %v1835_v31 = vadd.f32 %v1834_v36, %v4988_v63  ;;  %v1836_v23 = vpop.f32.mrb[131].mxu0  ;;  %4041 = vmatpush1.bf16.msra.mxu0 %v4040_v0  ;;  %v2396_v32 = vmax.f32 %v2104_v48, 0.0  ;;  %v2108_v46 = vadd.f32 %v2107_v44, %v4991_v26  ;;  %v2109_v45 = vpop.f32.mrb[131].mxu1  ;;  %4137 = vmatpush1.bf16.msra.mxu1 %v4136_v20 }
 0x266   :  { %v2395_v37 = vmax.f32 %v1833_v19, 0.0  ;;  %v1837_v15 = vadd.f32 %v1836_v23, %v4993_v49  ;;  %v2397_v47 = vmax.f32 %v2106_v33, 0.0  ;;  %v2110_v21 = vadd.f32 %v2109_v45, %v4997_v29 }
 0x267   :  { %2778 = vst [vmem:[#allocation10 + $0x420] sm:$0xff] %v2394_v34  ;;  %v2402_v50 = vmax.f32 %v1835_v31, 0.0  ;;  %2780 = vst [vmem:[#allocation10 + $0x430] sm:$0xff] %v2396_v32  ;;  %v2404_v38 = vmax.f32 %v2108_v46, 0.0 }
 0x268   :  { %2779 = vst [vmem:[#allocation10 + $0x428] sm:$0xff] %v2395_v37  ;;  %v2403_v59 = vmax.f32 %v1837_v15, 0.0  ;;  %2781 = vst [vmem:[#allocation10 + $0x438] sm:$0xff] %v2397_v47  ;;  %v2405_v51 = vmax.f32 %v2110_v21, 0.0 }
 0x269   :  { %2786 = vst [vmem:[#allocation10 + $0x460] sm:$0xff] %v2402_v50  ;;  %v4044_v18 = vpack.c.bf16 %v2402_v50, %v2394_v34  ;;  %2788 = vst [vmem:[#allocation10 + $0x470] sm:$0xff] %v2404_v38  ;;  %v4140_v52 = vpack.c.bf16 %v2404_v38, %v2396_v32 }
 0x26a   :  { %2787 = vst [vmem:[#allocation10 + $0x468] sm:$0xff] %v2403_v59  ;;  %v4042_v61 = vpack.c.bf16 %v2403_v59, %v2395_v37  ;;  %v1840_v13 = vpop.f32.mrb[132].mxu0  ;;  %2789 = vst [vmem:[#allocation10 + $0x478] sm:$0xff] %v2405_v51  ;;  %v4138_v53 = vpack.c.bf16 %v2405_v51, %v2397_v47  ;;  %v2113_v22 = vpop.f32.mrb[132].mxu1 }
 0x26b   :  { %v1841_v54 = vadd.f32 %v1840_v13, %v4988_v63  ;;  %v1842_v14 = vpop.f32.mrb[133].mxu0  ;;  %v2114_v57 = vadd.f32 %v2113_v22, %v4991_v26  ;;  %v2115_v55 = vpop.f32.mrb[133].mxu1 }
 0x26c   :  { %v1843_v58 = vadd.f32 %v1842_v14, %v4993_v49  ;;  %v1844_v60 = vpop.f32.mrb[134].mxu0  ;;  %4043 = vmatprep.subr.bf16.mxu0 %v4042_v61  ;;  %v2116_v1 = vadd.f32 %v2115_v55, %v4997_v29  ;;  %v2117_v5 = vpop.f32.mrb[134].mxu1  ;;  %4139 = vmatprep.subr.bf16.mxu1 %v4138_v53 }
 0x26d   :  { %v2410_v17 = vmax.f32 %v1841_v54, 0.0  ;;  %v1845_v41 = vadd.f32 %v1844_v60, %v4988_v63  ;;  %v1846_v39 = vpop.f32.mrb[135].mxu0  ;;  %4045 = vmatpush1.bf16.msra.mxu0 %v4044_v18  ;;  %v2412_v3 = vmax.f32 %v2114_v57, 0.0  ;;  %v2118_v43 = vadd.f32 %v2117_v5, %v4991_v26  ;;  %v2119_v7 = vpop.f32.mrb[135].mxu1  ;;  %4141 = vmatpush1.bf16.msra.mxu1 %v4140_v52 }
 0x26e   :  { %v2411_v40 = vmax.f32 %v1843_v58, 0.0  ;;  %v1847_v35 = vadd.f32 %v1846_v39, %v4993_v49  ;;  %v2413_v30 = vmax.f32 %v2116_v1, 0.0  ;;  %v2120_v8 = vadd.f32 %v2119_v7, %v4997_v29 }
 0x26f   :  { %2794 = vst [vmem:[#allocation10 + $0x4a0] sm:$0xff] %v2410_v17  ;;  %v2418_v62 = vmax.f32 %v1845_v41, 0.0  ;;  %2796 = vst [vmem:[#allocation10 + $0x4b0] sm:$0xff] %v2412_v3  ;;  %v2420_v9 = vmax.f32 %v2118_v43, 0.0 }
 0x270   :  { %2795 = vst [vmem:[#allocation10 + $0x4a8] sm:$0xff] %v2411_v40  ;;  %v2419_v10 = vmax.f32 %v1847_v35, 0.0  ;;  %2797 = vst [vmem:[#allocation10 + $0x4b8] sm:$0xff] %v2413_v30  ;;  %v2421_v2 = vmax.f32 %v2120_v8, 0.0 }
 0x271   :  { %2802 = vst [vmem:[#allocation10 + $0x4e0] sm:$0xff] %v2418_v62  ;;  %v4048_v11 = vpack.c.bf16 %v2418_v62, %v2410_v17  ;;  %2804 = vst [vmem:[#allocation10 + $0x4f0] sm:$0xff] %v2420_v9  ;;  %v4144_v56 = vpack.c.bf16 %v2420_v9, %v2412_v3 }
 0x272   :  { %2803 = vst [vmem:[#allocation10 + $0x4e8] sm:$0xff] %v2419_v10  ;;  %v4046_v0 = vpack.c.bf16 %v2419_v10, %v2411_v40  ;;  %v1850_v6 = vpop.f32.mrb[136].mxu0  ;;  %2805 = vst [vmem:[#allocation10 + $0x4f8] sm:$0xff] %v2421_v2  ;;  %v4142_v20 = vpack.c.bf16 %v2421_v2, %v2413_v30  ;;  %v2123_v27 = vpop.f32.mrb[136].mxu1 }
 0x273   :  { %v1851_v24 = vadd.f32 %v1850_v6, %v4988_v63  ;;  %v1852_v4 = vpop.f32.mrb[137].mxu0  ;;  %v2124_v16 = vadd.f32 %v2123_v27, %v4991_v26  ;;  %v2125_v12 = vpop.f32.mrb[137].mxu1 }
 0x274   :  { %v1853_v42 = vadd.f32 %v1852_v4, %v4993_v49  ;;  %v1854_v48 = vpop.f32.mrb[138].mxu0  ;;  %4047 = vmatprep.subr.bf16.mxu0 %v4046_v0  ;;  %v2126_v28 = vadd.f32 %v2125_v12, %v4997_v29  ;;  %v2127_v34 = vpop.f32.mrb[138].mxu1  ;;  %4143 = vmatprep.subr.bf16.mxu1 %v4142_v20 }
 0x275   :  { %v2426_v19 = vmax.f32 %v1851_v24, 0.0  ;;  %v1855_v36 = vadd.f32 %v1854_v48, %v4988_v63  ;;  %v1856_v33 = vpop.f32.mrb[139].mxu0  ;;  %4049 = vmatpush1.bf16.msra.mxu0 %v4048_v11  ;;  %v2428_v31 = vmax.f32 %v2124_v16, 0.0  ;;  %v2128_v23 = vadd.f32 %v2127_v34, %v4991_v26  ;;  %v2129_v37 = vpop.f32.mrb[139].mxu1  ;;  %4145 = vmatpush1.bf16.msra.mxu1 %v4144_v56 }
 0x276   :  { %v2427_v44 = vmax.f32 %v1853_v42, 0.0  ;;  %v1857_v32 = vadd.f32 %v1856_v33, %v4993_v49  ;;  %v2429_v46 = vmax.f32 %v2126_v28, 0.0  ;;  %v2130_v45 = vadd.f32 %v2129_v37, %v4997_v29 }
 0x277   :  { %2810 = vst [vmem:[#allocation10 + $0x520] sm:$0xff] %v2426_v19  ;;  %v2434_v15 = vmax.f32 %v1855_v36, 0.0  ;;  %2812 = vst [vmem:[#allocation10 + $0x530] sm:$0xff] %v2428_v31  ;;  %v2436_v47 = vmax.f32 %v2128_v23, 0.0 }
 0x278   :  { %2811 = vst [vmem:[#allocation10 + $0x528] sm:$0xff] %v2427_v44  ;;  %v2435_v50 = vmax.f32 %v1857_v32, 0.0  ;;  %2813 = vst [vmem:[#allocation10 + $0x538] sm:$0xff] %v2429_v46  ;;  %v2437_v38 = vmax.f32 %v2130_v45, 0.0 }
 0x279   :  { %2818 = vst [vmem:[#allocation10 + $0x560] sm:$0xff] %v2434_v15  ;;  %v4052_v21 = vpack.c.bf16 %v2434_v15, %v2426_v19  ;;  %2820 = vst [vmem:[#allocation10 + $0x570] sm:$0xff] %v2436_v47  ;;  %v4148_v59 = vpack.c.bf16 %v2436_v47, %v2428_v31 }
 0x27a   :  { %2819 = vst [vmem:[#allocation10 + $0x568] sm:$0xff] %v2435_v50  ;;  %v4050_v18 = vpack.c.bf16 %v2435_v50, %v2427_v44  ;;  %v1860_v51 = vpop.f32.mrb[140].mxu0  ;;  %2821 = vst [vmem:[#allocation10 + $0x578] sm:$0xff] %v2437_v38  ;;  %v4146_v52 = vpack.c.bf16 %v2437_v38, %v2429_v46  ;;  %v2133_v13 = vpop.f32.mrb[140].mxu1 }
 0x27b   :  { %v1861_v61 = vadd.f32 %v1860_v51, %v4988_v63  ;;  %v1862_v53 = vpop.f32.mrb[141].mxu0  ;;  %v2134_v54 = vadd.f32 %v2133_v13, %v4991_v26  ;;  %v2135_v14 = vpop.f32.mrb[141].mxu1 }
 0x27c   :  { %v1863_v22 = vadd.f32 %v1862_v53, %v4993_v49  ;;  %v1864_v57 = vpop.f32.mrb[142].mxu0  ;;  %4051 = vmatprep.subr.bf16.mxu0 %v4050_v18  ;;  %v2136_v55 = vadd.f32 %v2135_v14, %v4997_v29  ;;  %v2137_v17 = vpop.f32.mrb[142].mxu1  ;;  %4147 = vmatprep.subr.bf16.mxu1 %v4146_v52 }
 0x27d   :  { %v2442_v58 = vmax.f32 %v1861_v61, 0.0  ;;  %v1865_v60 = vadd.f32 %v1864_v57, %v4988_v63  ;;  %v1866_v1 = vpop.f32.mrb[143].mxu0  ;;  %4053 = vmatpush1.bf16.msra.mxu0 %v4052_v21  ;;  %v2444_v41 = vmax.f32 %v2134_v54, 0.0  ;;  %v2138_v39 = vadd.f32 %v2137_v17, %v4991_v26  ;;  %v2139_v40 = vpop.f32.mrb[143].mxu1  ;;  %4149 = vmatpush1.bf16.msra.mxu1 %v4148_v59 }
 0x27e   :  { %v2443_v5 = vmax.f32 %v1863_v22, 0.0  ;;  %v1867_v3 = vadd.f32 %v1866_v1, %v4993_v49  ;;  %v2445_v43 = vmax.f32 %v2136_v55, 0.0  ;;  %v2140_v7 = vadd.f32 %v2139_v40, %v4997_v29 }
 0x27f   :  { %2826 = vst [vmem:[#allocation10 + $0x5a0] sm:$0xff] %v2442_v58  ;;  %v2450_v35 = vmax.f32 %v1865_v60, 0.0  ;;  %2828 = vst [vmem:[#allocation10 + $0x5b0] sm:$0xff] %v2444_v41  ;;  %v2452_v30 = vmax.f32 %v2138_v39, 0.0 }
 0x280   :  { %2827 = vst [vmem:[#allocation10 + $0x5a8] sm:$0xff] %v2443_v5  ;;  %v2451_v62 = vmax.f32 %v1867_v3, 0.0  ;;  %2829 = vst [vmem:[#allocation10 + $0x5b8] sm:$0xff] %v2445_v43  ;;  %v2453_v9 = vmax.f32 %v2140_v7, 0.0 }
 0x281   :  { %2834 = vst [vmem:[#allocation10 + $0x5e0] sm:$0xff] %v2450_v35  ;;  %v4056_v8 = vpack.c.bf16 %v2450_v35, %v2442_v58  ;;  %2836 = vst [vmem:[#allocation10 + $0x5f0] sm:$0xff] %v2452_v30  ;;  %v4152_v10 = vpack.c.bf16 %v2452_v30, %v2444_v41 }
 0x282   :  { %2835 = vst [vmem:[#allocation10 + $0x5e8] sm:$0xff] %v2451_v62  ;;  %v4054_v11 = vpack.c.bf16 %v2451_v62, %v2443_v5  ;;  %v1870_v2 = vpop.f32.mrb[144].mxu0  ;;  %2837 = vst [vmem:[#allocation10 + $0x5f8] sm:$0xff] %v2453_v9  ;;  %v4150_v56 = vpack.c.bf16 %v2453_v9, %v2445_v43  ;;  %v2143_v6 = vpop.f32.mrb[144].mxu1 }
 0x283   :  { %v1871_v0 = vadd.f32 %v1870_v2, %v4988_v63  ;;  %v1872_v20 = vpop.f32.mrb[145].mxu0  ;;  %v2144_v24 = vadd.f32 %v2143_v6, %v4991_v26  ;;  %v2145_v4 = vpop.f32.mrb[145].mxu1 }
 0x284   :  { %v1873_v27 = vadd.f32 %v1872_v20, %v4993_v49  ;;  %v1874_v16 = vpop.f32.mrb[146].mxu0  ;;  %4055 = vmatprep.subr.bf16.mxu0 %v4054_v11  ;;  %v2146_v12 = vadd.f32 %v2145_v4, %v4997_v29  ;;  %v2147_v19 = vpop.f32.mrb[146].mxu1  ;;  %4151 = vmatprep.subr.bf16.mxu1 %v4150_v56 }
 0x285   :  { %v2458_v42 = vmax.f32 %v1871_v0, 0.0  ;;  %v1875_v48 = vadd.f32 %v1874_v16, %v4988_v63  ;;  %v1876_v28 = vpop.f32.mrb[147].mxu0  ;;  %4057 = vmatpush1.bf16.msra.mxu0 %v4056_v8  ;;  %v2460_v36 = vmax.f32 %v2144_v24, 0.0  ;;  %v2148_v33 = vadd.f32 %v2147_v19, %v4991_v26  ;;  %v2149_v44 = vpop.f32.mrb[147].mxu1  ;;  %4153 = vmatpush1.bf16.msra.mxu1 %v4152_v10 }
 0x286   :  { %v2459_v34 = vmax.f32 %v1873_v27, 0.0  ;;  %v1877_v31 = vadd.f32 %v1876_v28, %v4993_v49  ;;  %v2461_v23 = vmax.f32 %v2146_v12, 0.0  ;;  %v2150_v37 = vadd.f32 %v2149_v44, %v4997_v29 }
 0x287   :  { %2842 = vst [vmem:[#allocation10 + $0x620] sm:$0xff] %v2458_v42  ;;  %v2466_v32 = vmax.f32 %v1875_v48, 0.0  ;;  %2844 = vst [vmem:[#allocation10 + $0x630] sm:$0xff] %v2460_v36  ;;  %v2468_v46 = vmax.f32 %v2148_v33, 0.0 }
 0x288   :  { %2843 = vst [vmem:[#allocation10 + $0x628] sm:$0xff] %v2459_v34  ;;  %v2467_v15 = vmax.f32 %v1877_v31, 0.0  ;;  %2845 = vst [vmem:[#allocation10 + $0x638] sm:$0xff] %v2461_v23  ;;  %v2469_v47 = vmax.f32 %v2150_v37, 0.0 }
 0x289   :  { %2850 = vst [vmem:[#allocation10 + $0x660] sm:$0xff] %v2466_v32  ;;  %v4060_v45 = vpack.c.bf16 %v2466_v32, %v2458_v42  ;;  %2852 = vst [vmem:[#allocation10 + $0x670] sm:$0xff] %v2468_v46  ;;  %v4156_v50 = vpack.c.bf16 %v2468_v46, %v2460_v36 }
 0x28a   :  { %2851 = vst [vmem:[#allocation10 + $0x668] sm:$0xff] %v2467_v15  ;;  %v4058_v21 = vpack.c.bf16 %v2467_v15, %v2459_v34  ;;  %v1880_v38 = vpop.f32.mrb[148].mxu0  ;;  %2853 = vst [vmem:[#allocation10 + $0x678] sm:$0xff] %v2469_v47  ;;  %v4154_v59 = vpack.c.bf16 %v2469_v47, %v2461_v23  ;;  %v2153_v51 = vpop.f32.mrb[148].mxu1 }
 0x28b   :  { %v1881_v18 = vadd.f32 %v1880_v38, %v4988_v63  ;;  %v1882_v52 = vpop.f32.mrb[149].mxu0  ;;  %v2154_v61 = vadd.f32 %v2153_v51, %v4991_v26  ;;  %v2155_v53 = vpop.f32.mrb[149].mxu1 }
 0x28c   :  { %v1883_v13 = vadd.f32 %v1882_v52, %v4993_v49  ;;  %v1884_v54 = vpop.f32.mrb[150].mxu0  ;;  %4059 = vmatprep.subr.bf16.mxu0 %v4058_v21  ;;  %v2156_v14 = vadd.f32 %v2155_v53, %v4997_v29  ;;  %v2157_v58 = vpop.f32.mrb[150].mxu1  ;;  %4155 = vmatprep.subr.bf16.mxu1 %v4154_v59 }
 0x28d   :  { %v2474_v22 = vmax.f32 %v1881_v18, 0.0  ;;  %v1885_v57 = vadd.f32 %v1884_v54, %v4988_v63  ;;  %v1886_v55 = vpop.f32.mrb[151].mxu0  ;;  %4061 = vmatpush1.bf16.msra.mxu0 %v4060_v45  ;;  %v2476_v60 = vmax.f32 %v2154_v61, 0.0  ;;  %v2158_v1 = vadd.f32 %v2157_v58, %v4991_v26  ;;  %v2159_v5 = vpop.f32.mrb[151].mxu1  ;;  %4157 = vmatpush1.bf16.msra.mxu1 %v4156_v50 }
 0x28e   :  { %v2475_v17 = vmax.f32 %v1883_v13, 0.0  ;;  %v1887_v41 = vadd.f32 %v1886_v55, %v4993_v49  ;;  %v2477_v39 = vmax.f32 %v2156_v14, 0.0  ;;  %v2160_v40 = vadd.f32 %v2159_v5, %v4997_v29 }
 0x28f   :  { %2858 = vst [vmem:[#allocation10 + $0x6a0] sm:$0xff] %v2474_v22  ;;  %v2482_v3 = vmax.f32 %v1885_v57, 0.0  ;;  %2860 = vst [vmem:[#allocation10 + $0x6b0] sm:$0xff] %v2476_v60  ;;  %v2484_v43 = vmax.f32 %v2158_v1, 0.0 }
 0x290   :  { %2859 = vst [vmem:[#allocation10 + $0x6a8] sm:$0xff] %v2475_v17  ;;  %v2483_v35 = vmax.f32 %v1887_v41, 0.0  ;;  %2861 = vst [vmem:[#allocation10 + $0x6b8] sm:$0xff] %v2477_v39  ;;  %v2485_v30 = vmax.f32 %v2160_v40, 0.0 }
 0x291   :  { %2866 = vst [vmem:[#allocation10 + $0x6e0] sm:$0xff] %v2482_v3  ;;  %v4064_v7 = vpack.c.bf16 %v2482_v3, %v2474_v22  ;;  %2868 = vst [vmem:[#allocation10 + $0x6f0] sm:$0xff] %v2484_v43  ;;  %v4160_v62 = vpack.c.bf16 %v2484_v43, %v2476_v60 }
 0x292   :  { %2867 = vst [vmem:[#allocation10 + $0x6e8] sm:$0xff] %v2483_v35  ;;  %v4062_v8 = vpack.c.bf16 %v2483_v35, %v2475_v17  ;;  %v1890_v9 = vpop.f32.mrb[152].mxu0  ;;  %2869 = vst [vmem:[#allocation10 + $0x6f8] sm:$0xff] %v2485_v30  ;;  %v4158_v10 = vpack.c.bf16 %v2485_v30, %v2477_v39  ;;  %v2163_v2 = vpop.f32.mrb[152].mxu1 }
 0x293   :  { %v1891_v11 = vadd.f32 %v1890_v9, %v4988_v63  ;;  %v1892_v56 = vpop.f32.mrb[153].mxu0  ;;  %v2164_v0 = vadd.f32 %v2163_v2, %v4991_v26  ;;  %v2165_v20 = vpop.f32.mrb[153].mxu1 }
 0x294   :  { %v1893_v6 = vadd.f32 %v1892_v56, %v4993_v49  ;;  %v1894_v24 = vpop.f32.mrb[154].mxu0  ;;  %4063 = vmatprep.subr.bf16.mxu0 %v4062_v8  ;;  %v2166_v4 = vadd.f32 %v2165_v20, %v4997_v29  ;;  %v2167_v42 = vpop.f32.mrb[154].mxu1  ;;  %4159 = vmatprep.subr.bf16.mxu1 %v4158_v10 }
 0x295   :  { %v2490_v27 = vmax.f32 %v1891_v11, 0.0  ;;  %v1895_v16 = vadd.f32 %v1894_v24, %v4988_v63  ;;  %v1896_v12 = vpop.f32.mrb[155].mxu0  ;;  %4065 = vmatpush1.bf16.msra.mxu0 %v4064_v7  ;;  %v2492_v48 = vmax.f32 %v2164_v0, 0.0  ;;  %v2168_v28 = vadd.f32 %v2167_v42, %v4991_v26  ;;  %v2169_v34 = vpop.f32.mrb[155].mxu1  ;;  %4161 = vmatpush1.bf16.msra.mxu1 %v4160_v62 }
 0x296   :  { %v2491_v19 = vmax.f32 %v1893_v6, 0.0  ;;  %v1897_v36 = vadd.f32 %v1896_v12, %v4993_v49  ;;  %v2493_v33 = vmax.f32 %v2166_v4, 0.0  ;;  %v2170_v44 = vadd.f32 %v2169_v34, %v4997_v29 }
 0x297   :  { %2874 = vst [vmem:[#allocation10 + $0x720] sm:$0xff] %v2490_v27  ;;  %v2498_v31 = vmax.f32 %v1895_v16, 0.0  ;;  %2876 = vst [vmem:[#allocation10 + $0x730] sm:$0xff] %v2492_v48  ;;  %v2500_v23 = vmax.f32 %v2168_v28, 0.0 }
 0x298   :  { %2875 = vst [vmem:[#allocation10 + $0x728] sm:$0xff] %v2491_v19  ;;  %v2499_v32 = vmax.f32 %v1897_v36, 0.0  ;;  %2877 = vst [vmem:[#allocation10 + $0x738] sm:$0xff] %v2493_v33  ;;  %v2501_v46 = vmax.f32 %v2170_v44, 0.0  ;;  %v4319_v44 = vld [vmem:[#allocation8] sm:$0x3f] }
 0x299   :  { %2882 = vst [vmem:[#allocation10 + $0x760] sm:$0xff] %v2498_v31  ;;  %v4068_v37 = vpack.c.bf16 %v2498_v31, %v2490_v27  ;;  %2884 = vst [vmem:[#allocation10 + $0x770] sm:$0xff] %v2500_v23  ;;  %v4164_v15 = vpack.c.bf16 %v2500_v23, %v2492_v48 }
 0x29a   :  { %2883 = vst [vmem:[#allocation10 + $0x768] sm:$0xff] %v2499_v32  ;;  %v4066_v45 = vpack.c.bf16 %v2499_v32, %v2491_v19  ;;  %v1900_v47 = vpop.f32.mrb[156].mxu0  ;;  %2885 = vst [vmem:[#allocation10 + $0x778] sm:$0xff] %v2501_v46  ;;  %v4162_v50 = vpack.c.bf16 %v2501_v46, %v2493_v33  ;;  %v2173_v38 = vpop.f32.mrb[156].mxu1 }
 0x29b   :  { %v1901_v21 = vadd.f32 %v1900_v47, %v4988_v63  ;;  %v1902_v59 = vpop.f32.mrb[157].mxu0  ;;  %v2174_v18 = vadd.f32 %v2173_v38, %v4991_v26  ;;  %v2175_v52 = vpop.f32.mrb[157].mxu1 }
 0x29c   :  { %v1903_v51 = vadd.f32 %v1902_v59, %v4993_v49  ;;  %v1904_v61 = vpop.f32.mrb[158].mxu0  ;;  %4067 = vmatprep.subr.bf16.mxu0 %v4066_v45  ;;  %v2176_v53 = vadd.f32 %v2175_v52, %v4997_v29  ;;  %v2177_v22 = vpop.f32.mrb[158].mxu1  ;;  %4163 = vmatprep.subr.bf16.mxu1 %v4162_v50 }
 0x29d   :  { %v2506_v13 = vmax.f32 %v1901_v21, 0.0  ;;  %v1905_v54 = vadd.f32 %v1904_v61, %v4988_v63  ;;  %v1906_v14 = vpop.f32.mrb[159].mxu0  ;;  %4069 = vmatpush1.bf16.msra.mxu0 %v4068_v37  ;;  %v2508_v57 = vmax.f32 %v2174_v18, 0.0  ;;  %v2178_v55 = vadd.f32 %v2177_v22, %v4991_v26  ;;  %v2179_v17 = vpop.f32.mrb[159].mxu1  ;;  %4165 = vmatpush1.bf16.msra.mxu1 %v4164_v15 }
 0x29e   :  { %v2507_v58 = vmax.f32 %v1903_v51, 0.0  ;;  %v1907_v60 = vadd.f32 %v1906_v14, %v4993_v49  ;;  %v2509_v1 = vmax.f32 %v2176_v53, 0.0  ;;  %v2180_v5 = vadd.f32 %v2179_v17, %v4997_v29 }
 0x29f   :  { %2890 = vst [vmem:[#allocation10 + $0x7a0] sm:$0xff] %v2506_v13  ;;  %v2514_v41 = vmax.f32 %v1905_v54, 0.0  ;;  %2892 = vst [vmem:[#allocation10 + $0x7b0] sm:$0xff] %v2508_v57  ;;  %v2516_v39 = vmax.f32 %v2178_v55, 0.0 }
 0x2a0   :  { %2891 = vst [vmem:[#allocation10 + $0x7a8] sm:$0xff] %v2507_v58  ;;  %v2515_v3 = vmax.f32 %v1907_v60, 0.0  ;;  %2893 = vst [vmem:[#allocation10 + $0x7b8] sm:$0xff] %v2509_v1  ;;  %v2517_v43 = vmax.f32 %v2180_v5, 0.0 }
 0x2a1   :  { %2898 = vst [vmem:[#allocation10 + $0x7e0] sm:$0xff] %v2514_v41  ;;  %v4072_v40 = vpack.c.bf16 %v2514_v41, %v2506_v13  ;;  %2900 = vst [vmem:[#allocation10 + $0x7f0] sm:$0xff] %v2516_v39  ;;  %v4168_v35 = vpack.c.bf16 %v2516_v39, %v2508_v57 }
 0x2a2   :  { %2899 = vst [vmem:[#allocation10 + $0x7e8] sm:$0xff] %v2515_v3  ;;  %v4070_v7 = vpack.c.bf16 %v2515_v3, %v2507_v58  ;;  %v1910_v30 = vpop.f32.mrb[160].mxu0  ;;  %2901 = vst [vmem:[#allocation10 + $0x7f8] sm:$0xff] %v2517_v43  ;;  %v4166_v62 = vpack.c.bf16 %v2517_v43, %v2509_v1  ;;  %v2183_v9 = vpop.f32.mrb[160].mxu1 }
 0x2a3   :  { %v1911_v8 = vadd.f32 %v1910_v30, %v4988_v63  ;;  %v1912_v10 = vpop.f32.mrb[161].mxu0  ;;  %v2184_v11 = vadd.f32 %v2183_v9, %v4991_v26  ;;  %v2185_v56 = vpop.f32.mrb[161].mxu1 }
 0x2a4   :  { %v1913_v2 = vadd.f32 %v1912_v10, %v4993_v49  ;;  %v1914_v0 = vpop.f32.mrb[162].mxu0  ;;  %4071 = vmatprep.subr.bf16.mxu0 %v4070_v7  ;;  %v2186_v20 = vadd.f32 %v2185_v56, %v4997_v29  ;;  %v2187_v27 = vpop.f32.mrb[162].mxu1  ;;  %4167 = vmatprep.subr.bf16.mxu1 %v4166_v62 }
 0x2a5   :  { %v2522_v6 = vmax.f32 %v1911_v8, 0.0  ;;  %v1915_v24 = vadd.f32 %v1914_v0, %v4988_v63  ;;  %v1916_v4 = vpop.f32.mrb[163].mxu0  ;;  %4073 = vmatpush1.bf16.msra.mxu0 %v4072_v40  ;;  %v2524_v16 = vmax.f32 %v2184_v11, 0.0  ;;  %v2188_v12 = vadd.f32 %v2187_v27, %v4991_v26  ;;  %v2189_v19 = vpop.f32.mrb[163].mxu1  ;;  %4169 = vmatpush1.bf16.msra.mxu1 %v4168_v35 }
 0x2a6   :  { %v2523_v42 = vmax.f32 %v1913_v2, 0.0  ;;  %v1917_v48 = vadd.f32 %v1916_v4, %v4993_v49  ;;  %v2525_v28 = vmax.f32 %v2186_v20, 0.0  ;;  %v2190_v34 = vadd.f32 %v2189_v19, %v4997_v29 }
 0x2a7   :  { %2906 = vst [vmem:[#allocation10 + $0x820] sm:$0xff] %v2522_v6  ;;  %v2530_v36 = vmax.f32 %v1915_v24, 0.0  ;;  %2908 = vst [vmem:[#allocation10 + $0x830] sm:$0xff] %v2524_v16  ;;  %v2532_v33 = vmax.f32 %v2188_v12, 0.0 }
 0x2a8   :  { %2907 = vst [vmem:[#allocation10 + $0x828] sm:$0xff] %v2523_v42  ;;  %v2531_v31 = vmax.f32 %v1917_v48, 0.0  ;;  %3382 = vmatmul.mubr.f32.vlgmr.msra.gmra.mrb[194].mxu0 %v4319_v44  ;;  %2909 = vst [vmem:[#allocation10 + $0x838] sm:$0xff] %v2525_v28  ;;  %v2533_v32 = vmax.f32 %v2190_v34, 0.0  ;;  %3524 = vmatmul.mubr.f32.vlgmr.msra.gmra.mrb[194].mxu1 %v4319_v44 }
 0x2a9   :  { %2914 = vst [vmem:[#allocation10 + $0x860] sm:$0xff] %v2530_v36  ;;  %v4076_v23 = vpack.c.bf16 %v2530_v36, %v2522_v6  ;;  %3452 = vmatprep.mubr.f32.mxu0 %v4471_v25  ;;  %2916 = vst [vmem:[#allocation10 + $0x870] sm:$0xff] %v2532_v33  ;;  %v4172_v37 = vpack.c.bf16 %v2532_v33, %v2524_v16  ;;  %3594 = vmatprep.mubr.f32.mxu1 %v4471_v25 }
 0x2aa   :  { %2915 = vst [vmem:[#allocation10 + $0x868] sm:$0xff] %v2531_v31  ;;  %v4074_v46 = vpack.c.bf16 %v2531_v31, %v2523_v42  ;;  %v1920_v15 = vpop.f32.mrb[164].mxu0  ;;  %2917 = vst [vmem:[#allocation10 + $0x878] sm:$0xff] %v2533_v32  ;;  %v4170_v45 = vpack.c.bf16 %v2533_v32, %v2525_v28  ;;  %v2193_v50 = vpop.f32.mrb[164].mxu1 }
 0x2ab   :  { %v1921_v47 = vadd.f32 %v1920_v15, %v4988_v63  ;;  %v1922_v21 = vpop.f32.mrb[165].mxu0  ;;  %v2194_v38 = vadd.f32 %v2193_v50, %v4991_v26  ;;  %v2195_v18 = vpop.f32.mrb[165].mxu1 }
 0x2ac   :  { %v1923_v59 = vadd.f32 %v1922_v21, %v4993_v49  ;;  %v1924_v51 = vpop.f32.mrb[166].mxu0  ;;  %4075 = vmatprep.subr.bf16.mxu0 %v4074_v46  ;;  %v2196_v61 = vadd.f32 %v2195_v18, %v4997_v29  ;;  %v2197_v53 = vpop.f32.mrb[166].mxu1  ;;  %4171 = vmatprep.subr.bf16.mxu1 %v4170_v45 }
 0x2ad   :  { %v2538_v52 = vmax.f32 %v1921_v47, 0.0  ;;  %v1925_v13 = vadd.f32 %v1924_v51, %v4988_v63  ;;  %v1926_v25 = vpop.f32.mrb[167].mxu0  ;;  %4077 = vmatpush1.bf16.msra.mxu0 %v4076_v23  ;;  %v2540_v54 = vmax.f32 %v2194_v38, 0.0  ;;  %v2198_v14 = vadd.f32 %v2197_v53, %v4991_v26  ;;  %v2199_v58 = vpop.f32.mrb[167].mxu1  ;;  %4173 = vmatpush1.bf16.msra.mxu1 %v4172_v37 }
 0x2ae   :  { %v2539_v22 = vmax.f32 %v1923_v59, 0.0  ;;  %v1927_v57 = vadd.f32 %v1926_v25, %v4993_v49  ;;  %v2541_v55 = vmax.f32 %v2196_v61, 0.0  ;;  %v2200_v17 = vadd.f32 %v2199_v58, %v4997_v29 }
 0x2af   :  { %2922 = vst [vmem:[#allocation10 + $0x8a0] sm:$0xff] %v2538_v52  ;;  %v2546_v60 = vmax.f32 %v1925_v13, 0.0  ;;  %2924 = vst [vmem:[#allocation10 + $0x8b0] sm:$0xff] %v2540_v54  ;;  %v2548_v1 = vmax.f32 %v2198_v14, 0.0 }
 0x2b0   :  { %2923 = vst [vmem:[#allocation10 + $0x8a8] sm:$0xff] %v2539_v22  ;;  %v2547_v41 = vmax.f32 %v1927_v57, 0.0  ;;  %2925 = vst [vmem:[#allocation10 + $0x8b8] sm:$0xff] %v2541_v55  ;;  %v2549_v39 = vmax.f32 %v2200_v17, 0.0 }
 0x2b1   :  { %2930 = vst [vmem:[#allocation10 + $0x8e0] sm:$0xff] %v2546_v60  ;;  %v4080_v5 = vpack.c.bf16 %v2546_v60, %v2538_v52  ;;  %2932 = vst [vmem:[#allocation10 + $0x8f0] sm:$0xff] %v2548_v1  ;;  %v4176_v3 = vpack.c.bf16 %v2548_v1, %v2540_v54 }
 0x2b2   :  { %2931 = vst [vmem:[#allocation10 + $0x8e8] sm:$0xff] %v2547_v41  ;;  %v4078_v40 = vpack.c.bf16 %v2547_v41, %v2539_v22  ;;  %v1930_v43 = vpop.f32.mrb[168].mxu0  ;;  %2933 = vst [vmem:[#allocation10 + $0x8f8] sm:$0xff] %v2549_v39  ;;  %v4174_v35 = vpack.c.bf16 %v2549_v39, %v2541_v55  ;;  %v2203_v30 = vpop.f32.mrb[168].mxu1 }
 0x2b3   :  { %v1931_v7 = vadd.f32 %v1930_v43, %v4988_v63  ;;  %v1932_v62 = vpop.f32.mrb[169].mxu0  ;;  %v2204_v8 = vadd.f32 %v2203_v30, %v4991_v26  ;;  %v2205_v10 = vpop.f32.mrb[169].mxu1 }
 0x2b4   :  { %v1933_v9 = vadd.f32 %v1932_v62, %v4993_v49  ;;  %v1934_v11 = vpop.f32.mrb[170].mxu0  ;;  %4079 = vmatprep.subr.bf16.mxu0 %v4078_v40  ;;  %v2206_v56 = vadd.f32 %v2205_v10, %v4997_v29  ;;  %v2207_v6 = vpop.f32.mrb[170].mxu1  ;;  %4175 = vmatprep.subr.bf16.mxu1 %v4174_v35 }
 0x2b5   :  { %v2554_v2 = vmax.f32 %v1931_v7, 0.0  ;;  %v1935_v0 = vadd.f32 %v1934_v11, %v4988_v63  ;;  %v1936_v20 = vpop.f32.mrb[171].mxu0  ;;  %4081 = vmatpush1.bf16.msra.mxu0 %v4080_v5  ;;  %v2556_v24 = vmax.f32 %v2204_v8, 0.0  ;;  %v2208_v4 = vadd.f32 %v2207_v6, %v4991_v26  ;;  %v2209_v42 = vpop.f32.mrb[171].mxu1  ;;  %4177 = vmatpush1.bf16.msra.mxu1 %v4176_v3 }
 0x2b6   :  { %v2555_v27 = vmax.f32 %v1933_v9, 0.0  ;;  %v1937_v16 = vadd.f32 %v1936_v20, %v4993_v49  ;;  %v2557_v12 = vmax.f32 %v2206_v56, 0.0  ;;  %v2210_v19 = vadd.f32 %v2209_v42, %v4997_v29 }
 0x2b7   :  { %2938 = vst [vmem:[#allocation10 + $0x920] sm:$0xff] %v2554_v2  ;;  %v2562_v48 = vmax.f32 %v1935_v0, 0.0  ;;  %2940 = vst [vmem:[#allocation10 + $0x930] sm:$0xff] %v2556_v24  ;;  %v2564_v28 = vmax.f32 %v2208_v4, 0.0 }
 0x2b8   :  { %2939 = vst [vmem:[#allocation10 + $0x928] sm:$0xff] %v2555_v27  ;;  %v2563_v36 = vmax.f32 %v1937_v16, 0.0  ;;  %2941 = vst [vmem:[#allocation10 + $0x938] sm:$0xff] %v2557_v12  ;;  %v2565_v33 = vmax.f32 %v2210_v19, 0.0 }
 0x2b9   :  { %2946 = vst [vmem:[#allocation10 + $0x960] sm:$0xff] %v2562_v48  ;;  %v4084_v34 = vpack.c.bf16 %v2562_v48, %v2554_v2  ;;  %2948 = vst [vmem:[#allocation10 + $0x970] sm:$0xff] %v2564_v28  ;;  %v4180_v31 = vpack.c.bf16 %v2564_v28, %v2556_v24 }
 0x2ba   :  { %2947 = vst [vmem:[#allocation10 + $0x968] sm:$0xff] %v2563_v36  ;;  %v4082_v44 = vpack.c.bf16 %v2563_v36, %v2555_v27  ;;  %v1940_v23 = vpop.f32.mrb[172].mxu0  ;;  %2949 = vst [vmem:[#allocation10 + $0x978] sm:$0xff] %v2565_v33  ;;  %v4178_v32 = vpack.c.bf16 %v2565_v33, %v2557_v12  ;;  %v2213_v46 = vpop.f32.mrb[172].mxu1 }
 0x2bb   :  { %v1941_v37 = vadd.f32 %v1940_v23, %v4988_v63  ;;  %v1942_v15 = vpop.f32.mrb[173].mxu0  ;;  %v2214_v45 = vadd.f32 %v2213_v46, %v4991_v26  ;;  %v2215_v50 = vpop.f32.mrb[173].mxu1 }
 0x2bc   :  { %v1943_v47 = vadd.f32 %v1942_v15, %v4993_v49  ;;  %v1944_v21 = vpop.f32.mrb[174].mxu0  ;;  %4083 = vmatprep.subr.bf16.mxu0 %v4082_v44  ;;  %v2216_v59 = vadd.f32 %v2215_v50, %v4997_v29  ;;  %v2217_v51 = vpop.f32.mrb[174].mxu1  ;;  %4179 = vmatprep.subr.bf16.mxu1 %v4178_v32 }
 0x2bd   :  { %v2570_v38 = vmax.f32 %v1941_v37, 0.0  ;;  %v1945_v18 = vadd.f32 %v1944_v21, %v4988_v63  ;;  %v1946_v52 = vpop.f32.mrb[175].mxu0  ;;  %4085 = vmatpush1.bf16.msra.mxu0 %v4084_v34  ;;  %v2572_v61 = vmax.f32 %v2214_v45, 0.0  ;;  %v2218_v53 = vadd.f32 %v2217_v51, %v4991_v26  ;;  %v2219_v54 = vpop.f32.mrb[175].mxu1  ;;  %4181 = vmatpush1.bf16.msra.mxu1 %v4180_v31 }
 0x2be   :  { %v2571_v13 = vmax.f32 %v1943_v47, 0.0  ;;  %v1947_v25 = vadd.f32 %v1946_v52, %v4993_v49  ;;  %v2573_v22 = vmax.f32 %v2216_v59, 0.0  ;;  %v2220_v57 = vadd.f32 %v2219_v54, %v4997_v29 }
 0x2bf   :  { %2954 = vst [vmem:[#allocation10 + $0x9a0] sm:$0xff] %v2570_v38  ;;  %v2578_v14 = vmax.f32 %v1945_v18, 0.0  ;;  %2956 = vst [vmem:[#allocation10 + $0x9b0] sm:$0xff] %v2572_v61  ;;  %v2580_v58 = vmax.f32 %v2218_v53, 0.0 }
 0x2c0   :  { %2955 = vst [vmem:[#allocation10 + $0x9a8] sm:$0xff] %v2571_v13  ;;  %v2579_v55 = vmax.f32 %v1947_v25, 0.0  ;;  %2957 = vst [vmem:[#allocation10 + $0x9b8] sm:$0xff] %v2573_v22  ;;  %v2581_v17 = vmax.f32 %v2220_v57, 0.0 }
 0x2c1   :  { %2962 = vst [vmem:[#allocation10 + $0x9e0] sm:$0xff] %v2578_v14  ;;  %v4088_v60 = vpack.c.bf16 %v2578_v14, %v2570_v38  ;;  %2964 = vst [vmem:[#allocation10 + $0x9f0] sm:$0xff] %v2580_v58  ;;  %v4184_v1 = vpack.c.bf16 %v2580_v58, %v2572_v61 }
 0x2c2   :  { %2963 = vst [vmem:[#allocation10 + $0x9e8] sm:$0xff] %v2579_v55  ;;  %v4086_v41 = vpack.c.bf16 %v2579_v55, %v2571_v13  ;;  %v1950_v5 = vpop.f32.mrb[176].mxu0  ;;  %2965 = vst [vmem:[#allocation10 + $0x9f8] sm:$0xff] %v2581_v17  ;;  %v4182_v39 = vpack.c.bf16 %v2581_v17, %v2573_v22  ;;  %v2223_v40 = vpop.f32.mrb[176].mxu1 }
 0x2c3   :  { %v1951_v3 = vadd.f32 %v1950_v5, %v4988_v63  ;;  %v1952_v43 = vpop.f32.mrb[177].mxu0  ;;  %v2224_v35 = vadd.f32 %v2223_v40, %v4991_v26  ;;  %v2225_v30 = vpop.f32.mrb[177].mxu1 }
 0x2c4   :  { %v1953_v7 = vadd.f32 %v1952_v43, %v4993_v49  ;;  %v1954_v62 = vpop.f32.mrb[178].mxu0  ;;  %4087 = vmatprep.subr.bf16.mxu0 %v4086_v41  ;;  %v2226_v9 = vadd.f32 %v2225_v30, %v4997_v29  ;;  %v2227_v11 = vpop.f32.mrb[178].mxu1  ;;  %4183 = vmatprep.subr.bf16.mxu1 %v4182_v39 }
 0x2c5   :  { %v2586_v8 = vmax.f32 %v1951_v3, 0.0  ;;  %v1955_v10 = vadd.f32 %v1954_v62, %v4988_v63  ;;  %v1956_v2 = vpop.f32.mrb[179].mxu0  ;;  %4089 = vmatpush1.bf16.msra.mxu0 %v4088_v60  ;;  %v2588_v56 = vmax.f32 %v2224_v35, 0.0  ;;  %v2228_v6 = vadd.f32 %v2227_v11, %v4991_v26  ;;  %v2229_v24 = vpop.f32.mrb[179].mxu1  ;;  %4185 = vmatpush1.bf16.msra.mxu1 %v4184_v1 }
 0x2c6   :  { %v2587_v0 = vmax.f32 %v1953_v7, 0.0  ;;  %v1957_v20 = vadd.f32 %v1956_v2, %v4993_v49  ;;  %v2589_v27 = vmax.f32 %v2226_v9, 0.0  ;;  %v2230_v16 = vadd.f32 %v2229_v24, %v4997_v29 }
 0x2c7   :  { %2970 = vst [vmem:[#allocation10 + $0xa20] sm:$0xff] %v2586_v8  ;;  %v2594_v4 = vmax.f32 %v1955_v10, 0.0  ;;  %2972 = vst [vmem:[#allocation10 + $0xa30] sm:$0xff] %v2588_v56  ;;  %v2596_v42 = vmax.f32 %v2228_v6, 0.0 }
 0x2c8   :  { %2971 = vst [vmem:[#allocation10 + $0xa28] sm:$0xff] %v2587_v0  ;;  %v2595_v12 = vmax.f32 %v1957_v20, 0.0  ;;  %2973 = vst [vmem:[#allocation10 + $0xa38] sm:$0xff] %v2589_v27  ;;  %v2597_v19 = vmax.f32 %v2230_v16, 0.0 }
 0x2c9   :  { %2978 = vst [vmem:[#allocation10 + $0xa60] sm:$0xff] %v2594_v4  ;;  %v4092_v48 = vpack.c.bf16 %v2594_v4, %v2586_v8  ;;  %2980 = vst [vmem:[#allocation10 + $0xa70] sm:$0xff] %v2596_v42  ;;  %v4188_v28 = vpack.c.bf16 %v2596_v42, %v2588_v56 }
 0x2ca   :  { %2979 = vst [vmem:[#allocation10 + $0xa68] sm:$0xff] %v2595_v12  ;;  %v4090_v36 = vpack.c.bf16 %v2595_v12, %v2587_v0  ;;  %v1960_v34 = vpop.f32.mrb[180].mxu0  ;;  %2981 = vst [vmem:[#allocation10 + $0xa78] sm:$0xff] %v2597_v19  ;;  %v4186_v33 = vpack.c.bf16 %v2597_v19, %v2589_v27  ;;  %v2233_v44 = vpop.f32.mrb[180].mxu1 }
 0x2cb   :  { %v1961_v31 = vadd.f32 %v1960_v34, %v4988_v63  ;;  %v1962_v23 = vpop.f32.mrb[181].mxu0  ;;  %v2234_v32 = vadd.f32 %v2233_v44, %v4991_v26  ;;  %v2235_v46 = vpop.f32.mrb[181].mxu1 }
 0x2cc   :  { %v1963_v37 = vadd.f32 %v1962_v23, %v4993_v49  ;;  %v1964_v15 = vpop.f32.mrb[182].mxu0  ;;  %4091 = vmatprep.subr.bf16.mxu0 %v4090_v36  ;;  %v2236_v47 = vadd.f32 %v2235_v46, %v4997_v29  ;;  %v2237_v21 = vpop.f32.mrb[182].mxu1  ;;  %4187 = vmatprep.subr.bf16.mxu1 %v4186_v33 }
 0x2cd   :  { %v2602_v45 = vmax.f32 %v1961_v31, 0.0  ;;  %v1965_v50 = vadd.f32 %v1964_v15, %v4988_v63  ;;  %v1966_v38 = vpop.f32.mrb[183].mxu0  ;;  %4093 = vmatpush1.bf16.msra.mxu0 %v4092_v48  ;;  %v2604_v59 = vmax.f32 %v2234_v32, 0.0  ;;  %v2238_v51 = vadd.f32 %v2237_v21, %v4991_v26  ;;  %v2239_v61 = vpop.f32.mrb[183].mxu1  ;;  %4189 = vmatpush1.bf16.msra.mxu1 %v4188_v28 }
 0x2ce   :  { %v2603_v18 = vmax.f32 %v1963_v37, 0.0  ;;  %v1967_v52 = vadd.f32 %v1966_v38, %v4993_v49  ;;  %v2605_v13 = vmax.f32 %v2236_v47, 0.0  ;;  %v2240_v25 = vadd.f32 %v2239_v61, %v4997_v29 }
 0x2cf   :  { %2986 = vst [vmem:[#allocation10 + $0xaa0] sm:$0xff] %v2602_v45  ;;  %v2610_v53 = vmax.f32 %v1965_v50, 0.0  ;;  %2988 = vst [vmem:[#allocation10 + $0xab0] sm:$0xff] %v2604_v59  ;;  %v2612_v54 = vmax.f32 %v2238_v51, 0.0 }
 0x2d0   :  { %2987 = vst [vmem:[#allocation10 + $0xaa8] sm:$0xff] %v2603_v18  ;;  %v2611_v22 = vmax.f32 %v1967_v52, 0.0  ;;  %2989 = vst [vmem:[#allocation10 + $0xab8] sm:$0xff] %v2605_v13  ;;  %v2613_v57 = vmax.f32 %v2240_v25, 0.0 }
 0x2d1   :  { %2994 = vst [vmem:[#allocation10 + $0xae0] sm:$0xff] %v2610_v53  ;;  %v4096_v14 = vpack.c.bf16 %v2610_v53, %v2602_v45  ;;  %2996 = vst [vmem:[#allocation10 + $0xaf0] sm:$0xff] %v2612_v54  ;;  %v4192_v58 = vpack.c.bf16 %v2612_v54, %v2604_v59  ;;  %v4320_v54 = vld [vmem:[#allocation8 + $0x10] sm:$0x3f] }
 0x2d2   :  { %2995 = vst [vmem:[#allocation10 + $0xae8] sm:$0xff] %v2611_v22  ;;  %v4094_v55 = vpack.c.bf16 %v2611_v22, %v2603_v18  ;;  %v1970_v60 = vpop.f32.mrb[184].mxu0  ;;  %2997 = vst [vmem:[#allocation10 + $0xaf8] sm:$0xff] %v2613_v57  ;;  %v4190_v17 = vpack.c.bf16 %v2613_v57, %v2605_v13  ;;  %v2243_v41 = vpop.f32.mrb[184].mxu1 }
 0x2d3   :  { %v1971_v1 = vadd.f32 %v1970_v60, %v4988_v63  ;;  %v1972_v5 = vpop.f32.mrb[185].mxu0  ;;  %v2244_v39 = vadd.f32 %v2243_v41, %v4991_v26  ;;  %v2245_v40 = vpop.f32.mrb[185].mxu1 }
 0x2d4   :  { %v1973_v3 = vadd.f32 %v1972_v5, %v4993_v49  ;;  %v1974_v43 = vpop.f32.mrb[186].mxu0  ;;  %4095 = vmatprep.subr.bf16.mxu0 %v4094_v55  ;;  %v2246_v7 = vadd.f32 %v2245_v40, %v4997_v29  ;;  %v2247_v62 = vpop.f32.mrb[186].mxu1  ;;  %4191 = vmatprep.subr.bf16.mxu1 %v4190_v17 }
 0x2d5   :  { %v2618_v35 = vmax.f32 %v1971_v1, 0.0  ;;  %v1975_v30 = vadd.f32 %v1974_v43, %v4988_v63  ;;  %v1976_v8 = vpop.f32.mrb[187].mxu0  ;;  %4097 = vmatpush1.bf16.msra.mxu0 %v4096_v14  ;;  %v2620_v9 = vmax.f32 %v2244_v39, 0.0  ;;  %v2248_v11 = vadd.f32 %v2247_v62, %v4991_v26  ;;  %v2249_v56 = vpop.f32.mrb[187].mxu1  ;;  %4193 = vmatpush1.bf16.msra.mxu1 %v4192_v58 }
 0x2d6   :  { %v2619_v10 = vmax.f32 %v1973_v3, 0.0  ;;  %v1977_v2 = vadd.f32 %v1976_v8, %v4993_v49  ;;  %v2621_v0 = vmax.f32 %v2246_v7, 0.0  ;;  %v2250_v20 = vadd.f32 %v2249_v56, %v4997_v29 }
 0x2d7   :  { %3002 = vst [vmem:[#allocation10 + $0xb20] sm:$0xff] %v2618_v35  ;;  %v2626_v6 = vmax.f32 %v1975_v30, 0.0  ;;  %3004 = vst [vmem:[#allocation10 + $0xb30] sm:$0xff] %v2620_v9  ;;  %v2628_v24 = vmax.f32 %v2248_v11, 0.0 }
 0x2d8   :  { %3003 = vst [vmem:[#allocation10 + $0xb28] sm:$0xff] %v2619_v10  ;;  %v2627_v27 = vmax.f32 %v1977_v2, 0.0  ;;  %3005 = vst [vmem:[#allocation10 + $0xb38] sm:$0xff] %v2621_v0  ;;  %v2629_v16 = vmax.f32 %v2250_v20, 0.0 }
 0x2d9   :  { %3010 = vst [vmem:[#allocation10 + $0xb60] sm:$0xff] %v2626_v6  ;;  %v4100_v4 = vpack.c.bf16 %v2626_v6, %v2618_v35  ;;  %3012 = vst [vmem:[#allocation10 + $0xb70] sm:$0xff] %v2628_v24  ;;  %v4196_v42 = vpack.c.bf16 %v2628_v24, %v2620_v9 }
 0x2da   :  { %3011 = vst [vmem:[#allocation10 + $0xb68] sm:$0xff] %v2627_v27  ;;  %v4098_v12 = vpack.c.bf16 %v2627_v27, %v2619_v10  ;;  %v1980_v48 = vpop.f32.mrb[188].mxu0  ;;  %3013 = vst [vmem:[#allocation10 + $0xb78] sm:$0xff] %v2629_v16  ;;  %v4194_v19 = vpack.c.bf16 %v2629_v16, %v2621_v0  ;;  %v2253_v36 = vpop.f32.mrb[188].mxu1 }
 0x2db   :  { %v1981_v28 = vadd.f32 %v1980_v48, %v4988_v63  ;;  %v1982_v34 = vpop.f32.mrb[189].mxu0  ;;  %v2254_v33 = vadd.f32 %v2253_v36, %v4991_v26  ;;  %v2255_v44 = vpop.f32.mrb[189].mxu1 }
 0x2dc   :  { %v1983_v31 = vadd.f32 %v1982_v34, %v4993_v49  ;;  %v1984_v23 = vpop.f32.mrb[190].mxu0  ;;  %4099 = vmatprep.subr.bf16.mxu0 %v4098_v12  ;;  %v2256_v37 = vadd.f32 %v2255_v44, %v4997_v29  ;;  %v2257_v15 = vpop.f32.mrb[190].mxu1  ;;  %4195 = vmatprep.subr.bf16.mxu1 %v4194_v19 }
 0x2dd   :  { %v2634_v32 = vmax.f32 %v1981_v28, 0.0  ;;  %v1985_v46 = vadd.f32 %v1984_v23, %v4988_v63  ;;  %v1986_v45 = vpop.f32.mrb[191].mxu0  ;;  %4101 = vmatpush1.bf16.msra.mxu0 %v4100_v4  ;;  %v2636_v47 = vmax.f32 %v2254_v33, 0.0  ;;  %v2258_v21 = vadd.f32 %v2257_v15, %v4991_v26  ;;  %v2259_v59 = vpop.f32.mrb[191].mxu1  ;;  %4197 = vmatpush1.bf16.msra.mxu1 %v4196_v42 }
 0x2de   :  { %v2635_v50 = vmax.f32 %v1983_v31, 0.0  ;;  %v1987_v38 = vadd.f32 %v1986_v45, %v4993_v49  ;;  %v2637_v18 = vmax.f32 %v2256_v37, 0.0  ;;  %v2260_v52 = vadd.f32 %v2259_v59, %v4997_v29 }
 0x2df   :  { %3018 = vst [vmem:[#allocation10 + $0xba0] sm:$0xff] %v2634_v32  ;;  %v2642_v51 = vmax.f32 %v1985_v46, 0.0  ;;  %3020 = vst [vmem:[#allocation10 + $0xbb0] sm:$0xff] %v2636_v47  ;;  %v2644_v63 = vmax.f32 %v2258_v21, 0.0 }
 0x2e0   :  { %3019 = vst [vmem:[#allocation10 + $0xba8] sm:$0xff] %v2635_v50  ;;  %v2643_v61 = vmax.f32 %v1987_v38, 0.0  ;;  %3021 = vst [vmem:[#allocation10 + $0xbb8] sm:$0xff] %v2637_v18  ;;  %v2645_v53 = vmax.f32 %v2260_v52, 0.0 }
 0x2e1   :  { %3026 = vst [vmem:[#allocation10 + $0xbe0] sm:$0xff] %v2642_v51  ;;  %v4104_v13 = vpack.c.bf16 %v2642_v51, %v2634_v32  ;;  %3028 = vst [vmem:[#allocation10 + $0xbf0] sm:$0xff] %v2644_v63  ;;  %v4200_v25 = vpack.c.bf16 %v2644_v63, %v2636_v47 }
 0x2e2   :  { %3027 = vst [vmem:[#allocation10 + $0xbe8] sm:$0xff] %v2643_v61  ;;  %v4102_v26 = vpack.c.bf16 %v2643_v61, %v2635_v50  ;;  %3029 = vst [vmem:[#allocation10 + $0xbf8] sm:$0xff] %v2645_v53  ;;  %v4198_v49 = vpack.c.bf16 %v2645_v53, %v2637_v18 }
 0x2e4   :  { %4103 = vmatprep.subr.bf16.mxu0 %v4102_v26  ;;  %4199 = vmatprep.subr.bf16.mxu1 %v4198_v49 }
 0x2e5   :  { %4105 = vmatpush1.bf16.msra.mxu0 %v4104_v13  ;;  %4201 = vmatpush1.bf16.msra.mxu1 %v4200_v25 }
 0x2e8   :  { %3453 = vmatmul.mubr.f32.vlgmr.msra.gmra.mrb[194].mxu0 %v4320_v54  ;;  %3595 = vmatmul.mubr.f32.vlgmr.msra.gmra.mrb[194].mxu1 %v4320_v54 }
 0x302   :  { %v3170_v29 = vpop.f32.mrb[192].mxu0  ;;  %v3312_v22 = vpop.f32.mrb[192].mxu1 }
 0x303   :  { %3601 = vst [vmem:[#allocation11] sm:$0x3f] %v3170_v29  ;;  %v3172_v14 = vpop.f32.mrb[193].mxu0  ;;  %3603 = vst [vmem:[#allocation11 + $0x10] sm:$0x3f] %v3312_v22  ;;  %v3314_v57 = vpop.f32.mrb[193].mxu1 }
 0x304   :  { %3602 = vst [vmem:[#allocation11 + $0x8] sm:$0x3f] %v3172_v14  ;;  %3604 = vst [vmem:[#allocation11 + $0x18] sm:$0x3f] %v3314_v57 }
 0x305   :  { %4420 = shalt.err (!%p4417_p8)
}
 0x306   :  { %s4421_s20 = scalar_lea.hbm %s5230_s4, 49152 }
 0x307   :  { %p4422_p9 = scmp.ne.s32.totalorder %s5230_s4, %s4421_s20  ;;  %p4425_p10 = scmp.lt.u32.totalorder %s4421_s20, %s5230_s4 }
 0x309   :  { %p4427_p11 = pnand %p4425_p10, %p4422_p9 }
 0x30b   :  { %4430 = shalt.err (!%p4427_p11)
}
 0x30c   :  { %s4473_s25 = smov 1024   ;;  %s4474_s26 = smov 64  }
 0x30d   :  { %3620 = dma.vmem_to_hbm [thread:$0]  %s3615_s1, 49152, %s5230_s4, [#allocation4], %s4473_s25, %s4473_s25, %s4474_s26  }
 0x30e   :  { %s4475_s29 = smov [#allocation11]  }
 0x30f   :  { %s3627_s30 = sshll.u32 %s4475_s29, 4  ;;  %s3628_s30 = int_to_ptr.vmem [resolvable:$true] %s3627_s30 }
 0x310   :  { %s4431_s0 = scalar_lea.vmem %s3628_s30, 1024  ;;  %p4436_p13 = scmp.lt.s32.totalorder %s3628_s30, %s3628_s30 }
 0x311   :  { %p4432_p12 = scmp.ne.s32.totalorder %s3628_s30, %s4431_s0  ;;  %p4437_p0 = scmp.lt.s32.totalorder %s4431_s0, %s4431_s0 }
 0x313   :  { %p4438_p1 = por %p4437_p0, %p4436_p13 }
 0x315   :  { %p4439_p2 = pnand %p4438_p1, %p4432_p12 }
 0x3bb   :  { %v3454_v58 = vpop.f32.mrb[194].mxu0  ;;  %v3596_v55 = vpop.f32.mrb[194].mxu1 }
 0x3bc   :  { %3605 = vst [vmem:[#allocation11 + $0x20] sm:$0x3f] %v3454_v58  ;;  %v3456_v60 = vpop.f32.mrb[195].mxu0  ;;  %3607 = vst [vmem:[#allocation11 + $0x30] sm:$0x3f] %v3596_v55  ;;  %v3598_v17 = vpop.f32.mrb[195].mxu1 }
 0x3bd   :  { %3606 = vst [vmem:[#allocation11 + $0x28] sm:$0x3f] %v3456_v60  ;;  %3608 = vst [vmem:[#allocation11 + $0x38] sm:$0x3f] %v3598_v17 }
 0x3be   :  { %4442 = shalt.err (!%p4439_p2)
}
 0x3bf   :  { %s4443_s7 = scalar_lea.hbm %s5231_s5, 1024 }
 0x3c0   :  { %p4444_p3 = scmp.ne.s32.totalorder %s5231_s5, %s4443_s7  ;;  %p4447_p4 = scmp.lt.u32.totalorder %s4443_s7, %s5231_s5 }
 0x3c2   :  { %p4449_p5 = pnand %p4447_p4, %p4444_p3 }
 0x3c4   :  { %4452 = shalt.err (!%p4449_p5)
}
 0x3c5   :  { %3630 = dma.vmem_to_hbm [thread:$0]  %s3628_s30, 1024, %s5231_s5, [#allocation12]  }
 0x3c6   :  { %4459 = dma.done.wait [#allocation4], 49152  }
 0x3c7   :  { %4460 = vsyncadd [#allocation4], 4294918144 }
 0x3c8   :  { %4461 = dma.done.wait [#allocation12], 1024  }
 0x3c9   :  { %4462 = vsyncadd [#allocation12], 4294966272 }
 0x3ca   :  { %3637 = vsyncpa [#allocation3], 1 }
 0x3cb   :  { %3638 = vsyncpa [#allocation6], 1 }
 0x3cc   :  { %3639 = vsyncpa [#allocation9], 1 }
 0x3cd   :  { %3640 = vsyncpa [#allocation4], 1 }
 0x3ce   :  { %3641 = vsyncpa [#allocation12], 1 }

// kernel: ufe_forward.7
= control target key start
LH: loop header
LB: loop body
LE: loop exit
PB: predicated region body
PF: predicated region fallthrough
CT: control target
= control target key end

     0   :  { %vm158_vm0 = vcmask 1045504   ;;  %vm314_vm1 = vcmask 72704   ;;  %vm1018_vm6 = vcmask 70656   ;;  %s2670_s0 = inlined_call_operand.vmem [shape: f32[6,1024], index: 0, kind: input, shape index: {}]   ;;  %s2671_s1 = inlined_call_operand.vmem [shape: f32[1024,9], index: 1, kind: input, shape index: {}]   ;;  %s2672_s2 = inlined_call_operand.vmem [shape: s32[6,1], index: 2, kind: input, shape index: {}]   ;;  %s2673_s3 = inlined_call_operand.vmem [shape: f32[6,9], index: 3, kind: output, shape index: {}]  }
   0x1   :  { %v14_v0 = vld [vmem:[%s2670_s0] sm:$0x3f]  ;;  %v1358_v1 = vld [vmem:[%s2670_s0 + $0x8] sm:$0x3f]  ;;  %v16_v2 = vld [vmem:[%s2670_s0 + $0x10] sm:$0x3f] }
   0x2   :  { %v1366_v3 = vld [vmem:[%s2670_s0 + $0x18] sm:$0x3f]  ;;  %v18_v4 = vld [vmem:[%s2670_s0 + $0x20] sm:$0x3f]  ;;  %v150_v5 = vmul.f32 %v14_v0, %v14_v0  ;;  %v151_v6 = vmul.f32 %v1358_v1, %v1358_v1  ;;  %v152_v7 = vmul.f32 %v16_v2, %v16_v2  ;;  %v19_v8 = vld [vmem:[%s2670_s0 + $0x28] sm:$0x3f] }
   0x3   :  { %v153_v9 = vmul.f32 %v1366_v3, %v1366_v3  ;;  %v154_v10 = vmul.f32 %v18_v4, %v18_v4  ;;  %v20_v13 = vld [vmem:[%s2670_s0 + $0x30] sm:$0x3f]  ;;  %v155_v16 = vmul.f32 %v19_v8, %v19_v8  ;;  %v21_v18 = vld [vmem:[%s2670_s0 + $0x38] sm:$0x3f]  ;;  %v22_v27 = vld [vmem:[%s2671_s1] sm:$0xff] }
   0x4   :  { %v159_v11 = vsel %vm158_vm0, %v150_v5, 0.0  ;;  %v160_v12 = vsel %vm158_vm0, %v151_v6, 0.0  ;;  %v162_v15 = vsel %vm158_vm0, %v152_v7, 0.0  ;;  %v156_v20 = vmul.f32 %v20_v13, %v20_v13  ;;  %v23_v29 = vld [vmem:[%s2671_s1 + $0x8] sm:$0xff]  ;;  %v24_v32 = vld [vmem:[%s2671_s1 + $0x10] sm:$0xff]  ;;  %v25_v36 = vld [vmem:[%s2671_s1 + $0x18] sm:$0xff] }
   0x5   :  { %v161_v14 = vadd.f32 %v160_v12, %v159_v11  ;;  %v164_v17 = vsel %vm158_vm0, %v153_v9, 0.0  ;;  %v166_v21 = vsel %vm158_vm0, %v154_v10, 0.0  ;;  %v157_v23 = vmul.f32 %v21_v18, %v21_v18  ;;  %v26_v38 = vld [vmem:[%s2671_s1 + $0x20] sm:$0xff]  ;;  %v27_v42 = vld [vmem:[%s2671_s1 + $0x28] sm:$0xff]  ;;  %v28_v46 = vld [vmem:[%s2671_s1 + $0x30] sm:$0xff] }
   0x6   :  { %v168_v24 = vsel %vm158_vm0, %v155_v16, 0.0  ;;  %v170_v26 = vsel %vm158_vm0, %v156_v20, 0.0  ;;  %v186_v33 = vmul.f32 %v22_v27, %v22_v27  ;;  %v187_v34 = vmul.f32 %v23_v29, %v23_v29  ;;  %v29_v50 = vld [vmem:[%s2671_s1 + $0x38] sm:$0xff]  ;;  %v30_v54 = vld [vmem:[%s2671_s1 + $0x40] sm:$0xff]  ;;  %v31_v58 = vld [vmem:[%s2671_s1 + $0x48] sm:$0xff] }
   0x7   :  { %v163_v19 = vadd.f32 %v162_v15, %v161_v14  ;;  %v172_v30 = vsel %vm158_vm0, %v157_v23, 0.0  ;;  %v188_v37 = vmul.f32 %v24_v32, %v24_v32  ;;  %v189_v40 = vmul.f32 %v25_v36, %v25_v36  ;;  %v32_v62 = vld [vmem:[%s2671_s1 + $0x50] sm:$0xff]  ;;  %v33_v4 = vld [vmem:[%s2671_s1 + $0x58] sm:$0xff]  ;;  %v34_v8 = vld [vmem:[%s2671_s1 + $0x60] sm:$0xff] }
   0x8   :  { %v315_v39 = vsel %vm314_vm1, %v186_v33, 0.0  ;;  %v316_v41 = vsel %vm314_vm1, %v187_v34, 0.0  ;;  %v190_v44 = vmul.f32 %v26_v38, %v26_v38  ;;  %v191_v48 = vmul.f32 %v27_v42, %v27_v42  ;;  %v35_v12 = vld [vmem:[%s2671_s1 + $0x68] sm:$0xff]  ;;  %v36_v16 = vld [vmem:[%s2671_s1 + $0x70] sm:$0xff]  ;;  %v37_v18 = vld [vmem:[%s2671_s1 + $0x78] sm:$0xff] }
   0x9   :  { %v165_v22 = vadd.f32 %v164_v17, %v163_v19  ;;  %v317_v43 = vadd.f32 %v316_v41, %v315_v39  ;;  %v318_v45 = vsel %vm314_vm1, %v188_v37, 0.0  ;;  %v320_v49 = vsel %vm314_vm1, %v189_v40, 0.0  ;;  %v1477_v34 = vld [vmem:[%s2671_s1 + $0x98] sm:$0xff]  ;;  %v1486_v39 = vld [vmem:[%s2671_s1 + $0xa0] sm:$0xff] }
   0xa   :  { %v192_v52 = vmul.f32 %v28_v46, %v28_v46  ;;  %v322_v53 = vsel %vm314_vm1, %v190_v44, 0.0  ;;  %v193_v56 = vmul.f32 %v29_v50, %v29_v50  ;;  %v324_v57 = vsel %vm314_vm1, %v191_v48, 0.0 }
   0xb   :  { %v167_v25 = vadd.f32 %v166_v21, %v165_v22  ;;  %v319_v47 = vadd.f32 %v318_v45, %v317_v43  ;;  %v194_v60 = vmul.f32 %v30_v54, %v30_v54  ;;  %v195_v0 = vmul.f32 %v31_v58, %v31_v58  ;;  %v1455_v21 = vld [vmem:[%s2671_s1 + $0x80] sm:$0xff]  ;;  %v1494_v43 = vld [vmem:[%s2671_s1 + $0xa8] sm:$0xff] }
   0xc   :  { %v326_v61 = vsel %vm314_vm1, %v192_v52, 0.0  ;;  %v328_v2 = vsel %vm314_vm1, %v193_v56, 0.0  ;;  %v196_v6 = vmul.f32 %v32_v62, %v32_v62  ;;  %v197_v10 = vmul.f32 %v33_v4, %v33_v4 }
   0xd   :  { %v169_v28 = vadd.f32 %v168_v24, %v167_v25  ;;  %v321_v51 = vadd.f32 %v320_v49, %v319_v47  ;;  %v330_v7 = vsel %vm314_vm1, %v194_v60, 0.0  ;;  %v332_v11 = vsel %vm314_vm1, %v195_v0, 0.0  ;;  %v1461_v25 = vld [vmem:[%s2671_s1 + $0x88] sm:$0xff]  ;;  %v1502_v47 = vld [vmem:[%s2671_s1 + $0xb0] sm:$0xff] }
   0xe   :  { %v198_v14 = vmul.f32 %v34_v8, %v34_v8  ;;  %v334_v15 = vsel %vm314_vm1, %v196_v6, 0.0  ;;  %v199_v19 = vmul.f32 %v35_v12, %v35_v12  ;;  %v336_v20 = vsel %vm314_vm1, %v197_v10, 0.0 }
   0xf   :  { %v171_v31 = vadd.f32 %v170_v26, %v169_v28  ;;  %v323_v55 = vadd.f32 %v322_v53, %v321_v51  ;;  %v200_v23 = vmul.f32 %v36_v16, %v36_v16  ;;  %v201_v26 = vmul.f32 %v37_v18, %v37_v18  ;;  %v1510_v51 = vld [vmem:[%s2671_s1 + $0xb8] sm:$0xff] }
  0x10   :  { %v338_v24 = vsel %vm314_vm1, %v198_v14, 0.0  ;;  %v202_v28 = vmul.f32 %v1455_v21, %v1455_v21  ;;  %v340_v29 = vsel %vm314_vm1, %v199_v19, 0.0  ;;  %v203_v32 = vmul.f32 %v1461_v25, %v1461_v25 }
  0x11   :  { %v173_v35 = vadd.f32 %v172_v30, %v171_v31  ;;  %v325_v59 = vadd.f32 %v324_v57, %v323_v55  ;;  %v1469_v30 = vld [vmem:[%s2671_s1 + $0x90] sm:$0xff]  ;;  %v342_v33 = vsel %vm314_vm1, %v200_v23, 0.0  ;;  %v344_v36 = vsel %vm314_vm1, %v201_v26, 0.0  ;;  %v1518_v55 = vld [vmem:[%s2671_s1 + $0xc0] sm:$0xff] }
  0x12   :  { %v204_v37 = vmul.f32 %v1469_v30, %v1469_v30  ;;  %v346_v38 = vsel %vm314_vm1, %v202_v28, 0.0  ;;  %v205_v41 = vmul.f32 %v1477_v34, %v1477_v34  ;;  %v348_v42 = vsel %vm314_vm1, %v203_v32, 0.0  ;;  %v1574_v32 = vld [vmem:[%s2671_s1 + $0x108] sm:$0xff] }
  0x13   :  { %174 = vadd.xlane.f32.xlu0 %v173_v35  ;;  %v327_v63 = vadd.f32 %v326_v61, %v325_v59  ;;  %v206_v45 = vmul.f32 %v1486_v39, %v1486_v39  ;;  %v207_v49 = vmul.f32 %v1494_v43, %v1494_v43  ;;  %v208_v53 = vmul.f32 %v1502_v47, %v1502_v47  ;;  %v1526_v59 = vld [vmem:[%s2671_s1 + $0xc8] sm:$0xff] }
  0x14   :  { %v350_v46 = vsel %vm314_vm1, %v204_v37, 0.0  ;;  %v352_v50 = vsel %vm314_vm1, %v205_v41, 0.0  ;;  %v209_v57 = vmul.f32 %v1510_v51, %v1510_v51  ;;  %v210_v61 = vmul.f32 %v1518_v55, %v1518_v55  ;;  %v1582_v37 = vld [vmem:[%s2671_s1 + $0x110] sm:$0xff] }
  0x15   :  { %v329_v5 = vadd.f32 %v328_v2, %v327_v63  ;;  %v354_v54 = vsel %vm314_vm1, %v206_v45, 0.0  ;;  %v356_v58 = vsel %vm314_vm1, %v207_v49, 0.0  ;;  %v358_v62 = vsel %vm314_vm1, %v208_v53, 0.0  ;;  %v1534_v63 = vld [vmem:[%s2671_s1 + $0xd0] sm:$0xff]  ;;  %v1606_v53 = vld [vmem:[%s2671_s1 + $0x128] sm:$0xff] }
  0x16   :  { %v211_v2 = vmul.f32 %v1526_v59, %v1526_v59  ;;  %v360_v4 = vsel %vm314_vm1, %v209_v57, 0.0  ;;  %v362_v8 = vsel %vm314_vm1, %v210_v61, 0.0  ;;  %v220_v45 = vmul.f32 %v1582_v37, %v1582_v37 }
  0x17   :  { %v331_v9 = vadd.f32 %v330_v7, %v329_v5  ;;  %v1542_v5 = vld [vmem:[%s2671_s1 + $0xd8] sm:$0xff]  ;;  %v212_v7 = vmul.f32 %v1534_v63, %v1534_v63  ;;  %v223_v61 = vmul.f32 %v1606_v53, %v1606_v53 }
  0x18   :  { %v364_v12 = vsel %vm314_vm1, %v211_v2, 0.0  ;;  %v382_v57 = vsel %vm314_vm1, %v220_v45, 0.0  ;;  %v1686_v45 = vld [vmem:[%s2671_s1 + $0x178] sm:$0xff] }
  0x19   :  { %v333_v13 = vadd.f32 %v332_v11, %v331_v9  ;;  %v50_v9 = vld [vmem:[%s2671_s1 + $0xe0] sm:$0xff]  ;;  %v213_v11 = vmul.f32 %v1542_v5, %v1542_v5  ;;  %v366_v16 = vsel %vm314_vm1, %v212_v7, 0.0  ;;  %2740 = vst [vmem:[#allocation2_spill] sm:$0xff] %v1686_v45 }
  0x1a   :  { %v1630_v7 = vld [vmem:[%s2671_s1 + $0x140] sm:$0xff] }
  0x1b   :  { %v335_v17 = vadd.f32 %v334_v15, %v333_v13  ;;  %v51_v13 = vld [vmem:[%s2671_s1 + $0xe8] sm:$0xff]  ;;  %v214_v15 = vmul.f32 %v50_v9, %v50_v9 }
  0x1c   :  { %v215_v19 = vmul.f32 %v51_v13, %v51_v13  ;;  %v226_v13 = vmul.f32 %v1630_v7, %v1630_v7 }
  0x1d   :  { %v337_v22 = vadd.f32 %v336_v20, %v335_v17  ;;  %v52_v17 = vld [vmem:[%s2671_s1 + $0xf0] sm:$0xff]  ;;  %v368_v20 = vsel %vm314_vm1, %v213_v11, 0.0  ;;  %v370_v26 = vsel %vm314_vm1, %v214_v15, 0.0  ;;  %v1638_v11 = vld [vmem:[%s2671_s1 + $0x148] sm:$0xff] }
  0x1e   :  { %v1646_v15 = vld [vmem:[%s2671_s1 + $0x150] sm:$0xff] }
  0x1f   :  { %v339_v27 = vadd.f32 %v338_v24, %v337_v22  ;;  %v53_v22 = vld [vmem:[%s2671_s1 + $0xf8] sm:$0xff]  ;;  %v216_v24 = vmul.f32 %v52_v17, %v52_v17  ;;  %v227_v17 = vmul.f32 %v1638_v11, %v1638_v11 }
  0x21   :  { %v341_v31 = vadd.f32 %v340_v29, %v339_v27  ;;  %v1568_v27 = vld [vmem:[%s2671_s1 + $0x100] sm:$0xff]  ;;  %v217_v29 = vmul.f32 %v53_v22, %v53_v22  ;;  %v228_v22 = vmul.f32 %v1646_v15, %v1646_v15 }
  0x23   :  { %v343_v35 = vadd.f32 %v342_v33, %v341_v31  ;;  %v372_v31 = vsel %vm314_vm1, %v215_v19, 0.0  ;;  %v376_v41 = vsel %vm314_vm1, %v217_v29, 0.0  ;;  %v1654_v19 = vld [vmem:[%s2671_s1 + $0x158] sm:$0xff]  ;;  %v396_v29 = vsel %vm314_vm1, %v227_v17, 0.0 }
  0x25   :  { %v345_v40 = vadd.f32 %v344_v36, %v343_v35  ;;  %v218_v35 = vmul.f32 %v1568_v27, %v1568_v27  ;;  %v374_v36 = vsel %vm314_vm1, %v216_v24, 0.0  ;;  %v1662_v24 = vld [vmem:[%s2671_s1 + $0x160] sm:$0xff] }
  0x27   :  { %v347_v44 = vadd.f32 %v346_v38, %v345_v40  ;;  %v219_v40 = vmul.f32 %v1574_v32, %v1574_v32 }
  0x29   :  { %v349_v48 = vadd.f32 %v348_v42, %v347_v44  ;;  %v1590_v42 = vld [vmem:[%s2671_s1 + $0x118] sm:$0xff] }
  0x2b   :  { %v351_v52 = vadd.f32 %v350_v46, %v349_v48  ;;  %v378_v46 = vsel %vm314_vm1, %v218_v35, 0.0  ;;  %v1598_v48 = vld [vmem:[%s2671_s1 + $0x120] sm:$0xff]  ;;  %v230_v35 = vmul.f32 %v1662_v24, %v1662_v24 }
  0x2d   :  { %v353_v56 = vadd.f32 %v352_v50, %v351_v52  ;;  %v221_v50 = vmul.f32 %v1590_v42, %v1590_v42  ;;  %v380_v52 = vsel %vm314_vm1, %v219_v40, 0.0 }
  0x2f   :  { %v355_v60 = vadd.f32 %v354_v54, %v353_v56  ;;  %v222_v56 = vmul.f32 %v1598_v48, %v1598_v48 }
  0x31   :  { %v357_v0 = vadd.f32 %v356_v58, %v355_v60  ;;  %v1614_v58 = vld [vmem:[%s2671_s1 + $0x130] sm:$0xff] }
  0x33   :  { %v359_v6 = vadd.f32 %v358_v62, %v357_v0  ;;  %v384_v62 = vsel %vm314_vm1, %v221_v50, 0.0  ;;  %v1622_v0 = vld [vmem:[%s2671_s1 + $0x138] sm:$0xff]  ;;  %v402_v50 = vsel %vm314_vm1, %v230_v35, 0.0 }
  0x34   :  { %v225_v9 = vmul.f32 %v1622_v0, %v1622_v0 }
  0x35   :  { %v361_v10 = vadd.f32 %v360_v4, %v359_v6  ;;  %v224_v4 = vmul.f32 %v1614_v58, %v1614_v58  ;;  %v386_v6 = vsel %vm314_vm1, %v222_v56, 0.0  ;;  %v233_v56 = vmul.f32 %v1686_v45, %v1686_v45 }
  0x37   :  { %v363_v14 = vadd.f32 %v362_v8, %v361_v10  ;;  %v388_v10 = vsel %vm314_vm1, %v223_v61, 0.0 }
  0x39   :  { %v365_v18 = vadd.f32 %v364_v12, %v363_v14  ;;  %v390_v14 = vsel %vm314_vm1, %v224_v4, 0.0  ;;  %v1710_v4 = vld [vmem:[%s2671_s1 + $0x190] sm:$0xff] }
  0x3b   :  { %v367_v23 = vadd.f32 %v366_v16, %v365_v18  ;;  %v392_v18 = vsel %vm314_vm1, %v225_v9, 0.0  ;;  %v408_v9 = vsel %vm314_vm1, %v233_v56, 0.0 }
  0x3d   :  { %v369_v28 = vadd.f32 %v368_v20, %v367_v23  ;;  %v394_v23 = vsel %vm314_vm1, %v226_v13, 0.0  ;;  %v236_v13 = vmul.f32 %v1710_v4, %v1710_v4 }
  0x3f   :  { %v371_v33 = vadd.f32 %v370_v26, %v369_v28  ;;  %v229_v28 = vmul.f32 %v1654_v19, %v1654_v19 }
  0x41   :  { %v373_v38 = vadd.f32 %v372_v31, %v371_v33  ;;  %v1670_v31 = vld [vmem:[%s2671_s1 + $0x168] sm:$0xff] }
  0x43   :  { %v375_v44 = vadd.f32 %v374_v36, %v373_v38  ;;  %v398_v36 = vsel %vm314_vm1, %v228_v22, 0.0  ;;  %v1678_v38 = vld [vmem:[%s2671_s1 + $0x170] sm:$0xff]  ;;  %v1734_v22 = vld [vmem:[%s2671_s1 + $0x1a8] sm:$0xff] }
  0x44   :  { %v239_v35 = vmul.f32 %v1734_v22, %v1734_v22 }
  0x45   :  { %v377_v49 = vadd.f32 %v376_v41, %v375_v44  ;;  %v231_v41 = vmul.f32 %v1670_v31, %v1670_v31  ;;  %v400_v44 = vsel %vm314_vm1, %v229_v28, 0.0  ;;  %v414_v28 = vsel %vm314_vm1, %v236_v13, 0.0  ;;  %v1782_v13 = vld [vmem:[%s2671_s1 + $0x1d8] sm:$0xff] }
  0x46   :  { %v420_v56 = vsel %vm314_vm1, %v239_v35, 0.0 }
  0x47   :  { %v379_v54 = vadd.f32 %v378_v46, %v377_v49  ;;  %v232_v49 = vmul.f32 %v1678_v38, %v1678_v38 }
  0x49   :  { %v381_v60 = vadd.f32 %v380_v52, %v379_v54  ;;  %v1694_v52 = vld [vmem:[%s2671_s1 + $0x180] sm:$0xff] }
  0x4b   :  { %v383_v2 = vadd.f32 %v382_v57, %v381_v60  ;;  %v404_v57 = vsel %vm314_vm1, %v231_v41, 0.0  ;;  %v1702_v60 = vld [vmem:[%s2671_s1 + $0x188] sm:$0xff] }
  0x4d   :  { %v385_v8 = vadd.f32 %v384_v62, %v383_v2  ;;  %v234_v62 = vmul.f32 %v1694_v52, %v1694_v52  ;;  %v406_v2 = vsel %vm314_vm1, %v232_v49, 0.0  ;;  %v1758_v49 = vld [vmem:[%s2671_s1 + $0x1c0] sm:$0xff] }
  0x4f   :  { %v387_v12 = vadd.f32 %v386_v6, %v385_v8  ;;  %v235_v8 = vmul.f32 %v1702_v60, %v1702_v60 }
  0x51   :  { %v389_v16 = vadd.f32 %v388_v10, %v387_v12  ;;  %v1718_v10 = vld [vmem:[%s2671_s1 + $0x198] sm:$0xff] }
  0x53   :  { %v391_v20 = vadd.f32 %v390_v14, %v389_v16  ;;  %v410_v14 = vsel %vm314_vm1, %v234_v62, 0.0  ;;  %v1726_v16 = vld [vmem:[%s2671_s1 + $0x1a0] sm:$0xff]  ;;  %v242_v62 = vmul.f32 %v1758_v49, %v1758_v49 }
  0x55   :  { %v393_v26 = vadd.f32 %v392_v18, %v391_v20  ;;  %v237_v18 = vmul.f32 %v1718_v10, %v1718_v10  ;;  %v412_v20 = vsel %vm314_vm1, %v235_v8, 0.0 }
  0x57   :  { %v395_v33 = vadd.f32 %v394_v23, %v393_v26  ;;  %v238_v26 = vmul.f32 %v1726_v16, %v1726_v16 }
  0x59   :  { %v397_v40 = vadd.f32 %v396_v29, %v395_v33  ;;  %v1742_v29 = vld [vmem:[%s2671_s1 + $0x1b0] sm:$0xff] }
  0x5b   :  { %v399_v46 = vadd.f32 %v398_v36, %v397_v40  ;;  %v416_v36 = vsel %vm314_vm1, %v237_v18, 0.0  ;;  %v1750_v40 = vld [vmem:[%s2671_s1 + $0x1b8] sm:$0xff]  ;;  %v426_v18 = vsel %vm314_vm1, %v242_v62, 0.0 }
  0x5d   :  { %v401_v54 = vadd.f32 %v400_v44, %v399_v46  ;;  %v240_v44 = vmul.f32 %v1742_v29, %v1742_v29  ;;  %v418_v46 = vsel %vm314_vm1, %v238_v26, 0.0  ;;  %v245_v26 = vmul.f32 %v1782_v13, %v1782_v13 }
  0x5f   :  { %v403_v61 = vadd.f32 %v402_v50, %v401_v54  ;;  %v241_v54 = vmul.f32 %v1750_v40, %v1750_v40 }
  0x61   :  { %v405_v6 = vadd.f32 %v404_v57, %v403_v61  ;;  %v1766_v57 = vld [vmem:[%s2671_s1 + $0x1c8] sm:$0xff] }
  0x63   :  { %v407_v12 = vadd.f32 %v406_v2, %v405_v6  ;;  %v422_v2 = vsel %vm314_vm1, %v240_v44, 0.0  ;;  %v1774_v6 = vld [vmem:[%s2671_s1 + $0x1d0] sm:$0xff] }
  0x64   :  { %v1806_v44 = vld [vmem:[%s2671_s1 + $0x1f0] sm:$0xff] }
  0x65   :  { %v409_v17 = vadd.f32 %v408_v9, %v407_v12  ;;  %v243_v9 = vmul.f32 %v1766_v57, %v1766_v57  ;;  %v424_v12 = vsel %vm314_vm1, %v241_v54, 0.0  ;;  %v432_v54 = vsel %vm314_vm1, %v245_v26, 0.0 }
  0x66   :  { %v248_v62 = vmul.f32 %v1806_v44, %v1806_v44 }
  0x67   :  { %v411_v23 = vadd.f32 %v410_v14, %v409_v17  ;;  %v244_v17 = vmul.f32 %v1774_v6, %v1774_v6 }
  0x68   :  { %v438_v26 = vsel %vm314_vm1, %v248_v62, 0.0  ;;  %v1854_v62 = vld [vmem:[%s2671_s1 + $0x220] sm:$0xff] }
  0x69   :  { %v413_v33 = vadd.f32 %v412_v20, %v411_v23  ;;  %v1790_v20 = vld [vmem:[%s2671_s1 + $0x1e0] sm:$0xff]  ;;  %2745 = vst [vmem:[#allocation7_spill] sm:$0xff] %v1854_v62 }
  0x6b   :  { %v415_v41 = vadd.f32 %v414_v28, %v413_v33  ;;  %v428_v28 = vsel %vm314_vm1, %v243_v9, 0.0  ;;  %v1798_v33 = vld [vmem:[%s2671_s1 + $0x1e8] sm:$0xff] }
  0x6d   :  { %v417_v50 = vadd.f32 %v416_v36, %v415_v41  ;;  %v246_v36 = vmul.f32 %v1790_v20, %v1790_v20  ;;  %v430_v41 = vsel %vm314_vm1, %v244_v17, 0.0  ;;  %v1830_v17 = vld [vmem:[%s2671_s1 + $0x208] sm:$0xff] }
  0x6e   :  { %2742 = vst [vmem:[#allocation4_spill] sm:$0xff] %v1830_v17 }
  0x6f   :  { %v419_v61 = vadd.f32 %v418_v46, %v417_v50  ;;  %v247_v50 = vmul.f32 %v1798_v33, %v1798_v33 }
  0x71   :  { %v421_v8 = vadd.f32 %v420_v56, %v419_v61  ;;  %v1814_v56 = vld [vmem:[%s2671_s1 + $0x1f8] sm:$0xff] }
  0x73   :  { %v423_v14 = vadd.f32 %v422_v2, %v421_v8  ;;  %v434_v2 = vsel %vm314_vm1, %v246_v36, 0.0  ;;  %v1822_v8 = vld [vmem:[%s2671_s1 + $0x200] sm:$0xff]  ;;  %v251_v36 = vmul.f32 %v1830_v17, %v1830_v17 }
  0x74   :  { %2741 = vst [vmem:[#allocation3_spill] sm:$0xff] %v1822_v8 }
  0x75   :  { %v425_v23 = vadd.f32 %v424_v12, %v423_v14  ;;  %v249_v12 = vmul.f32 %v1814_v56, %v1814_v56  ;;  %v436_v14 = vsel %vm314_vm1, %v247_v50, 0.0 }
  0x77   :  { %v427_v35 = vadd.f32 %v426_v18, %v425_v23  ;;  %v250_v23 = vmul.f32 %v1822_v8, %v1822_v8 }
  0x79   :  { %v429_v46 = vadd.f32 %v428_v28, %v427_v35  ;;  %v1838_v28 = vld [vmem:[%s2671_s1 + $0x210] sm:$0xff] }
  0x7a   :  { %2743 = vst [vmem:[#allocation5_spill] sm:$0xff] %v1838_v28 }
  0x7b   :  { %v431_v61 = vadd.f32 %v430_v41, %v429_v46  ;;  %v440_v41 = vsel %vm314_vm1, %v249_v12, 0.0  ;;  %v1846_v46 = vld [vmem:[%s2671_s1 + $0x218] sm:$0xff]  ;;  %v444_v12 = vsel %vm314_vm1, %v251_v36, 0.0 }
  0x7c   :  { %2744 = vst [vmem:[#allocation6_spill] sm:$0xff] %v1846_v46 }
  0x7d   :  { %v433_v9 = vadd.f32 %v432_v54, %v431_v61  ;;  %v252_v54 = vmul.f32 %v1838_v28, %v1838_v28  ;;  %v442_v61 = vsel %vm314_vm1, %v250_v23, 0.0  ;;  %v254_v23 = vmul.f32 %v1854_v62, %v1854_v62 }
  0x7f   :  { %v435_v18 = vadd.f32 %v434_v2, %v433_v9  ;;  %v253_v9 = vmul.f32 %v1846_v46, %v1846_v46  ;;  %v450_v62 = vsel %vm314_vm1, %v254_v23, 0.0 }
  0x81   :  { %v437_v35 = vadd.f32 %v436_v14, %v435_v18  ;;  %v1862_v14 = vld [vmem:[%s2671_s1 + $0x228] sm:$0xff] }
  0x82   :  { %2746 = vst [vmem:[#allocation8_spill] sm:$0xff] %v1862_v14  ;;  %v255_v36 = vmul.f32 %v1862_v14, %v1862_v14 }
  0x83   :  { %v439_v50 = vadd.f32 %v438_v26, %v437_v35  ;;  %v446_v26 = vsel %vm314_vm1, %v252_v54, 0.0  ;;  %v1870_v35 = vld [vmem:[%s2671_s1 + $0x230] sm:$0xff] }
  0x84   :  { %2747 = vst [vmem:[#allocation9_spill] sm:$0xff] %v1870_v35  ;;  %v256_v54 = vmul.f32 %v1870_v35, %v1870_v35  ;;  %v452_v14 = vsel %vm314_vm1, %v255_v36, 0.0 }
  0x85   :  { %v441_v2 = vadd.f32 %v440_v41, %v439_v50  ;;  %v448_v50 = vsel %vm314_vm1, %v253_v9, 0.0 }
  0x86   :  { %v454_v35 = vsel %vm314_vm1, %v256_v54, 0.0 }
  0x87   :  { %v443_v18 = vadd.f32 %v442_v61, %v441_v2  ;;  %v1878_v61 = vld [vmem:[%s2671_s1 + $0x238] sm:$0xff] }
  0x88   :  { %2748 = vst [vmem:[#allocation10_spill] sm:$0xff] %v1878_v61  ;;  %v257_v9 = vmul.f32 %v1878_v61, %v1878_v61 }
  0x89   :  { %v445_v41 = vadd.f32 %v444_v12, %v443_v18  ;;  %v1886_v12 = vld [vmem:[%s2671_s1 + $0x240] sm:$0xff] }
  0x8a   :  { %2749 = vst [vmem:[#allocation11_spill] sm:$0xff] %v1886_v12  ;;  %v258_v23 = vmul.f32 %v1886_v12, %v1886_v12  ;;  %v456_v61 = vsel %vm314_vm1, %v257_v9, 0.0 }
  0x8b   :  { %v447_v2 = vadd.f32 %v446_v26, %v445_v41  ;;  %v1894_v26 = vld [vmem:[%s2671_s1 + $0x248] sm:$0xff] }
  0x8c   :  { %2750 = vst [vmem:[#allocation12_spill] sm:$0xff] %v1894_v26  ;;  %v259_v36 = vmul.f32 %v1894_v26, %v1894_v26  ;;  %v458_v12 = vsel %vm314_vm1, %v258_v23, 0.0 }
  0x8d   :  { %v449_v18 = vadd.f32 %v448_v50, %v447_v2  ;;  %v1902_v50 = vld [vmem:[%s2671_s1 + $0x250] sm:$0xff] }
  0x8e   :  { %2751 = vst [vmem:[#allocation13_spill] sm:$0xff] %v1902_v50  ;;  %v260_v54 = vmul.f32 %v1902_v50, %v1902_v50  ;;  %v460_v26 = vsel %vm314_vm1, %v259_v36, 0.0 }
  0x8f   :  { %v451_v41 = vadd.f32 %v450_v62, %v449_v18  ;;  %v1910_v62 = vld [vmem:[%s2671_s1 + $0x258] sm:$0xff] }
  0x90   :  { %2752 = vst [vmem:[#allocation14_spill] sm:$0xff] %v1910_v62  ;;  %v261_v9 = vmul.f32 %v1910_v62, %v1910_v62  ;;  %v462_v50 = vsel %vm314_vm1, %v260_v54, 0.0 }
  0x91   :  { %v453_v2 = vadd.f32 %v452_v14, %v451_v41  ;;  %v1918_v14 = vld [vmem:[%s2671_s1 + $0x260] sm:$0xff] }
  0x92   :  { %2753 = vst [vmem:[#allocation15_spill] sm:$0xff] %v1918_v14  ;;  %v262_v23 = vmul.f32 %v1918_v14, %v1918_v14  ;;  %v464_v62 = vsel %vm314_vm1, %v261_v9, 0.0 }
  0x93   :  { %v455_v18 = vadd.f32 %v454_v35, %v453_v2  ;;  %v1926_v35 = vld [vmem:[%s2671_s1 + $0x268] sm:$0xff] }
  0x94   :  { %2754 = vst [vmem:[#allocation16_spill] sm:$0xff] %v1926_v35  ;;  %v263_v36 = vmul.f32 %v1926_v35, %v1926_v35  ;;  %v466_v14 = vsel %vm314_vm1, %v262_v23, 0.0 }
  0x95   :  { %v457_v41 = vadd.f32 %v456_v61, %v455_v18  ;;  %v1934_v61 = vld [vmem:[%s2671_s1 + $0x270] sm:$0xff] }
  0x96   :  { %2755 = vst [vmem:[#allocation17_spill] sm:$0xff] %v1934_v61  ;;  %v264_v54 = vmul.f32 %v1934_v61, %v1934_v61  ;;  %v468_v35 = vsel %vm314_vm1, %v263_v36, 0.0 }
  0x97   :  { %v459_v2 = vadd.f32 %v458_v12, %v457_v41  ;;  %v1942_v12 = vld [vmem:[%s2671_s1 + $0x278] sm:$0xff] }
  0x98   :  { %2756 = vst [vmem:[#allocation18_spill] sm:$0xff] %v1942_v12  ;;  %v265_v9 = vmul.f32 %v1942_v12, %v1942_v12  ;;  %v470_v61 = vsel %vm314_vm1, %v264_v54, 0.0 }
  0x99   :  { %v461_v18 = vadd.f32 %v460_v26, %v459_v2  ;;  %v1950_v26 = vld [vmem:[%s2671_s1 + $0x280] sm:$0xff] }
  0x9a   :  { %2757 = vst [vmem:[#allocation19_spill] sm:$0xff] %v1950_v26  ;;  %v266_v23 = vmul.f32 %v1950_v26, %v1950_v26  ;;  %v472_v12 = vsel %vm314_vm1, %v265_v9, 0.0 }
  0x9b   :  { %v463_v41 = vadd.f32 %v462_v50, %v461_v18  ;;  %v1958_v50 = vld [vmem:[%s2671_s1 + $0x288] sm:$0xff] }
  0x9c   :  { %2758 = vst [vmem:[#allocation20_spill] sm:$0xff] %v1958_v50  ;;  %v267_v36 = vmul.f32 %v1958_v50, %v1958_v50  ;;  %v474_v46 = vsel %vm314_vm1, %v266_v23, 0.0 }
  0x9d   :  { %v465_v2 = vadd.f32 %v464_v62, %v463_v41  ;;  %v1966_v62 = vld [vmem:[%s2671_s1 + $0x290] sm:$0xff] }
  0x9e   :  { %2759 = vst [vmem:[#allocation21_spill] sm:$0xff] %v1966_v62  ;;  %v268_v54 = vmul.f32 %v1966_v62, %v1966_v62  ;;  %v476_v28 = vsel %vm314_vm1, %v267_v36, 0.0 }
  0x9f   :  { %v467_v18 = vadd.f32 %v466_v14, %v465_v2  ;;  %v1974_v14 = vld [vmem:[%s2671_s1 + $0x298] sm:$0xff] }
  0xa0   :  { %2760 = vst [vmem:[#allocation22_spill] sm:$0xff] %v1974_v14  ;;  %v269_v9 = vmul.f32 %v1974_v14, %v1974_v14  ;;  %v478_v62 = vsel %vm314_vm1, %v268_v54, 0.0 }
  0xa1   :  { %v469_v41 = vadd.f32 %v468_v35, %v467_v18  ;;  %v1982_v35 = vld [vmem:[%s2671_s1 + $0x2a0] sm:$0xff] }
  0xa2   :  { %2761 = vst [vmem:[#allocation23_spill] sm:$0xff] %v1982_v35  ;;  %v270_v23 = vmul.f32 %v1982_v35, %v1982_v35  ;;  %v480_v14 = vsel %vm314_vm1, %v269_v9, 0.0 }
  0xa3   :  { %v471_v2 = vadd.f32 %v470_v61, %v469_v41  ;;  %v1990_v61 = vld [vmem:[%s2671_s1 + $0x2a8] sm:$0xff] }
  0xa4   :  { %2762 = vst [vmem:[#allocation24_spill] sm:$0xff] %v1990_v61  ;;  %v271_v36 = vmul.f32 %v1990_v61, %v1990_v61  ;;  %v482_v35 = vsel %vm314_vm1, %v270_v23, 0.0 }
  0xa5   :  { %v473_v18 = vadd.f32 %v472_v12, %v471_v2  ;;  %v1998_v12 = vld [vmem:[%s2671_s1 + $0x2b0] sm:$0xff] }
  0xa6   :  { %2763 = vst [vmem:[#allocation25_spill] sm:$0xff] %v1998_v12  ;;  %v272_v54 = vmul.f32 %v1998_v12, %v1998_v12  ;;  %v484_v61 = vsel %vm314_vm1, %v271_v36, 0.0 }
  0xa7   :  { %v475_v41 = vadd.f32 %v474_v46, %v473_v18  ;;  %v2006_v46 = vld [vmem:[%s2671_s1 + $0x2b8] sm:$0xff] }
  0xa8   :  { %2764 = vst [vmem:[#allocation26_spill] sm:$0xff] %v2006_v46  ;;  %v273_v9 = vmul.f32 %v2006_v46, %v2006_v46  ;;  %v486_v12 = vsel %vm314_vm1, %v272_v54, 0.0  ;;  %v175_v46 = vpop.xlane.xlu0 %174 }
  0xa9   :  { %v477_v2 = vadd.f32 %v476_v28, %v475_v41  ;;  %v2014_v28 = vld [vmem:[%s2671_s1 + $0x2c0] sm:$0xff]  ;;  %v176_v8 = vadd.f32 1e-12, %v175_v46 }
  0xaa   :  { %2765 = vst [vmem:[#allocation27_spill] sm:$0xff] %v2014_v28  ;;  %v274_v23 = vmul.f32 %v2014_v28, %v2014_v28  ;;  %v488_v17 = vsel %vm314_vm1, %v273_v9, 0.0 }
  0xab   :  { %v479_v18 = vadd.f32 %v478_v62, %v477_v2  ;;  %v2022_v62 = vld [vmem:[%s2671_s1 + $0x2c8] sm:$0xff]  ;;  %1298 = vrsqrt.f32 %v176_v8 }
  0xac   :  { %2766 = vst [vmem:[#allocation28_spill] sm:$0xff] %v2022_v62  ;;  %v275_v36 = vmul.f32 %v2022_v62, %v2022_v62  ;;  %v490_v28 = vsel %vm314_vm1, %v274_v23, 0.0 }
  0xad   :  { %v481_v41 = vadd.f32 %v480_v14, %v479_v18  ;;  %v2030_v14 = vld [vmem:[%s2671_s1 + $0x2d0] sm:$0xff] }
  0xae   :  { %2767 = vst [vmem:[#allocation29_spill] sm:$0xff] %v2030_v14  ;;  %v276_v54 = vmul.f32 %v2030_v14, %v2030_v14  ;;  %v492_v9 = vsel %vm314_vm1, %v275_v36, 0.0 }
  0xaf   :  { %v483_v2 = vadd.f32 %v482_v35, %v481_v41  ;;  %v2038_v35 = vld [vmem:[%s2671_s1 + $0x2d8] sm:$0xff] }
  0xb0   :  { %2768 = vst [vmem:[#allocation30_spill] sm:$0xff] %v2038_v35  ;;  %v277_v46 = vmul.f32 %v2038_v35, %v2038_v35  ;;  %v494_v23 = vsel %vm314_vm1, %v276_v54, 0.0 }
  0xb1   :  { %v485_v18 = vadd.f32 %v484_v61, %v483_v2  ;;  %v2046_v61 = vld [vmem:[%s2671_s1 + $0x2e0] sm:$0xff] }
  0xb2   :  { %2769 = vst [vmem:[#allocation31_spill] sm:$0xff] %v2046_v61  ;;  %v278_v8 = vmul.f32 %v2046_v61, %v2046_v61  ;;  %v496_v35 = vsel %vm314_vm1, %v277_v46, 0.0 }
  0xb3   :  { %v487_v41 = vadd.f32 %v486_v12, %v485_v18  ;;  %v2054_v12 = vld [vmem:[%s2671_s1 + $0x2e8] sm:$0xff] }
  0xb4   :  { %2770 = vst [vmem:[#allocation32_spill] sm:$0xff] %v2054_v12  ;;  %v279_v36 = vmul.f32 %v2054_v12, %v2054_v12  ;;  %v498_v61 = vsel %vm314_vm1, %v278_v8, 0.0 }
  0xb5   :  { %v489_v2 = vadd.f32 %v488_v17, %v487_v41  ;;  %v2062_v17 = vld [vmem:[%s2671_s1 + $0x2f0] sm:$0xff]  ;;  %v2080_v12 = vpop.eup %1298 }
  0xb6   :  { %2771 = vst [vmem:[#allocation33_spill] sm:$0xff] %v2062_v17  ;;  %v280_v54 = vmul.f32 %v2062_v17, %v2062_v17  ;;  %2774 = vst [vmem:[#allocation36_spill] sm:$0xff] %v2080_v12  ;;  %v500_v14 = vsel %vm314_vm1, %v279_v36, 0.0  ;;  %v179_v36 = vmul.f32 %v2080_v12, %v1358_v1 }
  0xb7   :  { %v491_v18 = vadd.f32 %v490_v28, %v489_v2  ;;  %v2070_v28 = vld [vmem:[%s2671_s1 + $0x2f8] sm:$0xff] }
  0xb8   :  { %2772 = vst [vmem:[#allocation34_spill] sm:$0xff] %v2070_v28  ;;  %v281_v46 = vmul.f32 %v2070_v28, %v2070_v28  ;;  %v502_v17 = vsel %vm314_vm1, %v280_v54, 0.0  ;;  %v181_v28 = vmul.f32 %v2080_v12, %v1366_v3  ;;  %v2108_v54 = vld [vmem:[%s2671_s1 + $0x318] sm:$0xff]  ;;  %770 = vmatprep.mubr.f32.mxu0 %v179_v36  ;;  %v2116_v3 = vld [vmem:[%s2671_s1 + $0x320] sm:$0xff] }
  0xb9   :  { %v493_v41 = vadd.f32 %v492_v9, %v491_v18  ;;  %v2078_v9 = vld [vmem:[%s2671_s1 + $0x300] sm:$0xff]  ;;  %2777 = vst [vmem:[#allocation39_spill] sm:$0xff] %v2108_v54  ;;  %2778 = vst [vmem:[#allocation40_spill] sm:$0xff] %v2116_v3 }
  0xba   :  { %2773 = vst [vmem:[#allocation35_spill] sm:$0xff] %v2078_v9  ;;  %v282_v8 = vmul.f32 %v2078_v9, %v2078_v9  ;;  %840 = vmatprep.mubr.f32.mxu1 %v181_v28  ;;  %v1330_v9 = vmov 0  }
  0xbb   :  { %v495_v2 = vadd.f32 %v494_v23, %v493_v41  ;;  %v2088_v23 = vld [vmem:[%s2671_s1 + $0x308] sm:$0xff]  ;;  %1297 = vset.pattern.permute.xlu0 %v1330_v9  ;;  %v2263_v9 = vld [vmem:[%s2671_s1 + $0x3b0] sm:$0xff] }
  0xbc   :  { %2775 = vst [vmem:[#allocation37_spill] sm:$0xff] %v2088_v23  ;;  %v506_v1 = vsel %vm314_vm1, %v282_v8, 0.0  ;;  %v286_v8 = vmul.f32 %v2116_v3, %v2116_v3  ;;  %2796 = vst [vmem:[#allocation58_spill] sm:$0xff] %v2263_v9 }
  0xbd   :  { %v497_v18 = vadd.f32 %v496_v35, %v495_v2  ;;  %v2096_v35 = vld [vmem:[%s2671_s1 + $0x310] sm:$0xff] }
  0xbe   :  { %2776 = vst [vmem:[#allocation38_spill] sm:$0xff] %v2096_v35  ;;  %v514_v3 = vsel %vm314_vm1, %v286_v8, 0.0 }
  0xbf   :  { %v499_v41 = vadd.f32 %v498_v61, %v497_v18  ;;  %v283_v61 = vmul.f32 %v2088_v23, %v2088_v23  ;;  %v504_v18 = vsel %vm314_vm1, %v281_v46, 0.0  ;;  %v285_v46 = vmul.f32 %v2108_v54, %v2108_v54 }
  0xc1   :  { %v501_v2 = vadd.f32 %v500_v14, %v499_v41  ;;  %v284_v14 = vmul.f32 %v2096_v35, %v2096_v35  ;;  %v508_v23 = vsel %vm314_vm1, %v283_v61, 0.0 }
  0xc3   :  { %v503_v62 = vadd.f32 %v502_v17, %v501_v2  ;;  %v2124_v17 = vld [vmem:[%s2671_s1 + $0x328] sm:$0xff]  ;;  %v510_v2 = vsel %vm314_vm1, %v284_v14, 0.0 }
  0xc4   :  { %2779 = vst [vmem:[#allocation41_spill] sm:$0xff] %v2124_v17  ;;  %v287_v61 = vmul.f32 %v2124_v17, %v2124_v17 }
  0xc5   :  { %v505_v41 = vadd.f32 %v504_v18, %v503_v62  ;;  %v2132_v62 = vld [vmem:[%s2671_s1 + $0x330] sm:$0xff]  ;;  %v512_v18 = vsel %vm314_vm1, %v285_v46, 0.0 }
  0xc6   :  { %2780 = vst [vmem:[#allocation42_spill] sm:$0xff] %v2132_v62  ;;  %v288_v14 = vmul.f32 %v2132_v62, %v2132_v62  ;;  %v516_v17 = vsel %vm314_vm1, %v287_v61, 0.0 }
  0xc7   :  { %v507_v28 = vadd.f32 %v506_v1, %v505_v41  ;;  %v2140_v1 = vld [vmem:[%s2671_s1 + $0x338] sm:$0xff] }
  0xc8   :  { %2781 = vst [vmem:[#allocation43_spill] sm:$0xff] %v2140_v1  ;;  %v289_v46 = vmul.f32 %v2140_v1, %v2140_v1  ;;  %v518_v62 = vsel %vm314_vm1, %v288_v14, 0.0 }
  0xc9   :  { %v509_v36 = vadd.f32 %v508_v23, %v507_v28  ;;  %v2148_v23 = vld [vmem:[%s2671_s1 + $0x340] sm:$0xff] }
  0xca   :  { %2782 = vst [vmem:[#allocation44_spill] sm:$0xff] %v2148_v23  ;;  %v290_v8 = vmul.f32 %v2148_v23, %v2148_v23  ;;  %v520_v1 = vsel %vm314_vm1, %v289_v46, 0.0 }
  0xcb   :  { %v511_v41 = vadd.f32 %v510_v2, %v509_v36  ;;  %v2156_v2 = vld [vmem:[%s2671_s1 + $0x348] sm:$0xff] }
  0xcc   :  { %2783 = vst [vmem:[#allocation45_spill] sm:$0xff] %v2156_v2  ;;  %v291_v61 = vmul.f32 %v2156_v2, %v2156_v2  ;;  %v522_v23 = vsel %vm314_vm1, %v290_v8, 0.0 }
  0xcd   :  { %v513_v28 = vadd.f32 %v512_v18, %v511_v41  ;;  %v2164_v18 = vld [vmem:[%s2671_s1 + $0x350] sm:$0xff] }
  0xce   :  { %2784 = vst [vmem:[#allocation46_spill] sm:$0xff] %v2164_v18  ;;  %v292_v14 = vmul.f32 %v2164_v18, %v2164_v18  ;;  %v524_v2 = vsel %vm314_vm1, %v291_v61, 0.0 }
  0xcf   :  { %v515_v36 = vadd.f32 %v514_v3, %v513_v28  ;;  %v2172_v3 = vld [vmem:[%s2671_s1 + $0x358] sm:$0xff] }
  0xd0   :  { %2785 = vst [vmem:[#allocation47_spill] sm:$0xff] %v2172_v3  ;;  %v293_v46 = vmul.f32 %v2172_v3, %v2172_v3  ;;  %v526_v18 = vsel %vm314_vm1, %v292_v14, 0.0 }
  0xd1   :  { %v517_v41 = vadd.f32 %v516_v17, %v515_v36  ;;  %v2180_v17 = vld [vmem:[%s2671_s1 + $0x360] sm:$0xff] }
  0xd2   :  { %2786 = vst [vmem:[#allocation48_spill] sm:$0xff] %v2180_v17  ;;  %v294_v8 = vmul.f32 %v2180_v17, %v2180_v17  ;;  %v528_v3 = vsel %vm314_vm1, %v293_v46, 0.0 }
  0xd3   :  { %v519_v28 = vadd.f32 %v518_v62, %v517_v41  ;;  %v2188_v62 = vld [vmem:[%s2671_s1 + $0x368] sm:$0xff] }
  0xd4   :  { %2787 = vst [vmem:[#allocation49_spill] sm:$0xff] %v2188_v62  ;;  %v295_v61 = vmul.f32 %v2188_v62, %v2188_v62  ;;  %v530_v17 = vsel %vm314_vm1, %v294_v8, 0.0 }
  0xd5   :  { %v521_v36 = vadd.f32 %v520_v1, %v519_v28  ;;  %v2196_v1 = vld [vmem:[%s2671_s1 + $0x370] sm:$0xff] }
  0xd6   :  { %2788 = vst [vmem:[#allocation50_spill] sm:$0xff] %v2196_v1  ;;  %v296_v14 = vmul.f32 %v2196_v1, %v2196_v1  ;;  %v532_v62 = vsel %vm314_vm1, %v295_v61, 0.0 }
  0xd7   :  { %v523_v41 = vadd.f32 %v522_v23, %v521_v36  ;;  %v2204_v23 = vld [vmem:[%s2671_s1 + $0x378] sm:$0xff] }
  0xd8   :  { %2789 = vst [vmem:[#allocation51_spill] sm:$0xff] %v2204_v23  ;;  %v297_v46 = vmul.f32 %v2204_v23, %v2204_v23  ;;  %v534_v1 = vsel %vm314_vm1, %v296_v14, 0.0 }
  0xd9   :  { %v525_v28 = vadd.f32 %v524_v2, %v523_v41  ;;  %v2212_v2 = vld [vmem:[%s2671_s1 + $0x380] sm:$0xff] }
  0xda   :  { %2790 = vst [vmem:[#allocation52_spill] sm:$0xff] %v2212_v2  ;;  %v298_v8 = vmul.f32 %v2212_v2, %v2212_v2  ;;  %v536_v23 = vsel %vm314_vm1, %v297_v46, 0.0 }
  0xdb   :  { %v527_v36 = vadd.f32 %v526_v18, %v525_v28  ;;  %v2220_v18 = vld [vmem:[%s2671_s1 + $0x388] sm:$0xff] }
  0xdc   :  { %2791 = vst [vmem:[#allocation53_spill] sm:$0xff] %v2220_v18  ;;  %v299_v61 = vmul.f32 %v2220_v18, %v2220_v18  ;;  %v538_v54 = vsel %vm314_vm1, %v298_v8, 0.0  ;;  %v2255_v8 = vld [vmem:[%s2671_s1 + $0x3a8] sm:$0xff] }
  0xdd   :  { %v529_v41 = vadd.f32 %v528_v3, %v527_v36  ;;  %v2228_v3 = vld [vmem:[%s2671_s1 + $0x390] sm:$0xff]  ;;  %2795 = vst [vmem:[#allocation57_spill] sm:$0xff] %v2255_v8 }
  0xde   :  { %2792 = vst [vmem:[#allocation54_spill] sm:$0xff] %v2228_v3  ;;  %v300_v14 = vmul.f32 %v2228_v3, %v2228_v3  ;;  %v540_v35 = vsel %vm314_vm1, %v299_v61, 0.0 }
  0xdf   :  { %v531_v28 = vadd.f32 %v530_v17, %v529_v41  ;;  %v2236_v17 = vld [vmem:[%s2671_s1 + $0x398] sm:$0xff] }
  0xe0   :  { %2793 = vst [vmem:[#allocation55_spill] sm:$0xff] %v2236_v17  ;;  %v301_v46 = vmul.f32 %v2236_v17, %v2236_v17  ;;  %v303_v17 = vmul.f32 %v2255_v8, %v2255_v8 }
  0xe1   :  { %v533_v36 = vadd.f32 %v532_v62, %v531_v28  ;;  %v2244_v62 = vld [vmem:[%s2671_s1 + $0x3a0] sm:$0xff] }
  0xe2   :  { %2794 = vst [vmem:[#allocation56_spill] sm:$0xff] %v2244_v62  ;;  %v544_v3 = vsel %vm314_vm1, %v301_v46, 0.0  ;;  %v548_v8 = vsel %vm314_vm1, %v303_v17, 0.0 }
  0xe3   :  { %v535_v41 = vadd.f32 %v534_v1, %v533_v36  ;;  %v1006_v1 = vld [vmem:[%s2672_s2] sm:$0x3f] }
  0xe4   :  { %1008 = vperm.xlu0 %1297, %v1006_v1  }
  0xe5   :  { %v537_v28 = vadd.f32 %v536_v23, %v535_v41  ;;  %v302_v23 = vmul.f32 %v2244_v62, %v2244_v62  ;;  %v542_v41 = vsel %vm314_vm1, %v300_v14, 0.0  ;;  %v304_v14 = vmul.f32 %v2263_v9, %v2263_v9 }
  0xe7   :  { %v539_v36 = vadd.f32 %v538_v54, %v537_v28  ;;  %v2271_v54 = vld [vmem:[%s2671_s1 + $0x3b8] sm:$0xff]  ;;  %v546_v1 = vsel %vm314_vm1, %v302_v23, 0.0  ;;  %v550_v9 = vsel %vm314_vm1, %v304_v14, 0.0 }
  0xe8   :  { %2797 = vst [vmem:[#allocation59_spill] sm:$0xff] %v2271_v54  ;;  %v305_v46 = vmul.f32 %v2271_v54, %v2271_v54 }
  0xe9   :  { %v541_v61 = vadd.f32 %v540_v35, %v539_v36  ;;  %v2279_v35 = vld [vmem:[%s2671_s1 + $0x3c0] sm:$0xff] }
  0xea   :  { %2798 = vst [vmem:[#allocation60_spill] sm:$0xff] %v2279_v35  ;;  %v306_v23 = vmul.f32 %v2279_v35, %v2279_v35  ;;  %v552_v54 = vsel %vm314_vm1, %v305_v46, 0.0 }
  0xeb   :  { %v543_v28 = vadd.f32 %v542_v41, %v541_v61  ;;  %v2287_v41 = vld [vmem:[%s2671_s1 + $0x3c8] sm:$0xff] }
  0xec   :  { %2799 = vst [vmem:[#allocation61_spill] sm:$0xff] %v2287_v41  ;;  %v307_v17 = vmul.f32 %v2287_v41, %v2287_v41  ;;  %v554_v35 = vsel %vm314_vm1, %v306_v23, 0.0 }
  0xed   :  { %v545_v36 = vadd.f32 %v544_v3, %v543_v28  ;;  %v2295_v3 = vld [vmem:[%s2671_s1 + $0x3d0] sm:$0xff] }
  0xee   :  { %2800 = vst [vmem:[#allocation62_spill] sm:$0xff] %v2295_v3  ;;  %v308_v14 = vmul.f32 %v2295_v3, %v2295_v3  ;;  %v556_v41 = vsel %vm314_vm1, %v307_v17, 0.0 }
  0xef   :  { %v547_v61 = vadd.f32 %v546_v1, %v545_v36  ;;  %v2303_v1 = vld [vmem:[%s2671_s1 + $0x3d8] sm:$0xff] }
  0xf0   :  { %2801 = vst [vmem:[#allocation63_spill] sm:$0xff] %v2303_v1  ;;  %v309_v46 = vmul.f32 %v2303_v1, %v2303_v1  ;;  %v558_v3 = vsel %vm314_vm1, %v308_v14, 0.0 }
  0xf1   :  { %v549_v28 = vadd.f32 %v548_v8, %v547_v61  ;;  %v2311_v8 = vld [vmem:[%s2671_s1 + $0x3e0] sm:$0xff] }
  0xf2   :  { %2802 = vst [vmem:[#allocation64_spill] sm:$0xff] %v2311_v8  ;;  %v310_v23 = vmul.f32 %v2311_v8, %v2311_v8  ;;  %v560_v1 = vsel %vm314_vm1, %v309_v46, 0.0 }
  0xf3   :  { %v551_v36 = vadd.f32 %v550_v9, %v549_v28  ;;  %v2319_v9 = vld [vmem:[%s2671_s1 + $0x3e8] sm:$0xff] }
  0xf4   :  { %2803 = vst [vmem:[#allocation65_spill] sm:$0xff] %v2319_v9  ;;  %v311_v17 = vmul.f32 %v2319_v9, %v2319_v9  ;;  %v562_v8 = vsel %vm314_vm1, %v310_v23, 0.0 }
  0xf5   :  { %v553_v61 = vadd.f32 %v552_v54, %v551_v36  ;;  %v2327_v54 = vld [vmem:[%s2671_s1 + $0x3f0] sm:$0xff] }
  0xf6   :  { %2804 = vst [vmem:[#allocation66_spill] sm:$0xff] %v2327_v54  ;;  %v312_v14 = vmul.f32 %v2327_v54, %v2327_v54 }
  0xf7   :  { %v555_v28 = vadd.f32 %v554_v35, %v553_v61  ;;  %v2335_v35 = vld [vmem:[%s2671_s1 + $0x3f8] sm:$0xff] }
  0xf8   :  { %v566_v46 = vsel %vm314_vm1, %v312_v14, 0.0 }
  0xf9   :  { %v557_v36 = vadd.f32 %v556_v41, %v555_v28  ;;  %v313_v41 = vmul.f32 %v2335_v35, %v2335_v35  ;;  %v564_v28 = vsel %vm314_vm1, %v311_v17, 0.0 }
  0xfb   :  { %v559_v61 = vadd.f32 %v558_v3, %v557_v36  ;;  %v568_v18 = vsel %vm314_vm1, %v313_v41, 0.0 }
  0xfd   :  { %v561_v62 = vadd.f32 %v560_v1, %v559_v61 }
  0xff   :  { %v563_v9 = vadd.f32 %v562_v8, %v561_v62 }
 0x101   :  { %v565_v12 = vadd.f32 %v564_v28, %v563_v9 }
 0x103   :  { %v567_v2 = vadd.f32 %v566_v46, %v565_v12 }
 0x105   :  { %v569_v50 = vadd.f32 %v568_v18, %v567_v2  ;;  %v1305_v2 = vld [vmem:[%s2671_s1 + $0x8] sm:$0xff] }
 0x107   :  { %v570_v3 = vrot.slane %v569_v50, 4 }
 0x109   :  { %v571_v36 = vadd.f32 %v570_v3, %v569_v50 }
 0x10b   :  { %v572_v26 = vrot.slane %v571_v36, 2 }
 0x10d   :  { %v573_v54 = vadd.f32 %v572_v26, %v571_v36 }
 0x10f   :  { %v574_v45 = vrot.slane %v573_v54, 1 }
 0x111   :  { %v575_v23 = vadd.f32 %v574_v45, %v573_v54  ;;  %v1304_v45 = vld [vmem:[%s2671_s1] sm:$0xff] }
 0x113   :  { %v576_v1 = vadd.f32 1e-12, %v575_v23 }
 0x115   :  { %1300 = vrsqrt.f32 %v576_v1 }
 0x11f   :  { %v2345_v61 = vpop.eup %1300 }
 0x120   :  { %v594_v62 = vmul.f32 %v2345_v61, %v1455_v21  ;;  %v595_v8 = vmul.f32 %v2345_v61, %v1461_v25  ;;  %v626_v12 = vmul.f32 %v2345_v61, %v1694_v52  ;;  %v627_v50 = vmul.f32 %v2345_v61, %v1702_v60 }
 0x121   :  { %v578_v26 = vmul.f32 %v1304_v45, %v2345_v61  ;;  %v579_v21 = vmul.f32 %v1305_v2, %v2345_v61  ;;  %v610_v25 = vmul.f32 %v2345_v61, %v1568_v27  ;;  %v611_v52 = vmul.f32 %v2345_v61, %v1574_v32  ;;  %v1306_v32 = vld [vmem:[%s2671_s1 + $0x10] sm:$0xff] }
 0x122   :  { %v1167_v18 = vpack.c.bf16 %v595_v8, %v594_v62  ;;  %v1199_v60 = vpack.c.bf16 %v627_v50, %v626_v12  ;;  %v596_v9 = vmul.f32 %v2345_v61, %v1469_v30  ;;  %v597_v54 = vmul.f32 %v2345_v61, %v1477_v34  ;;  %v1307_v34 = vld [vmem:[%s2671_s1 + $0x18] sm:$0xff] }
 0x123   :  { %v1169_v17 = vpack.c.bf16 %v579_v21, %v578_v26  ;;  %v1201_v14 = vpack.c.bf16 %v611_v52, %v610_v25  ;;  %v628_v41 = vmul.f32 %v2345_v61, %v1710_v4  ;;  %v629_v28 = vmul.f32 %v2345_v61, %v1718_v10 }
 0x124   :  { %1168 = vmatprep.subr.bf16.mxu0 %v1167_v18  ;;  %1200 = vmatprep.subr.bf16.mxu1 %v1199_v60  ;;  %v1171_v27 = vpack.c.bf16 %v597_v54, %v596_v9  ;;  %v580_v30 = vmul.f32 %v1306_v32, %v2345_v61  ;;  %v581_v46 = vmul.f32 %v1307_v34, %v2345_v61 }
 0x125   :  { %1170 = vmatpush3.bf16.msra.mxu0 %v1169_v17  ;;  %1202 = vmatpush3.bf16.msra.mxu1 %v1201_v14  ;;  %v1203_v4 = vpack.c.bf16 %v629_v28, %v628_v41  ;;  %v612_v10 = vmul.f32 %v2345_v61, %v1582_v37  ;;  %v613_v3 = vmul.f32 %v2345_v61, %v1590_v42  ;;  %v1308_v37 = vld [vmem:[%s2671_s1 + $0x20] sm:$0xff] }
 0x126   :  { %1172 = vmatprep.subr.bf16.mxu0 %v1171_v27  ;;  %v1173_v36 = vpack.c.bf16 %v581_v46, %v580_v30  ;;  %v598_v23 = vmul.f32 %v2345_v61, %v1486_v39  ;;  %v599_v1 = vmul.f32 %v2345_v61, %v1494_v43  ;;  %v630_v62 = vmul.f32 %v2345_v61, %v1726_v16  ;;  %v1309_v39 = vld [vmem:[%s2671_s1 + $0x28] sm:$0xff] }
 0x127   :  { %1204 = vmatprep.subr.bf16.mxu1 %v1203_v4  ;;  %v1205_v8 = vpack.c.bf16 %v613_v3, %v612_v10  ;;  %v631_v12 = vmul.f32 %v2345_v61, %v1734_v22  ;;  %v582_v42 = vmul.f32 %v1308_v37, %v2345_v61  ;;  %v583_v43 = vmul.f32 %v1309_v39, %v2345_v61 }
 0x128   :  { %v1175_v50 = vpack.c.bf16 %v599_v1, %v598_v23  ;;  %v614_v16 = vmul.f32 %v2345_v61, %v1598_v48  ;;  %v615_v45 = vmul.f32 %v2345_v61, %v1606_v53  ;;  %v600_v22 = vmul.f32 %v2345_v61, %v1502_v47  ;;  %v1310_v53 = vld [vmem:[%s2671_s1 + $0x30] sm:$0xff] }
 0x129   :  { %1174 = vmatpush3.bf16.msra.mxu0 %v1173_v36  ;;  %1206 = vmatpush3.bf16.msra.mxu1 %v1205_v8  ;;  %v1207_v26 = vpack.c.bf16 %v631_v12, %v630_v62  ;;  %v1177_v2 = vpack.c.bf16 %v583_v43, %v582_v42  ;;  %v601_v21 = vmul.f32 %v2345_v61, %v1510_v51  ;;  %v1311_v51 = vld [vmem:[%s2671_s1 + $0x38] sm:$0xff]  ;;  %v1316_v62 = vld [vmem:[%s2671_s1 + $0xe0] sm:$0xff]  ;;  %v1317_v12 = vld [vmem:[%s2671_s1 + $0xe8] sm:$0xff] }
 0x12a   :  { %1176 = vmatprep.subr.bf16.mxu0 %v1175_v50  ;;  %v1209_v25 = vpack.c.bf16 %v615_v45, %v614_v16  ;;  %v632_v52 = vmul.f32 %v2345_v61, %v1742_v29  ;;  %v633_v48 = vmul.f32 %v2345_v61, %v1750_v40  ;;  %v584_v47 = vmul.f32 %v1310_v53, %v2345_v61  ;;  %v1319_v43 = vld [vmem:[%s2671_s1 + $0x68] sm:$0xff] }
 0x12b   :  { %1208 = vmatprep.subr.bf16.mxu1 %v1207_v26  ;;  %v1179_v18 = vpack.c.bf16 %v601_v21, %v600_v22  ;;  %v585_v60 = vmul.f32 %v1311_v51, %v2345_v61  ;;  %v616_v29 = vmul.f32 %v2345_v61, %v1614_v58  ;;  %v617_v40 = vmul.f32 %v2345_v61, %v1622_v0 }
 0x12c   :  { %v1211_v9 = vpack.c.bf16 %v633_v48, %v632_v52  ;;  %v602_v54 = vmul.f32 %v2345_v61, %v1518_v55  ;;  %v603_v17 = vmul.f32 %v2345_v61, %v1526_v59  ;;  %v634_v14 = vmul.f32 %v2345_v61, %v1758_v49  ;;  %v1312_v55 = vld [vmem:[%s2671_s1 + $0x40] sm:$0xff]  ;;  %v1313_v59 = vld [vmem:[%s2671_s1 + $0x48] sm:$0xff] }
 0x12d   :  { %1178 = vmatpush3.bf16.msra.mxu0 %v1177_v2  ;;  %1210 = vmatpush3.bf16.msra.mxu1 %v1209_v25  ;;  %v1181_v41 = vpack.c.bf16 %v585_v60, %v584_v47  ;;  %v1213_v28 = vpack.c.bf16 %v617_v40, %v616_v29  ;;  %v635_v58 = vmul.f32 %v2345_v61, %v1766_v57  ;;  %v1320_v2 = vld [vmem:[%s2671_s1 + $0xf0] sm:$0xff]  ;;  %v1321_v25 = vld [vmem:[%s2671_s1 + $0xf8] sm:$0xff]  ;;  %v2805_v29 = vld [vmem:[#allocation2_spill] sm:$0xff] }
 0x12e   :  { %1180 = vmatprep.subr.bf16.mxu0 %v1179_v18  ;;  %1212 = vmatprep.subr.bf16.mxu1 %v1211_v9  ;;  %v1183_v0 = vpack.c.bf16 %v603_v17, %v602_v54  ;;  %v586_v27 = vmul.f32 %v1312_v55, %v2345_v61  ;;  %v587_v49 = vmul.f32 %v1313_v59, %v2345_v61  ;;  %v1323_v18 = vld [vmem:[%s2671_s1 + $0x78] sm:$0xff]  ;;  %v2806_v54 = vld [vmem:[#allocation19_spill] sm:$0xff]  ;;  %v1324_v59 = vld [vmem:[%s2670_s0] sm:$0x3f] }
 0x12f   :  { %v1215_v32 = vpack.c.bf16 %v635_v58, %v634_v14  ;;  %v618_v30 = vmul.f32 %v2345_v61, %v1630_v7  ;;  %v619_v57 = vmul.f32 %v2345_v61, %v1638_v11  ;;  %v604_v34 = vmul.f32 %v2345_v61, %v1534_v63  ;;  %v1314_v7 = vld [vmem:[%s2671_s1 + $0x50] sm:$0xff]  ;;  %v1315_v63 = vld [vmem:[%s2671_s1 + $0x58] sm:$0xff] }
 0x130   :  { %v1185_v46 = vpack.c.bf16 %v587_v49, %v586_v27  ;;  %v605_v4 = vmul.f32 %v2345_v61, %v1542_v5  ;;  %v636_v10 = vmul.f32 %v2345_v61, %v1774_v6  ;;  %v637_v3 = vmul.f32 %v2345_v61, %v1782_v13  ;;  %v2807_v14 = vld [vmem:[#allocation20_spill] sm:$0xff] }
 0x131   :  { %1182 = vmatpush3.bf16.msra.mxu0 %v1181_v41  ;;  %1214 = vmatpush3.bf16.msra.mxu1 %v1213_v28  ;;  %v1217_v36 = vpack.c.bf16 %v619_v57, %v618_v30  ;;  %v588_v11 = vmul.f32 %v1314_v7, %v2345_v61  ;;  %v589_v5 = vmul.f32 %v1315_v63, %v2345_v61  ;;  %v2808_v28 = vld [vmem:[#allocation52_spill] sm:$0xff]  ;;  %v2813_v7 = vld [vmem:[#allocation35_spill] sm:$0xff]  ;;  %v2814_v63 = vld [vmem:[#allocation37_spill] sm:$0xff] }
 0x132   :  { %1184 = vmatprep.subr.bf16.mxu0 %v1183_v0  ;;  %1216 = vmatprep.subr.bf16.mxu1 %v1215_v32  ;;  %v1187_v6 = vpack.c.bf16 %v605_v4, %v604_v34  ;;  %v1219_v23 = vpack.c.bf16 %v637_v3, %v636_v10  ;;  %v620_v13 = vmul.f32 %v2345_v61, %v1646_v15  ;;  %v2810_v49 = vld [vmem:[#allocation36_spill] sm:$0xff] }
 0x133   :  { %v621_v1 = vmul.f32 %v2345_v61, %v1654_v19  ;;  %v606_v8 = vmul.f32 %v1316_v62, %v2345_v61  ;;  %v607_v37 = vmul.f32 %v1317_v12, %v2345_v61  ;;  %v638_v42 = vmul.f32 %v2345_v61, %v1790_v20  ;;  %v1318_v19 = vld [vmem:[%s2671_s1 + $0x60] sm:$0xff]  ;;  %v1325_v30 = vld [vmem:[%s2670_s0 + $0x10] sm:$0x3f]  ;;  %v2818_v12 = vld [vmem:[#allocation55_spill] sm:$0xff] }
 0x134   :  { %v639_v15 = vmul.f32 %v2345_v61, %v1798_v33  ;;  %v590_v39 = vmul.f32 %v1318_v19, %v2345_v61  ;;  %v591_v50 = vmul.f32 %v1319_v43, %v2345_v61  ;;  %v1189_v16 = vpack.c.bf16 %v589_v5, %v588_v11  ;;  %v2812_v10 = vld [vmem:[#allocation4_spill] sm:$0xff]  ;;  %v2817_v62 = vld [vmem:[#allocation54_spill] sm:$0xff] }
 0x135   :  { %1186 = vmatpush3.bf16.msra.mxu0 %v1185_v46  ;;  %1218 = vmatpush3.bf16.msra.mxu1 %v1217_v36  ;;  %v1221_v45 = vpack.c.bf16 %v621_v1, %v620_v13  ;;  %v622_v20 = vmul.f32 %v2345_v61, %v1662_v24  ;;  %v1191_v33 = vpack.c.bf16 %v607_v37, %v606_v8  ;;  %v2811_v46 = vld [vmem:[#allocation3_spill] sm:$0xff]  ;;  %v2816_v13 = vld [vmem:[#allocation22_spill] sm:$0xff] }
 0x136   :  { %1188 = vmatprep.subr.bf16.mxu0 %v1187_v6  ;;  %1220 = vmatprep.subr.bf16.mxu1 %v1219_v23  ;;  %v1223_v22 = vpack.c.bf16 %v639_v15, %v638_v42  ;;  %v623_v26 = vmul.f32 %v2345_v61, %v1670_v31  ;;  %v608_v21 = vmul.f32 %v1320_v2, %v2345_v61  ;;  %v1322_v31 = vld [vmem:[%s2671_s1 + $0x70] sm:$0xff]  ;;  %v2815_v6 = vld [vmem:[#allocation21_spill] sm:$0xff]  ;;  %v2820_v19 = vld [vmem:[#allocation6_spill] sm:$0xff] }
 0x137   :  { %v609_v52 = vmul.f32 %v1321_v25, %v2345_v61  ;;  %v640_v24 = vmul.f32 %v2345_v61, %v1806_v44  ;;  %v641_v48 = vmul.f32 %v2345_v61, %v1814_v56  ;;  %v1193_v53 = vpack.c.bf16 %v591_v50, %v590_v39  ;;  %v2819_v42 = vld [vmem:[#allocation5_spill] sm:$0xff]  ;;  %v2821_v43 = vld [vmem:[#allocation38_spill] sm:$0xff]  ;;  %v2823_v25 = vld [vmem:[#allocation23_spill] sm:$0xff] }
 0x138   :  { %v592_v47 = vmul.f32 %v1322_v31, %v2345_v61  ;;  %v593_v51 = vmul.f32 %v1323_v18, %v2345_v61  ;;  %v624_v60 = vmul.f32 %v2345_v61, %v1678_v38  ;;  %v1225_v44 = vpack.c.bf16 %v623_v26, %v622_v20  ;;  %v2809_v38 = vld [vmem:[#allocation53_spill] sm:$0xff] }
 0x139   :  { %1190 = vmatpush3.bf16.msra.mxu0 %v1189_v16  ;;  %1222 = vmatpush3.bf16.msra.mxu1 %v1221_v45  ;;  %v1195_v56 = vpack.c.bf16 %v609_v52, %v608_v21  ;;  %v625_v40 = vmul.f32 %v2345_v61, %v2805_v29  ;;  %v1227_v9 = vpack.c.bf16 %v641_v48, %v640_v24  ;;  %v2822_v16 = vld [vmem:[#allocation39_spill] sm:$0xff]  ;;  %v1327_v26 = vld [vmem:[%s2670_s0 + $0x38] sm:$0x3f]  ;;  %v2824_v24 = vld [vmem:[#allocation24_spill] sm:$0xff] }
 0x13a   :  { %1192 = vmatprep.subr.bf16.mxu0 %v1191_v33  ;;  %1224 = vmatprep.subr.bf16.mxu1 %v1223_v22  ;;  %v658_v17 = vmul.f32 %v2345_v61, %v2806_v54  ;;  %v659_v41 = vmul.f32 %v2345_v61, %v2807_v14  ;;  %v690_v58 = vmul.f32 %v2345_v61, %v2808_v28  ;;  %v1326_v33 = vld [vmem:[%s2670_s0 + $0x28] sm:$0x3f] }
 0x13b   :  { %v691_v0 = vmul.f32 %v2345_v61, %v2809_v38  ;;  %v1197_v55 = vpack.c.bf16 %v593_v51, %v592_v47  ;;  %v1229_v27 = vpack.c.bf16 %v625_v40, %v624_v60  ;;  %v178_v32 = vmul.f32 %v1324_v59, %v2810_v49  ;;  %v2825_v47 = vld [vmem:[#allocation56_spill] sm:$0xff]  ;;  %v2826_v51 = vld [vmem:[#allocation57_spill] sm:$0xff]  ;;  %v2827_v29 = vld [vmem:[#allocation7_spill] sm:$0xff] }
 0x13c   :  { %v180_v57 = vmul.f32 %v1325_v30, %v2810_v49  ;;  %v1231_v34 = vpack.c.bf16 %v659_v41, %v658_v17  ;;  %v642_v4 = vmul.f32 %v2345_v61, %v2811_v46  ;;  %v643_v3 = vmul.f32 %v2345_v61, %v2812_v10  ;;  %v2829_v17 = vld [vmem:[#allocation40_spill] sm:$0xff]  ;;  %v2830_v41 = vld [vmem:[#allocation41_spill] sm:$0xff]  ;;  %v2836_v10 = vld [vmem:[#allocation10_spill] sm:$0xff] }
 0x13d   :  { %1194 = vmatpush3.bf16.msra.mxu0 %v1193_v53  ;;  %1226 = vmatpush3.bf16.msra.mxu1 %v1225_v44  ;;  %v1263_v36 = vpack.c.bf16 %v691_v0, %v690_v58  ;;  %v674_v11 = vmul.f32 %v2345_v61, %v2813_v7  ;;  %v675_v5 = vmul.f32 %v2345_v61, %v2814_v63  ;;  %v2831_v38 = vld [vmem:[#allocation25_spill] sm:$0xff] }
 0x13e   :  { %1196 = vmatprep.subr.bf16.mxu0 %v1195_v56  ;;  %1228 = vmatprep.subr.bf16.mxu1 %v1227_v9  ;;  %v660_v23 = vmul.f32 %v2345_v61, %v2815_v6  ;;  %v661_v1 = vmul.f32 %v2345_v61, %v2816_v13  ;;  %v692_v8 = vmul.f32 %v2345_v61, %v2817_v62  ;;  %v2828_v9 = vld [vmem:[#allocation8_spill] sm:$0xff]  ;;  %v2835_v46 = vld [vmem:[#allocation9_spill] sm:$0xff]  ;;  %v2839_v13 = vld [vmem:[#allocation27_spill] sm:$0xff] }
 0x13f   :  { %v693_v37 = vmul.f32 %v2345_v61, %v2818_v12  ;;  %v644_v15 = vmul.f32 %v2345_v61, %v2819_v42  ;;  %v645_v39 = vmul.f32 %v2345_v61, %v2820_v19  ;;  %v676_v50 = vmul.f32 %v2345_v61, %v2821_v43  ;;  %v2840_v62 = vld [vmem:[#allocation28_spill] sm:$0xff] }
 0x140   :  { %v677_v45 = vmul.f32 %v2345_v61, %v2822_v16  ;;  %v1233_v20 = vpack.c.bf16 %v643_v3, %v642_v4  ;;  %v183_v22 = vmul.f32 %v1326_v33, %v2810_v49  ;;  %v185_v2 = vmul.f32 %v1327_v26, %v2810_v49  ;;  %v2845_v33 = vld [vmem:[#allocation44_spill] sm:$0xff]  ;;  %v2846_v26 = vld [vmem:[#allocation45_spill] sm:$0xff] }
 0x141   :  { %1198 = vmatpush3.bf16.msra.mxu0 %v1197_v55  ;;  %1230 = vmatpush3.bf16.msra.mxu1 %v1229_v27  ;;  %v1265_v21 = vpack.c.bf16 %v675_v5, %v674_v11  ;;  %v662_v52 = vmul.f32 %v2345_v61, %v2823_v25  ;;  %v663_v48 = vmul.f32 %v2345_v61, %v2824_v24  ;;  %v2832_v55 = vld [vmem:[#allocation26_spill] sm:$0xff]  ;;  %v2838_v11 = vld [vmem:[#allocation43_spill] sm:$0xff]  ;;  %v2847_v25 = vld [vmem:[#allocation29_spill] sm:$0xff] }
 0x142   :  { %1232 = vmatprep.subr.bf16.mxu0 %v1231_v34  ;;  %1264 = vmatprep.subr.bf16.mxu1 %v1263_v36  ;;  %v1235_v53 = vpack.c.bf16 %v661_v1, %v660_v23  ;;  %v1267_v31 = vpack.c.bf16 %v693_v37, %v692_v8  ;;  %v694_v18 = vmul.f32 %v2345_v61, %v2825_v47  ;;  %v2837_v36 = vld [vmem:[#allocation42_spill] sm:$0xff]  ;;  %v2841_v37 = vld [vmem:[#allocation60_spill] sm:$0xff] }
 0x143   :  { %v695_v60 = vmul.f32 %v2345_v61, %v2826_v51  ;;  %v1237_v44 = vpack.c.bf16 %v645_v39, %v644_v15  ;;  %v1269_v56 = vpack.c.bf16 %v677_v45, %v676_v50  ;;  %v646_v40 = vmul.f32 %v2345_v61, %v2827_v29  ;;  %v2842_v15 = vld [vmem:[#allocation61_spill] sm:$0xff]  ;;  %v2843_v50 = vld [vmem:[#allocation11_spill] sm:$0xff]  ;;  %v2844_v45 = vld [vmem:[#allocation12_spill] sm:$0xff] }
 0x144   :  { %771 = vmatmul.mubr.f32.vlgmr.msra.gmra.mrb[0].mxu0 %v178_v32  ;;  %841 = vmatmul.mubr.f32.vlgmr.msra.gmra.mrb[0].mxu1 %v180_v57  ;;  %v647_v54 = vmul.f32 %v2345_v61, %v2828_v9  ;;  %v678_v14 = vmul.f32 %v2345_v61, %v2829_v17  ;;  %v679_v28 = vmul.f32 %v2345_v61, %v2830_v41  ;;  %v2833_v32 = vld [vmem:[#allocation58_spill] sm:$0xff]  ;;  %v2834_v57 = vld [vmem:[#allocation59_spill] sm:$0xff] }
 0x145   :  { %1234 = vmatpush3.bf16.msra.mxu0 %v1233_v20  ;;  %910 = vmatprep.mubr.f32.mxu0 %v183_v22  ;;  %v1239_v58 = vpack.c.bf16 %v663_v48, %v662_v52  ;;  %v664_v0 = vmul.f32 %v2345_v61, %v2831_v38  ;;  %v665_v27 = vmul.f32 %v2345_v61, %v2832_v55  ;;  %v2848_v24 = vld [vmem:[#allocation30_spill] sm:$0xff] }
 0x146   :  { %1266 = vmatpush3.bf16.msra.mxu1 %v1265_v21  ;;  %980 = vmatprep.mubr.f32.mxu1 %v185_v2  ;;  %v1271_v59 = vpack.c.bf16 %v695_v60, %v694_v18  ;;  %v696_v30 = vmul.f32 %v2345_v61, %v2833_v32  ;;  %v697_v34 = vmul.f32 %v2345_v61, %v2834_v57  ;;  %v2850_v18 = vld [vmem:[#allocation63_spill] sm:$0xff]  ;;  %v2851_v60 = vld [vmem:[#allocation13_spill] sm:$0xff] }
 0x147   :  { %1236 = vmatprep.subr.bf16.mxu0 %v1235_v53  ;;  %1268 = vmatprep.subr.bf16.mxu1 %v1267_v31  ;;  %v648_v4 = vmul.f32 %v2345_v61, %v2835_v46  ;;  %v649_v3 = vmul.f32 %v2345_v61, %v2836_v10  ;;  %v680_v7 = vmul.f32 %v2345_v61, %v2837_v36  ;;  %v2849_v31 = vld [vmem:[#allocation62_spill] sm:$0xff] }
 0x148   :  { %v681_v63 = vmul.f32 %v2345_v61, %v2838_v11  ;;  %v1241_v5 = vpack.c.bf16 %v647_v54, %v646_v40  ;;  %v1273_v6 = vpack.c.bf16 %v679_v28, %v678_v14  ;;  %v1243_v23 = vpack.c.bf16 %v665_v27, %v664_v0  ;;  %v2853_v40 = vld [vmem:[#allocation46_spill] sm:$0xff]  ;;  %v2854_v54 = vld [vmem:[#allocation47_spill] sm:$0xff]  ;;  %v2856_v0 = vld [vmem:[#allocation32_spill] sm:$0xff] }
 0x149   :  { %1238 = vmatpush3.bf16.msra.mxu0 %v1237_v44  ;;  %v666_v1 = vmul.f32 %v2345_v61, %v2839_v13  ;;  %v667_v8 = vmul.f32 %v2345_v61, %v2840_v62  ;;  %v1275_v12 = vpack.c.bf16 %v697_v34, %v696_v30  ;;  %v698_v42 = vmul.f32 %v2345_v61, %v2841_v37  ;;  %v2858_v30 = vld [vmem:[#allocation65_spill] sm:$0xff] }
 0x14a   :  { %1270 = vmatpush3.bf16.msra.mxu1 %v1269_v56  ;;  %1240 = vmatprep.subr.bf16.mxu0 %v1239_v58  ;;  %v699_v19 = vmul.f32 %v2345_v61, %v2842_v15  ;;  %v1245_v39 = vpack.c.bf16 %v649_v3, %v648_v4  ;;  %v1277_v43 = vpack.c.bf16 %v681_v63, %v680_v7  ;;  %v2852_v56 = vld [vmem:[#allocation14_spill] sm:$0xff]  ;;  %v2855_v58 = vld [vmem:[#allocation31_spill] sm:$0xff]  ;;  %v2860_v3 = vld [vmem:[#allocation16_spill] sm:$0xff] }
 0x14b   :  { %1272 = vmatprep.subr.bf16.mxu1 %v1271_v59  ;;  %v650_v16 = vmul.f32 %v2345_v61, %v2843_v50  ;;  %v651_v20 = vmul.f32 %v2345_v61, %v2844_v45  ;;  %v682_v22 = vmul.f32 %v2345_v61, %v2845_v33  ;;  %v683_v2 = vmul.f32 %v2345_v61, %v2846_v26  ;;  %v2857_v59 = vld [vmem:[#allocation64_spill] sm:$0xff]  ;;  %v2859_v4 = vld [vmem:[#allocation15_spill] sm:$0xff]  ;;  %v2862_v63 = vld [vmem:[#allocation49_spill] sm:$0xff] }
 0x14c   :  { %v1247_v21 = vpack.c.bf16 %v667_v8, %v666_v1  ;;  %v668_v52 = vmul.f32 %v2345_v61, %v2847_v25  ;;  %v669_v48 = vmul.f32 %v2345_v61, %v2848_v24  ;;  %v1279_v53 = vpack.c.bf16 %v699_v19, %v698_v42  ;;  %v2861_v7 = vld [vmem:[#allocation48_spill] sm:$0xff]  ;;  %v2864_v1 = vld [vmem:[#allocation34_spill] sm:$0xff] }
 0x14d   :  { %1242 = vmatpush3.bf16.msra.mxu0 %v1241_v5  ;;  %v700_v47 = vmul.f32 %v2345_v61, %v2849_v31  ;;  %v701_v51 = vmul.f32 %v2345_v61, %v2850_v18  ;;  %v652_v44 = vmul.f32 %v2345_v61, %v2851_v60  ;;  %v653_v29 = vmul.f32 %v2345_v61, %v2852_v56  ;;  %v2867_v50 = vld [vmem:[#allocation18_spill] sm:$0xff] }
 0x14e   :  { %1274 = vmatpush3.bf16.msra.mxu1 %v1273_v6  ;;  %1244 = vmatprep.subr.bf16.mxu0 %v1243_v23  ;;  %v684_v9 = vmul.f32 %v2345_v61, %v2853_v40  ;;  %v685_v17 = vmul.f32 %v2345_v61, %v2854_v54  ;;  %v1249_v14 = vpack.c.bf16 %v651_v20, %v650_v16  ;;  %v2863_v23 = vld [vmem:[#allocation33_spill] sm:$0xff]  ;;  %v2868_v20 = vld [vmem:[#allocation50_spill] sm:$0xff] }
 0x14f   :  { %1276 = vmatprep.subr.bf16.mxu1 %v1275_v12  ;;  %v1281_v41 = vpack.c.bf16 %v683_v2, %v682_v22  ;;  %v1251_v28 = vpack.c.bf16 %v669_v48, %v668_v52  ;;  %v670_v38 = vmul.f32 %v2345_v61, %v2855_v58  ;;  %v671_v55 = vmul.f32 %v2345_v61, %v2856_v0  ;;  %v2865_v12 = vld [vmem:[#allocation66_spill] sm:$0xff]  ;;  %v2869_v22 = vld [vmem:[#allocation51_spill] sm:$0xff] }
 0x150   :  { %v1283_v27 = vpack.c.bf16 %v701_v51, %v700_v47  ;;  %v702_v32 = vmul.f32 %v2345_v61, %v2857_v59  ;;  %v703_v57 = vmul.f32 %v2345_v61, %v2858_v30  ;;  %v1253_v34 = vpack.c.bf16 %v653_v29, %v652_v44  ;;  %v1328_v25 = vld [vmem:[%s2670_s0 + $0x20] sm:$0x3f] }
 0x151   :  { %1246 = vmatpush3.bf16.msra.mxu0 %v1245_v39  ;;  %v1285_v46 = vpack.c.bf16 %v685_v17, %v684_v9  ;;  %v654_v10 = vmul.f32 %v2345_v61, %v2859_v4  ;;  %v655_v36 = vmul.f32 %v2345_v61, %v2860_v3  ;;  %v686_v11 = vmul.f32 %v2345_v61, %v2861_v7  ;;  %v2866_v39 = vld [vmem:[#allocation17_spill] sm:$0xff] }
 0x152   :  { %1278 = vmatpush3.bf16.msra.mxu1 %v1277_v43  ;;  %1248 = vmatprep.subr.bf16.mxu0 %v1247_v21  ;;  %v687_v5 = vmul.f32 %v2345_v61, %v2862_v63  ;;  %v1255_v6 = vpack.c.bf16 %v671_v55, %v670_v38  ;;  %v672_v13 = vmul.f32 %v2345_v61, %v2863_v23  ;;  %v1004_v38 = vlaneseq }
 0x153   :  { %1280 = vmatprep.subr.bf16.mxu1 %v1279_v53  ;;  %v673_v62 = vmul.f32 %v2345_v61, %v2864_v1  ;;  %v1287_v8 = vpack.c.bf16 %v703_v57, %v702_v32  ;;  %v704_v37 = vmul.f32 %v2345_v61, %v2865_v12  ;;  %v705_v42 = vmul.f32 %v2345_v61, %v2335_v35 }
 0x154   :  { %v1257_v15 = vpack.c.bf16 %v655_v36, %v654_v10  ;;  %v1289_v19 = vpack.c.bf16 %v687_v5, %v686_v11  ;;  %v656_v43 = vmul.f32 %v2345_v61, %v2866_v39  ;;  %v657_v16 = vmul.f32 %v2345_v61, %v2867_v50 }
 0x155   :  { %1250 = vmatpush3.bf16.msra.mxu0 %v1249_v14  ;;  %v1259_v45 = vpack.c.bf16 %v673_v62, %v672_v13  ;;  %v688_v33 = vmul.f32 %v2345_v61, %v2868_v20  ;;  %v689_v26 = vmul.f32 %v2345_v61, %v2869_v22  ;;  %v1291_v35 = vpack.c.bf16 %v705_v42, %v704_v37  ;;  %v1329_v61 = vld [vmem:[%s2670_s0 + $0x30] sm:$0x3f] }
 0x156   :  { %1282 = vmatpush3.bf16.msra.mxu1 %v1281_v41  ;;  %1252 = vmatprep.subr.bf16.mxu0 %v1251_v28  ;;  %v1261_v2 = vpack.c.bf16 %v657_v16, %v656_v43  ;;  %v182_v52 = vmul.f32 %v1328_v25, %v2810_v49  ;;  %v184_v24 = vmul.f32 %v1329_v61, %v2810_v49  ;;  %v1005_v0 = vand.u32 127, %v1004_v38 }
 0x157   :  { %1284 = vmatprep.subr.bf16.mxu1 %v1283_v27  ;;  %v1293_v21 = vpack.c.bf16 %v689_v26, %v688_v33  ;;  %v1331_v57 = vmov 0.0  }
 0x159   :  { %1254 = vmatpush3.bf16.msra.mxu0 %v1253_v34 }
 0x15a   :  { %1286 = vmatpush3.bf16.msra.mxu1 %v1285_v46  ;;  %1256 = vmatprep.subr.bf16.mxu0 %v1255_v6 }
 0x15b   :  { %1288 = vmatprep.subr.bf16.mxu1 %v1287_v8 }
 0x15d   :  { %1258 = vmatpush3.bf16.msra.mxu0 %v1257_v15 }
 0x15e   :  { %1290 = vmatpush3.bf16.msra.mxu1 %v1289_v19  ;;  %1260 = vmatprep.subr.bf16.mxu0 %v1259_v45 }
 0x15f   :  { %1292 = vmatprep.subr.bf16.mxu1 %v1291_v35 }
 0x161   :  { %1262 = vmatpush3.bf16.msra.mxu0 %v1261_v2 }
 0x162   :  { %1294 = vmatpush3.bf16.msra.mxu1 %v1293_v21 }
 0x163   :  { %v1009_v55 = vpop.permute.xlu0 %1008 }
 0x164   :  { %911 = vmatmul.mubr.f32.vlgmr.msra.gmra.mrb[2].mxu0 %v182_v52  ;;  %vm1010_vm2 = vcmp.eq.s32.totalorder %v1005_v0, %v1009_v55 }
 0x165   :  { %981 = vmatmul.mubr.f32.vlgmr.msra.gmra.mrb[2].mxu1 %v184_v24  ;;  %v1026_v34 = vsel %vm1010_vm2, 1.0, %v1331_v57 }
 0x166   :  { %v1014_v3 = vsub.f32 1.0, %v1026_v34 }
 0x217   :  { %v1059_v48 = vpop.f32.mrb[0].mxu0  ;;  %v1094_v53 = vpop.f32.mrb[0].mxu1 }
 0x218   :  { %v1060_v31 = vpop.f32.mrb[1].mxu0  ;;  %v1095_v47 = vpop.f32.mrb[1].mxu1 }
 0x219   :  { %v1061_v18 = vadd.f32 %v1060_v31, %v1059_v48  ;;  %v1096_v51 = vadd.f32 %v1095_v47, %v1094_v53 }
 0x21b   :  { %v843_v60 = vadd.f32 %v1096_v51, %v1061_v18 }
 0x237   :  { %v1129_v44 = vpop.f32.mrb[2].mxu0 }
 0x238   :  { %v1164_v56 = vpop.f32.mrb[2].mxu1  ;;  %v1130_v29 = vpop.f32.mrb[3].mxu0 }
 0x239   :  { %v1131_v40 = vadd.f32 %v1130_v29, %v1129_v44  ;;  %v1165_v9 = vpop.f32.mrb[3].mxu1 }
 0x23a   :  { %v1166_v54 = vadd.f32 %v1165_v9, %v1164_v56 }
 0x23b   :  { %v913_v17 = vadd.f32 %v1131_v40, %v843_v60 }
 0x23d   :  { %v983_v14 = vadd.f32 %v1166_v54, %v913_v17 }
 0x23f   :  { %v1024_v41 = vclamps-f32 %v983_v14, 1.0 }
 0x241   :  { %v988_v28 = vmul.f32 %v1024_v41, %v1024_v41  ;;  %v998_v4 = vmul.f32 0.87758255, %v1024_v41  ;;  %v1025_v7 = vadd.f32 -0.23971277, %v1024_v41  ;;  %vm1001_vm5 = vcmp.gt.f32.partialorder %v1024_v41, -0.87758255 }
 0x242   :  { %v1015_v5 = vmul.f32 %v1024_v41, %v1014_v3 }
 0x243   :  { %v989_v49 = vsub.f32 1.0, %v988_v28 }
 0x245   :  { %v990_v58 = vmax.f32 %v989_v49, 0.0 }
 0x247   :  { %1302 = vrsqrt.f32 %v990_v58  ;;  %vm993_vm3 = vcmp.eq.f32.partialorder %v990_v58, inf  ;;  %v996_v32 = vand.u32 2147483648, %v990_v58  ;;  %vm995_vm4 = vcmp.eq.f32.partialorder %v990_v58, 0.0 }
 0x251   :  { %v1303_v27 = vpop.eup %1302 }
 0x252   :  { %v992_v59 = vmul.f32 %v1303_v27, %v990_v58 }
 0x254   :  { %v994_v30 = vsel %vm993_vm3, %v990_v58, %v992_v59 }
 0x255   :  { %v997_v46 = vsel %vm995_vm4, %v996_v32, %v994_v30 }
 0x256   :  { %v999_v10 = vmul.f32 0.47942555, %v997_v46 }
 0x258   :  { %v1000_v36 = vsub.f32 %v998_v4, %v999_v10 }
 0x25a   :  { %v1003_v11 = vsel %vm1001_vm5, %v1000_v36, %v1025_v7 }
 0x25b   :  { %v1013_v63 = vmul.f32 %v1026_v34, %v1003_v11 }
 0x25d   :  { %v1016_v6 = vadd.f32 %v1015_v5, %v1013_v63 }
 0x25f   :  { %v1017_v23 = vmul.f32 64.0, %v1016_v6 }
 0x261   :  { %1019 = vst.msk [vmem:[%s2673_s3] sm:$0x3f] %vm1018_vm6, %v1017_v23 }

</bundles_post_ra>
